<compile_context>
chip_gen: v7x
topology: tpu7x:2x2x1
jax: 0.10.0
libtpu: 0.0.40
codegen_flags: <defaults>
</compile_context>

<pallas_src>
import functools

import numpy as np

import jax
import jax.numpy as jnp
from jax.experimental import pallas as pl
from jax.experimental.pallas import tpu as pltpu

F32 = jnp.float32
BF16 = jnp.bfloat16
LANE = 128

# (cin, cout, expand, stride) per MBConv block -- static config (kept out of
# the jitted params pytree so python `if`s stay static).
_BLOCK_DEFS = (
    (16, 16, 1, 1),
    (16, 24, 6, 2),
    (24, 24, 6, 1),
)


# ----------------------------------------------------------------------------
# pallas_call plumbing: whole arrays as single VMEM blocks (everything is tiny)
# ----------------------------------------------------------------------------
def _full_spec(shape):
    nd = len(shape)
    return pl.BlockSpec(shape, lambda *_: (0,) * nd)


# ----------------------------------------------------------------------------
# The single fused kernel: stem -> 3x MBConv (expand/dw/SE/project/residual)
# -> head conv -> global pool -> FC.  All intermediates stay on-chip.
# ----------------------------------------------------------------------------
def _net_kernel(*refs, n_batch, block_meta):
    it = iter(refs[:-1])
    o_ref = refs[-1]
    nxt = lambda: next(it)[...]

    def batch_mean(a):
        # per-image spatial mean over flattened (N*HW, C) rows -> (N, C)
        rows = a.shape[0] // n_batch
        return jnp.concatenate(
            [jnp.mean(a[b * rows:(b + 1) * rows, :], axis=0, keepdims=True)
             for b in range(n_batch)], axis=0)

    def batch_scale(a, s):
        # multiply each image's rows by its (1, C) SE scale
        rows = a.shape[0] // n_batch
        return jnp.concatenate(
            [a[b * rows:(b + 1) * rows, :] * s[b:b + 1, :]
             for b in range(n_batch)], axis=0)

    # ---- stem: ONE matmul over im2col'd 3x3/s2 taps (K = 9*Cin) + BN + swish
    xcol = nxt()                          # (M0, 9*Cin) bf16
    sw = nxt()                            # (9*Cin, Cs) bf16
    ssb = nxt()                           # (2, Cs) f32
    h = jnp.dot(xcol, sw, preferred_element_type=F32)
    h = h * ssb[0:1, :] + ssb[1:2, :]
    h = h * jax.nn.sigmoid(h)             # swish, (M0, 128) f32

    # ---- MBConv blocks, fully fused ----
    for (wsp, stride, has_expand, residual) in block_meta:
        mask = nxt()                                  # (Mi, 9) f32 border masks
        sel = nxt() if stride != 1 else None          # (Mo, Mi) f32 stride select
        x_in = h

        # expand 1x1 conv + BN + swish
        if has_expand:
            ew = nxt(); esb = nxt()
            h = jnp.dot(x_in.astype(BF16), ew, preferred_element_type=F32)
            h = h * esb[0:1, :] + esb[1:2, :]
            h = h * jax.nn.sigmoid(h)                 # (Mi, Cmid)

        # depthwise 3x3: zero-pad rows, 9 shifted static slices, mask + w_t
        dww = nxt()                                   # (9, Cmid) f32
        dwsb = nxt()                                  # (2, Cmid) f32
        mi, c = h.shape
        pad_rows = ((wsp + 1 + 7) // 8) * 8           # >= W+1, sublane aligned
        zpad = jnp.zeros((pad_rows, c), F32)
        hp = jnp.concatenate([zpad, h, zpad], axis=0)
        acc = jnp.zeros((mi, c), F32)
        for di in range(3):
            for dj in range(3):
                t = di * 3 + dj
                off = (di - 1) * wsp + (dj - 1)       # flattened-row tap offset
                tap = hp[pad_rows + off:pad_rows + off + mi, :]
                acc = acc + tap * mask[:, t:t + 1] * dww[t:t + 1, :]
        if sel is not None:                           # stride-2: keep even (i, j)
            acc = jnp.dot(sel, acc, preferred_element_type=F32)
        d = acc * dwsb[0:1, :] + dwsb[1:2, :]
        d = d * jax.nn.sigmoid(d)                     # (Mo, Cmid)

        # squeeze-excite: per-batch mean, reduce/expand matmuls, sigmoid scale
        srw = nxt(); srb = nxt(); sew = nxt(); seb = nxt()
        s = jnp.dot(batch_mean(d).astype(BF16), srw,
                    preferred_element_type=F32) + srb
        s = s * jax.nn.sigmoid(s)                     # swish
        s = jnp.dot(s.astype(BF16), sew, preferred_element_type=F32) + seb
        d = batch_scale(d, jax.nn.sigmoid(s))

        # project 1x1 conv + BN (+ residual)
        pw = nxt(); psb = nxt()
        out = jnp.dot(d.astype(BF16), pw, preferred_element_type=F32)
        out = out * psb[0:1, :] + psb[1:2, :]
        if residual:
            out = out + x_in
        h = out

    # ---- head 1x1 conv + BN + swish -> global avg pool -> FC ----
    hdw = nxt(); hsb = nxt(); fw = nxt(); fb = nxt()
    hh = jnp.dot(h.astype(BF16), hdw, preferred_element_type=F32)
    hh = hh * hsb[0:1, :] + hsb[1:2, :]
    hh = hh * jax.nn.sigmoid(hh)
    o_ref[...] = jnp.dot(batch_mean(hh).astype(BF16), fw,
                         preferred_element_type=F32) + fb


# ----------------------------------------------------------------------------
# Static host-side helpers: border masks, stride select, channel padding
# ----------------------------------------------------------------------------
def _dw_masks(n, h, w):
    """(N*H*W, 9) 0/1 masks: tap t=(di,dj) valid at row (b,i,j) iff the shifted
    pixel stays inside the same image (handles borders and batch wrap)."""
    m = np.zeros((n * h * w, 9), np.float32)
    for b in range(n):
        for i in range(h):
            for j in range(w):
                r = b * h * w + i * w + j
                for di in range(3):
                    for dj in range(3):
                        if 0 <= i + di - 1 < h and 0 <= j + dj - 1 < w:
                            m[r, di * 3 + dj] = 1.0
    return m


def _stride2_select(n, h, w):
    """(N*ho*wo, N*H*W) 0/1 row-select picking (i%2==0, j%2==0) positions."""
    ho, wo = h // 2, w // 2
    s = np.zeros((n * ho * wo, n * h * w), np.float32)
    for b in range(n):
        for io in range(ho):
            for jo in range(wo):
                s[b * ho * wo + io * wo + jo,
                  b * h * w + (2 * io) * w + (2 * jo)] = 1.0
    return s


def _rup(c):
    return ((c + LANE - 1) // LANE) * LANE


def _pad_w(w, rows, cols):
    w = jnp.pad(w, ((0, rows - w.shape[0]), (0, cols - w.shape[1])))
    return w.astype(BF16)


def _pad_row(v, cols):
    return jnp.pad(v, ((0, 0), (0, cols - v.shape[1]))).astype(F32)


def _sb(scale, bias, cols):
    scale = jnp.pad(scale, (0, cols - scale.shape[0]))
    bias = jnp.pad(bias, (0, cols - bias.shape[0]))
    return jnp.stack([scale, bias]).astype(F32)


# ----------------------------------------------------------------------------
# Deterministic synthetic parameters (BatchNorm folded into scale / bias)
# ----------------------------------------------------------------------------
def _p(key, shape, scale=0.1):
    return (scale * jax.random.normal(key, shape)).astype(F32)


def _bn_params(key, c, eps=1e-3):
    k1, k2, k3, k4 = jax.random.split(key, 4)
    gamma = 1.0 + 0.05 * jax.random.normal(k1, (c,))
    beta = 0.05 * jax.random.normal(k2, (c,))
    mean = 0.05 * jax.random.normal(k3, (c,))
    var = 1.0 + 0.05 * jnp.abs(jax.random.normal(k4, (c,)))
    scale = gamma / jnp.sqrt(var + eps)
    bias = beta - mean * scale
    return scale.astype(F32), bias.astype(F32)


def init_params(key, num_classes=10, batch=2, image_hw=16, in_ch=3):
    keys = iter(jax.random.split(key, 64))
    p = {}

    # ---- stem: 3x3 stride-2 conv, in_ch -> 16 (channels padded to 128) ----
    c_stem = 16
    cps = _rup(c_stem)
    w = _p(next(keys), (3, 3, in_ch, c_stem)).reshape(9 * in_ch, c_stem)
    p["stem_w"] = jnp.pad(w, ((0, 0), (0, cps - c_stem))).astype(BF16)
    s, b = _bn_params(next(keys), c_stem)
    p["stem_sb"] = _sb(s, b, cps)
    h_sp = image_hw // 2                        # stem output spatial (8)

    # ---- MBConv blocks ----
    blocks = []
    for (cin_t, cout_t, expand, stride) in _BLOCK_DEFS:
        blk = {}
        cmid_t = cin_t * expand
        cse_t = max(1, cin_t // 4)              # se_ratio = 0.25 on input filters
        cinp, cmidp = _rup(cin_t), _rup(cmid_t)
        csep, coutp = _rup(cse_t), _rup(cout_t)
        if expand != 1:
            blk["ew"] = _pad_w(_p(next(keys), (cin_t, cmid_t)), cinp, cmidp)
            s, b = _bn_params(next(keys), cmid_t)
            blk["esb"] = _sb(s, b, cmidp)
        dw = _p(next(keys), (3, 3, cmid_t)).reshape(9, cmid_t)
        blk["dww"] = jnp.pad(dw, ((0, 0), (0, cmidp - cmid_t))).astype(F32)
        s, b = _bn_params(next(keys), cmid_t)
        blk["dwsb"] = _sb(s, b, cmidp)
        blk["srw"] = _pad_w(_p(next(keys), (cmid_t, cse_t)), cmidp, csep)
        blk["srb"] = _pad_row(_p(next(keys), (1, cse_t)), csep)
        blk["sew"] = _pad_w(_p(next(keys), (cse_t, cmid_t)), csep, cmidp)
        blk["seb"] = _pad_row(_p(next(keys), (1, cmid_t)), cmidp)
        blk["pw"] = _pad_w(_p(next(keys), (cmid_t, cout_t)), cmidp, coutp)
        s, b = _bn_params(next(keys), cout_t)
        blk["psb"] = _sb(s, b, coutp)
        blk["mask"] = jnp.asarray(_dw_masks(batch, h_sp, h_sp), F32)
        if stride != 1:
            blk["sel"] = jnp.asarray(_stride2_select(batch, h_sp, h_sp), F32)
            h_sp //= 2
        blocks.append(blk)
    p["blocks"] = blocks

    # ---- head 1x1 conv 24 -> 64, global pool, fc 64 -> num_classes ----
    c_head_in, c_head = _BLOCK_DEFS[-1][1], 64
    chp = _rup(c_head)
    p["head_w"] = _pad_w(_p(next(keys), (c_head_in, c_head)), _rup(c_head_in), chp)
    s, b = _bn_params(next(keys), c_head)
    p["head_sb"] = _sb(s, b, chp)
    ncp = _rup(num_classes)
    p["fc_w"] = _pad_w(_p(next(keys), (c_head, num_classes)), chp, ncp)
    p["fc_b"] = _pad_row(_p(next(keys), (1, num_classes)), ncp)
    return p


# ----------------------------------------------------------------------------
# Wrapper-side stem im2col (layout plumbing on the raw input, stride+pad folded)
# ----------------------------------------------------------------------------
def _stem_im2col(x_nhwc, k=3, stride=2, pad=1):
    n, h, w, c = x_nhwc.shape
    ho = (h + 2 * pad - k) // stride + 1
    wo = (w + 2 * pad - k) // stride + 1
    xp = jnp.pad(x_nhwc, ((0, 0), (pad, pad), (pad, pad), (0, 0)))
    cols = [xp[:, di:di + stride * ho:stride, dj:dj + stride * wo:stride, :]
            for di in range(k) for dj in range(k)]
    patches = jnp.stack(cols, axis=3)               # (N, ho, wo, k*k, Cin)
    return patches.reshape(n * ho * wo, k * k * c), ho


# ----------------------------------------------------------------------------
# Forward pass (equivalent of EfficientNetModel.forward), one pallas_call
# ----------------------------------------------------------------------------
@functools.partial(jax.jit, static_argnames=("num_classes",))
def efficientnet_forward(params, x_nchw, num_classes=10):
    n = x_nchw.shape[0]
    x_nhwc = jnp.transpose(x_nchw, (0, 2, 3, 1)).astype(F32)
    x_col, h_sp = _stem_im2col(x_nhwc)

    ins = [x_col.astype(BF16), params["stem_w"], params["stem_sb"]]
    block_meta = []
    for blk, (cin_t, cout_t, expand, stride) in zip(params["blocks"], _BLOCK_DEFS):
        has_expand = expand != 1
        residual = (stride == 1 and cin_t == cout_t)
        block_meta.append((h_sp, stride, has_expand, residual))
        ins.append(blk["mask"])
        if stride != 1:
            ins.append(blk["sel"])
        if has_expand:
            ins += [blk["ew"], blk["esb"]]
        ins += [blk["dww"], blk["dwsb"], blk["srw"], blk["srb"],
                blk["sew"], blk["seb"], blk["pw"], blk["psb"]]
        if stride != 1:
            h_sp //= 2
    ins += [params["head_w"], params["head_sb"], params["fc_w"], params["fc_b"]]

    kern = functools.partial(_net_kernel, n_batch=n, block_meta=tuple(block_meta))
    out_cols = params["fc_b"].shape[1]
    logits = pl.pallas_call(
        kern,
        out_shape=jax.ShapeDtypeStruct((n, out_cols), F32),
        grid=(1,),
        in_specs=[_full_spec(a.shape) for a in ins],
        out_specs=_full_spec((n, out_cols)),
        compiler_params=pltpu.CompilerParams(
            dimension_semantics=("arbitrary",),
            vmem_limit_bytes=32 * 1024 * 1024),
    )(*ins)
    return logits[:, :num_classes]


if __name__ == "__main__":
    key = jax.random.PRNGKey(0)
    kx, kp = jax.random.split(key)
    x = jax.random.normal(kx, (2, 3, 16, 16), F32)  # NCHW, like the PyTorch module
    params = init_params(kp, num_classes=10, batch=2, image_hw=16, in_ch=3)
    logits = efficientnet_forward(params, x)
    jax.block_until_ready(logits)
    assert logits.shape == (2, 10) and logits.dtype == jnp.float32
    assert bool(jnp.all(jnp.isfinite(logits)))
    print("KERNEL_OK")
</pallas_src>

<mosaic_0001>
module attributes {stable_mosaic.version = 11 : i64} {
  func.func @_net_kernel(%arg0: i32, %arg1: memref<128x27xbf16, #tpu.memory_space<vmem>>, %arg2: memref<27x128xbf16, #tpu.memory_space<vmem>>, %arg3: memref<2x128xf32, #tpu.memory_space<vmem>>, %arg4: memref<128x9xf32, #tpu.memory_space<vmem>>, %arg5: memref<9x128xf32, #tpu.memory_space<vmem>>, %arg6: memref<2x128xf32, #tpu.memory_space<vmem>>, %arg7: memref<128x128xbf16, #tpu.memory_space<vmem>>, %arg8: memref<1x128xf32, #tpu.memory_space<vmem>>, %arg9: memref<128x128xbf16, #tpu.memory_space<vmem>>, %arg10: memref<1x128xf32, #tpu.memory_space<vmem>>, %arg11: memref<128x128xbf16, #tpu.memory_space<vmem>>, %arg12: memref<2x128xf32, #tpu.memory_space<vmem>>, %arg13: memref<128x9xf32, #tpu.memory_space<vmem>>, %arg14: memref<32x128xf32, #tpu.memory_space<vmem>>, %arg15: memref<128x128xbf16, #tpu.memory_space<vmem>>, %arg16: memref<2x128xf32, #tpu.memory_space<vmem>>, %arg17: memref<9x128xf32, #tpu.memory_space<vmem>>, %arg18: memref<2x128xf32, #tpu.memory_space<vmem>>, %arg19: memref<128x128xbf16, #tpu.memory_space<vmem>>, %arg20: memref<1x128xf32, #tpu.memory_space<vmem>>, %arg21: memref<128x128xbf16, #tpu.memory_space<vmem>>, %arg22: memref<1x128xf32, #tpu.memory_space<vmem>>, %arg23: memref<128x128xbf16, #tpu.memory_space<vmem>>, %arg24: memref<2x128xf32, #tpu.memory_space<vmem>>, %arg25: memref<32x9xf32, #tpu.memory_space<vmem>>, %arg26: memref<128x256xbf16, #tpu.memory_space<vmem>>, %arg27: memref<2x256xf32, #tpu.memory_space<vmem>>, %arg28: memref<9x256xf32, #tpu.memory_space<vmem>>, %arg29: memref<2x256xf32, #tpu.memory_space<vmem>>, %arg30: memref<256x128xbf16, #tpu.memory_space<vmem>>, %arg31: memref<1x128xf32, #tpu.memory_space<vmem>>, %arg32: memref<128x256xbf16, #tpu.memory_space<vmem>>, %arg33: memref<1x256xf32, #tpu.memory_space<vmem>>, %arg34: memref<256x128xbf16, #tpu.memory_space<vmem>>, %arg35: memref<2x128xf32, #tpu.memory_space<vmem>>, %arg36: memref<128x128xbf16, #tpu.memory_space<vmem>>, %arg37: memref<2x128xf32, #tpu.memory_space<vmem>>, %arg38: memref<128x128xbf16, #tpu.memory_space<vmem>>, %arg39: memref<1x128xf32, #tpu.memory_space<vmem>>, %arg40: memref<2x128xf32, #tpu.memory_space<vmem>>) attributes {dimension_semantics = [#tpu.dimension_semantics<arbitrary>], iteration_bounds = array<i64: 1>, scalar_prefetch = 0 : i64, scratch_operands = 0 : i64, tpu.core_type = #tpu.core_type<tc>, window_params = [{pipeline_mode = #tpu.pipeline_mode<synchronous>, transform_indices = @transform_0, window_bounds = array<i64: 128, 27>}, {pipeline_mode = #tpu.pipeline_mode<synchronous>, transform_indices = @transform_1, window_bounds = array<i64: 27, 128>}, {pipeline_mode = #tpu.pipeline_mode<synchronous>, transform_indices = @transform_2, window_bounds = array<i64: 2, 128>}, {pipeline_mode = #tpu.pipeline_mode<synchronous>, transform_indices = @transform_3, window_bounds = array<i64: 128, 9>}, {pipeline_mode = #tpu.pipeline_mode<synchronous>, transform_indices = @transform_4, window_bounds = array<i64: 9, 128>}, {pipeline_mode = #tpu.pipeline_mode<synchronous>, transform_indices = @transform_5, window_bounds = array<i64: 2, 128>}, {pipeline_mode = #tpu.pipeline_mode<synchronous>, transform_indices = @transform_6, window_bounds = array<i64: 128, 128>}, {pipeline_mode = #tpu.pipeline_mode<synchronous>, transform_indices = @transform_7, window_bounds = array<i64: 1, 128>}, {pipeline_mode = #tpu.pipeline_mode<synchronous>, transform_indices = @transform_8, window_bounds = array<i64: 128, 128>}, {pipeline_mode = #tpu.pipeline_mode<synchronous>, transform_indices = @transform_9, window_bounds = array<i64: 1, 128>}, {pipeline_mode = #tpu.pipeline_mode<synchronous>, transform_indices = @transform_10, window_bounds = array<i64: 128, 128>}, {pipeline_mode = #tpu.pipeline_mode<synchronous>, transform_indices = @transform_11, window_bounds = array<i64: 2, 128>}, {pipeline_mode = #tpu.pipeline_mode<synchronous>, transform_indices = @transform_12, window_bounds = array<i64: 128, 9>}, {pipeline_mode = #tpu.pipeline_mode<synchronous>, transform_indices = @transform_13, window_bounds = array<i64: 32, 128>}, {pipeline_mode = #tpu.pipeline_mode<synchronous>, transform_indices = @transform_14, window_bounds = array<i64: 128, 128>}, {pipeline_mode = #tpu.pipeline_mode<synchronous>, transform_indices = @transform_15, window_bounds = array<i64: 2, 128>}, {pipeline_mode = #tpu.pipeline_mode<synchronous>, transform_indices = @transform_16, window_bounds = array<i64: 9, 128>}, {pipeline_mode = #tpu.pipeline_mode<synchronous>, transform_indices = @transform_17, window_bounds = array<i64: 2, 128>}, {pipeline_mode = #tpu.pipeline_mode<synchronous>, transform_indices = @transform_18, window_bounds = array<i64: 128, 128>}, {pipeline_mode = #tpu.pipeline_mode<synchronous>, transform_indices = @transform_19, window_bounds = array<i64: 1, 128>}, {pipeline_mode = #tpu.pipeline_mode<synchronous>, transform_indices = @transform_20, window_bounds = array<i64: 128, 128>}, {pipeline_mode = #tpu.pipeline_mode<synchronous>, transform_indices = @transform_21, window_bounds = array<i64: 1, 128>}, {pipeline_mode = #tpu.pipeline_mode<synchronous>, transform_indices = @transform_22, window_bounds = array<i64: 128, 128>}, {pipeline_mode = #tpu.pipeline_mode<synchronous>, transform_indices = @transform_23, window_bounds = array<i64: 2, 128>}, {pipeline_mode = #tpu.pipeline_mode<synchronous>, transform_indices = @transform_24, window_bounds = array<i64: 32, 9>}, {pipeline_mode = #tpu.pipeline_mode<synchronous>, transform_indices = @transform_25, window_bounds = array<i64: 128, 256>}, {pipeline_mode = #tpu.pipeline_mode<synchronous>, transform_indices = @transform_26, window_bounds = array<i64: 2, 256>}, {pipeline_mode = #tpu.pipeline_mode<synchronous>, transform_indices = @transform_27, window_bounds = array<i64: 9, 256>}, {pipeline_mode = #tpu.pipeline_mode<synchronous>, transform_indices = @transform_28, window_bounds = array<i64: 2, 256>}, {pipeline_mode = #tpu.pipeline_mode<synchronous>, transform_indices = @transform_29, window_bounds = array<i64: 256, 128>}, {pipeline_mode = #tpu.pipeline_mode<synchronous>, transform_indices = @transform_30, window_bounds = array<i64: 1, 128>}, {pipeline_mode = #tpu.pipeline_mode<synchronous>, transform_indices = @transform_31, window_bounds = array<i64: 128, 256>}, {pipeline_mode = #tpu.pipeline_mode<synchronous>, transform_indices = @transform_32, window_bounds = array<i64: 1, 256>}, {pipeline_mode = #tpu.pipeline_mode<synchronous>, transform_indices = @transform_33, window_bounds = array<i64: 256, 128>}, {pipeline_mode = #tpu.pipeline_mode<synchronous>, transform_indices = @transform_34, window_bounds = array<i64: 2, 128>}, {pipeline_mode = #tpu.pipeline_mode<synchronous>, transform_indices = @transform_35, window_bounds = array<i64: 128, 128>}, {pipeline_mode = #tpu.pipeline_mode<synchronous>, transform_indices = @transform_36, window_bounds = array<i64: 2, 128>}, {pipeline_mode = #tpu.pipeline_mode<synchronous>, transform_indices = @transform_37, window_bounds = array<i64: 128, 128>}, {pipeline_mode = #tpu.pipeline_mode<synchronous>, transform_indices = @transform_38, window_bounds = array<i64: 1, 128>}, {pipeline_mode = #tpu.pipeline_mode<synchronous>, transform_indices = @transform_39, window_bounds = array<i64: 2, 128>}]} {
    %c0 = arith.constant 0 : index
    %c0_0 = arith.constant 0 : index
    %0 = vector.load %arg1[%c0, %c0_0] : memref<128x27xbf16, #tpu.memory_space<vmem>>, vector<128x27xbf16>
    %c0_1 = arith.constant 0 : index
    %c0_2 = arith.constant 0 : index
    %1 = vector.load %arg2[%c0_1, %c0_2] : memref<27x128xbf16, #tpu.memory_space<vmem>>, vector<27x128xbf16>
    %c0_3 = arith.constant 0 : index
    %c0_4 = arith.constant 0 : index
    %2 = vector.load %arg3[%c0_3, %c0_4] : memref<2x128xf32, #tpu.memory_space<vmem>>, vector<2x128xf32>
    %cst = arith.constant dense<0.000000e+00> : vector<128x128xf32>
    %3 = tpu.matmul %0, %1, %cst {dimension_numbers = #tpu.dot_dimension_numbers<[1], [0], [0], [1], [0, 0, 1, 1], [], []>} : vector<128x27xbf16>, vector<27x128xbf16>, vector<128x128xf32> -> vector<128x128xf32>
    %4 = vector.extract_strided_slice %2 {offsets = [0, 0], sizes = [1, 128], strides = [1, 1]} : vector<2x128xf32> to vector<1x128xf32>
    %5 = vector.broadcast %4 : vector<1x128xf32> to vector<128x128xf32>
    %6 = arith.mulf %3, %5 : vector<128x128xf32>
    %7 = vector.extract_strided_slice %2 {offsets = [1, 0], sizes = [1, 128], strides = [1, 1]} : vector<2x128xf32> to vector<1x128xf32>
    %8 = vector.broadcast %7 : vector<1x128xf32> to vector<128x128xf32>
    %9 = arith.addf %6, %8 : vector<128x128xf32>
    %10 = arith.negf %9 : vector<128x128xf32>
    %11 = math.exp %10 : vector<128x128xf32>
    %cst_5 = arith.constant 1.000000e+00 : f32
    %12 = vector.broadcast %cst_5 : f32 to vector<128x128xf32>
    %13 = arith.addf %12, %11 : vector<128x128xf32>
    %14 = arith.divf %12, %13 : vector<128x128xf32>
    %15 = arith.mulf %9, %14 : vector<128x128xf32>
    %c0_6 = arith.constant 0 : index
    %c0_7 = arith.constant 0 : index
    %16 = vector.load %arg4[%c0_6, %c0_7] : memref<128x9xf32, #tpu.memory_space<vmem>>, vector<128x9xf32>
    %c0_8 = arith.constant 0 : index
    %c0_9 = arith.constant 0 : index
    %17 = vector.load %arg5[%c0_8, %c0_9] : memref<9x128xf32, #tpu.memory_space<vmem>>, vector<9x128xf32>
    %c0_10 = arith.constant 0 : index
    %c0_11 = arith.constant 0 : index
    %18 = vector.load %arg6[%c0_10, %c0_11] : memref<2x128xf32, #tpu.memory_space<vmem>>, vector<2x128xf32>
    %cst_12 = arith.constant 0.000000e+00 : f32
    %19 = vector.broadcast %cst_12 : f32 to vector<16x128xf32>
    %20 = tpu.concatenate %19, %15, %19 in 0 : vector<16x128xf32>, vector<128x128xf32>, vector<16x128xf32> -> vector<160x128xf32>
    %cst_13 = arith.constant 0.000000e+00 : f32
    %21 = vector.broadcast %cst_13 : f32 to vector<128x128xf32>
    %22 = vector.extract_strided_slice %20 {offsets = [7, 0], sizes = [128, 128], strides = [1, 1]} : vector<160x128xf32> to vector<128x128xf32>
    %23 = vector.extract_strided_slice %16 {offsets = [0, 0], sizes = [128, 1], strides = [1, 1]} : vector<128x9xf32> to vector<128x1xf32>
    %24 = vector.broadcast %23 : vector<128x1xf32> to vector<128x128xf32>
    %25 = arith.mulf %22, %24 : vector<128x128xf32>
    %26 = vector.extract_strided_slice %17 {offsets = [0, 0], sizes = [1, 128], strides = [1, 1]} : vector<9x128xf32> to vector<1x128xf32>
    %27 = vector.broadcast %26 : vector<1x128xf32> to vector<128x128xf32>
    %28 = arith.mulf %25, %27 : vector<128x128xf32>
    %29 = arith.addf %21, %28 : vector<128x128xf32>
    %30 = vector.extract_strided_slice %20 {offsets = [8, 0], sizes = [128, 128], strides = [1, 1]} : vector<160x128xf32> to vector<128x128xf32>
    %31 = vector.extract_strided_slice %16 {offsets = [0, 1], sizes = [128, 1], strides = [1, 1]} : vector<128x9xf32> to vector<128x1xf32>
    %32 = vector.broadcast %31 : vector<128x1xf32> to vector<128x128xf32>
    %33 = arith.mulf %30, %32 : vector<128x128xf32>
    %34 = vector.extract_strided_slice %17 {offsets = [1, 0], sizes = [1, 128], strides = [1, 1]} : vector<9x128xf32> to vector<1x128xf32>
    %35 = vector.broadcast %34 : vector<1x128xf32> to vector<128x128xf32>
    %36 = arith.mulf %33, %35 : vector<128x128xf32>
    %37 = arith.addf %29, %36 : vector<128x128xf32>
    %38 = vector.extract_strided_slice %20 {offsets = [9, 0], sizes = [128, 128], strides = [1, 1]} : vector<160x128xf32> to vector<128x128xf32>
    %39 = vector.extract_strided_slice %16 {offsets = [0, 2], sizes = [128, 1], strides = [1, 1]} : vector<128x9xf32> to vector<128x1xf32>
    %40 = vector.broadcast %39 : vector<128x1xf32> to vector<128x128xf32>
    %41 = arith.mulf %38, %40 : vector<128x128xf32>
    %42 = vector.extract_strided_slice %17 {offsets = [2, 0], sizes = [1, 128], strides = [1, 1]} : vector<9x128xf32> to vector<1x128xf32>
    %43 = vector.broadcast %42 : vector<1x128xf32> to vector<128x128xf32>
    %44 = arith.mulf %41, %43 : vector<128x128xf32>
    %45 = arith.addf %37, %44 : vector<128x128xf32>
    %46 = vector.extract_strided_slice %20 {offsets = [15, 0], sizes = [128, 128], strides = [1, 1]} : vector<160x128xf32> to vector<128x128xf32>
    %47 = vector.extract_strided_slice %16 {offsets = [0, 3], sizes = [128, 1], strides = [1, 1]} : vector<128x9xf32> to vector<128x1xf32>
    %48 = vector.broadcast %47 : vector<128x1xf32> to vector<128x128xf32>
    %49 = arith.mulf %46, %48 : vector<128x128xf32>
    %50 = vector.extract_strided_slice %17 {offsets = [3, 0], sizes = [1, 128], strides = [1, 1]} : vector<9x128xf32> to vector<1x128xf32>
    %51 = vector.broadcast %50 : vector<1x128xf32> to vector<128x128xf32>
    %52 = arith.mulf %49, %51 : vector<128x128xf32>
    %53 = arith.addf %45, %52 : vector<128x128xf32>
    %54 = vector.extract_strided_slice %20 {offsets = [16, 0], sizes = [128, 128], strides = [1, 1]} : vector<160x128xf32> to vector<128x128xf32>
    %55 = vector.extract_strided_slice %16 {offsets = [0, 4], sizes = [128, 1], strides = [1, 1]} : vector<128x9xf32> to vector<128x1xf32>
    %56 = vector.broadcast %55 : vector<128x1xf32> to vector<128x128xf32>
    %57 = arith.mulf %54, %56 : vector<128x128xf32>
    %58 = vector.extract_strided_slice %17 {offsets = [4, 0], sizes = [1, 128], strides = [1, 1]} : vector<9x128xf32> to vector<1x128xf32>
    %59 = vector.broadcast %58 : vector<1x128xf32> to vector<128x128xf32>
    %60 = arith.mulf %57, %59 : vector<128x128xf32>
    %61 = arith.addf %53, %60 : vector<128x128xf32>
    %62 = vector.extract_strided_slice %20 {offsets = [17, 0], sizes = [128, 128], strides = [1, 1]} : vector<160x128xf32> to vector<128x128xf32>
    %63 = vector.extract_strided_slice %16 {offsets = [0, 5], sizes = [128, 1], strides = [1, 1]} : vector<128x9xf32> to vector<128x1xf32>
    %64 = vector.broadcast %63 : vector<128x1xf32> to vector<128x128xf32>
    %65 = arith.mulf %62, %64 : vector<128x128xf32>
    %66 = vector.extract_strided_slice %17 {offsets = [5, 0], sizes = [1, 128], strides = [1, 1]} : vector<9x128xf32> to vector<1x128xf32>
    %67 = vector.broadcast %66 : vector<1x128xf32> to vector<128x128xf32>
    %68 = arith.mulf %65, %67 : vector<128x128xf32>
    %69 = arith.addf %61, %68 : vector<128x128xf32>
    %70 = vector.extract_strided_slice %20 {offsets = [23, 0], sizes = [128, 128], strides = [1, 1]} : vector<160x128xf32> to vector<128x128xf32>
    %71 = vector.extract_strided_slice %16 {offsets = [0, 6], sizes = [128, 1], strides = [1, 1]} : vector<128x9xf32> to vector<128x1xf32>
    %72 = vector.broadcast %71 : vector<128x1xf32> to vector<128x128xf32>
    %73 = arith.mulf %70, %72 : vector<128x128xf32>
    %74 = vector.extract_strided_slice %17 {offsets = [6, 0], sizes = [1, 128], strides = [1, 1]} : vector<9x128xf32> to vector<1x128xf32>
    %75 = vector.broadcast %74 : vector<1x128xf32> to vector<128x128xf32>
    %76 = arith.mulf %73, %75 : vector<128x128xf32>
    %77 = arith.addf %69, %76 : vector<128x128xf32>
    %78 = vector.extract_strided_slice %20 {offsets = [24, 0], sizes = [128, 128], strides = [1, 1]} : vector<160x128xf32> to vector<128x128xf32>
    %79 = vector.extract_strided_slice %16 {offsets = [0, 7], sizes = [128, 1], strides = [1, 1]} : vector<128x9xf32> to vector<128x1xf32>
    %80 = vector.broadcast %79 : vector<128x1xf32> to vector<128x128xf32>
    %81 = arith.mulf %78, %80 : vector<128x128xf32>
    %82 = vector.extract_strided_slice %17 {offsets = [7, 0], sizes = [1, 128], strides = [1, 1]} : vector<9x128xf32> to vector<1x128xf32>
    %83 = vector.broadcast %82 : vector<1x128xf32> to vector<128x128xf32>
    %84 = arith.mulf %81, %83 : vector<128x128xf32>
    %85 = arith.addf %77, %84 : vector<128x128xf32>
    %86 = vector.extract_strided_slice %20 {offsets = [25, 0], sizes = [128, 128], strides = [1, 1]} : vector<160x128xf32> to vector<128x128xf32>
    %87 = vector.extract_strided_slice %16 {offsets = [0, 8], sizes = [128, 1], strides = [1, 1]} : vector<128x9xf32> to vector<128x1xf32>
    %88 = vector.broadcast %87 : vector<128x1xf32> to vector<128x128xf32>
    %89 = arith.mulf %86, %88 : vector<128x128xf32>
    %90 = vector.extract_strided_slice %17 {offsets = [8, 0], sizes = [1, 128], strides = [1, 1]} : vector<9x128xf32> to vector<1x128xf32>
    %91 = vector.broadcast %90 : vector<1x128xf32> to vector<128x128xf32>
    %92 = arith.mulf %89, %91 : vector<128x128xf32>
    %93 = arith.addf %85, %92 : vector<128x128xf32>
    %94 = vector.extract_strided_slice %18 {offsets = [0, 0], sizes = [1, 128], strides = [1, 1]} : vector<2x128xf32> to vector<1x128xf32>
    %95 = vector.broadcast %94 : vector<1x128xf32> to vector<128x128xf32>
    %96 = arith.mulf %93, %95 : vector<128x128xf32>
    %97 = vector.extract_strided_slice %18 {offsets = [1, 0], sizes = [1, 128], strides = [1, 1]} : vector<2x128xf32> to vector<1x128xf32>
    %98 = vector.broadcast %97 : vector<1x128xf32> to vector<128x128xf32>
    %99 = arith.addf %96, %98 : vector<128x128xf32>
    %100 = arith.negf %99 : vector<128x128xf32>
    %101 = math.exp %100 : vector<128x128xf32>
    %cst_14 = arith.constant 1.000000e+00 : f32
    %102 = vector.broadcast %cst_14 : f32 to vector<128x128xf32>
    %103 = arith.addf %102, %101 : vector<128x128xf32>
    %104 = arith.divf %102, %103 : vector<128x128xf32>
    %105 = arith.mulf %99, %104 : vector<128x128xf32>
    %c0_15 = arith.constant 0 : index
    %c0_16 = arith.constant 0 : index
    %106 = vector.load %arg7[%c0_15, %c0_16] : memref<128x128xbf16, #tpu.memory_space<vmem>>, vector<128x128xbf16>
    %c0_17 = arith.constant 0 : index
    %c0_18 = arith.constant 0 : index
    %107 = vector.load %arg8[%c0_17, %c0_18] : memref<1x128xf32, #tpu.memory_space<vmem>>, vector<1x128xf32>
    %c0_19 = arith.constant 0 : index
    %c0_20 = arith.constant 0 : index
    %108 = vector.load %arg9[%c0_19, %c0_20] : memref<128x128xbf16, #tpu.memory_space<vmem>>, vector<128x128xbf16>
    %c0_21 = arith.constant 0 : index
    %c0_22 = arith.constant 0 : index
    %109 = vector.load %arg10[%c0_21, %c0_22] : memref<1x128xf32, #tpu.memory_space<vmem>>, vector<1x128xf32>
    %110 = vector.extract_strided_slice %105 {offsets = [0, 0], sizes = [64, 128], strides = [1, 1]} : vector<128x128xf32> to vector<64x128xf32>
    %cst_23 = arith.constant dense<0.000000e+00> : vector<128xf32>
    %111 = vector.multi_reduction <add>, %110, %cst_23 [0] : vector<64x128xf32> to vector<128xf32>
    %112 = vector.shape_cast %111 : vector<128xf32> to vector<1x128xf32>
    %cst_24 = arith.constant 6.400000e+01 : f32
    %113 = vector.broadcast %cst_24 : f32 to vector<1x128xf32>
    %114 = arith.divf %112, %113 : vector<1x128xf32>
    %115 = vector.extract_strided_slice %105 {offsets = [64, 0], sizes = [64, 128], strides = [1, 1]} : vector<128x128xf32> to vector<64x128xf32>
    %cst_25 = arith.constant dense<0.000000e+00> : vector<128xf32>
    %116 = vector.multi_reduction <add>, %115, %cst_25 [0] : vector<64x128xf32> to vector<128xf32>
    %117 = vector.shape_cast %116 : vector<128xf32> to vector<1x128xf32>
    %cst_26 = arith.constant 6.400000e+01 : f32
    %118 = vector.broadcast %cst_26 : f32 to vector<1x128xf32>
    %119 = arith.divf %117, %118 : vector<1x128xf32>
    %120 = tpu.concatenate %114, %119 in 0 : vector<1x128xf32>, vector<1x128xf32> -> vector<2x128xf32>
    %121 = arith.truncf %120 : vector<2x128xf32> to vector<2x128xbf16>
    %cst_27 = arith.constant dense<0.000000e+00> : vector<2x128xf32>
    %122 = tpu.matmul %121, %106, %cst_27 {dimension_numbers = #tpu.dot_dimension_numbers<[1], [0], [0], [1], [0, 0, 1, 1], [], []>} : vector<2x128xbf16>, vector<128x128xbf16>, vector<2x128xf32> -> vector<2x128xf32>
    %123 = vector.broadcast %107 : vector<1x128xf32> to vector<2x128xf32>
    %124 = arith.addf %122, %123 : vector<2x128xf32>
    %125 = arith.negf %124 : vector<2x128xf32>
    %126 = math.exp %125 : vector<2x128xf32>
    %cst_28 = arith.constant 1.000000e+00 : f32
    %127 = vector.broadcast %cst_28 : f32 to vector<2x128xf32>
    %128 = arith.addf %127, %126 : vector<2x128xf32>
    %129 = arith.divf %127, %128 : vector<2x128xf32>
    %130 = arith.mulf %124, %129 : vector<2x128xf32>
    %131 = arith.truncf %130 : vector<2x128xf32> to vector<2x128xbf16>
    %cst_29 = arith.constant dense<0.000000e+00> : vector<2x128xf32>
    %132 = tpu.matmul %131, %108, %cst_29 {dimension_numbers = #tpu.dot_dimension_numbers<[1], [0], [0], [1], [0, 0, 1, 1], [], []>} : vector<2x128xbf16>, vector<128x128xbf16>, vector<2x128xf32> -> vector<2x128xf32>
    %133 = vector.broadcast %109 : vector<1x128xf32> to vector<2x128xf32>
    %134 = arith.addf %132, %133 : vector<2x128xf32>
    %135 = arith.negf %134 : vector<2x128xf32>
    %136 = math.exp %135 : vector<2x128xf32>
    %cst_30 = arith.constant 1.000000e+00 : f32
    %137 = vector.broadcast %cst_30 : f32 to vector<2x128xf32>
    %138 = arith.addf %137, %136 : vector<2x128xf32>
    %139 = arith.divf %137, %138 : vector<2x128xf32>
    %140 = vector.extract_strided_slice %105 {offsets = [0, 0], sizes = [64, 128], strides = [1, 1]} : vector<128x128xf32> to vector<64x128xf32>
    %141 = vector.extract_strided_slice %139 {offsets = [0, 0], sizes = [1, 128], strides = [1, 1]} : vector<2x128xf32> to vector<1x128xf32>
    %142 = vector.broadcast %141 : vector<1x128xf32> to vector<64x128xf32>
    %143 = arith.mulf %140, %142 : vector<64x128xf32>
    %144 = vector.extract_strided_slice %105 {offsets = [64, 0], sizes = [64, 128], strides = [1, 1]} : vector<128x128xf32> to vector<64x128xf32>
    %145 = vector.extract_strided_slice %139 {offsets = [1, 0], sizes = [1, 128], strides = [1, 1]} : vector<2x128xf32> to vector<1x128xf32>
    %146 = vector.broadcast %145 : vector<1x128xf32> to vector<64x128xf32>
    %147 = arith.mulf %144, %146 : vector<64x128xf32>
    %148 = tpu.concatenate %143, %147 in 0 : vector<64x128xf32>, vector<64x128xf32> -> vector<128x128xf32>
    %c0_31 = arith.constant 0 : index
    %c0_32 = arith.constant 0 : index
    %149 = vector.load %arg11[%c0_31, %c0_32] : memref<128x128xbf16, #tpu.memory_space<vmem>>, vector<128x128xbf16>
    %c0_33 = arith.constant 0 : index
    %c0_34 = arith.constant 0 : index
    %150 = vector.load %arg12[%c0_33, %c0_34] : memref<2x128xf32, #tpu.memory_space<vmem>>, vector<2x128xf32>
    %151 = arith.truncf %148 : vector<128x128xf32> to vector<128x128xbf16>
    %cst_35 = arith.constant dense<0.000000e+00> : vector<128x128xf32>
    %152 = tpu.matmul %151, %149, %cst_35 {dimension_numbers = #tpu.dot_dimension_numbers<[1], [0], [0], [1], [0, 0, 1, 1], [], []>} : vector<128x128xbf16>, vector<128x128xbf16>, vector<128x128xf32> -> vector<128x128xf32>
    %153 = vector.extract_strided_slice %150 {offsets = [0, 0], sizes = [1, 128], strides = [1, 1]} : vector<2x128xf32> to vector<1x128xf32>
    %154 = vector.broadcast %153 : vector<1x128xf32> to vector<128x128xf32>
    %155 = arith.mulf %152, %154 : vector<128x128xf32>
    %156 = vector.extract_strided_slice %150 {offsets = [1, 0], sizes = [1, 128], strides = [1, 1]} : vector<2x128xf32> to vector<1x128xf32>
    %157 = vector.broadcast %156 : vector<1x128xf32> to vector<128x128xf32>
    %158 = arith.addf %155, %157 : vector<128x128xf32>
    %159 = arith.addf %158, %15 : vector<128x128xf32>
    %c0_36 = arith.constant 0 : index
    %c0_37 = arith.constant 0 : index
    %160 = vector.load %arg13[%c0_36, %c0_37] : memref<128x9xf32, #tpu.memory_space<vmem>>, vector<128x9xf32>
    %c0_38 = arith.constant 0 : index
    %c0_39 = arith.constant 0 : index
    %161 = vector.load %arg14[%c0_38, %c0_39] : memref<32x128xf32, #tpu.memory_space<vmem>>, vector<32x128xf32>
    %c0_40 = arith.constant 0 : index
    %c0_41 = arith.constant 0 : index
    %162 = vector.load %arg15[%c0_40, %c0_41] : memref<128x128xbf16, #tpu.memory_space<vmem>>, vector<128x128xbf16>
    %c0_42 = arith.constant 0 : index
    %c0_43 = arith.constant 0 : index
    %163 = vector.load %arg16[%c0_42, %c0_43] : memref<2x128xf32, #tpu.memory_space<vmem>>, vector<2x128xf32>
    %164 = arith.truncf %159 : vector<128x128xf32> to vector<128x128xbf16>
    %cst_44 = arith.constant dense<0.000000e+00> : vector<128x128xf32>
    %165 = tpu.matmul %164, %162, %cst_44 {dimension_numbers = #tpu.dot_dimension_numbers<[1], [0], [0], [1], [0, 0, 1, 1], [], []>} : vector<128x128xbf16>, vector<128x128xbf16>, vector<128x128xf32> -> vector<128x128xf32>
    %166 = vector.extract_strided_slice %163 {offsets = [0, 0], sizes = [1, 128], strides = [1, 1]} : vector<2x128xf32> to vector<1x128xf32>
    %167 = vector.broadcast %166 : vector<1x128xf32> to vector<128x128xf32>
    %168 = arith.mulf %165, %167 : vector<128x128xf32>
    %169 = vector.extract_strided_slice %163 {offsets = [1, 0], sizes = [1, 128], strides = [1, 1]} : vector<2x128xf32> to vector<1x128xf32>
    %170 = vector.broadcast %169 : vector<1x128xf32> to vector<128x128xf32>
    %171 = arith.addf %168, %170 : vector<128x128xf32>
    %172 = arith.negf %171 : vector<128x128xf32>
    %173 = math.exp %172 : vector<128x128xf32>
    %cst_45 = arith.constant 1.000000e+00 : f32
    %174 = vector.broadcast %cst_45 : f32 to vector<128x128xf32>
    %175 = arith.addf %174, %173 : vector<128x128xf32>
    %176 = arith.divf %174, %175 : vector<128x128xf32>
    %177 = arith.mulf %171, %176 : vector<128x128xf32>
    %c0_46 = arith.constant 0 : index
    %c0_47 = arith.constant 0 : index
    %178 = vector.load %arg17[%c0_46, %c0_47] : memref<9x128xf32, #tpu.memory_space<vmem>>, vector<9x128xf32>
    %c0_48 = arith.constant 0 : index
    %c0_49 = arith.constant 0 : index
    %179 = vector.load %arg18[%c0_48, %c0_49] : memref<2x128xf32, #tpu.memory_space<vmem>>, vector<2x128xf32>
    %cst_50 = arith.constant 0.000000e+00 : f32
    %180 = vector.broadcast %cst_50 : f32 to vector<16x128xf32>
    %181 = tpu.concatenate %180, %177, %180 in 0 : vector<16x128xf32>, vector<128x128xf32>, vector<16x128xf32> -> vector<160x128xf32>
    %cst_51 = arith.constant 0.000000e+00 : f32
    %182 = vector.broadcast %cst_51 : f32 to vector<128x128xf32>
    %183 = vector.extract_strided_slice %181 {offsets = [7, 0], sizes = [128, 128], strides = [1, 1]} : vector<160x128xf32> to vector<128x128xf32>
    %184 = vector.extract_strided_slice %160 {offsets = [0, 0], sizes = [128, 1], strides = [1, 1]} : vector<128x9xf32> to vector<128x1xf32>
    %185 = vector.broadcast %184 : vector<128x1xf32> to vector<128x128xf32>
    %186 = arith.mulf %183, %185 : vector<128x128xf32>
    %187 = vector.extract_strided_slice %178 {offsets = [0, 0], sizes = [1, 128], strides = [1, 1]} : vector<9x128xf32> to vector<1x128xf32>
    %188 = vector.broadcast %187 : vector<1x128xf32> to vector<128x128xf32>
    %189 = arith.mulf %186, %188 : vector<128x128xf32>
    %190 = arith.addf %182, %189 : vector<128x128xf32>
    %191 = vector.extract_strided_slice %181 {offsets = [8, 0], sizes = [128, 128], strides = [1, 1]} : vector<160x128xf32> to vector<128x128xf32>
    %192 = vector.extract_strided_slice %160 {offsets = [0, 1], sizes = [128, 1], strides = [1, 1]} : vector<128x9xf32> to vector<128x1xf32>
    %193 = vector.broadcast %192 : vector<128x1xf32> to vector<128x128xf32>
    %194 = arith.mulf %191, %193 : vector<128x128xf32>
    %195 = vector.extract_strided_slice %178 {offsets = [1, 0], sizes = [1, 128], strides = [1, 1]} : vector<9x128xf32> to vector<1x128xf32>
    %196 = vector.broadcast %195 : vector<1x128xf32> to vector<128x128xf32>
    %197 = arith.mulf %194, %196 : vector<128x128xf32>
    %198 = arith.addf %190, %197 : vector<128x128xf32>
    %199 = vector.extract_strided_slice %181 {offsets = [9, 0], sizes = [128, 128], strides = [1, 1]} : vector<160x128xf32> to vector<128x128xf32>
    %200 = vector.extract_strided_slice %160 {offsets = [0, 2], sizes = [128, 1], strides = [1, 1]} : vector<128x9xf32> to vector<128x1xf32>
    %201 = vector.broadcast %200 : vector<128x1xf32> to vector<128x128xf32>
    %202 = arith.mulf %199, %201 : vector<128x128xf32>
    %203 = vector.extract_strided_slice %178 {offsets = [2, 0], sizes = [1, 128], strides = [1, 1]} : vector<9x128xf32> to vector<1x128xf32>
    %204 = vector.broadcast %203 : vector<1x128xf32> to vector<128x128xf32>
    %205 = arith.mulf %202, %204 : vector<128x128xf32>
    %206 = arith.addf %198, %205 : vector<128x128xf32>
    %207 = vector.extract_strided_slice %181 {offsets = [15, 0], sizes = [128, 128], strides = [1, 1]} : vector<160x128xf32> to vector<128x128xf32>
    %208 = vector.extract_strided_slice %160 {offsets = [0, 3], sizes = [128, 1], strides = [1, 1]} : vector<128x9xf32> to vector<128x1xf32>
    %209 = vector.broadcast %208 : vector<128x1xf32> to vector<128x128xf32>
    %210 = arith.mulf %207, %209 : vector<128x128xf32>
    %211 = vector.extract_strided_slice %178 {offsets = [3, 0], sizes = [1, 128], strides = [1, 1]} : vector<9x128xf32> to vector<1x128xf32>
    %212 = vector.broadcast %211 : vector<1x128xf32> to vector<128x128xf32>
    %213 = arith.mulf %210, %212 : vector<128x128xf32>
    %214 = arith.addf %206, %213 : vector<128x128xf32>
    %215 = vector.extract_strided_slice %181 {offsets = [16, 0], sizes = [128, 128], strides = [1, 1]} : vector<160x128xf32> to vector<128x128xf32>
    %216 = vector.extract_strided_slice %160 {offsets = [0, 4], sizes = [128, 1], strides = [1, 1]} : vector<128x9xf32> to vector<128x1xf32>
    %217 = vector.broadcast %216 : vector<128x1xf32> to vector<128x128xf32>
    %218 = arith.mulf %215, %217 : vector<128x128xf32>
    %219 = vector.extract_strided_slice %178 {offsets = [4, 0], sizes = [1, 128], strides = [1, 1]} : vector<9x128xf32> to vector<1x128xf32>
    %220 = vector.broadcast %219 : vector<1x128xf32> to vector<128x128xf32>
    %221 = arith.mulf %218, %220 : vector<128x128xf32>
    %222 = arith.addf %214, %221 : vector<128x128xf32>
    %223 = vector.extract_strided_slice %181 {offsets = [17, 0], sizes = [128, 128], strides = [1, 1]} : vector<160x128xf32> to vector<128x128xf32>
    %224 = vector.extract_strided_slice %160 {offsets = [0, 5], sizes = [128, 1], strides = [1, 1]} : vector<128x9xf32> to vector<128x1xf32>
    %225 = vector.broadcast %224 : vector<128x1xf32> to vector<128x128xf32>
    %226 = arith.mulf %223, %225 : vector<128x128xf32>
    %227 = vector.extract_strided_slice %178 {offsets = [5, 0], sizes = [1, 128], strides = [1, 1]} : vector<9x128xf32> to vector<1x128xf32>
    %228 = vector.broadcast %227 : vector<1x128xf32> to vector<128x128xf32>
    %229 = arith.mulf %226, %228 : vector<128x128xf32>
    %230 = arith.addf %222, %229 : vector<128x128xf32>
    %231 = vector.extract_strided_slice %181 {offsets = [23, 0], sizes = [128, 128], strides = [1, 1]} : vector<160x128xf32> to vector<128x128xf32>
    %232 = vector.extract_strided_slice %160 {offsets = [0, 6], sizes = [128, 1], strides = [1, 1]} : vector<128x9xf32> to vector<128x1xf32>
    %233 = vector.broadcast %232 : vector<128x1xf32> to vector<128x128xf32>
    %234 = arith.mulf %231, %233 : vector<128x128xf32>
    %235 = vector.extract_strided_slice %178 {offsets = [6, 0], sizes = [1, 128], strides = [1, 1]} : vector<9x128xf32> to vector<1x128xf32>
    %236 = vector.broadcast %235 : vector<1x128xf32> to vector<128x128xf32>
    %237 = arith.mulf %234, %236 : vector<128x128xf32>
    %238 = arith.addf %230, %237 : vector<128x128xf32>
    %239 = vector.extract_strided_slice %181 {offsets = [24, 0], sizes = [128, 128], strides = [1, 1]} : vector<160x128xf32> to vector<128x128xf32>
    %240 = vector.extract_strided_slice %160 {offsets = [0, 7], sizes = [128, 1], strides = [1, 1]} : vector<128x9xf32> to vector<128x1xf32>
    %241 = vector.broadcast %240 : vector<128x1xf32> to vector<128x128xf32>
    %242 = arith.mulf %239, %241 : vector<128x128xf32>
    %243 = vector.extract_strided_slice %178 {offsets = [7, 0], sizes = [1, 128], strides = [1, 1]} : vector<9x128xf32> to vector<1x128xf32>
    %244 = vector.broadcast %243 : vector<1x128xf32> to vector<128x128xf32>
    %245 = arith.mulf %242, %244 : vector<128x128xf32>
    %246 = arith.addf %238, %245 : vector<128x128xf32>
    %247 = vector.extract_strided_slice %181 {offsets = [25, 0], sizes = [128, 128], strides = [1, 1]} : vector<160x128xf32> to vector<128x128xf32>
    %248 = vector.extract_strided_slice %160 {offsets = [0, 8], sizes = [128, 1], strides = [1, 1]} : vector<128x9xf32> to vector<128x1xf32>
    %249 = vector.broadcast %248 : vector<128x1xf32> to vector<128x128xf32>
    %250 = arith.mulf %247, %249 : vector<128x128xf32>
    %251 = vector.extract_strided_slice %178 {offsets = [8, 0], sizes = [1, 128], strides = [1, 1]} : vector<9x128xf32> to vector<1x128xf32>
    %252 = vector.broadcast %251 : vector<1x128xf32> to vector<128x128xf32>
    %253 = arith.mulf %250, %252 : vector<128x128xf32>
    %254 = arith.addf %246, %253 : vector<128x128xf32>
    %cst_52 = arith.constant dense<0.000000e+00> : vector<32x128xf32>
    %255 = tpu.matmul %161, %254, %cst_52 {dimension_numbers = #tpu.dot_dimension_numbers<[1], [0], [0], [1], [0, 0, 1, 1], [], []>} : vector<32x128xf32>, vector<128x128xf32>, vector<32x128xf32> -> vector<32x128xf32>
    %256 = vector.extract_strided_slice %179 {offsets = [0, 0], sizes = [1, 128], strides = [1, 1]} : vector<2x128xf32> to vector<1x128xf32>
    %257 = vector.broadcast %256 : vector<1x128xf32> to vector<32x128xf32>
    %258 = arith.mulf %255, %257 : vector<32x128xf32>
    %259 = vector.extract_strided_slice %179 {offsets = [1, 0], sizes = [1, 128], strides = [1, 1]} : vector<2x128xf32> to vector<1x128xf32>
    %260 = vector.broadcast %259 : vector<1x128xf32> to vector<32x128xf32>
    %261 = arith.addf %258, %260 : vector<32x128xf32>
    %262 = arith.negf %261 : vector<32x128xf32>
    %263 = math.exp %262 : vector<32x128xf32>
    %cst_53 = arith.constant 1.000000e+00 : f32
    %264 = vector.broadcast %cst_53 : f32 to vector<32x128xf32>
    %265 = arith.addf %264, %263 : vector<32x128xf32>
    %266 = arith.divf %264, %265 : vector<32x128xf32>
    %267 = arith.mulf %261, %266 : vector<32x128xf32>
    %c0_54 = arith.constant 0 : index
    %c0_55 = arith.constant 0 : index
    %268 = vector.load %arg19[%c0_54, %c0_55] : memref<128x128xbf16, #tpu.memory_space<vmem>>, vector<128x128xbf16>
    %c0_56 = arith.constant 0 : index
    %c0_57 = arith.constant 0 : index
    %269 = vector.load %arg20[%c0_56, %c0_57] : memref<1x128xf32, #tpu.memory_space<vmem>>, vector<1x128xf32>
    %c0_58 = arith.constant 0 : index
    %c0_59 = arith.constant 0 : index
    %270 = vector.load %arg21[%c0_58, %c0_59] : memref<128x128xbf16, #tpu.memory_space<vmem>>, vector<128x128xbf16>
    %c0_60 = arith.constant 0 : index
    %c0_61 = arith.constant 0 : index
    %271 = vector.load %arg22[%c0_60, %c0_61] : memref<1x128xf32, #tpu.memory_space<vmem>>, vector<1x128xf32>
    %272 = vector.extract_strided_slice %267 {offsets = [0, 0], sizes = [16, 128], strides = [1, 1]} : vector<32x128xf32> to vector<16x128xf32>
    %cst_62 = arith.constant dense<0.000000e+00> : vector<128xf32>
    %273 = vector.multi_reduction <add>, %272, %cst_62 [0] : vector<16x128xf32> to vector<128xf32>
    %274 = vector.shape_cast %273 : vector<128xf32> to vector<1x128xf32>
    %cst_63 = arith.constant 1.600000e+01 : f32
    %275 = vector.broadcast %cst_63 : f32 to vector<1x128xf32>
    %276 = arith.divf %274, %275 : vector<1x128xf32>
    %277 = vector.extract_strided_slice %267 {offsets = [16, 0], sizes = [16, 128], strides = [1, 1]} : vector<32x128xf32> to vector<16x128xf32>
    %cst_64 = arith.constant dense<0.000000e+00> : vector<128xf32>
    %278 = vector.multi_reduction <add>, %277, %cst_64 [0] : vector<16x128xf32> to vector<128xf32>
    %279 = vector.shape_cast %278 : vector<128xf32> to vector<1x128xf32>
    %cst_65 = arith.constant 1.600000e+01 : f32
    %280 = vector.broadcast %cst_65 : f32 to vector<1x128xf32>
    %281 = arith.divf %279, %280 : vector<1x128xf32>
    %282 = tpu.concatenate %276, %281 in 0 : vector<1x128xf32>, vector<1x128xf32> -> vector<2x128xf32>
    %283 = arith.truncf %282 : vector<2x128xf32> to vector<2x128xbf16>
    %cst_66 = arith.constant dense<0.000000e+00> : vector<2x128xf32>
    %284 = tpu.matmul %283, %268, %cst_66 {dimension_numbers = #tpu.dot_dimension_numbers<[1], [0], [0], [1], [0, 0, 1, 1], [], []>} : vector<2x128xbf16>, vector<128x128xbf16>, vector<2x128xf32> -> vector<2x128xf32>
    %285 = vector.broadcast %269 : vector<1x128xf32> to vector<2x128xf32>
    %286 = arith.addf %284, %285 : vector<2x128xf32>
    %287 = arith.negf %286 : vector<2x128xf32>
    %288 = math.exp %287 : vector<2x128xf32>
    %cst_67 = arith.constant 1.000000e+00 : f32
    %289 = vector.broadcast %cst_67 : f32 to vector<2x128xf32>
    %290 = arith.addf %289, %288 : vector<2x128xf32>
    %291 = arith.divf %289, %290 : vector<2x128xf32>
    %292 = arith.mulf %286, %291 : vector<2x128xf32>
    %293 = arith.truncf %292 : vector<2x128xf32> to vector<2x128xbf16>
    %cst_68 = arith.constant dense<0.000000e+00> : vector<2x128xf32>
    %294 = tpu.matmul %293, %270, %cst_68 {dimension_numbers = #tpu.dot_dimension_numbers<[1], [0], [0], [1], [0, 0, 1, 1], [], []>} : vector<2x128xbf16>, vector<128x128xbf16>, vector<2x128xf32> -> vector<2x128xf32>
    %295 = vector.broadcast %271 : vector<1x128xf32> to vector<2x128xf32>
    %296 = arith.addf %294, %295 : vector<2x128xf32>
    %297 = arith.negf %296 : vector<2x128xf32>
    %298 = math.exp %297 : vector<2x128xf32>
    %cst_69 = arith.constant 1.000000e+00 : f32
    %299 = vector.broadcast %cst_69 : f32 to vector<2x128xf32>
    %300 = arith.addf %299, %298 : vector<2x128xf32>
    %301 = arith.divf %299, %300 : vector<2x128xf32>
    %302 = vector.extract_strided_slice %267 {offsets = [0, 0], sizes = [16, 128], strides = [1, 1]} : vector<32x128xf32> to vector<16x128xf32>
    %303 = vector.extract_strided_slice %301 {offsets = [0, 0], sizes = [1, 128], strides = [1, 1]} : vector<2x128xf32> to vector<1x128xf32>
    %304 = vector.broadcast %303 : vector<1x128xf32> to vector<16x128xf32>
    %305 = arith.mulf %302, %304 : vector<16x128xf32>
    %306 = vector.extract_strided_slice %267 {offsets = [16, 0], sizes = [16, 128], strides = [1, 1]} : vector<32x128xf32> to vector<16x128xf32>
    %307 = vector.extract_strided_slice %301 {offsets = [1, 0], sizes = [1, 128], strides = [1, 1]} : vector<2x128xf32> to vector<1x128xf32>
    %308 = vector.broadcast %307 : vector<1x128xf32> to vector<16x128xf32>
    %309 = arith.mulf %306, %308 : vector<16x128xf32>
    %310 = tpu.concatenate %305, %309 in 0 : vector<16x128xf32>, vector<16x128xf32> -> vector<32x128xf32>
    %c0_70 = arith.constant 0 : index
    %c0_71 = arith.constant 0 : index
    %311 = vector.load %arg23[%c0_70, %c0_71] : memref<128x128xbf16, #tpu.memory_space<vmem>>, vector<128x128xbf16>
    %c0_72 = arith.constant 0 : index
    %c0_73 = arith.constant 0 : index
    %312 = vector.load %arg24[%c0_72, %c0_73] : memref<2x128xf32, #tpu.memory_space<vmem>>, vector<2x128xf32>
    %313 = arith.truncf %310 : vector<32x128xf32> to vector<32x128xbf16>
    %cst_74 = arith.constant dense<0.000000e+00> : vector<32x128xf32>
    %314 = tpu.matmul %313, %311, %cst_74 {dimension_numbers = #tpu.dot_dimension_numbers<[1], [0], [0], [1], [0, 0, 1, 1], [], []>} : vector<32x128xbf16>, vector<128x128xbf16>, vector<32x128xf32> -> vector<32x128xf32>
    %315 = vector.extract_strided_slice %312 {offsets = [0, 0], sizes = [1, 128], strides = [1, 1]} : vector<2x128xf32> to vector<1x128xf32>
    %316 = vector.broadcast %315 : vector<1x128xf32> to vector<32x128xf32>
    %317 = arith.mulf %314, %316 : vector<32x128xf32>
    %318 = vector.extract_strided_slice %312 {offsets = [1, 0], sizes = [1, 128], strides = [1, 1]} : vector<2x128xf32> to vector<1x128xf32>
    %319 = vector.broadcast %318 : vector<1x128xf32> to vector<32x128xf32>
    %320 = arith.addf %317, %319 : vector<32x128xf32>
    %c0_75 = arith.constant 0 : index
    %c0_76 = arith.constant 0 : index
    %321 = vector.load %arg25[%c0_75, %c0_76] : memref<32x9xf32, #tpu.memory_space<vmem>>, vector<32x9xf32>
    %c0_77 = arith.constant 0 : index
    %c0_78 = arith.constant 0 : index
    %322 = vector.load %arg26[%c0_77, %c0_78] : memref<128x256xbf16, #tpu.memory_space<vmem>>, vector<128x256xbf16>
    %c0_79 = arith.constant 0 : index
    %c0_80 = arith.constant 0 : index
    %323 = vector.load %arg27[%c0_79, %c0_80] : memref<2x256xf32, #tpu.memory_space<vmem>>, vector<2x256xf32>
    %324 = arith.truncf %320 : vector<32x128xf32> to vector<32x128xbf16>
    %cst_81 = arith.constant dense<0.000000e+00> : vector<32x256xf32>
    %325 = tpu.matmul %324, %322, %cst_81 {dimension_numbers = #tpu.dot_dimension_numbers<[1], [0], [0], [1], [0, 0, 1, 1], [], []>} : vector<32x128xbf16>, vector<128x256xbf16>, vector<32x256xf32> -> vector<32x256xf32>
    %326 = vector.extract_strided_slice %323 {offsets = [0, 0], sizes = [1, 256], strides = [1, 1]} : vector<2x256xf32> to vector<1x256xf32>
    %327 = vector.broadcast %326 : vector<1x256xf32> to vector<32x256xf32>
    %328 = arith.mulf %325, %327 : vector<32x256xf32>
    %329 = vector.extract_strided_slice %323 {offsets = [1, 0], sizes = [1, 256], strides = [1, 1]} : vector<2x256xf32> to vector<1x256xf32>
    %330 = vector.broadcast %329 : vector<1x256xf32> to vector<32x256xf32>
    %331 = arith.addf %328, %330 : vector<32x256xf32>
    %332 = arith.negf %331 : vector<32x256xf32>
    %333 = math.exp %332 : vector<32x256xf32>
    %cst_82 = arith.constant 1.000000e+00 : f32
    %334 = vector.broadcast %cst_82 : f32 to vector<32x256xf32>
    %335 = arith.addf %334, %333 : vector<32x256xf32>
    %336 = arith.divf %334, %335 : vector<32x256xf32>
    %337 = arith.mulf %331, %336 : vector<32x256xf32>
    %c0_83 = arith.constant 0 : index
    %c0_84 = arith.constant 0 : index
    %338 = vector.load %arg28[%c0_83, %c0_84] : memref<9x256xf32, #tpu.memory_space<vmem>>, vector<9x256xf32>
    %c0_85 = arith.constant 0 : index
    %c0_86 = arith.constant 0 : index
    %339 = vector.load %arg29[%c0_85, %c0_86] : memref<2x256xf32, #tpu.memory_space<vmem>>, vector<2x256xf32>
    %cst_87 = arith.constant 0.000000e+00 : f32
    %340 = vector.broadcast %cst_87 : f32 to vector<8x256xf32>
    %341 = tpu.concatenate %340, %337, %340 in 0 : vector<8x256xf32>, vector<32x256xf32>, vector<8x256xf32> -> vector<48x256xf32>
    %cst_88 = arith.constant 0.000000e+00 : f32
    %342 = vector.broadcast %cst_88 : f32 to vector<32x256xf32>
    %343 = vector.extract_strided_slice %341 {offsets = [3, 0], sizes = [32, 256], strides = [1, 1]} : vector<48x256xf32> to vector<32x256xf32>
    %344 = vector.extract_strided_slice %321 {offsets = [0, 0], sizes = [32, 1], strides = [1, 1]} : vector<32x9xf32> to vector<32x1xf32>
    %345 = vector.broadcast %344 : vector<32x1xf32> to vector<32x256xf32>
    %346 = arith.mulf %343, %345 : vector<32x256xf32>
    %347 = vector.extract_strided_slice %338 {offsets = [0, 0], sizes = [1, 256], strides = [1, 1]} : vector<9x256xf32> to vector<1x256xf32>
    %348 = vector.broadcast %347 : vector<1x256xf32> to vector<32x256xf32>
    %349 = arith.mulf %346, %348 : vector<32x256xf32>
    %350 = arith.addf %342, %349 : vector<32x256xf32>
    %351 = vector.extract_strided_slice %341 {offsets = [4, 0], sizes = [32, 256], strides = [1, 1]} : vector<48x256xf32> to vector<32x256xf32>
    %352 = vector.extract_strided_slice %321 {offsets = [0, 1], sizes = [32, 1], strides = [1, 1]} : vector<32x9xf32> to vector<32x1xf32>
    %353 = vector.broadcast %352 : vector<32x1xf32> to vector<32x256xf32>
    %354 = arith.mulf %351, %353 : vector<32x256xf32>
    %355 = vector.extract_strided_slice %338 {offsets = [1, 0], sizes = [1, 256], strides = [1, 1]} : vector<9x256xf32> to vector<1x256xf32>
    %356 = vector.broadcast %355 : vector<1x256xf32> to vector<32x256xf32>
    %357 = arith.mulf %354, %356 : vector<32x256xf32>
    %358 = arith.addf %350, %357 : vector<32x256xf32>
    %359 = vector.extract_strided_slice %341 {offsets = [5, 0], sizes = [32, 256], strides = [1, 1]} : vector<48x256xf32> to vector<32x256xf32>
    %360 = vector.extract_strided_slice %321 {offsets = [0, 2], sizes = [32, 1], strides = [1, 1]} : vector<32x9xf32> to vector<32x1xf32>
    %361 = vector.broadcast %360 : vector<32x1xf32> to vector<32x256xf32>
    %362 = arith.mulf %359, %361 : vector<32x256xf32>
    %363 = vector.extract_strided_slice %338 {offsets = [2, 0], sizes = [1, 256], strides = [1, 1]} : vector<9x256xf32> to vector<1x256xf32>
    %364 = vector.broadcast %363 : vector<1x256xf32> to vector<32x256xf32>
    %365 = arith.mulf %362, %364 : vector<32x256xf32>
    %366 = arith.addf %358, %365 : vector<32x256xf32>
    %367 = vector.extract_strided_slice %341 {offsets = [7, 0], sizes = [32, 256], strides = [1, 1]} : vector<48x256xf32> to vector<32x256xf32>
    %368 = vector.extract_strided_slice %321 {offsets = [0, 3], sizes = [32, 1], strides = [1, 1]} : vector<32x9xf32> to vector<32x1xf32>
    %369 = vector.broadcast %368 : vector<32x1xf32> to vector<32x256xf32>
    %370 = arith.mulf %367, %369 : vector<32x256xf32>
    %371 = vector.extract_strided_slice %338 {offsets = [3, 0], sizes = [1, 256], strides = [1, 1]} : vector<9x256xf32> to vector<1x256xf32>
    %372 = vector.broadcast %371 : vector<1x256xf32> to vector<32x256xf32>
    %373 = arith.mulf %370, %372 : vector<32x256xf32>
    %374 = arith.addf %366, %373 : vector<32x256xf32>
    %375 = vector.extract_strided_slice %341 {offsets = [8, 0], sizes = [32, 256], strides = [1, 1]} : vector<48x256xf32> to vector<32x256xf32>
    %376 = vector.extract_strided_slice %321 {offsets = [0, 4], sizes = [32, 1], strides = [1, 1]} : vector<32x9xf32> to vector<32x1xf32>
    %377 = vector.broadcast %376 : vector<32x1xf32> to vector<32x256xf32>
    %378 = arith.mulf %375, %377 : vector<32x256xf32>
    %379 = vector.extract_strided_slice %338 {offsets = [4, 0], sizes = [1, 256], strides = [1, 1]} : vector<9x256xf32> to vector<1x256xf32>
    %380 = vector.broadcast %379 : vector<1x256xf32> to vector<32x256xf32>
    %381 = arith.mulf %378, %380 : vector<32x256xf32>
    %382 = arith.addf %374, %381 : vector<32x256xf32>
    %383 = vector.extract_strided_slice %341 {offsets = [9, 0], sizes = [32, 256], strides = [1, 1]} : vector<48x256xf32> to vector<32x256xf32>
    %384 = vector.extract_strided_slice %321 {offsets = [0, 5], sizes = [32, 1], strides = [1, 1]} : vector<32x9xf32> to vector<32x1xf32>
    %385 = vector.broadcast %384 : vector<32x1xf32> to vector<32x256xf32>
    %386 = arith.mulf %383, %385 : vector<32x256xf32>
    %387 = vector.extract_strided_slice %338 {offsets = [5, 0], sizes = [1, 256], strides = [1, 1]} : vector<9x256xf32> to vector<1x256xf32>
    %388 = vector.broadcast %387 : vector<1x256xf32> to vector<32x256xf32>
    %389 = arith.mulf %386, %388 : vector<32x256xf32>
    %390 = arith.addf %382, %389 : vector<32x256xf32>
    %391 = vector.extract_strided_slice %341 {offsets = [11, 0], sizes = [32, 256], strides = [1, 1]} : vector<48x256xf32> to vector<32x256xf32>
    %392 = vector.extract_strided_slice %321 {offsets = [0, 6], sizes = [32, 1], strides = [1, 1]} : vector<32x9xf32> to vector<32x1xf32>
    %393 = vector.broadcast %392 : vector<32x1xf32> to vector<32x256xf32>
    %394 = arith.mulf %391, %393 : vector<32x256xf32>
    %395 = vector.extract_strided_slice %338 {offsets = [6, 0], sizes = [1, 256], strides = [1, 1]} : vector<9x256xf32> to vector<1x256xf32>
    %396 = vector.broadcast %395 : vector<1x256xf32> to vector<32x256xf32>
    %397 = arith.mulf %394, %396 : vector<32x256xf32>
    %398 = arith.addf %390, %397 : vector<32x256xf32>
    %399 = vector.extract_strided_slice %341 {offsets = [12, 0], sizes = [32, 256], strides = [1, 1]} : vector<48x256xf32> to vector<32x256xf32>
    %400 = vector.extract_strided_slice %321 {offsets = [0, 7], sizes = [32, 1], strides = [1, 1]} : vector<32x9xf32> to vector<32x1xf32>
    %401 = vector.broadcast %400 : vector<32x1xf32> to vector<32x256xf32>
    %402 = arith.mulf %399, %401 : vector<32x256xf32>
    %403 = vector.extract_strided_slice %338 {offsets = [7, 0], sizes = [1, 256], strides = [1, 1]} : vector<9x256xf32> to vector<1x256xf32>
    %404 = vector.broadcast %403 : vector<1x256xf32> to vector<32x256xf32>
    %405 = arith.mulf %402, %404 : vector<32x256xf32>
    %406 = arith.addf %398, %405 : vector<32x256xf32>
    %407 = vector.extract_strided_slice %341 {offsets = [13, 0], sizes = [32, 256], strides = [1, 1]} : vector<48x256xf32> to vector<32x256xf32>
    %408 = vector.extract_strided_slice %321 {offsets = [0, 8], sizes = [32, 1], strides = [1, 1]} : vector<32x9xf32> to vector<32x1xf32>
    %409 = vector.broadcast %408 : vector<32x1xf32> to vector<32x256xf32>
    %410 = arith.mulf %407, %409 : vector<32x256xf32>
    %411 = vector.extract_strided_slice %338 {offsets = [8, 0], sizes = [1, 256], strides = [1, 1]} : vector<9x256xf32> to vector<1x256xf32>
    %412 = vector.broadcast %411 : vector<1x256xf32> to vector<32x256xf32>
    %413 = arith.mulf %410, %412 : vector<32x256xf32>
    %414 = arith.addf %406, %413 : vector<32x256xf32>
    %415 = vector.extract_strided_slice %339 {offsets = [0, 0], sizes = [1, 256], strides = [1, 1]} : vector<2x256xf32> to vector<1x256xf32>
    %416 = vector.broadcast %415 : vector<1x256xf32> to vector<32x256xf32>
    %417 = arith.mulf %414, %416 : vector<32x256xf32>
    %418 = vector.extract_strided_slice %339 {offsets = [1, 0], sizes = [1, 256], strides = [1, 1]} : vector<2x256xf32> to vector<1x256xf32>
    %419 = vector.broadcast %418 : vector<1x256xf32> to vector<32x256xf32>
    %420 = arith.addf %417, %419 : vector<32x256xf32>
    %421 = arith.negf %420 : vector<32x256xf32>
    %422 = math.exp %421 : vector<32x256xf32>
    %cst_89 = arith.constant 1.000000e+00 : f32
    %423 = vector.broadcast %cst_89 : f32 to vector<32x256xf32>
    %424 = arith.addf %423, %422 : vector<32x256xf32>
    %425 = arith.divf %423, %424 : vector<32x256xf32>
    %426 = arith.mulf %420, %425 : vector<32x256xf32>
    %c0_90 = arith.constant 0 : index
    %c0_91 = arith.constant 0 : index
    %427 = vector.load %arg30[%c0_90, %c0_91] : memref<256x128xbf16, #tpu.memory_space<vmem>>, vector<256x128xbf16>
    %c0_92 = arith.constant 0 : index
    %c0_93 = arith.constant 0 : index
    %428 = vector.load %arg31[%c0_92, %c0_93] : memref<1x128xf32, #tpu.memory_space<vmem>>, vector<1x128xf32>
    %c0_94 = arith.constant 0 : index
    %c0_95 = arith.constant 0 : index
    %429 = vector.load %arg32[%c0_94, %c0_95] : memref<128x256xbf16, #tpu.memory_space<vmem>>, vector<128x256xbf16>
    %c0_96 = arith.constant 0 : index
    %c0_97 = arith.constant 0 : index
    %430 = vector.load %arg33[%c0_96, %c0_97] : memref<1x256xf32, #tpu.memory_space<vmem>>, vector<1x256xf32>
    %431 = vector.extract_strided_slice %426 {offsets = [0, 0], sizes = [16, 256], strides = [1, 1]} : vector<32x256xf32> to vector<16x256xf32>
    %cst_98 = arith.constant dense<0.000000e+00> : vector<256xf32>
    %432 = vector.multi_reduction <add>, %431, %cst_98 [0] : vector<16x256xf32> to vector<256xf32>
    %433 = vector.shape_cast %432 : vector<256xf32> to vector<1x256xf32>
    %cst_99 = arith.constant 1.600000e+01 : f32
    %434 = vector.broadcast %cst_99 : f32 to vector<1x256xf32>
    %435 = arith.divf %433, %434 : vector<1x256xf32>
    %436 = vector.extract_strided_slice %426 {offsets = [16, 0], sizes = [16, 256], strides = [1, 1]} : vector<32x256xf32> to vector<16x256xf32>
    %cst_100 = arith.constant dense<0.000000e+00> : vector<256xf32>
    %437 = vector.multi_reduction <add>, %436, %cst_100 [0] : vector<16x256xf32> to vector<256xf32>
    %438 = vector.shape_cast %437 : vector<256xf32> to vector<1x256xf32>
    %cst_101 = arith.constant 1.600000e+01 : f32
    %439 = vector.broadcast %cst_101 : f32 to vector<1x256xf32>
    %440 = arith.divf %438, %439 : vector<1x256xf32>
    %441 = tpu.concatenate %435, %440 in 0 : vector<1x256xf32>, vector<1x256xf32> -> vector<2x256xf32>
    %442 = arith.truncf %441 : vector<2x256xf32> to vector<2x256xbf16>
    %cst_102 = arith.constant dense<0.000000e+00> : vector<2x128xf32>
    %443 = tpu.matmul %442, %427, %cst_102 {dimension_numbers = #tpu.dot_dimension_numbers<[1], [0], [0], [1], [0, 0, 1, 1], [], []>} : vector<2x256xbf16>, vector<256x128xbf16>, vector<2x128xf32> -> vector<2x128xf32>
    %444 = vector.broadcast %428 : vector<1x128xf32> to vector<2x128xf32>
    %445 = arith.addf %443, %444 : vector<2x128xf32>
    %446 = arith.negf %445 : vector<2x128xf32>
    %447 = math.exp %446 : vector<2x128xf32>
    %cst_103 = arith.constant 1.000000e+00 : f32
    %448 = vector.broadcast %cst_103 : f32 to vector<2x128xf32>
    %449 = arith.addf %448, %447 : vector<2x128xf32>
    %450 = arith.divf %448, %449 : vector<2x128xf32>
    %451 = arith.mulf %445, %450 : vector<2x128xf32>
    %452 = arith.truncf %451 : vector<2x128xf32> to vector<2x128xbf16>
    %cst_104 = arith.constant dense<0.000000e+00> : vector<2x256xf32>
    %453 = tpu.matmul %452, %429, %cst_104 {dimension_numbers = #tpu.dot_dimension_numbers<[1], [0], [0], [1], [0, 0, 1, 1], [], []>} : vector<2x128xbf16>, vector<128x256xbf16>, vector<2x256xf32> -> vector<2x256xf32>
    %454 = vector.broadcast %430 : vector<1x256xf32> to vector<2x256xf32>
    %455 = arith.addf %453, %454 : vector<2x256xf32>
    %456 = arith.negf %455 : vector<2x256xf32>
    %457 = math.exp %456 : vector<2x256xf32>
    %cst_105 = arith.constant 1.000000e+00 : f32
    %458 = vector.broadcast %cst_105 : f32 to vector<2x256xf32>
    %459 = arith.addf %458, %457 : vector<2x256xf32>
    %460 = arith.divf %458, %459 : vector<2x256xf32>
    %461 = vector.extract_strided_slice %426 {offsets = [0, 0], sizes = [16, 256], strides = [1, 1]} : vector<32x256xf32> to vector<16x256xf32>
    %462 = vector.extract_strided_slice %460 {offsets = [0, 0], sizes = [1, 256], strides = [1, 1]} : vector<2x256xf32> to vector<1x256xf32>
    %463 = vector.broadcast %462 : vector<1x256xf32> to vector<16x256xf32>
    %464 = arith.mulf %461, %463 : vector<16x256xf32>
    %465 = vector.extract_strided_slice %426 {offsets = [16, 0], sizes = [16, 256], strides = [1, 1]} : vector<32x256xf32> to vector<16x256xf32>
    %466 = vector.extract_strided_slice %460 {offsets = [1, 0], sizes = [1, 256], strides = [1, 1]} : vector<2x256xf32> to vector<1x256xf32>
    %467 = vector.broadcast %466 : vector<1x256xf32> to vector<16x256xf32>
    %468 = arith.mulf %465, %467 : vector<16x256xf32>
    %469 = tpu.concatenate %464, %468 in 0 : vector<16x256xf32>, vector<16x256xf32> -> vector<32x256xf32>
    %c0_106 = arith.constant 0 : index
    %c0_107 = arith.constant 0 : index
    %470 = vector.load %arg34[%c0_106, %c0_107] : memref<256x128xbf16, #tpu.memory_space<vmem>>, vector<256x128xbf16>
    %c0_108 = arith.constant 0 : index
    %c0_109 = arith.constant 0 : index
    %471 = vector.load %arg35[%c0_108, %c0_109] : memref<2x128xf32, #tpu.memory_space<vmem>>, vector<2x128xf32>
    %472 = arith.truncf %469 : vector<32x256xf32> to vector<32x256xbf16>
    %cst_110 = arith.constant dense<0.000000e+00> : vector<32x128xf32>
    %473 = tpu.matmul %472, %470, %cst_110 {dimension_numbers = #tpu.dot_dimension_numbers<[1], [0], [0], [1], [0, 0, 1, 1], [], []>} : vector<32x256xbf16>, vector<256x128xbf16>, vector<32x128xf32> -> vector<32x128xf32>
    %474 = vector.extract_strided_slice %471 {offsets = [0, 0], sizes = [1, 128], strides = [1, 1]} : vector<2x128xf32> to vector<1x128xf32>
    %475 = vector.broadcast %474 : vector<1x128xf32> to vector<32x128xf32>
    %476 = arith.mulf %473, %475 : vector<32x128xf32>
    %477 = vector.extract_strided_slice %471 {offsets = [1, 0], sizes = [1, 128], strides = [1, 1]} : vector<2x128xf32> to vector<1x128xf32>
    %478 = vector.broadcast %477 : vector<1x128xf32> to vector<32x128xf32>
    %479 = arith.addf %476, %478 : vector<32x128xf32>
    %480 = arith.addf %479, %320 : vector<32x128xf32>
    %c0_111 = arith.constant 0 : index
    %c0_112 = arith.constant 0 : index
    %481 = vector.load %arg36[%c0_111, %c0_112] : memref<128x128xbf16, #tpu.memory_space<vmem>>, vector<128x128xbf16>
    %c0_113 = arith.constant 0 : index
    %c0_114 = arith.constant 0 : index
    %482 = vector.load %arg37[%c0_113, %c0_114] : memref<2x128xf32, #tpu.memory_space<vmem>>, vector<2x128xf32>
    %c0_115 = arith.constant 0 : index
    %c0_116 = arith.constant 0 : index
    %483 = vector.load %arg38[%c0_115, %c0_116] : memref<128x128xbf16, #tpu.memory_space<vmem>>, vector<128x128xbf16>
    %c0_117 = arith.constant 0 : index
    %c0_118 = arith.constant 0 : index
    %484 = vector.load %arg39[%c0_117, %c0_118] : memref<1x128xf32, #tpu.memory_space<vmem>>, vector<1x128xf32>
    %485 = arith.truncf %480 : vector<32x128xf32> to vector<32x128xbf16>
    %cst_119 = arith.constant dense<0.000000e+00> : vector<32x128xf32>
    %486 = tpu.matmul %485, %481, %cst_119 {dimension_numbers = #tpu.dot_dimension_numbers<[1], [0], [0], [1], [0, 0, 1, 1], [], []>} : vector<32x128xbf16>, vector<128x128xbf16>, vector<32x128xf32> -> vector<32x128xf32>
    %487 = vector.extract_strided_slice %482 {offsets = [0, 0], sizes = [1, 128], strides = [1, 1]} : vector<2x128xf32> to vector<1x128xf32>
    %488 = vector.broadcast %487 : vector<1x128xf32> to vector<32x128xf32>
    %489 = arith.mulf %486, %488 : vector<32x128xf32>
    %490 = vector.extract_strided_slice %482 {offsets = [1, 0], sizes = [1, 128], strides = [1, 1]} : vector<2x128xf32> to vector<1x128xf32>
    %491 = vector.broadcast %490 : vector<1x128xf32> to vector<32x128xf32>
    %492 = arith.addf %489, %491 : vector<32x128xf32>
    %493 = arith.negf %492 : vector<32x128xf32>
    %494 = math.exp %493 : vector<32x128xf32>
    %cst_120 = arith.constant 1.000000e+00 : f32
    %495 = vector.broadcast %cst_120 : f32 to vector<32x128xf32>
    %496 = arith.addf %495, %494 : vector<32x128xf32>
    %497 = arith.divf %495, %496 : vector<32x128xf32>
    %498 = arith.mulf %492, %497 : vector<32x128xf32>
    %499 = vector.extract_strided_slice %498 {offsets = [0, 0], sizes = [16, 128], strides = [1, 1]} : vector<32x128xf32> to vector<16x128xf32>
    %cst_121 = arith.constant dense<0.000000e+00> : vector<128xf32>
    %500 = vector.multi_reduction <add>, %499, %cst_121 [0] : vector<16x128xf32> to vector<128xf32>
    %501 = vector.shape_cast %500 : vector<128xf32> to vector<1x128xf32>
    %cst_122 = arith.constant 1.600000e+01 : f32
    %502 = vector.broadcast %cst_122 : f32 to vector<1x128xf32>
    %503 = arith.divf %501, %502 : vector<1x128xf32>
    %504 = vector.extract_strided_slice %498 {offsets = [16, 0], sizes = [16, 128], strides = [1, 1]} : vector<32x128xf32> to vector<16x128xf32>
    %cst_123 = arith.constant dense<0.000000e+00> : vector<128xf32>
    %505 = vector.multi_reduction <add>, %504, %cst_123 [0] : vector<16x128xf32> to vector<128xf32>
    %506 = vector.shape_cast %505 : vector<128xf32> to vector<1x128xf32>
    %cst_124 = arith.constant 1.600000e+01 : f32
    %507 = vector.broadcast %cst_124 : f32 to vector<1x128xf32>
    %508 = arith.divf %506, %507 : vector<1x128xf32>
    %509 = tpu.concatenate %503, %508 in 0 : vector<1x128xf32>, vector<1x128xf32> -> vector<2x128xf32>
    %510 = arith.truncf %509 : vector<2x128xf32> to vector<2x128xbf16>
    %cst_125 = arith.constant dense<0.000000e+00> : vector<2x128xf32>
    %511 = tpu.matmul %510, %483, %cst_125 {dimension_numbers = #tpu.dot_dimension_numbers<[1], [0], [0], [1], [0, 0, 1, 1], [], []>} : vector<2x128xbf16>, vector<128x128xbf16>, vector<2x128xf32> -> vector<2x128xf32>
    %512 = vector.broadcast %484 : vector<1x128xf32> to vector<2x128xf32>
    %513 = arith.addf %511, %512 : vector<2x128xf32>
    %c0_126 = arith.constant 0 : index
    %c0_127 = arith.constant 0 : index
    %514 = vector.load %arg40[%c0_126, %c0_127] : memref<2x128xf32, #tpu.memory_space<vmem>>, vector<2x128xf32>
    tpu.vector_store %arg40[%c0_126, %c0_127], %513 {strides = array<i32>} : memref<2x128xf32, #tpu.memory_space<vmem>>, vector<2x128xf32>,
    return
  }
  func.func @transform_0(%arg0: i32) -> (i32, i32) {
    %c0_i32 = arith.constant 0 : i32
    %c0_i32_0 = arith.constant 0 : i32
    %c0_i32_1 = arith.constant 0 : i32
    return %c0_i32, %c0_i32_0 : i32, i32
  }
  func.func @transform_1(%arg0: i32) -> (i32, i32) {
    %c0_i32 = arith.constant 0 : i32
    %c0_i32_0 = arith.constant 0 : i32
    %c0_i32_1 = arith.constant 0 : i32
    return %c0_i32, %c0_i32_0 : i32, i32
  }
  func.func @transform_2(%arg0: i32) -> (i32, i32) {
    %c0_i32 = arith.constant 0 : i32
    %c0_i32_0 = arith.constant 0 : i32
    %c0_i32_1 = arith.constant 0 : i32
    return %c0_i32, %c0_i32_0 : i32, i32
  }
  func.func @transform_3(%arg0: i32) -> (i32, i32) {
    %c0_i32 = arith.constant 0 : i32
    %c0_i32_0 = arith.constant 0 : i32
    %c0_i32_1 = arith.constant 0 : i32
    return %c0_i32, %c0_i32_0 : i32, i32
  }
  func.func @transform_4(%arg0: i32) -> (i32, i32) {
    %c0_i32 = arith.constant 0 : i32
    %c0_i32_0 = arith.constant 0 : i32
    %c0_i32_1 = arith.constant 0 : i32
    return %c0_i32, %c0_i32_0 : i32, i32
  }
  func.func @transform_5(%arg0: i32) -> (i32, i32) {
    %c0_i32 = arith.constant 0 : i32
    %c0_i32_0 = arith.constant 0 : i32
    %c0_i32_1 = arith.constant 0 : i32
    return %c0_i32, %c0_i32_0 : i32, i32
  }
  func.func @transform_6(%arg0: i32) -> (i32, i32) {
    %c0_i32 = arith.constant 0 : i32
    %c0_i32_0 = arith.constant 0 : i32
    %c0_i32_1 = arith.constant 0 : i32
    return %c0_i32, %c0_i32_0 : i32, i32
  }
  func.func @transform_7(%arg0: i32) -> (i32, i32) {
    %c0_i32 = arith.constant 0 : i32
    %c0_i32_0 = arith.constant 0 : i32
    %c0_i32_1 = arith.constant 0 : i32
    return %c0_i32, %c0_i32_0 : i32, i32
  }
  func.func @transform_8(%arg0: i32) -> (i32, i32) {
    %c0_i32 = arith.constant 0 : i32
    %c0_i32_0 = arith.constant 0 : i32
    %c0_i32_1 = arith.constant 0 : i32
    return %c0_i32, %c0_i32_0 : i32, i32
  }
  func.func @transform_9(%arg0: i32) -> (i32, i32) {
    %c0_i32 = arith.constant 0 : i32
    %c0_i32_0 = arith.constant 0 : i32
    %c0_i32_1 = arith.constant 0 : i32
    return %c0_i32, %c0_i32_0 : i32, i32
  }
  func.func @transform_10(%arg0: i32) -> (i32, i32) {
    %c0_i32 = arith.constant 0 : i32
    %c0_i32_0 = arith.constant 0 : i32
    %c0_i32_1 = arith.constant 0 : i32
    return %c0_i32, %c0_i32_0 : i32, i32
  }
  func.func @transform_11(%arg0: i32) -> (i32, i32) {
    %c0_i32 = arith.constant 0 : i32
    %c0_i32_0 = arith.constant 0 : i32
    %c0_i32_1 = arith.constant 0 : i32
    return %c0_i32, %c0_i32_0 : i32, i32
  }
  func.func @transform_12(%arg0: i32) -> (i32, i32) {
    %c0_i32 = arith.constant 0 : i32
    %c0_i32_0 = arith.constant 0 : i32
    %c0_i32_1 = arith.constant 0 : i32
    return %c0_i32, %c0_i32_0 : i32, i32
  }
  func.func @transform_13(%arg0: i32) -> (i32, i32) {
    %c0_i32 = arith.constant 0 : i32
    %c0_i32_0 = arith.constant 0 : i32
    %c0_i32_1 = arith.constant 0 : i32
    return %c0_i32, %c0_i32_0 : i32, i32
  }
  func.func @transform_14(%arg0: i32) -> (i32, i32) {
    %c0_i32 = arith.constant 0 : i32
    %c0_i32_0 = arith.constant 0 : i32
    %c0_i32_1 = arith.constant 0 : i32
    return %c0_i32, %c0_i32_0 : i32, i32
  }
  func.func @transform_15(%arg0: i32) -> (i32, i32) {
    %c0_i32 = arith.constant 0 : i32
    %c0_i32_0 = arith.constant 0 : i32
    %c0_i32_1 = arith.constant 0 : i32
    return %c0_i32, %c0_i32_0 : i32, i32
  }
  func.func @transform_16(%arg0: i32) -> (i32, i32) {
    %c0_i32 = arith.constant 0 : i32
    %c0_i32_0 = arith.constant 0 : i32
    %c0_i32_1 = arith.constant 0 : i32
    return %c0_i32, %c0_i32_0 : i32, i32
  }
  func.func @transform_17(%arg0: i32) -> (i32, i32) {
    %c0_i32 = arith.constant 0 : i32
    %c0_i32_0 = arith.constant 0 : i32
    %c0_i32_1 = arith.constant 0 : i32
    return %c0_i32, %c0_i32_0 : i32, i32
  }
  func.func @transform_18(%arg0: i32) -> (i32, i32) {
    %c0_i32 = arith.constant 0 : i32
    %c0_i32_0 = arith.constant 0 : i32
    %c0_i32_1 = arith.constant 0 : i32
    return %c0_i32, %c0_i32_0 : i32, i32
  }
  func.func @transform_19(%arg0: i32) -> (i32, i32) {
    %c0_i32 = arith.constant 0 : i32
    %c0_i32_0 = arith.constant 0 : i32
    %c0_i32_1 = arith.constant 0 : i32
    return %c0_i32, %c0_i32_0 : i32, i32
  }
  func.func @transform_20(%arg0: i32) -> (i32, i32) {
    %c0_i32 = arith.constant 0 : i32
    %c0_i32_0 = arith.constant 0 : i32
    %c0_i32_1 = arith.constant 0 : i32
    return %c0_i32, %c0_i32_0 : i32, i32
  }
  func.func @transform_21(%arg0: i32) -> (i32, i32) {
    %c0_i32 = arith.constant 0 : i32
    %c0_i32_0 = arith.constant 0 : i32
    %c0_i32_1 = arith.constant 0 : i32
    return %c0_i32, %c0_i32_0 : i32, i32
  }
  func.func @transform_22(%arg0: i32) -> (i32, i32) {
    %c0_i32 = arith.constant 0 : i32
    %c0_i32_0 = arith.constant 0 : i32
    %c0_i32_1 = arith.constant 0 : i32
    return %c0_i32, %c0_i32_0 : i32, i32
  }
  func.func @transform_23(%arg0: i32) -> (i32, i32) {
    %c0_i32 = arith.constant 0 : i32
    %c0_i32_0 = arith.constant 0 : i32
    %c0_i32_1 = arith.constant 0 : i32
    return %c0_i32, %c0_i32_0 : i32, i32
  }
  func.func @transform_24(%arg0: i32) -> (i32, i32) {
    %c0_i32 = arith.constant 0 : i32
    %c0_i32_0 = arith.constant 0 : i32
    %c0_i32_1 = arith.constant 0 : i32
    return %c0_i32, %c0_i32_0 : i32, i32
  }
  func.func @transform_25(%arg0: i32) -> (i32, i32) {
    %c0_i32 = arith.constant 0 : i32
    %c0_i32_0 = arith.constant 0 : i32
    %c0_i32_1 = arith.constant 0 : i32
    return %c0_i32, %c0_i32_0 : i32, i32
  }
  func.func @transform_26(%arg0: i32) -> (i32, i32) {
    %c0_i32 = arith.constant 0 : i32
    %c0_i32_0 = arith.constant 0 : i32
    %c0_i32_1 = arith.constant 0 : i32
    return %c0_i32, %c0_i32_0 : i32, i32
  }
  func.func @transform_27(%arg0: i32) -> (i32, i32) {
    %c0_i32 = arith.constant 0 : i32
    %c0_i32_0 = arith.constant 0 : i32
    %c0_i32_1 = arith.constant 0 : i32
    return %c0_i32, %c0_i32_0 : i32, i32
  }
  func.func @transform_28(%arg0: i32) -> (i32, i32) {
    %c0_i32 = arith.constant 0 : i32
    %c0_i32_0 = arith.constant 0 : i32
    %c0_i32_1 = arith.constant 0 : i32
    return %c0_i32, %c0_i32_0 : i32, i32
  }
  func.func @transform_29(%arg0: i32) -> (i32, i32) {
    %c0_i32 = arith.constant 0 : i32
    %c0_i32_0 = arith.constant 0 : i32
    %c0_i32_1 = arith.constant 0 : i32
    return %c0_i32, %c0_i32_0 : i32, i32
  }
  func.func @transform_30(%arg0: i32) -> (i32, i32) {
    %c0_i32 = arith.constant 0 : i32
    %c0_i32_0 = arith.constant 0 : i32
    %c0_i32_1 = arith.constant 0 : i32
    return %c0_i32, %c0_i32_0 : i32, i32
  }
  func.func @transform_31(%arg0: i32) -> (i32, i32) {
    %c0_i32 = arith.constant 0 : i32
    %c0_i32_0 = arith.constant 0 : i32
    %c0_i32_1 = arith.constant 0 : i32
    return %c0_i32, %c0_i32_0 : i32, i32
  }
  func.func @transform_32(%arg0: i32) -> (i32, i32) {
    %c0_i32 = arith.constant 0 : i32
    %c0_i32_0 = arith.constant 0 : i32
    %c0_i32_1 = arith.constant 0 : i32
    return %c0_i32, %c0_i32_0 : i32, i32
  }
  func.func @transform_33(%arg0: i32) -> (i32, i32) {
    %c0_i32 = arith.constant 0 : i32
    %c0_i32_0 = arith.constant 0 : i32
    %c0_i32_1 = arith.constant 0 : i32
    return %c0_i32, %c0_i32_0 : i32, i32
  }
  func.func @transform_34(%arg0: i32) -> (i32, i32) {
    %c0_i32 = arith.constant 0 : i32
    %c0_i32_0 = arith.constant 0 : i32
    %c0_i32_1 = arith.constant 0 : i32
    return %c0_i32, %c0_i32_0 : i32, i32
  }
  func.func @transform_35(%arg0: i32) -> (i32, i32) {
    %c0_i32 = arith.constant 0 : i32
    %c0_i32_0 = arith.constant 0 : i32
    %c0_i32_1 = arith.constant 0 : i32
    return %c0_i32, %c0_i32_0 : i32, i32
  }
  func.func @transform_36(%arg0: i32) -> (i32, i32) {
    %c0_i32 = arith.constant 0 : i32
    %c0_i32_0 = arith.constant 0 : i32
    %c0_i32_1 = arith.constant 0 : i32
    return %c0_i32, %c0_i32_0 : i32, i32
  }
  func.func @transform_37(%arg0: i32) -> (i32, i32) {
    %c0_i32 = arith.constant 0 : i32
    %c0_i32_0 = arith.constant 0 : i32
    %c0_i32_1 = arith.constant 0 : i32
    return %c0_i32, %c0_i32_0 : i32, i32
  }
  func.func @transform_38(%arg0: i32) -> (i32, i32) {
    %c0_i32 = arith.constant 0 : i32
    %c0_i32_0 = arith.constant 0 : i32
    %c0_i32_1 = arith.constant 0 : i32
    return %c0_i32, %c0_i32_0 : i32, i32
  }
  func.func @transform_39(%arg0: i32) -> (i32, i32) {
    %c0_i32 = arith.constant 0 : i32
    %c0_i32_0 = arith.constant 0 : i32
    %c0_i32_1 = arith.constant 0 : i32
    return %c0_i32, %c0_i32_0 : i32, i32
  }
}

</mosaic_0001>

<bundles_post_ra>
// kernel: efficientnet_forward.1
= control target key start
LH: loop header
LB: loop body
LE: loop exit
PB: predicated region body
PF: predicated region fallthrough
CT: control target
= control target key end

     0   :  { %s9306_s6 = smov 1   ;;  %s9307_s10 = smov 2   ;;  %s15576_s0 = inlined_call_operand.smem [shape: u32[40], index: -1, kind: input, shape index: {}] }
   0x1   :  { %s9366_s5 = sld [smem:[%s15576_s0]]   ;;  %s9308_s14 = smov 3  }
   0x2   :  { %s9371_s9 = sld [smem:[%s15576_s0 + %s9306_s6]]   ;;  %s9309_s18 = smov 4  }
   0x3   :  { %s9376_s13 = sld [smem:[%s15576_s0 + %s9307_s10]]   ;;  %s9310_s22 = smov 5  }
   0x4   :  { %s9381_s17 = sld [smem:[%s15576_s0 + %s9308_s14]]   ;;  %s9311_s26 = smov 6  }
   0x5   :  { %s9386_s21 = sld [smem:[%s15576_s0 + %s9309_s18]]   ;;  %s9312_s30 = smov 7  }
   0x6   :  { %s9391_s25 = sld [smem:[%s15576_s0 + %s9310_s22]]   ;;  %s9313_s4 = smov 8  }
   0x7   :  { %s9396_s29 = sld [smem:[%s15576_s0 + %s9311_s26]]   ;;  %s9314_s10 = smov 9  }
   0x8   :  { %s9401_s3 = sld [smem:[%s15576_s0 + %s9312_s30]]   ;;  %s9315_s15 = smov 10  }
   0x9   :  { %s9406_s8 = sld [smem:[%s15576_s0 + %s9313_s4]]   ;;  %s9316_s20 = smov 11  }
   0xa   :  { %s9411_s14 = sld [smem:[%s15576_s0 + %s9314_s10]]   ;;  %s9317_s26 = smov 12  }
   0xb   :  { %s9416_s19 = sld [smem:[%s15576_s0 + %s9315_s15]]   ;;  %s9318_s1 = smov 13  }
   0xc   :  { %s9421_s24 = sld [smem:[%s15576_s0 + %s9316_s20]]   ;;  %s9319_s7 = smov 14  }
   0xd   :  { %s9426_s30 = sld [smem:[%s15576_s0 + %s9317_s26]]   ;;  %s9320_s15 = smov 15  }
   0xe   :  { %s9431_s6 = sld [smem:[%s15576_s0 + %s9318_s1]]   ;;  %s9321_s22 = smov 16  }
   0xf   :  { %s9436_s12 = sld [smem:[%s15576_s0 + %s9319_s7]]   ;;  %s9322_s28 = smov 17  }
  0x10   :  { %s9441_s20 = sld [smem:[%s15576_s0 + %s9320_s15]]   ;;  %s9323_s7 = smov 18  }
  0x11   :  { %s9446_s27 = sld [smem:[%s15576_s0 + %s9321_s22]]   ;;  %s9324_s15 = smov 19  }
  0x12   :  { %15936 = sst [smem:[#allocation5_spill]] %s9421_s24  ;;  %s9325_s22 = smov 20  }
  0x13   :  { %s9451_s4 = sld [smem:[%s15576_s0 + %s9322_s28]]   ;;  %s9326_s28 = smov 21  }
  0x14   :  { %15937 = sst [smem:[#allocation6_spill]] %s9431_s6 }
  0x15   :  { %s9456_s6 = sld [smem:[%s15576_s0 + %s9323_s7]]   ;;  %s9327_s7 = smov 22  }
  0x16   :  { %15938 = sst [smem:[#allocation7_spill]] %s9441_s20 }
  0x17   :  { %s9461_s20 = sld [smem:[%s15576_s0 + %s9324_s15]]   ;;  %s9328_s15 = smov 23  }
  0x18   :  { %s9466_s24 = sld [smem:[%s15576_s0 + %s9325_s22]]   ;;  %s9329_s22 = smov 24  }
  0x19   :  { %15939 = sst [smem:[#allocation8_spill]] %s9451_s4 }
  0x1a   :  { %s9471_s4 = sld [smem:[%s15576_s0 + %s9326_s28]]   ;;  %s9330_s28 = smov 25  }
  0x1b   :  { %15940 = sst [smem:[#allocation9_spill]] %s9456_s6 }
  0x1c   :  { %s9476_s6 = sld [smem:[%s15576_s0 + %s9327_s7]]   ;;  %s9331_s7 = smov 26  }
  0x1d   :  { %15941 = sst [smem:[#allocation10_spill]] %s9461_s20 }
  0x1e   :  { %15942 = sst [smem:[#allocation11_spill]] %s9466_s24 }
  0x1f   :  { %s9481_s20 = sld [smem:[%s15576_s0 + %s9328_s15]]   ;;  %s9332_s15 = smov 27  }
  0x20   :  { %15943 = sst [smem:[#allocation12_spill]] %s9471_s4 }
  0x21   :  { %s9486_s24 = sld [smem:[%s15576_s0 + %s9329_s22]]   ;;  %s9333_s22 = smov 28  }
  0x22   :  { %15944 = sst [smem:[#allocation13_spill]] %s9476_s6 }
  0x23   :  { %s9491_s4 = sld [smem:[%s15576_s0 + %s9330_s28]]   ;;  %s9334_s28 = smov 29  }
  0x24   :  { %s9496_s6 = sld [smem:[%s15576_s0 + %s9331_s7]]   ;;  %s9335_s7 = smov 30  }
  0x25   :  { %15945 = sst [smem:[#allocation14_spill]] %s9481_s20 }
  0x26   :  { %s9501_s20 = sld [smem:[%s15576_s0 + %s9332_s15]]   ;;  %s9336_s15 = smov 31  }
  0x27   :  { %15946 = sst [smem:[#allocation15_spill]] %s9486_s24 }
  0x28   :  { %s9506_s24 = sld [smem:[%s15576_s0 + %s9333_s22]]   ;;  %s9337_s22 = smov 32  }
  0x29   :  { %15947 = sst [smem:[#allocation16_spill]] %s9491_s4 }
  0x2a   :  { %15948 = sst [smem:[#allocation17_spill]] %s9496_s6 }
  0x2b   :  { %s9511_s4 = sld [smem:[%s15576_s0 + %s9334_s28]]   ;;  %s9338_s28 = smov 33  }
  0x2c   :  { %15949 = sst [smem:[#allocation18_spill]] %s9501_s20 }
  0x2d   :  { %s9516_s6 = sld [smem:[%s15576_s0 + %s9335_s7]]   ;;  %s9339_s7 = smov 34  }
  0x2e   :  { %15950 = sst [smem:[#allocation19_spill]] %s9506_s24 }
  0x2f   :  { %s9521_s20 = sld [smem:[%s15576_s0 + %s9336_s15]]   ;;  %s9340_s15 = smov 35  }
  0x30   :  { %s9526_s24 = sld [smem:[%s15576_s0 + %s9337_s22]]   ;;  %s9341_s22 = smov 36  }
  0x31   :  { %15951 = sst [smem:[#allocation20_spill]] %s9511_s4 }
  0x32   :  { %s9531_s4 = sld [smem:[%s15576_s0 + %s9338_s28]]   ;;  %s9342_s28 = smov 37  }
  0x33   :  { %15952 = sst [smem:[#allocation21_spill]] %s9516_s6 }
  0x34   :  { %s9536_s6 = sld [smem:[%s15576_s0 + %s9339_s7]]   ;;  %s9343_s7 = smov 38  }
  0x35   :  { %15953 = sst [smem:[#allocation22_spill]] %s9521_s20 }
  0x36   :  { %15954 = sst [smem:[#allocation23_spill]] %s9526_s24 }
  0x37   :  { %s9541_s20 = sld [smem:[%s15576_s0 + %s9340_s15]]   ;;  %s9344_s15 = smov 39  }
  0x38   :  { %15955 = sst [smem:[#allocation24_spill]] %s9531_s4 }
  0x39   :  { %s9546_s24 = sld [smem:[%s15576_s0 + %s9341_s22]]  }
  0x3a   :  { %15956 = sst [smem:[#allocation25_spill]] %s9536_s6 }
  0x3b   :  { %s9551_s4 = sld [smem:[%s15576_s0 + %s9342_s28]]  }
  0x3c   :  { %s9556_s6 = sld [smem:[%s15576_s0 + %s9343_s7]]  }
  0x3d   :  { %15957 = sst [smem:[#allocation26_spill]] %s9541_s20 }
  0x3e   :  { %s9561_s20 = sld [smem:[%s15576_s0 + %s9344_s15]]  }
  0x3f   :  { %v9564_v0 = vld [vmem:[%s9381_s17 + $0x10] sm:$0xff]  ;;  %v9567_v1 = vld [vmem:[%s9381_s17] sm:$0xff]  ;;  %vm261_vm0 = vcmask 1044480   ;;  %v15602_v2 = vmov 2   ;;  %vm262_vm1 = vcmask 1045504   ;;  %v9346_v4 = vmov 65535  }
  0x40   :  { %8624 = vset.pattern.permute.xlu1 %v15602_v2  ;;  %8623 = vset.pattern.permute.xlu0 %v15602_v2  ;;  %v8776_v3 = vld [vmem:[%s9371_s9] sm:$0xff]   ;;  %v263_v5 = vsel %vm261_vm0, 4294967295, %v9346_v4  ;;  %v9576_v6 = vld [vmem:[%s9381_s17 + $0x30] sm:$0xff]  ;;  %v9579_v7 = vld [vmem:[%s9381_s17 + $0x8] sm:$0xff]  ;;  %vm236_vm2 = vcmask 220160   ;;  %v15590_v22 = vmov 0  }
  0x41   :  { %892 = vperm.xlu1 %8624, %v9564_v0   ;;  %886 = vperm.xlu0 %8623, %v9567_v1   ;;  %v8777_v8 = vld [vmem:[%s9371_s9 + $0x8] sm:$0x3f]   ;;  %v264_v9 = vsel %vm262_vm1, %v263_v5, 0  ;;  %v8778_v10 = vld [vmem:[%s9366_s5] sm:$0xff]   ;;  %v9590_v13 = vld [vmem:[%s9381_s17 + $0x38] sm:$0xff]  ;;  %v15588_v28 = vmov 1  }
  0x42   :  { %8277 = vmatprep.subr.bf16.mxu0 %v8776_v3  ;;  %v266_v11 = vand.u32 %v8777_v8, %v264_v9  ;;  %v9587_v12 = vld [vmem:[%s9381_s17 + $0x40] sm:$0xff]  ;;  %8281 = vmatprep.mubr.msk.bf16.mxu0 %vm236_vm2, %v8778_v10  ;;  %v8779_v14 = vld [vmem:[%s9366_s5 + $0x8] sm:$0xff]   ;;  %v8780_v15 = vld [vmem:[%s9366_s5 + $0x10] sm:$0xff]   ;;  %v15594_v33 = vmov 3  }
  0x43   :  { %8278 = vmatpush3.bf16.msra.mxu0 %v8776_v3  ;;  %v9599_v16 = vld [vmem:[%s9381_s17 + $0x50] sm:$0xff]  ;;  %v9602_v17 = vld [vmem:[%s9381_s17 + $0x48] sm:$0xff]  ;;  %v9608_v18 = vld [vmem:[%s9381_s17 + $0x18] sm:$0xff] }
  0x44   :  { %8279 = vmatprep.subr.bf16.mxu0 %v266_v11  ;;  %v8781_v19 = vld [vmem:[%s9366_s5 + $0x18] sm:$0xff]   ;;  %v8782_v20 = vld [vmem:[%s9366_s5 + $0x20] sm:$0xff]   ;;  %v9621_v23 = vld [vmem:[%s9381_s17 + $0x28] sm:$0xff] }
  0x45   :  { %904 = vperm.xlu1 %8624, %v9576_v6   ;;  %889 = vperm.xlu0 %8623, %v9579_v7   ;;  %v9613_v21 = vld [vmem:[%s9381_s17 + $0x20] sm:$0xff]  ;;  %v8783_v24 = vld [vmem:[%s9366_s5 + $0x28] sm:$0xff]   ;;  %v8784_v25 = vld [vmem:[%s9366_s5 + $0x30] sm:$0xff]  }
  0x46   :  { %v9628_v26 = vld [vmem:[%s9381_s17 + $0x70] sm:$0xff]  ;;  %v8785_v27 = vld [vmem:[%s9366_s5 + $0x38] sm:$0xff]   ;;  %v9650_v30 = vld [vmem:[%s9381_s17 + $0x60] sm:$0xff] }
  0x47   :  { %8280 = vmatpush3.bf16.msra.mxu0 %v266_v11  ;;  %v9645_v29 = vld [vmem:[%s9381_s17 + $0x58] sm:$0xff]  ;;  %v9669_v31 = vld [vmem:[%s9381_s17 + $0x68] sm:$0xff] }
  0x48   :  { %v9677_v32 = vld [vmem:[%s9381_s17 + $0x78] sm:$0xff] }
  0x49   :  { %910 = vperm.xlu1 %8624, %v9587_v12   ;;  %907 = vperm.xlu0 %8623, %v9590_v13   ;;  %15958 = vst [vmem:[#allocation27_spill] sm:$0xff] %v9677_v32 }
  0x4a   :  { %8282 = vmatmul.mubr.msk.bf16.vlgmr.msra.gmra.mrb[0].mxu0 %vm236_vm2, %v8779_v14 }
  0x4b   :  { %8285 = vmatprep.mubr.msk.bf16.mxu0 %vm236_vm2, %v8780_v15 }
  0x4d   :  { %916 = vperm.xlu1 %8624, %v9599_v16   ;;  %913 = vperm.xlu0 %8623, %v9602_v17  }
  0x51   :  { %8625 = vset.pattern.permute.xlu1 %v15590_v22  ;;  %895 = vperm.xlu0 %8623, %v9608_v18  }
  0x52   :  { %542 = vperm.xlu1 %8625, %v9579_v7   ;;  %8286 = vmatmul.mubr.msk.bf16.gmra.mrb[4].mxu0 %vm236_vm2, %v8781_v19 }
  0x53   :  { %8289 = vmatprep.mubr.msk.bf16.mxu0 %vm236_vm2, %v8782_v20 }
  0x55   :  { %898 = vperm.xlu0 %8623, %v9613_v21  }
  0x56   :  { %546 = vperm.xlu1 %8625, %v9564_v0  }
  0x59   :  { %901 = vperm.xlu0 %8623, %v9621_v23  }
  0x5a   :  { %570 = vperm.xlu1 %8625, %v9587_v12   ;;  %8290 = vmatmul.mubr.msk.bf16.gmra.mrb[8].mxu0 %vm236_vm2, %v8783_v24 }
  0x5b   :  { %8293 = vmatprep.mubr.msk.bf16.mxu0 %vm236_vm2, %v8784_v25 }
  0x5d   :  { %928 = vperm.xlu0 %8623, %v9628_v26  }
  0x5e   :  { %578 = vperm.xlu1 %8625, %v9599_v16  }
  0x61   :  { %8640 = vset.pattern.permute.xlu0 %v15590_v22 }
  0x62   :  { %8626 = vset.pattern.permute.xlu1 %v15588_v28  ;;  %538 = vperm.xlu0 %8640, %v9567_v1  }
  0x63   :  { %8294 = vmatmul.mubr.msk.bf16.gmra.mrb[12].mxu0 %vm236_vm2, %v8785_v27  ;;  %709 = vperm.xlu1 %8626, %v9579_v7  }
  0x66   :  { %566 = vperm.xlu0 %8640, %v9590_v13  }
  0x67   :  { %713 = vperm.xlu1 %8626, %v9564_v0  }
  0x6a   :  { %574 = vperm.xlu0 %8640, %v9602_v17  }
  0x6b   :  { %737 = vperm.xlu1 %8626, %v9587_v12  }
  0x6e   :  { %582 = vperm.xlu0 %8640, %v9645_v29  }
  0x6f   :  { %745 = vperm.xlu1 %8626, %v9599_v16  }
  0x72   :  { %586 = vperm.xlu0 %8640, %v9650_v30  }
  0x73   :  { %8627 = vset.pattern.permute.xlu1 %v15602_v2 }
  0x74   :  { %919 = vperm.xlu1 %8627, %v9645_v29  }
  0x76   :  { %558 = vperm.xlu0 %8640, %v9621_v23  }
  0x78   :  { %8628 = vset.pattern.permute.xlu1 %v15590_v22 }
  0x79   :  { %550 = vperm.xlu1 %8628, %v9608_v18  }
  0x7a   :  { %562 = vperm.xlu0 %8640, %v9576_v6  }
  0x7d   :  { %8629 = vset.pattern.permute.xlu1 %v15588_v28 }
  0x7e   :  { %717 = vperm.xlu1 %8629, %v9608_v18   ;;  %8642 = vset.pattern.permute.xlu0 %v15588_v28 }
  0x7f   :  { %705 = vperm.xlu0 %8642, %v9567_v1  }
  0x82   :  { %749 = vperm.xlu1 %8629, %v9645_v29  }
  0x83   :  { %733 = vperm.xlu0 %8642, %v9590_v13  }
  0x86   :  { %8630 = vset.pattern.permute.xlu1 %v15602_v2 }
  0x87   :  { %922 = vperm.xlu1 %8630, %v9650_v30   ;;  %741 = vperm.xlu0 %8642, %v9602_v17  }
  0x8b   :  { %8631 = vset.pattern.permute.xlu1 %v15590_v22  ;;  %757 = vperm.xlu0 %8642, %v9669_v31  }
  0x8c   :  { %554 = vperm.xlu1 %8631, %v9613_v21  }
  0x8f   :  { %761 = vperm.xlu0 %8642, %v9628_v26  }
  0x90   :  { %8632 = vset.pattern.permute.xlu1 %v15588_v28 }
  0x91   :  { %721 = vperm.xlu1 %8632, %v9613_v21  }
  0x93   :  { %765 = vperm.xlu0 %8642, %v9677_v32  }
  0x95   :  { %753 = vperm.xlu1 %8632, %v9650_v30  }
  0x97   :  { %8650 = vset.pattern.permute.xlu0 %v15594_v33 }
  0x98   :  { %1105 = vperm.xlu0 %8650, %v9567_v1  }
  0x99   :  { %8633 = vset.pattern.permute.xlu1 %v15594_v33 }
  0x9a   :  { %1108 = vperm.xlu1 %8633, %v9579_v7  }
  0x9c   :  { %1126 = vperm.xlu0 %8650, %v9590_v13  }
  0x9e   :  { %1111 = vperm.xlu1 %8633, %v9564_v0  }
  0x9f   :  { %84 = vsyncpa [#allocation3], 0  ;;  %v15600_v34 = vmov 5   ;;  %v15596_v37 = vmov 4   ;;  %v15592_v50 = vmov 7   ;;  %v15604_v60 = vmov 6  }
  0xa0   :  { %1132 = vperm.xlu0 %8650, %v9602_v17   ;;  %v15598_v9 = vmov 8   ;;  %vm933_vm3 = vcmask 1040384   ;;  %vm600_vm4 = vcmask 1046528   ;;  %vm9356_vm5 = vmmov 0   ;;  %s16620_s0 = sld [smem:[#allocation5_spill]]  ;;  %s16719_s5 = sld [smem:[#allocation7_spill]] }
  0xa1   :  { %s16875_s9 = sld [smem:[#allocation6_spill]]  ;;  %vm5971_vm6 = vcmask 1043456   ;;  %vm5909_vm7 = vcmask 1042432   ;;  %s17100_s22 = sld [smem:[#allocation20_spill]]  ;;  %vm6400_vm8 = vcmask 1041408  }
  0xa2   :  { %1129 = vperm.xlu1 %8633, %v9587_v12   ;;  %s17205_s23 = sld [smem:[#allocation22_spill]]  ;;  %s17206_s26 = sld [smem:[#allocation21_spill]] }
  0xa3   :  { %s17207_s28 = sld [smem:[#allocation24_spill]]  ;;  %s17208_s1 = sld [smem:[#allocation26_spill]] }
  0xa4   :  { %1147 = vperm.xlu0 %8650, %v9628_v26   ;;  %s17209_s2 = sld [smem:[#allocation23_spill]]  ;;  %s17213_s7 = sld [smem:[#allocation25_spill]] }
  0xa6   :  { %1135 = vperm.xlu1 %8633, %v9599_v16  }
  0xa8   :  { %8657 = vset.pattern.permute.xlu0 %v15600_v34 }
  0xa9   :  { %1440 = vperm.xlu0 %8657, %v9579_v7  }
  0xaa   :  { %8634 = vset.pattern.permute.xlu1 %v15602_v2 }
  0xab   :  { %925 = vperm.xlu1 %8634, %v9669_v31  }
  0xad   :  { %1458 = vperm.xlu0 %8657, %v9590_v13  }
  0xaf   :  { %8635 = vset.pattern.permute.xlu1 %v15600_v34 }
  0xb0   :  { %1437 = vperm.xlu1 %8635, %v9567_v1  }
  0xb1   :  { %1464 = vperm.xlu0 %8657, %v9602_v17  }
  0xb4   :  { %1443 = vperm.xlu1 %8635, %v9564_v0  }
  0xb5   :  { %1449 = vperm.xlu0 %8657, %v9613_v21  }
  0xb8   :  { %1455 = vperm.xlu1 %8635, %v9576_v6  }
  0xb9   :  { %1476 = vperm.xlu0 %8657, %v9669_v31  }
  0xbc   :  { %1461 = vperm.xlu1 %8635, %v9587_v12  }
  0xbd   :  { %1482 = vperm.xlu0 %8657, %v9677_v32  }
  0xc0   :  { %v9708_v35 = vpop.permute.xlu1 %892  ;;  %1467 = vperm.xlu1 %8635, %v9599_v16   ;;  %v9711_v36 = vpop.permute.xlu0 %886 }
  0xc1   :  { %8667 = vset.pattern.permute.xlu0 %v15596_v37 }
  0xc2   :  { %1256 = vperm.xlu0 %8667, %v9567_v1  }
  0xc4   :  { %v9715_v38 = vpop.permute.xlu1 %904  ;;  %8636 = vset.pattern.permute.xlu1 %v15590_v22  ;;  %v9718_v39 = vpop.permute.xlu0 %889 }
  0xc5   :  { %590 = vperm.xlu1 %8636, %v9669_v31  }
  0xc6   :  { %1284 = vperm.xlu0 %8667, %v9590_v13  }
  0xc8   :  { %v9722_v40 = vpop.permute.xlu1 %910  ;;  %v9724_v41 = vpop.permute.xlu0 %907 }
  0xc9   :  { %8637 = vset.pattern.permute.xlu1 %v15588_v28 }
  0xca   :  { %725 = vperm.xlu1 %8637, %v9621_v23   ;;  %1292 = vperm.xlu0 %8667, %v9602_v17  }
  0xcc   :  { %v9729_v42 = vpop.permute.xlu1 %916  ;;  %v9731_v43 = vpop.permute.xlu0 %913 }
  0xce   :  { %8638 = vset.pattern.permute.xlu1 %v15594_v33  ;;  %1268 = vperm.xlu0 %8667, %v9608_v18  }
  0xcf   :  { %1114 = vperm.xlu1 %8638, %v9608_v18  }
  0xd0   :  { %v9740_v45 = vpop.permute.xlu0 %895 }
  0xd1   :  { %v9736_v44 = vpop.permute.xlu1 %542 }
  0xd2   :  { %1272 = vperm.xlu0 %8667, %v9613_v21  }
  0xd3   :  { %1138 = vperm.xlu1 %8638, %v9645_v29  }
  0xd4   :  { %v9749_v48 = vpop.permute.xlu0 %898 }
  0xd5   :  { %v9742_v46 = vpop.permute.xlu1 %546 }
  0xd6   :  { %1280 = vperm.xlu0 %8667, %v9576_v6  }
  0xd7   :  { %8639 = vset.pattern.permute.xlu1 %v15596_v37 }
  0xd8   :  { %1260 = vperm.xlu1 %8639, %v9579_v7   ;;  %v9757_v51 = vpop.permute.xlu0 %901 }
  0xd9   :  { %v9747_v47 = vpop.permute.xlu1 %570 }
  0xda   :  { %1316 = vperm.xlu0 %8667, %v9677_v32  }
  0xdc   :  { %1264 = vperm.xlu1 %8639, %v9564_v0   ;;  %v9764_v53 = vpop.permute.xlu0 %928 }
  0xdd   :  { %v9753_v49 = vpop.permute.xlu1 %578  ;;  %15960 = vst [vmem:[#allocation29_spill] sm:$0xff] %v9764_v53 }
  0xde   :  { %8669 = vset.pattern.permute.xlu0 %v15592_v50 }
  0xdf   :  { %1810 = vperm.xlu0 %8669, %v9579_v7  }
  0xe0   :  { %1288 = vperm.xlu1 %8639, %v9587_v12  }
  0xe1   :  { %v9774_v56 = vpop.permute.xlu0 %538 }
  0xe2   :  { %v9760_v52 = vpop.permute.xlu1 %709 }
  0xe3   :  { %15959 = vst [vmem:[#allocation28_spill] sm:$0xff] %v9760_v52  ;;  %1838 = vperm.xlu0 %8669, %v9587_v12   ;;  %v15980_v52 = vmov 5  }
  0xe4   :  { %1296 = vperm.xlu1 %8639, %v9599_v16  }
  0xe5   :  { %v9781_v58 = vpop.permute.xlu0 %566 }
  0xe6   :  { %v9766_v54 = vpop.permute.xlu1 %713 }
  0xe7   :  { %15961 = vst [vmem:[#allocation30_spill] sm:$0xff] %v9766_v54  ;;  %1846 = vperm.xlu0 %8669, %v9599_v16   ;;  %v9916_v54 = vld [vmem:[%s9381_s17] sm:$0xff] }
  0xe8   :  { %8641 = vset.pattern.permute.xlu1 %v15600_v34 }
  0xe9   :  { %1446 = vperm.xlu1 %8641, %v9608_v18   ;;  %v9790_v61 = vpop.permute.xlu0 %574 }
  0xea   :  { %v9771_v55 = vpop.permute.xlu1 %737 }
  0xeb   :  { %15962 = vst [vmem:[#allocation31_spill] sm:$0xff] %v9771_v55  ;;  %1822 = vperm.xlu0 %8669, %v9613_v21  }
  0xed   :  { %1470 = vperm.xlu1 %8641, %v9645_v29   ;;  %v9800_v3 = vpop.permute.xlu0 %582 }
  0xee   :  { %v9777_v57 = vpop.permute.xlu1 %745 }
  0xef   :  { %15963 = vst [vmem:[#allocation32_spill] sm:$0xff] %v9777_v57  ;;  %1826 = vperm.xlu0 %8669, %v9621_v23  }
  0xf1   :  { %8643 = vset.pattern.permute.xlu1 %v15590_v22  ;;  %v9806_v5 = vpop.permute.xlu0 %586 }
  0xf2   :  { %594 = vperm.xlu1 %8643, %v9628_v26  }
  0xf3   :  { %v9784_v59 = vpop.permute.xlu1 %919  ;;  %8674 = vset.pattern.permute.xlu0 %v15604_v60 }
  0xf4   :  { %1658 = vperm.xlu0 %8674, %v9579_v7  }
  0xf5   :  { %v9813_v7 = vpop.permute.xlu0 %558 }
  0xf6   :  { %8644 = vset.pattern.permute.xlu1 %v15588_v28 }
  0xf7   :  { %729 = vperm.xlu1 %8644, %v9576_v6  }
  0xf8   :  { %v9792_v62 = vpop.permute.xlu1 %550  ;;  %1679 = vperm.xlu0 %8674, %v9587_v12  }
  0xf9   :  { %v9822_v10 = vpop.permute.xlu0 %562 }
  0xfb   :  { %8645 = vset.pattern.permute.xlu1 %v15594_v33 }
  0xfc   :  { %1117 = vperm.xlu1 %8645, %v9613_v21   ;;  %1685 = vperm.xlu0 %8674, %v9599_v16  }
  0xfd   :  { %v9798_v63 = vpop.permute.xlu1 %717 }
  0xfe   :  { %15964 = vst [vmem:[#allocation33_spill] sm:$0xff] %v9798_v63  ;;  %v9830_v14 = vpop.permute.xlu0 %705  ;;  %v15985_v63 = vmov 8  }
 0x100   :  { %1141 = vperm.xlu1 %8645, %v9650_v30   ;;  %1664 = vperm.xlu0 %8674, %v9608_v18  }
 0x101   :  { %v9804_v4 = vpop.permute.xlu1 %749 }
 0x102   :  { %15965 = vst [vmem:[#allocation34_spill] sm:$0xff] %v9804_v4  ;;  %v9841_v20 = vpop.permute.xlu0 %733 }
 0x103   :  { %15969 = vst [vmem:[#allocation38_spill] sm:$0xff] %v9841_v20 }
 0x104   :  { %8646 = vset.pattern.permute.xlu1 %v15596_v37  ;;  %1691 = vperm.xlu0 %8674, %v9650_v30  }
 0x105   :  { %1300 = vperm.xlu1 %8646, %v9645_v29  }
 0x106   :  { %v9811_v6 = vpop.permute.xlu1 %922  ;;  %v9853_v25 = vpop.permute.xlu0 %741 }
 0x107   :  { %15971 = vst [vmem:[#allocation40_spill] sm:$0xff] %v9853_v25 }
 0x108   :  { %1700 = vperm.xlu0 %8674, %v9677_v32  }
 0x109   :  { %8647 = vset.pattern.permute.xlu1 %v15602_v2 }
 0x10a   :  { %931 = vperm.xlu1 %8647, %v9677_v32  }
 0x10b   :  { %v9818_v8 = vpop.permute.xlu1 %554 }
 0x10c   :  { %8677 = vset.pattern.permute.xlu0 %v15598_v9 }
 0x10d   :  { %1993 = vperm.xlu0 %8677, %v9564_v0  }
 0x10e   :  { %8648 = vset.pattern.permute.xlu1 %v15600_v34 }
 0x10f   :  { %1473 = vperm.xlu1 %8648, %v9650_v30  }
 0x110   :  { %v9826_v11 = vpop.permute.xlu1 %721 }
 0x111   :  { %15966 = vst [vmem:[#allocation35_spill] sm:$0xff] %v9826_v11  ;;  %2011 = vperm.xlu0 %8677, %v9587_v12  }
 0x113   :  { %8649 = vset.pattern.permute.xlu1 %v15590_v22  ;;  %v9867_v22 = vpop.permute.xlu0 %757 }
 0x114   :  { %v9832_v15 = vpop.permute.xlu1 %753  ;;  %598 = vperm.xlu1 %8649, %v9677_v32   ;;  %15974 = vst [vmem:[#allocation43_spill] sm:$0xff] %v9867_v22 }
 0x115   :  { %15967 = vst [vmem:[#allocation36_spill] sm:$0xff] %v9832_v15  ;;  %2017 = vperm.xlu0 %8677, %v9599_v16  }
 0x118   :  { %8651 = vset.pattern.permute.xlu1 %v15594_v33 }
 0x119   :  { %v9837_v19 = vpop.permute.xlu1 %1108  ;;  %1120 = vperm.xlu1 %8651, %v9621_v23   ;;  %1996 = vperm.xlu0 %8677, %v9608_v18  }
 0x11a   :  { %15968 = vst [vmem:[#allocation37_spill] sm:$0xff] %v9837_v19 }
 0x11d   :  { %v9843_v12 = vpop.permute.xlu1 %1111  ;;  %1144 = vperm.xlu1 %8651, %v9669_v31   ;;  %v9846_v21 = vpop.f32.mrb[0].mxu0  ;;  %2026 = vperm.xlu0 %8677, %v9669_v31  }
 0x11e   :  { %15970 = vst [vmem:[#allocation39_spill] sm:$0xff] %v9843_v12  ;;  %v9849_v24 = vpop.f32.mrb[1].mxu0  ;;  %v15996_v12 = vmov 3  }
 0x11f   :  { %v9851_v16 = vpop.f32.mrb[2].mxu0 }
 0x120   :  { %v9855_v26 = vpop.f32.mrb[3].mxu0 }
 0x121   :  { %v9857_v27 = vpop.permute.xlu1 %1129  ;;  %8652 = vset.pattern.permute.xlu1 %v15596_v37  ;;  %2032 = vperm.xlu0 %8677, %v9677_v32  }
 0x122   :  { %15972 = vst [vmem:[#allocation41_spill] sm:$0xff] %v9857_v27  ;;  %1304 = vperm.xlu1 %8652, %v9650_v30   ;;  %v9880_v30 = vpop.permute.xlu0 %761 }
 0x123   :  { %15976 = vst [vmem:[#allocation45_spill] sm:$0xff] %v9880_v30 }
 0x125   :  { %v9862_v18 = vpop.permute.xlu1 %1135  ;;  %v9864_v28 = vpop.f32.mrb[4].mxu0  ;;  %8680 = vset.pattern.permute.xlu0 %v15602_v2 }
 0x126   :  { %15973 = vst [vmem:[#allocation42_spill] sm:$0xff] %v9862_v18  ;;  %8653 = vset.pattern.permute.xlu1 %v15604_v60  ;;  %v9870_v50 = vpop.f32.mrb[5].mxu0  ;;  %v9893_v55 = vpop.permute.xlu0 %765  ;;  %v9929_v18 = vld [vmem:[%s9381_s17 + $0x30] sm:$0xff] }
 0x127   :  { %1655 = vperm.xlu1 %8653, %v9567_v1   ;;  %v9873_v33 = vpop.f32.mrb[6].mxu0  ;;  %15978 = vst [vmem:[#allocation47_spill] sm:$0xff] %v9893_v55  ;;  %15990 = vst [vmem:[#allocation57_spill] sm:$0xff] %v9929_v18 }
 0x128   :  { %v9875_v37 = vpop.f32.mrb[7].mxu0 }
 0x12a   :  { %v9877_v9 = vpop.permute.xlu1 %925  ;;  %v9905_v57 = vpop.permute.xlu0 %1105 }
 0x12b   :  { %15975 = vst [vmem:[#allocation44_spill] sm:$0xff] %v9877_v9  ;;  %1661 = vperm.xlu1 %8653, %v9564_v0  }
 0x12d   :  { %v9882_v34 = vpop.f32.mrb[8].mxu0 }
 0x12e   :  { %v9884_v2 = vpop.f32.mrb[9].mxu0  ;;  %v9919_v11 = vpop.permute.xlu0 %1126 }
 0x12f   :  { %1676 = vperm.xlu1 %8653, %v9590_v13   ;;  %v9887_v60 = vpop.permute.xlu1 %1437  ;;  %v9889_v1 = vpop.f32.mrb[10].mxu0  ;;  %15986 = vst [vmem:[#allocation53_spill] sm:$0xff] %v9919_v11 }
 0x130   :  { %15977 = vst [vmem:[#allocation46_spill] sm:$0xff] %v9887_v60  ;;  %v9891_v25 = vpop.f32.mrb[11].mxu0 }
 0x132   :  { %v9924_v60 = vpop.permute.xlu0 %1132 }
 0x133   :  { %1682 = vperm.xlu1 %8653, %v9602_v17   ;;  %v9896_v0 = vpop.permute.xlu1 %1443  ;;  %15988 = vst [vmem:[#allocation55_spill] sm:$0xff] %v9924_v60 }
 0x134   :  { %15979 = vst [vmem:[#allocation48_spill] sm:$0xff] %v9896_v0  ;;  %v9267_v0 = vld [vmem:[%s9381_s17 + $0x8] sm:$0xff] }
 0x136   :  { %v9898_v30 = vpop.f32.mrb[12].mxu0  ;;  %v9935_v27 = vpop.permute.xlu0 %1147 }
 0x137   :  { %v9900_v20 = vpop.f32.mrb[13].mxu0  ;;  %8654 = vset.pattern.permute.xlu1 %v15980_v52  ;;  %v9903_v4 = vpop.permute.xlu1 %1455  ;;  %15992 = vst [vmem:[#allocation59_spill] sm:$0xff] %v9935_v27 }
 0x138   :  { %15981 = vst [vmem:[#allocation49_spill] sm:$0xff] %v9903_v4  ;;  %v9907_v22 = vpop.f32.mrb[14].mxu0  ;;  %1452 = vperm.xlu1 %8654, %v9621_v23  }
 0x139   :  { %15982 = vst [vmem:[#allocation50_spill] sm:$0xff] %v9907_v22  ;;  %v9910_v55 = vpop.f32.mrb[15].mxu0  ;;  %v935_v22 = vrot.slane %v9718_v39, 7 }
 0x13a   :  { %15983 = vst [vmem:[#allocation51_spill] sm:$0xff] %v9910_v55 }
 0x13b   :  { %v9912_v15 = vpop.permute.xlu1 %1461 }
 0x13c   :  { %15984 = vst [vmem:[#allocation52_spill] sm:$0xff] %v9912_v15  ;;  %8655 = vset.pattern.permute.xlu1 %v15985_v63  ;;  %v365_v15 = vlaneseq  ;;  %v947_v63 = vrot.slane %v9724_v41, 7 }
 0x13d   :  { %1987 = vperm.xlu1 %8655, %v9916_v54  }
 0x13e   :  { %v9937_v11 = vshrl.u32 %v365_v15, 7 }
 0x13f   :  { %v9921_v4 = vpop.permute.xlu1 %1467 }
 0x140   :  { %15987 = vst [vmem:[#allocation54_spill] sm:$0xff] %v9921_v4  ;;  %v184_v4 = vld [vmem:[%s9376_s13] sm:$0x3]  ;;  %v9946_v60 = vsub.s32 0, %v9937_v11  ;;  %s17033_s13 = sld [smem:[#allocation9_spill]] }
 0x141   :  { %1990 = vperm.xlu1 %8655, %v9267_v0  }
 0x142   :  { %15995 = vst [vmem:[#allocation62_spill] sm:$0xff] %v9946_v60  ;;  %v9956_v15 = vrot.slane %v184_v4, %v9946_v60 }
 0x144   :  { %v9926_v9 = vpop.permute.xlu1 %590 }
 0x145   :  { %15989 = vst [vmem:[#allocation56_spill] sm:$0xff] %v9926_v9  ;;  %2005 = vperm.xlu1 %8655, %v9929_v18   ;;  %v9943_v9 = vpop.permute.xlu0 %1440 }
 0x146   :  { %15994 = vst [vmem:[#allocation61_spill] sm:$0xff] %v9943_v9  ;;  %v16001_v9 = vmov 4  }
 0x149   :  { %2008 = vperm.xlu1 %8655, %v9590_v13   ;;  %v9933_v32 = vpop.permute.xlu1 %725  ;;  %v9962_v27 = vpop.permute.xlu0 %1458 }
 0x14a   :  { %15991 = vst [vmem:[#allocation58_spill] sm:$0xff] %v9933_v32  ;;  %v9953_v32 = vsub.s32 1, %v9937_v11  ;;  %16000 = vst [vmem:[#allocation66_spill] sm:$0xff] %v9962_v27  ;;  %v369_v27 = vmul.f32 %v9956_v15, %v9849_v24 }
 0x14c   :  { %15998 = vst [vmem:[#allocation64_spill] sm:$0xff] %v9953_v32 }
 0x14d   :  { %2014 = vperm.xlu1 %8655, %v9602_v17   ;;  %v934_v17 = vrot.slane %v9711_v36, 7  ;;  %v9999_v24 = vpop.permute.xlu0 %1464 }
 0x14e   :  { %v9940_v0 = vpop.permute.xlu1 %1114  ;;  %16008 = vst [vmem:[#allocation73_spill] sm:$0xff] %v9999_v24 }
 0x14f   :  { %15993 = vst [vmem:[#allocation60_spill] sm:$0xff] %v9940_v0  ;;  %v9960_v0 = vsub.s32 2, %v9937_v11  ;;  %v982_v36 = vmul.f32 0.0, %v934_v17 }
 0x151   :  { %8656 = vset.pattern.permute.xlu1 %v15996_v12  ;;  %15999 = vst [vmem:[#allocation65_spill] sm:$0xff] %v9960_v0  ;;  %v9966_v12 = vld [vmem:[%s9386_s21] sm:$0xff] }
 0x152   :  { %1123 = vperm.xlu1 %8656, %v9929_v18   ;;  %v9950_v13 = vpop.permute.xlu1 %1138  ;;  %v371_v18 = vmul.f32 %v9846_v21, %v9956_v15  ;;  %v9978_v55 = vrot.slane %v9966_v12, %v9960_v0  ;;  %v9985_v21 = vsub.s32 3, %v9937_v11 }
 0x153   :  { %15997 = vst [vmem:[#allocation63_spill] sm:$0xff] %v9950_v13  ;;  %v9971_v13 = vrot.slane %v184_v4, %v9953_v32 }
 0x154   :  { %16003 = vst [vmem:[#allocation68_spill] sm:$0xff] %v9978_v55  ;;  %16004 = vst [vmem:[#allocation69_spill] sm:$0xff] %v9985_v21  ;;  %v9997_v0 = vmul.f32 %v9978_v55, %v982_v36  ;;  %v10015_v36 = vrot.slane %v9966_v12, %v9953_v32  ;;  %v937_v55 = vrot.slane %v9708_v35, 7  ;;  %v10023_v39 = vrot.slane %v9966_v12, %v9985_v21 }
 0x155   :  { %v9988_v4 = vadd.f32 %v9971_v13, %v371_v18  ;;  %v10006_v18 = vadd.f32 %v9971_v13, %v369_v27  ;;  %v10036_v35 = vsel %vm933_vm3, %v934_v17, %v935_v22  ;;  %v601_v17 = vrot.slane %v9774_v56, 1 }
 0x156   :  { %8658 = vset.pattern.permute.xlu1 %v16001_v9  ;;  %v370_v9 = vmul.f32 %v9956_v15, %v9855_v26  ;;  %16007 = vst [vmem:[#allocation72_spill] sm:$0xff] %v9997_v0  ;;  %v10002_v26 = vsub.s32 4, %v9937_v11  ;;  %16010 = vst [vmem:[#allocation75_spill] sm:$0xff] %v10023_v39  ;;  %v941_v56 = vrot.slane %v9749_v48, 7 }
 0x157   :  { %1276 = vperm.xlu1 %8658, %v9621_v23   ;;  %v9974_v19 = vpop.permute.xlu1 %1260  ;;  %v9991_v23 = vsub.s32 5, %v9937_v11  ;;  %v7874_v27 = vmul.f32 -1.442695, %v9988_v4  ;;  %16014 = vst [vmem:[#allocation78_spill] sm:$0xff] %v10036_v35  ;;  %v7872_v32 = vmul.f32 -1.442695, %v10006_v18 }
 0x158   :  { %16002 = vst [vmem:[#allocation67_spill] sm:$0xff] %v9974_v19  ;;  %16009 = vst [vmem:[#allocation74_spill] sm:$0xff] %v10002_v26  ;;  %v10040_v21 = vrot.slane %v9966_v12, %v10002_v26  ;;  %v372_v26 = vmul.f32 %v9851_v16, %v9956_v15  ;;  %v15635_v16 = vrot.slane %v9742_v46, 1 }
 0x159   :  { %16005 = vst [vmem:[#allocation70_spill] sm:$0xff] %v9991_v23  ;;  %v10028_v41 = vrot.slane %v9966_v12, %v9991_v23  ;;  %v10044_v23 = vsel %vm933_vm3, %v935_v22, %v937_v55  ;;  %8938 = vpow2.f32 %v7874_v27 }
 0x15a   :  { %16015 = vst [vmem:[#allocation79_spill] sm:$0xff] %v10040_v21  ;;  %16016 = vst [vmem:[#allocation80_spill] sm:$0xff] %v10044_v23  ;;  %v376_v21 = vmul.f32 %v9873_v33, %v9956_v15  ;;  %8940 = vpow2.f32 %v7872_v32  ;;  %v10080_v48 = vadd.f32 %v9971_v13, %v372_v26  ;;  %v375_v33 = vmul.f32 %v9864_v28, %v9956_v15 }
 0x15b   :  { %1308 = vperm.xlu1 %8658, %v9669_v31   ;;  %v9994_v19 = vpop.permute.xlu1 %1264  ;;  %v10011_v31 = vrot.slane %v9966_v12, %v9946_v60  ;;  %16011 = vst [vmem:[#allocation76_spill] sm:$0xff] %v10028_v41  ;;  %v16012_v60 = vmov 6   ;;  %v949_v41 = vrot.slane %v9722_v40, 7  ;;  %v939_v40 = vrot.slane %v9740_v45, 7 }
 0x15c   :  { %16006 = vst [vmem:[#allocation71_spill] sm:$0xff] %v9994_v19  ;;  %v10018_v19 = vadd.f32 %v9971_v13, %v370_v9  ;;  %v945_v9 = vrot.slane %v9715_v38, 7 }
 0x15d   :  { %v10071_v22 = vsel %vm933_vm3, %v947_v63, %v949_v41  ;;  %v10098_v26 = vsel %vm933_vm3, %v939_v40, %v941_v56 }
 0x15e   :  { %v10050_v38 = vsel %vm933_vm3, %v945_v9, %v947_v63  ;;  %v7873_v35 = vmul.f32 -1.442695, %v10018_v19  ;;  %16021 = vst [vmem:[#allocation84_spill] sm:$0xff] %v10071_v22  ;;  %v16023_v63 = vrot.slane %v9729_v42, 7 }
 0x15f   :  { %8659 = vset.pattern.permute.xlu1 %v16012_v60  ;;  %v10031_v24 = vpop.permute.xlu1 %1288  ;;  %16017 = vst [vmem:[#allocation81_spill] sm:$0xff] %v10050_v38  ;;  %v602_v38 = vrot.slane %v9736_v44, 1 }
 0x160   :  { %16013 = vst [vmem:[#allocation77_spill] sm:$0xff] %v10031_v24  ;;  %1688 = vperm.xlu1 %8659, %v9645_v29   ;;  %v951_v24 = vrot.slane %v9731_v43, 7  ;;  %v10056_v29 = vpop.permute.xlu0 %1449  ;;  %v373_v43 = vmul.f32 %v9956_v15, %v9870_v50  ;;  %v943_v50 = vrot.slane %v9757_v51, 7  ;;  %8942 = vpow2.f32 %v7873_v35 }
 0x161   :  { %16018 = vst [vmem:[#allocation82_spill] sm:$0xff] %v10056_v29  ;;  %v16020_v29 = vmov 7   ;;  %v603_v44 = vsel %vm600_vm4, %v601_v17, %v602_v38  ;;  %v10090_v51 = vsel %vm933_vm3, %v937_v55, %v939_v40  ;;  %v10103_v28 = vsel %vm600_vm4, %v602_v38, %v15635_v16 }
 0x162   :  { %v10074_v45 = vsel %vm933_vm3, %v949_v41, %v951_v24  ;;  %v10087_v27 = vsel %vm933_vm3, %v951_v24, %v16023_v63  ;;  %v10093_v32 = vadd.f32 %v9971_v13, %v373_v43  ;;  %16025 = vst [vmem:[#allocation87_spill] sm:$0xff] %v10103_v28  ;;  %v649_v41 = vmul.f32 0.0, %v601_v17 }
 0x163   :  { %v10062_v23 = vpop.permute.xlu1 %1296  ;;  %16022 = vst [vmem:[#allocation85_spill] sm:$0xff] %v10074_v45  ;;  %16024 = vst [vmem:[#allocation86_spill] sm:$0xff] %v10087_v27  ;;  %v10106_v24 = vadd.f32 %v9971_v13, %v376_v21  ;;  %v10113_v43 = vsel %vm933_vm3, %v941_v56, %v943_v50  ;;  %v650_v40 = vmul.f32 0.0, %v603_v44  ;;  %v379_v63 = vmul.f32 %v9882_v34, %v9956_v15 }
 0x164   :  { %16019 = vst [vmem:[#allocation83_spill] sm:$0xff] %v10062_v23  ;;  %8660 = vset.pattern.permute.xlu1 %v16020_v29  ;;  %v10108_v55 = vpop.permute.xlu0 %1476  ;;  %v9269_v23 = vld [vmem:[%s9381_s17 + $0x10] sm:$0xff]  ;;  %v10120_v38 = vsel %vm933_vm3, %v943_v50, %v945_v9  ;;  %v768_v21 = vmul.f32 0.0, %v9830_v14  ;;  %v7875_v17 = vmul.f32 -1.442695, %v10080_v48  ;;  %v10125_v16 = vadd.f32 %v9971_v13, %v375_v33 }
 0x165   :  { %1806 = vperm.xlu1 %8660, %v9916_v54   ;;  %v374_v54 = vmul.f32 %v9956_v15, %v9875_v37  ;;  %16026 = vst [vmem:[#allocation88_spill] sm:$0xff] %v10108_v55  ;;  %v616_v37 = vrot.slane %v9747_v47, 1  ;;  %16028 = vst [vmem:[#allocation90_spill] sm:$0xff] %v10120_v38  ;;  %v7876_v44 = vmul.f32 -1.442695, %v10093_v32  ;;  %v670_v9 = vmul.f32 %v10011_v31, %v649_v41  ;;  %v8939_v38 = vpop.eup %8938  ;;  %v9270_v41 = vld [vmem:[%s9381_s17 + $0x38] sm:$0xff] }
 0x166   :  { %v7879_v14 = vmul.f32 -1.442695, %v10106_v24  ;;  %v377_v50 = vmul.f32 %v9956_v15, %v9884_v2  ;;  %v10141_v56 = vmul.f32 %v10011_v31, %v650_v40  ;;  %v618_v47 = vrot.slane %v9790_v61, 1  ;;  %v8941_v61 = vpop.eup %8940 }
 0x167   :  { %v10131_v34 = vadd.f32 %v9971_v13, %v374_v54  ;;  %v10145_v54 = vadd.f32 %v9971_v13, %v379_v63  ;;  %8944 = vpow2.f32 %v7875_v17  ;;  %v7878_v2 = vmul.f32 -1.442695, %v10125_v16 }
 0x168   :  { %v10110_v35 = vpop.permute.xlu1 %1446  ;;  %16030 = vst [vmem:[#allocation92_spill] sm:$0xff] %v10141_v56  ;;  %v378_v40 = vmul.f32 %v9956_v15, %v9891_v25  ;;  %v16033_v63 = vrot.slane %v9781_v58, 1  ;;  %8946 = vpow2.f32 %v7876_v44  ;;  %v455_v22 = vadd.f32 1.0, %v8939_v38 }
 0x169   :  { %16027 = vst [vmem:[#allocation89_spill] sm:$0xff] %v10110_v35  ;;  %1814 = vperm.xlu1 %8660, %v9269_v23   ;;  %v620_v23 = vrot.slane %v9753_v49, 1  ;;  %v380_v49 = vmul.f32 %v9889_v1, %v9956_v15  ;;  %v10151_v35 = vmul.f32 %v10015_v36, %v768_v21  ;;  %v7877_v1 = vmul.f32 -1.442695, %v10131_v34 }
 0x16a   :  { %v10161_v45 = vsel %vm600_vm4, %v16033_v63, %v616_v37  ;;  %v381_v21 = vmul.f32 %v9956_v15, %v9900_v20  ;;  %v8943_v17 = vpop.eup %8942  ;;  %8948 = vpow2.f32 %v7879_v14  ;;  %v10168_v25 = vadd.f32 %v9971_v13, %v377_v50  ;;  %v9271_v20 = vld [vmem:[%s9381_s17 + $0x48] sm:$0xff] }
 0x16b   :  { %16031 = vst [vmem:[#allocation93_spill] sm:$0xff] %v10151_v35  ;;  %16034 = vst [vmem:[#allocation95_spill] sm:$0xff] %v10161_v45  ;;  %v10171_v56 = vsel %vm600_vm4, %v616_v37, %v618_v47  ;;  %v10174_v63 = vsel %vm600_vm4, %v618_v47, %v620_v23  ;;  %v7882_v44 = vmul.f32 -1.442695, %v10145_v54  ;;  %v10178_v45 = vadd.f32 %v9971_v13, %v380_v49 }
 0x16c   :  { %v10138_v33 = vpop.permute.xlu1 %1470  ;;  %16035 = vst [vmem:[#allocation96_spill] sm:$0xff] %v10171_v56  ;;  %16036 = vst [vmem:[#allocation97_spill] sm:$0xff] %v10174_v63  ;;  %v453_v38 = vadd.f32 1.0, %v8941_v61  ;;  %8950 = vpow2.f32 %v7878_v2  ;;  %v10185_v14 = vadd.f32 %v9971_v13, %v378_v40  ;;  %v15637_v37 = vrot.slane %v9806_v5, 1 }
 0x16d   :  { %16029 = vst [vmem:[#allocation91_spill] sm:$0xff] %v10138_v33  ;;  %1834 = vperm.xlu1 %8660, %v9270_v41   ;;  %v10156_v33 = vpop.permute.xlu0 %1482  ;;  %v622_v41 = vrot.slane %v9800_v3, 1  ;;  %v15639_v3 = vrot.slane %v10151_v35, 1  ;;  %v454_v47 = vadd.f32 1.0, %v8943_v17  ;;  %8952 = vpow2.f32 %v7877_v1  ;;  %v10211_v17 = vld [vmem:[%s9381_s17 + $0x70] sm:$0xff]  ;;  %v16058_v35 = vld [vmem:[#allocation39_spill] sm:$0xff] }
 0x16e   :  { %16032 = vst [vmem:[#allocation94_spill] sm:$0xff] %v10156_v33  ;;  %v10189_v50 = vadd.f32 %v9971_v13, %v381_v21  ;;  %8954 = vrcp.f32 %v455_v22  ;;  %v7880_v61 = vmul.f32 -1.442695, %v10168_v25  ;;  %v606_v1 = vrot.slane %v9792_v62, 1 }
 0x16f   :  { %v10192_v49 = vsel %vm600_vm4, %v620_v23, %v622_v41  ;;  %v10201_v40 = vsel %vm600_vm4, %v622_v41, %v15637_v37  ;;  %8956 = vpow2.f32 %v7882_v44  ;;  %v7883_v21 = vmul.f32 -1.442695, %v10178_v45 }
 0x170   :  { %16038 = vst [vmem:[#allocation99_spill] sm:$0xff] %v10192_v49  ;;  %16039 = vst [vmem:[#allocation100_spill] sm:$0xff] %v10201_v40  ;;  %v612_v23 = vrot.slane %v9822_v10, 1  ;;  %8958 = vrcp.f32 %v453_v38  ;;  %v7881_v22 = vmul.f32 -1.442695, %v10185_v14  ;;  %v1152_v44 = vrot.slane %v9905_v57, 1 }
 0x171   :  { %1842 = vperm.xlu1 %8660, %v9271_v20   ;;  %v10181_v28 = vpop.permute.xlu1 %594  ;;  %v955_v20 = vrot.slane %v9784_v59, 7  ;;  %v10196_v2 = vpop.permute.xlu0 %1256  ;;  %v868_v59 = vadd.f32 %v15639_v3, %v670_v9  ;;  %8960 = vrcp.f32 %v454_v47  ;;  %v7884_v37 = vmul.f32 -1.442695, %v10189_v50 }
 0x172   :  { %16037 = vst [vmem:[#allocation98_spill] sm:$0xff] %v10181_v28  ;;  %v8945_v10 = vpop.eup %8944  ;;  %v610_v38 = vrot.slane %v9813_v7, 1  ;;  %v608_v3 = vrot.slane %v9818_v8, 1  ;;  %8962 = vpow2.f32 %v7880_v61  ;;  %v16044_v57 = vrot.slane %v9742_v46, 1 }
 0x173   :  { %v8947_v62 = vpop.eup %8946  ;;  %8964 = vpow2.f32 %v7883_v21  ;;  %v16046_v8 = vrot.slane %v9781_v58, 1  ;;  %v16048_v28 = vrot.slane %v9997_v0, 2  ;;  %v16050_v21 = vrot.slane %v9811_v6, 7  ;;  %v10254_v58 = vld [vmem:[%s9381_s17 + $0x58] sm:$0xff] }
 0x174   :  { %v10231_v47 = vsel %vm600_vm4, %v16044_v57, %v606_v1  ;;  %v10236_v7 = vsel %vm600_vm4, %v610_v38, %v612_v23  ;;  %8966 = vpow2.f32 %v7881_v22  ;;  %v16049_v57 = vmov 8  }
 0x175   :  { %8661 = vset.pattern.permute.xlu1 %v15980_v52  ;;  %v16041_v52 = vrot.slane %v9729_v42, 7  ;;  %v10226_v40 = vpop.permute.xlu0 %1284  ;;  %v383_v42 = vmul.f32 %v9898_v30, %v9956_v15  ;;  %16045 = vst [vmem:[#allocation104_spill] sm:$0xff] %v10236_v7  ;;  %v10241_v61 = vsel %vm600_vm4, %v612_v23, %v16046_v8  ;;  %v1087_v46 = vadd.f32 %v16048_v28, %v868_v59  ;;  %v16052_v7 = vld [vmem:[#allocation50_spill] sm:$0xff]  ;;  %v16055_v8 = vld [vmem:[#allocation51_spill] sm:$0xff] }
 0x176   :  { %1479 = vperm.xlu1 %8661, %v10211_v17   ;;  %v10214_v41 = vpop.permute.xlu1 %729  ;;  %16043 = vst [vmem:[#allocation103_spill] sm:$0xff] %v10226_v40  ;;  %16047 = vst [vmem:[#allocation105_spill] sm:$0xff] %v10241_v61  ;;  %v10249_v63 = vsel %vm933_vm3, %v955_v20, %v16050_v21  ;;  %v456_v30 = vadd.f32 1.0, %v8945_v10  ;;  %8968 = vpow2.f32 %v7884_v37  ;;  %v384_v56 = vmul.f32 %v16052_v7, %v9956_v15  ;;  %v16057_v21 = vld [vmem:[#allocation37_spill] sm:$0xff] }
 0x177   :  { %16040 = vst [vmem:[#allocation101_spill] sm:$0xff] %v10214_v41  ;;  %v10222_v9 = vsel %vm933_vm3, %v16041_v52, %v955_v20  ;;  %v1200_v41 = vmul.f32 0.0, %v1152_v44  ;;  %v8949_v52 = vpop.eup %8948  ;;  %16051 = vst [vmem:[#allocation106_spill] sm:$0xff] %v10249_v63  ;;  %v10260_v59 = vsel %vm600_vm4, %v606_v1, %v608_v3  ;;  %v457_v22 = vadd.f32 1.0, %v8947_v62  ;;  %v16060_v40 = vld [vmem:[#allocation41_spill] sm:$0xff] }
 0x178   :  { %16042 = vst [vmem:[#allocation102_spill] sm:$0xff] %v10222_v9  ;;  %v8951_v28 = vpop.eup %8950  ;;  %16054 = vst [vmem:[#allocation107_spill] sm:$0xff] %v10260_v59  ;;  %v382_v20 = vmul.f32 %v9956_v15, %v16055_v8  ;;  %v10265_v10 = vsub.s32 7, %v9937_v11  ;;  %v1153_v7 = vrot.slane %v16057_v21, 1  ;;  %v460_v61 = vadd.f32 1.0, %v8949_v52  ;;  %v16059_v59 = vld [vmem:[#allocation53_spill] sm:$0xff] }
 0x179   :  { %v8953_v37 = vpop.eup %8952  ;;  %v1221_v63 = vmul.f32 %v10023_v39, %v1200_v41  ;;  %v10270_v0 = vadd.f32 %v9971_v13, %v383_v42  ;;  %v1167_v9 = vrot.slane %v16060_v40, 1  ;;  %v16061_v15 = vld [vmem:[#allocation55_spill] sm:$0xff]  ;;  %v10276_v49 = vpop.permute.xlu0 %1292  ;;  %v10279_v21 = vsel %vm600_vm4, %v608_v3, %v610_v38 }
 0x17a   :  { %8662 = vset.pattern.permute.xlu1 %v16049_v57  ;;  %16056 = vst [vmem:[#allocation51_spill] sm:$0xff] %v10265_v10  ;;  %v1169_v8 = vrot.slane %v16061_v15, 1  ;;  %16062 = vst [vmem:[#allocation37_spill] sm:$0xff] %v10276_v49  ;;  %8970 = vrcp.f32 %v456_v30  ;;  %v459_v41 = vadd.f32 1.0, %v8951_v28  ;;  %v10282_v42 = vadd.f32 %v9971_v13, %v384_v56  ;;  %v16065_v49 = vld [vmem:[#allocation27_spill] sm:$0xff] }
 0x17b   :  { %2020 = vperm.xlu1 %8662, %v10254_v58   ;;  %v10257_v23 = vpop.permute.xlu1 %1117  ;;  %v16063_v52 = vmov 3   ;;  %8972 = vrcp.f32 %v457_v22  ;;  %v458_v40 = vadd.f32 1.0, %v8953_v37  ;;  %v10288_v15 = vadd.f32 %v9971_v13, %v382_v20 }
 0x17c   :  { %16053 = vst [vmem:[#allocation50_spill] sm:$0xff] %v10257_v23  ;;  %v8955_v23 = vpop.eup %8954  ;;  %v10293_v3 = vrot.slane %v9966_v12, %v10265_v10  ;;  %v10296_v56 = vsel %vm600_vm4, %v1152_v44, %v1153_v7  ;;  %v10298_v30 = vadd.f32 %v1221_v63, %v1087_v46  ;;  %8974 = vrcp.f32 %v460_v61  ;;  %v16073_v46 = vld [vmem:[#allocation42_spill] sm:$0xff] }
 0x17d   :  { %v8957_v27 = vpop.eup %8956  ;;  %16067 = vst [vmem:[#allocation55_spill] sm:$0xff] %v10296_v56  ;;  %v7886_v28 = vmul.f32 -1.442695, %v10270_v0  ;;  %v16068_v37 = vrot.slane %v16058_v35, 1  ;;  %v10312_v10 = vsel %vm600_vm4, %v1167_v9, %v1169_v8  ;;  %8976 = vrcp.f32 %v459_v41 }
 0x17e   :  { %v8959_v62 = vpop.eup %8958  ;;  %16066 = vst [vmem:[#allocation41_spill] sm:$0xff] %v10293_v3  ;;  %16072 = vst [vmem:[#allocation109_spill] sm:$0xff] %v10312_v10  ;;  %v463_v44 = vadd.f32 1.0, %v8957_v27  ;;  %8978 = vrcp.f32 %v458_v40  ;;  %v16080_v10 = vld [vmem:[#allocation48_spill] sm:$0xff] }
 0x17f   :  { %8663 = vset.pattern.permute.xlu1 %v16063_v52  ;;  %v10285_v1 = vpop.permute.xlu1 %1141  ;;  %v8961_v38 = vpop.eup %8960  ;;  %v10304_v13 = vsel %vm600_vm4, %v1153_v7, %v16068_v37  ;;  %v16074_v52 = vld [vmem:[#allocation61_spill] sm:$0xff]  ;;  %v16075_v7 = vld [vmem:[#allocation44_spill] sm:$0xff]  ;;  %8980 = vpow2.f32 %v7886_v28  ;;  %v10334_v40 = vmul.f32 %v8959_v62, %v10006_v18  ;;  %v10346_v18 = vsub.s32 6, %v9937_v11 }
 0x180   :  { %16064 = vst [vmem:[#allocation39_spill] sm:$0xff] %v10285_v1  ;;  %1150 = vperm.xlu1 %8663, %v16065_v49   ;;  %v8963_v22 = vpop.eup %8962  ;;  %16069 = vst [vmem:[#allocation27_spill] sm:$0xff] %v10304_v13  ;;  %v16070_v49 = vrot.slane %v16059_v59, 1  ;;  %v1485_v3 = vrot.slane %v16074_v52, 7  ;;  %v7887_v1 = vmul.f32 -1.442695, %v10282_v42  ;;  %v10326_v41 = vmul.f32 %v8961_v38, %v10018_v19 }
 0x181   :  { %v8965_v63 = vpop.eup %8964  ;;  %v959_v37 = vrot.slane %v16075_v7, 7  ;;  %v16076_v59 = vld [vmem:[#allocation46_spill] sm:$0xff]  ;;  %v461_v52 = vadd.f32 1.0, %v8963_v22  ;;  %8982 = vrcp.f32 %v463_v44  ;;  %16087 = vst [vmem:[#allocation112_spill] sm:$0xff] %v10346_v18  ;;  %v1319_v19 = vmul.f32 %v10196_v2, %v10334_v40 }
 0x182   :  { %v10309_v20 = vsel %vm600_vm4, %v16070_v49, %v1167_v9  ;;  %v8967_v56 = vpop.eup %8966  ;;  %v1484_v13 = vrot.slane %v16076_v59, 7  ;;  %v7885_v49 = vmul.f32 -1.442695, %v10288_v15  ;;  %v16077_v9 = vmov 4   ;;  %16079 = vst [vmem:[#allocation61_spill] sm:$0xff] %v10326_v41  ;;  %16082 = vst [vmem:[#allocation46_spill] sm:$0xff] %v10334_v40 }
 0x183   :  { %16071 = vst [vmem:[#allocation108_spill] sm:$0xff] %v10309_v20  ;;  %v10320_v20 = vpop.permute.xlu0 %1268  ;;  %v8969_v61 = vpop.eup %8968  ;;  %v10331_v59 = vmul.f32 %v8955_v23, %v9988_v4  ;;  %v464_v7 = vadd.f32 1.0, %v8965_v63  ;;  %v462_v22 = vadd.f32 1.0, %v8967_v56  ;;  %8984 = vpow2.f32 %v7887_v1  ;;  %v16094_v38 = vld [vmem:[#allocation66_spill] sm:$0xff] }
 0x184   :  { %8664 = vset.pattern.permute.xlu1 %v16077_v9  ;;  %v10323_v27 = vpop.permute.xlu1 %1300  ;;  %v16083_v9 = vrot.slane %v16073_v46, 1  ;;  %v1486_v28 = vsel %vm933_vm3, %v1484_v13, %v1485_v3  ;;  %v465_v39 = vadd.f32 1.0, %v8969_v61  ;;  %8986 = vpow2.f32 %v7885_v49  ;;  %v8971_v23 = vpop.eup %8970 }
 0x185   :  { %16078 = vst [vmem:[#allocation42_spill] sm:$0xff] %v10323_v27  ;;  %1312 = vperm.xlu1 %8664, %v10211_v17   ;;  %16081 = vst [vmem:[#allocation44_spill] sm:$0xff] %v10331_v59  ;;  %8988 = vrcp.f32 %v461_v52  ;;  %v1533_v62 = vmul.f32 %v1486_v28, %v10326_v41  ;;  %v8973_v63 = vpop.eup %8972  ;;  %v16090_v61 = vrot.slane %v9811_v6, 7  ;;  %v1532_v49 = vmul.f32 %v1484_v13, %v10334_v40  ;;  %v10364_v52 = vld [vmem:[%s9381_s17 + $0x20] sm:$0xff] }
 0x186   :  { %v10339_v27 = vsel %vm600_vm4, %v1169_v8, %v16083_v9  ;;  %v16088_v8 = vrot.slane %v16080_v10, 7  ;;  %8990 = vrcp.f32 %v464_v7  ;;  %v16092_v28 = vrot.slane %v9764_v53, 7  ;;  %v16097_v7 = vld [vmem:[#allocation52_spill] sm:$0xff] }
 0x187   :  { %16084 = vst [vmem:[#allocation110_spill] sm:$0xff] %v10339_v27  ;;  %v10343_v4 = vpop.permute.xlu0 %1272  ;;  %v10359_v11 = vsel %vm933_vm3, %v16090_v61, %v959_v37  ;;  %v1497_v6 = vrot.slane %v16094_v38, 7  ;;  %8992 = vrcp.f32 %v462_v22  ;;  %v16095_v61 = vld [vmem:[#allocation49_spill] sm:$0xff]  ;;  %v10375_v13 = vmul.f32 %v8971_v23, %v10080_v48 }
 0x188   :  { %16086 = vst [vmem:[#allocation111_spill] sm:$0xff] %v10343_v4  ;;  %v1488_v44 = vsel %vm933_vm3, %v1485_v3, %v16088_v8  ;;  %16091 = vst [vmem:[#allocation114_spill] sm:$0xff] %v10359_v11  ;;  %v8975_v3 = vpop.eup %8974  ;;  %v10370_v8 = vsel %vm933_vm3, %v959_v37, %v16092_v28  ;;  %8994 = vrcp.f32 %v465_v39  ;;  %v10381_v53 = vmul.f32 %v8973_v63, %v10093_v32  ;;  %v16099_v37 = vld [vmem:[#allocation76_spill] sm:$0xff]  ;;  %v16100_v38 = vld [vmem:[#allocation73_spill] sm:$0xff] }
 0x189   :  { %8665 = vset.pattern.permute.xlu1 %v16012_v60  ;;  %v10354_v56 = vpop.permute.xlu1 %931  ;;  %v1534_v9 = vmul.f32 %v1488_v44, %v10331_v59  ;;  %16093 = vst [vmem:[#allocation115_spill] sm:$0xff] %v10370_v8  ;;  %16096 = vst [vmem:[#allocation66_spill] sm:$0xff] %v10375_v13  ;;  %v1499_v44 = vrot.slane %v16097_v7, 7  ;;  %v8977_v11 = vpop.eup %8976  ;;  %v10384_v28 = vmul.f32 %v16099_v37, %v1533_v62  ;;  %v1501_v22 = vrot.slane %v16100_v38, 7  ;;  %v16109_v4 = vld [vmem:[#allocation54_spill] sm:$0xff] }
 0x18a   :  { %16089 = vst [vmem:[#allocation113_spill] sm:$0xff] %v10354_v56  ;;  %1667 = vperm.xlu1 %8665, %v10364_v52   ;;  %16098 = vst [vmem:[#allocation52_spill] sm:$0xff] %v10381_v53  ;;  %v16101_v1 = vrot.slane %v10156_v33, 7  ;;  %v8979_v23 = vpop.eup %8978  ;;  %v10390_v39 = vmul.f32 %v8975_v3, %v10106_v24  ;;  %v10393_v7 = vmul.f32 %v16099_v37, %v1532_v49  ;;  %v16107_v3 = vrot.slane %v16095_v61, 7  ;;  %v16108_v33 = vld [vmem:[#allocation58_spill] sm:$0xff]  ;;  %v16111_v24 = vld [vmem:[#allocation35_spill] sm:$0xff] }
 0x18b   :  { %v10396_v2 = vmul.f32 %v16099_v37, %v1534_v9  ;;  %v10398_v32 = vpop.permute.xlu0 %1280  ;;  %v10405_v63 = vrot.slane %v9966_v12, %v10346_v18  ;;  %v773_v8 = vmul.f32 %v16108_v33, %v10381_v53  ;;  %v9275_v56 = vld [vmem:[%s9381_s17 + $0x18] sm:$0xff]  ;;  %v16110_v18 = vld [vmem:[#allocation79_spill] sm:$0xff]  ;;  %v772_v61 = vmul.f32 %v16111_v24, %v10375_v13 }
 0x18c   :  { %v1548_v48 = vmul.f32 0.0, %v16101_v1  ;;  %16102 = vst [vmem:[#allocation73_spill] sm:$0xff] %v10390_v39  ;;  %16103 = vst [vmem:[#allocation116_spill] sm:$0xff] %v10398_v32  ;;  %v8981_v1 = vpop.eup %8980  ;;  %v1498_v49 = vsel %vm933_vm3, %v16107_v3, %v1497_v6  ;;  %v1502_v9 = vsel %vm933_vm3, %v1499_v44, %v1501_v22 }
 0x18d   :  { %16105 = vst [vmem:[#allocation118_spill] sm:$0xff] %v10405_v63  ;;  %v8983_v32 = vpop.eup %8982  ;;  %v10418_v63 = vmul.f32 %v16110_v18, %v1319_v19  ;;  %v1587_v19 = vrot.slane %v10393_v7, 2  ;;  %v1539_v24 = vmul.f32 %v1498_v49, %v10390_v39  ;;  %v10440_v55 = vmul.f32 %v10015_v36, %v773_v8 }
 0x18e   :  { %8666 = vset.pattern.permute.xlu1 %v16020_v29  ;;  %v10401_v62 = vpop.permute.xlu1 %1473  ;;  %v8985_v38 = vpop.eup %8984  ;;  %v10425_v33 = vmul.f32 %v16099_v37, %v1548_v48  ;;  %v10435_v3 = vmul.f32 %v8983_v32, %v10145_v54  ;;  %v654_v48 = vmul.f32 %v10279_v21, %v10375_v13  ;;  %v10446_v7 = vmul.f32 %v8979_v23, %v10131_v34 }
 0x18f   :  { %16104 = vst [vmem:[#allocation117_spill] sm:$0xff] %v10401_v62  ;;  %1818 = vperm.xlu1 %8666, %v9275_v56   ;;  %v1500_v62 = vsel %vm933_vm3, %v1497_v6, %v1499_v44  ;;  %v16113_v56 = vld [vmem:[#allocation56_spill] sm:$0xff]  ;;  %v8987_v27 = vpop.eup %8986  ;;  %v10429_v6 = vmul.f32 %v8977_v11, %v10125_v16  ;;  %v467_v44 = vadd.f32 1.0, %v8981_v1  ;;  %16115 = vst [vmem:[#allocation79_spill] sm:$0xff] %v10440_v55  ;;  %v16118_v49 = vrot.slane %v16109_v4, 7  ;;  %v10455_v21 = vpop.permute.xlu0 %1316 }
 0x190   :  { %16112 = vst [vmem:[#allocation58_spill] sm:$0xff] %v10425_v33  ;;  %v8989_v10 = vpop.eup %8988  ;;  %16114 = vst [vmem:[#allocation54_spill] sm:$0xff] %v10435_v3  ;;  %v10453_v1 = vmul.f32 %v10015_v36, %v772_v61  ;;  %v16122_v23 = vrot.slane %v16113_v56, 1  ;;  %v986_v61 = vmul.f32 %v10098_v26, %v10375_v13  ;;  %v987_v34 = vmul.f32 %v10113_v43, %v10381_v53 }
 0x191   :  { %v8991_v11 = vpop.eup %8990  ;;  %16117 = vst [vmem:[#allocation119_spill] sm:$0xff] %v10446_v7  ;;  %v1504_v54 = vsel %vm933_vm3, %v1501_v22, %v16118_v49  ;;  %16120 = vst [vmem:[#allocation121_spill] sm:$0xff] %v10455_v21  ;;  %v10471_v32 = vmul.f32 %v8989_v10, %v10168_v25  ;;  %v10474_v21 = vmul.f32 %v16099_v37, %v1539_v24  ;;  %8996 = vrcp.f32 %v467_v44  ;;  %v16175_v7 = vld [vmem:[#allocation103_spill] sm:$0xff] }
 0x192   :  { %16119 = vst [vmem:[#allocation120_spill] sm:$0xff] %v10453_v1  ;;  %v8993_v8 = vpop.eup %8992  ;;  %v1542_v33 = vmul.f32 %v1504_v54, %v10435_v3  ;;  %v10483_v26 = vmul.f32 %v8991_v11, %v10178_v45  ;;  %v466_v25 = vadd.f32 1.0, %v8987_v27  ;;  %v16127_v10 = vrot.slane %v10418_v63, 1  ;;  %v16131_v54 = vld [vmem:[#allocation68_spill] sm:$0xff]  ;;  %v16133_v27 = vld [vmem:[#allocation30_spill] sm:$0xff] }
 0x193   :  { %1850 = vperm.xlu1 %8666, %v10254_v58   ;;  %v10443_v16 = vpop.permute.xlu1 %598  ;;  %v16121_v58 = vrot.slane %v10384_v28, 2  ;;  %v8995_v49 = vpop.eup %8994  ;;  %16124 = vst [vmem:[#allocation122_spill] sm:$0xff] %v10471_v32  ;;  %16125 = vst [vmem:[#allocation123_spill] sm:$0xff] %v10474_v21  ;;  %v15662_v24 = vrot.slane %v10453_v1, 1  ;;  %v10493_v44 = vmul.f32 %v8993_v8, %v10185_v14  ;;  %v10499_v45 = vmul.f32 %v16131_v54, %v986_v61 }
 0x194   :  { %16116 = vst [vmem:[#allocation35_spill] sm:$0xff] %v10443_v16  ;;  %v16123_v16 = vrot.slane %v9806_v5, 1  ;;  %v675_v5 = vmul.f32 %v10011_v31, %v654_v48  ;;  %16126 = vst [vmem:[#allocation124_spill] sm:$0xff] %v10483_v26  ;;  %v10496_v48 = vmul.f32 %v8995_v49, %v10189_v50  ;;  %v770_v11 = vmul.f32 %v16133_v27, %v10326_v41  ;;  %v10508_v14 = vpop.permute.xlu0 %1810  ;;  %v16137_v49 = vld [vmem:[#allocation33_spill] sm:$0xff]  ;;  %v10528_v27 = vld [vmem:[%s9381_s17 + $0x60] sm:$0xff] }
 0x195   :  { %v10460_v12 = vsel %vm262_vm1, %v1587_v19, %v16121_v58  ;;  %v468_v58 = vadd.f32 1.0, %v8985_v38  ;;  %v1419_v38 = vadd.f32 %v16127_v10, %v10298_v30  ;;  %16129 = vst [vmem:[#allocation126_spill] sm:$0xff] %v10493_v44  ;;  %16132 = vst [vmem:[#allocation68_spill] sm:$0xff] %v10499_v45  ;;  %v10511_v50 = vmul.f32 %v16099_v37, %v1542_v33  ;;  %v16139_v33 = vld [vmem:[#allocation36_spill] sm:$0xff] }
 0x196   :  { %v627_v22 = vsel %vm600_vm4, %v16123_v16, %v16122_v23  ;;  %v15661_v16 = vrot.slane %v10440_v55, 1  ;;  %16130 = vst [vmem:[#allocation127_spill] sm:$0xff] %v10496_v48  ;;  %v10506_v23 = vmul.f32 %v16131_v54, %v987_v34  ;;  %16135 = vst [vmem:[#allocation128_spill] sm:$0xff] %v10508_v14  ;;  %v652_v61 = vmul.f32 %v10231_v47, %v10326_v41  ;;  %v16141_v47 = vld [vmem:[#allocation43_spill] sm:$0xff] }
 0x197   :  { %8668 = vset.pattern.permute.xlu1 %v16049_v57  ;;  %8998 = vrcp.f32 %v468_v58  ;;  %16136 = vst [vmem:[#allocation129_spill] sm:$0xff] %v10511_v50  ;;  %v10522_v34 = vadd.f32 %v1587_v19, %v1419_v38  ;;  %v662_v58 = vmul.f32 %v627_v22, %v10483_v26  ;;  %v780_v10 = vmul.f32 %v16139_v33, %v10483_v26  ;;  %v16142_v33 = vld [vmem:[#allocation32_spill] sm:$0xff] }
 0x198   :  { %1999 = vperm.xlu1 %8668, %v10364_v52   ;;  %v10490_v43 = vpop.permute.xlu1 %1120  ;;  %v1540_v52 = vmul.f32 %v1500_v62, %v10471_v32  ;;  %16134 = vst [vmem:[#allocation30_spill] sm:$0xff] %v10506_v23  ;;  %v830_v8 = vsel %vm600_vm4, %v15662_v24, %v15661_v16  ;;  %v771_v62 = vmul.f32 %v16137_v49, %v10331_v59  ;;  %9000 = vrcp.f32 %v466_v25  ;;  %v10563_v49 = vpop.permute.xlu0 %1838  ;;  %v10575_v14 = vld [vmem:[%s9381_s17 + $0x28] sm:$0xff] }
 0x199   :  { %16128 = vst [vmem:[#allocation125_spill] sm:$0xff] %v10490_v43  ;;  %16138 = vst [vmem:[#allocation33_spill] sm:$0xff] %v10522_v34  ;;  %v1541_v16 = vmul.f32 %v1502_v9, %v10493_v44  ;;  %v781_v24 = vmul.f32 %v16141_v47, %v10496_v48  ;;  %v10538_v19 = vmul.f32 %v10015_v36, %v770_v11  ;;  %v16144_v11 = vld [vmem:[#allocation80_spill] sm:$0xff] }
 0x19a   :  { %v10541_v22 = vmul.f32 %v16099_v37, %v1540_v52  ;;  %v873_v38 = vadd.f32 %v830_v8, %v675_v5  ;;  %v778_v34 = vmul.f32 %v16142_v33, %v10493_v44  ;;  %v10549_v47 = vmul.f32 %v10015_v36, %v771_v62  ;;  %v16146_v33 = vld [vmem:[#allocation34_spill] sm:$0xff]  ;;  %16147 = vst [vmem:[#allocation80_spill] sm:$0xff] %v10563_v49  ;;  %v16152_v43 = vld [vmem:[#allocation28_spill] sm:$0xff] }
 0x19b   :  { %v984_v25 = vmul.f32 %v16144_v11, %v10326_v41  ;;  %v10554_v52 = vmul.f32 %v10011_v31, %v662_v58  ;;  %v10557_v5 = vmul.f32 %v10015_v36, %v780_v10  ;;  %v985_v8 = vmul.f32 %v10090_v51, %v10331_v59  ;;  %v16148_v11 = vld [vmem:[#allocation60_spill] sm:$0xff] }
 0x19c   :  { %2023 = vperm.xlu1 %8668, %v10528_v27   ;;  %v10531_v30 = vpop.permute.xlu1 %1144  ;;  %16143 = vst [vmem:[#allocation43_spill] sm:$0xff] %v10549_v47  ;;  %v779_v9 = vmul.f32 %v16146_v33, %v10435_v3  ;;  %v10567_v62 = vmul.f32 %v16099_v37, %v1541_v16  ;;  %v10570_v58 = vmul.f32 %v10015_v36, %v781_v24  ;;  %v16150_v49 = vrot.slane %v10506_v23, 2  ;;  %v16153_v33 = vld [vmem:[#allocation86_spill] sm:$0xff]  ;;  %v16154_v23 = vld [vmem:[#allocation63_spill] sm:$0xff] }
 0x19d   :  { %16140 = vst [vmem:[#allocation36_spill] sm:$0xff] %v10531_v30  ;;  %v673_v30 = vmul.f32 %v10011_v31, %v652_v61  ;;  %16145 = vst [vmem:[#allocation32_spill] sm:$0xff] %v10557_v5  ;;  %v8997_v61 = vpop.eup %8996  ;;  %v16151_v16 = vrot.slane %v10499_v45, 2  ;;  %v10587_v24 = vmul.f32 %v10015_v36, %v778_v34  ;;  %v769_v10 = vmul.f32 %v16152_v43, %v10334_v40  ;;  %v10623_v50 = vld [vmem:[%s9381_s17 + $0x68] sm:$0xff] }
 0x19e   :  { %v10593_v48 = vmul.f32 %v16131_v54, %v984_v25  ;;  %v10602_v34 = vmul.f32 %v16131_v54, %v985_v8  ;;  %v10607_v1 = vmul.f32 %v10015_v36, %v779_v9  ;;  %v16158_v56 = vrot.slane %v10549_v47, 1 }
 0x19f   :  { %v1047_v55 = vsel %vm262_vm1, %v16151_v16, %v16150_v49  ;;  %v10599_v49 = vmul.f32 %v8997_v61, %v10270_v0  ;;  %v16156_v16 = vld [vmem:[#allocation99_spill] sm:$0xff]  ;;  %v16160_v0 = vrot.slane %v16148_v11, 1  ;;  %v16161_v61 = vrot.slane %v16058_v35, 1  ;;  %v10631_v35 = vpop.permute.xlu0 %1846 }
 0x1a0   :  { %8670 = vset.pattern.permute.xlu1 %v16012_v60  ;;  %v660_v43 = vmul.f32 %v16156_v16, %v10493_v44  ;;  %16157 = vst [vmem:[#allocation86_spill] sm:$0xff] %v10607_v1  ;;  %16164 = vst [vmem:[#allocation63_spill] sm:$0xff] %v10631_v35  ;;  %v16167_v25 = vrot.slane %v16154_v23, 1  ;;  %v16168_v47 = vrot.slane %v16073_v46, 1 }
 0x1a1   :  { %1670 = vperm.xlu1 %8670, %v10575_v14   ;;  %v10578_v51 = vpop.permute.xlu1 %1304  ;;  %v8999_v45 = vpop.eup %8998  ;;  %16155 = vst [vmem:[#allocation28_spill] sm:$0xff] %v10599_v49  ;;  %v1158_v8 = vsel %vm600_vm4, %v16161_v61, %v16160_v0  ;;  %v16162_v49 = vld [vmem:[#allocation102_spill] sm:$0xff]  ;;  %v10635_v61 = vadd.f32 %v1047_v55, %v873_v38  ;;  %v16169_v55 = vrot.slane %v10570_v58, 1  ;;  %v16170_v38 = vrot.slane %v10557_v5, 1 }
 0x1a2   :  { %16149 = vst [vmem:[#allocation34_spill] sm:$0xff] %v10578_v51  ;;  %v992_v51 = vmul.f32 %v16153_v33, %v10493_v44  ;;  %v16159_v33 = vrot.slane %v10538_v19, 1  ;;  %v993_v16 = vmul.f32 %v16162_v49, %v10435_v3  ;;  %v9001_v9 = vpop.eup %9000  ;;  %v1203_v35 = vmul.f32 %v1158_v8, %v10331_v59 }
 0x1a3   :  { %16166 = vst [vmem:[#allocation102_spill] sm:$0xff] %v10635_v61  ;;  %v15683_v49 = vrot.slane %v10602_v34, 2  ;;  %v681_v61 = vmul.f32 %v10011_v31, %v660_v43  ;;  %v16174_v43 = vrot.slane %v10593_v48, 2  ;;  %v10687_v5 = vpop.permute.xlu0 %1822 }
 0x1a4   :  { %v826_v26 = vsel %vm600_vm4, %v16159_v33, %v16158_v56  ;;  %v789_v56 = vmul.f32 %v10015_v36, %v769_v10  ;;  %v16163_v33 = vld [vmem:[#allocation78_spill] sm:$0xff]  ;;  %v10639_v37 = vmul.f32 %v16131_v54, %v992_v51  ;;  %v1174_v10 = vsel %vm600_vm4, %v16168_v47, %v16167_v25 }
 0x1a5   :  { %1694 = vperm.xlu1 %8670, %v10623_v50   ;;  %v983_v11 = vmul.f32 %v16163_v33, %v10334_v40  ;;  %v871_v33 = vadd.f32 %v826_v26, %v673_v30  ;;  %v846_v51 = vsel %vm600_vm4, %v16170_v38, %v16169_v55  ;;  %v10657_v46 = vmul.f32 %v16131_v54, %v993_v16  ;;  %v16181_v38 = vld [vmem:[#allocation87_spill] sm:$0xff] }
 0x1a6   :  { %v10633_v0 = vpop.permute.xlu1 %1655  ;;  %v16172_v26 = vrot.slane %v10587_v24, 1  ;;  %v1211_v47 = vmul.f32 %v1174_v10, %v10435_v3  ;;  %v821_v25 = vrot.slane %v789_v56, 1  ;;  %v1043_v16 = vsel %vm262_vm1, %v16174_v43, %v15683_v49  ;;  %v16176_v10 = vld [vmem:[#allocation67_spill] sm:$0xff] }
 0x1a7   :  { %16165 = vst [vmem:[#allocation99_spill] sm:$0xff] %v10633_v0  ;;  %v15680_v0 = vrot.slane %v10607_v1, 1  ;;  %16171 = vst [vmem:[#allocation78_spill] sm:$0xff] %v10657_v46  ;;  %v1004_v8 = vmul.f32 %v16131_v54, %v983_v11  ;;  %v1320_v56 = vmul.f32 %v16176_v10, %v10326_v41  ;;  %v10681_v11 = vmul.f32 %v8999_v45, %v10282_v42  ;;  %v16182_v45 = vld [vmem:[#allocation93_spill] sm:$0xff] }
 0x1a8   :  { %16179 = vst [vmem:[#allocation67_spill] sm:$0xff] %v10687_v5  ;;  %v10690_v43 = vadd.f32 %v846_v51, %v10554_v52  ;;  %v651_v10 = vmul.f32 %v16181_v38, %v10334_v40  ;;  %v16188_v38 = vrot.slane %v10538_v19, 1  ;;  %v16192_v5 = vld [vmem:[#allocation92_spill] sm:$0xff] }
 0x1a9   :  { %8671 = vset.pattern.permute.xlu1 %v16020_v29  ;;  %v842_v30 = vsel %vm600_vm4, %v16172_v26, %v15680_v0  ;;  %v1326_v26 = vmul.f32 %v16175_v7, %v10390_v39  ;;  %16177 = vst [vmem:[#allocation103_spill] sm:$0xff] %v10681_v11  ;;  %v1090_v0 = vadd.f32 %v1043_v16, %v871_v33  ;;  %v15686_v7 = vrot.slane %v10657_v46, 2 }
 0x1aa   :  { %1854 = vperm.xlu1 %8671, %v10528_v27   ;;  %v10668_v55 = vpop.permute.xlu1 %1661  ;;  %v10684_v27 = vmul.f32 %v9001_v9, %v10288_v15  ;;  %v879_v49 = vadd.f32 %v842_v30, %v681_v61  ;;  %v16183_v11 = vrot.slane %v16182_v45, 1  ;;  %v1038_v9 = vrot.slane %v1004_v8, 2  ;;  %v16189_v45 = vld [vmem:[#allocation38_spill] sm:$0xff] }
 0x1ab   :  { %16173 = vst [vmem:[#allocation130_spill] sm:$0xff] %v10668_v55  ;;  %v16178_v55 = vld [vmem:[#allocation75_spill] sm:$0xff]  ;;  %v16186_v61 = vrot.slane %v10639_v37, 2  ;;  %v10710_v30 = vmul.f32 %v16110_v18, %v1326_v26  ;;  %v1340_v8 = vmul.f32 %v16110_v18, %v1320_v56  ;;  %v16191_v26 = vld [vmem:[#allocation40_spill] sm:$0xff]  ;;  %v672_v56 = vmul.f32 %v10011_v31, %v651_v10 }
 0x1ac   :  { %v1224_v1 = vmul.f32 %v16178_v55, %v1203_v35  ;;  %16180 = vst [vmem:[#allocation75_spill] sm:$0xff] %v10690_v43  ;;  %v1232_v42 = vmul.f32 %v16178_v55, %v1211_v47  ;;  %v822_v15 = vsel %vm600_vm4, %v16183_v11, %v821_v25  ;;  %v16184_v35 = vld [vmem:[#allocation71_spill] sm:$0xff]  ;;  %v824_v11 = vsel %vm600_vm4, %v821_v25, %v16188_v38  ;;  %v16193_v25 = vld [vmem:[#allocation72_spill] sm:$0xff] }
 0x1ad   :  { %v1321_v33 = vmul.f32 %v16184_v35, %v10331_v59  ;;  %v1059_v51 = vsel %vm262_vm1, %v16186_v61, %v15686_v7  ;;  %v16187_v47 = vld [vmem:[#allocation55_spill] sm:$0xff]  ;;  %v775_v35 = vmul.f32 %v16189_v45, %v10429_v6  ;;  %v777_v7 = vmul.f32 %v16191_v26, %v10471_v32  ;;  %v10737_v26 = vpop.permute.xlu0 %1826 }
 0x1ae   :  { %8672 = vset.pattern.permute.xlu1 %v16049_v57  ;;  %v10702_v52 = vpop.permute.xlu1 %1676  ;;  %v1201_v16 = vmul.f32 %v16187_v47, %v10334_v40  ;;  %v1098_v43 = vadd.f32 %v1059_v51, %v879_v49  ;;  %v869_v47 = vadd.f32 %v822_v15, %v16192_v5  ;;  %v10729_v19 = vadd.f32 %v1224_v1, %v1090_v0  ;;  %v16195_v40 = vld [vmem:[#allocation37_spill] sm:$0xff] }
 0x1af   :  { %16185 = vst [vmem:[#allocation87_spill] sm:$0xff] %v10702_v52  ;;  %2002 = vperm.xlu1 %8672, %v10575_v14   ;;  %v16190_v52 = vld [vmem:[#allocation31_spill] sm:$0xff]  ;;  %v1322_v14 = vmul.f32 %v10320_v20, %v10375_v13  ;;  %v16194_v38 = vrot.slane %v16193_v25, 2  ;;  %v1341_v46 = vmul.f32 %v16110_v18, %v1321_v33  ;;  %v1372_v10 = vrot.slane %v1340_v8, 1  ;;  %v16198_v25 = vld [vmem:[#allocation57_spill] sm:$0xff] }
 0x1b0   :  { %v776_v61 = vmul.f32 %v16190_v52, %v10390_v39  ;;  %v1328_v52 = vmul.f32 %v16195_v40, %v10493_v44  ;;  %v870_v15 = vadd.f32 %v824_v11, %v672_v56  ;;  %v16197_v20 = vld [vmem:[#allocation27_spill] sm:$0xff]  ;;  %v1222_v0 = vmul.f32 %v16178_v55, %v1201_v16  ;;  %v16199_v56 = vld [vmem:[#allocation84_spill] sm:$0xff] }
 0x1b1   :  { %v1039_v45 = vsel %vm262_vm1, %v16194_v38, %v1038_v9  ;;  %v1202_v1 = vmul.f32 %v16197_v20, %v10326_v41  ;;  %v10747_v51 = vmul.f32 %v10015_v36, %v775_v35  ;;  %v797_v33 = vmul.f32 %v10015_v36, %v777_v7  ;;  %v16201_v7 = vld [vmem:[#allocation85_spill] sm:$0xff] }
 0x1b2   :  { %v10739_v49 = vpop.permute.xlu1 %1682  ;;  %v796_v40 = vmul.f32 %v10015_v36, %v776_v61  ;;  %v10752_v38 = vadd.f32 %v1232_v42, %v1098_v43  ;;  %v1088_v8 = vadd.f32 %v1039_v45, %v869_v47  ;;  %v10755_v11 = vmul.f32 %v16110_v18, %v1322_v14  ;;  %v16203_v45 = vld [vmem:[#allocation95_spill] sm:$0xff] }
 0x1b3   :  { %16196 = vst [vmem:[#allocation93_spill] sm:$0xff] %v10739_v49  ;;  %8673 = vset.pattern.permute.xlu1 %v16012_v60  ;;  %v990_v20 = vmul.f32 %v16199_v56, %v10390_v39  ;;  %v10760_v16 = vmul.f32 %v16110_v18, %v1328_v52  ;;  %v16200_v35 = vrot.slane %v10593_v48, 2  ;;  %v1374_v5 = vrot.slane %v1341_v46, 1  ;;  %v16205_v46 = vld [vmem:[#allocation81_spill] sm:$0xff] }
 0x1b4   :  { %1673 = vperm.xlu1 %8673, %v16198_v25   ;;  %v991_v25 = vmul.f32 %v16201_v7, %v10471_v32  ;;  %v16202_v43 = vrot.slane %v10418_v63, 1  ;;  %v1223_v14 = vmul.f32 %v16178_v55, %v1202_v1  ;;  %v657_v56 = vmul.f32 %v16203_v45, %v10429_v6  ;;  %v10778_v7 = vpop.permute.xlu0 %1658  ;;  %v16207_v1 = vld [vmem:[#allocation96_spill] sm:$0xff] }
 0x1b5   :  { %v1041_v61 = vsel %vm262_vm1, %v1038_v9, %v16200_v35  ;;  %v835_v60 = vrot.slane %v796_v40, 1  ;;  %v837_v9 = vrot.slane %v797_v33, 1  ;;  %v989_v35 = vmul.f32 %v16205_v46, %v10429_v6  ;;  %16206 = vst [vmem:[#allocation55_spill] sm:$0xff] %v10778_v7  ;;  %v16208_v46 = vld [vmem:[#allocation77_spill] sm:$0xff] }
 0x1b6   :  { %v1373_v42 = vsel %vm600_vm4, %v16202_v43, %v1372_v10  ;;  %v1089_v47 = vadd.f32 %v1041_v61, %v870_v15  ;;  %v1239_v63 = vadd.f32 %v1222_v0, %v1088_v8  ;;  %v658_v61 = vmul.f32 %v16207_v1, %v10390_v39  ;;  %v16209_v8 = vld [vmem:[#allocation97_spill] sm:$0xff] }
 0x1b7   :  { %v10773_v52 = vpop.permute.xlu1 %1452  ;;  %v1011_v43 = vmul.f32 %v16131_v54, %v990_v20  ;;  %v1375_v40 = vsel %vm600_vm4, %v1372_v10, %v1374_v5  ;;  %v1012_v33 = vmul.f32 %v16131_v54, %v991_v25  ;;  %v1327_v48 = vmul.f32 %v16208_v46, %v10471_v32  ;;  %v16211_v25 = vld [vmem:[#allocation83_spill] sm:$0xff] }
 0x1b8   :  { %16204 = vst [vmem:[#allocation71_spill] sm:$0xff] %v10773_v52  ;;  %1697 = vperm.xlu1 %8673, %v10211_v17   ;;  %v1420_v49 = vadd.f32 %v1373_v42, %v1239_v63  ;;  %v1240_v41 = vadd.f32 %v1223_v14, %v1089_v47  ;;  %v678_v0 = vmul.f32 %v10011_v31, %v657_v56  ;;  %v16210_v1 = vrot.slane %v10747_v51, 1 }
 0x1b9   :  { %v659_v15 = vmul.f32 %v16209_v8, %v10471_v32  ;;  %v838_v45 = vsel %vm600_vm4, %v835_v60, %v837_v9  ;;  %v10798_v10 = vmul.f32 %v16131_v54, %v989_v35  ;;  %v1329_v52 = vmul.f32 %v16211_v25, %v10435_v3  ;;  %v16215_v25 = vld [vmem:[#allocation89_spill] sm:$0xff] }
 0x1ba   :  { %v836_v20 = vsel %vm600_vm4, %v16210_v1, %v835_v60  ;;  %v1421_v47 = vadd.f32 %v1375_v40, %v1240_v41  ;;  %v16213_v14 = vrot.slane %v10755_v11, 1  ;;  %v679_v63 = vmul.f32 %v10011_v31, %v658_v61 }
 0x1bb   :  { %v1052_v46 = vrot.slane %v1011_v43, 2  ;;  %v1054_v60 = vrot.slane %v1012_v33, 2  ;;  %v1347_v35 = vmul.f32 %v16110_v18, %v1327_v48  ;;  %v16214_v8 = vrot.slane %v10587_v24, 1 }
 0x1bc   :  { %8675 = vset.pattern.permute.xlu1 %v16020_v29  ;;  %v10803_v42 = vpop.permute.xlu1 %1987  ;;  %v1377_v56 = vsel %vm600_vm4, %v1374_v5, %v16213_v14  ;;  %v1489_v7 = vrot.slane %v16215_v25, 7  ;;  %v16216_v41 = vrot.slane %v10396_v2, 2  ;;  %v16217_v5 = vrot.slane %v10384_v28, 2 }
 0x1bd   :  { %16212 = vst [vmem:[#allocation38_spill] sm:$0xff] %v10803_v42  ;;  %1858 = vperm.xlu1 %8675, %v10623_v50   ;;  %v840_v1 = vsel %vm600_vm4, %v837_v9, %v16214_v8  ;;  %v10815_v42 = vpop.permute.xlu0 %1679  ;;  %v876_v43 = vadd.f32 %v836_v20, %v678_v0  ;;  %v877_v40 = vadd.f32 %v838_v45, %v679_v63  ;;  %v15693_v24 = vrot.slane %v10798_v10, 2  ;;  %v16219_v9 = vld [vmem:[#allocation108_spill] sm:$0xff] }
 0x1be   :  { %v1591_v61 = vsel %vm262_vm1, %v16217_v5, %v16216_v41  ;;  %v680_v50 = vmul.f32 %v10011_v31, %v659_v15  ;;  %v10824_v48 = vadd.f32 %v10460_v12, %v1420_v49  ;;  %v1208_v33 = vmul.f32 %v16219_v9, %v10390_v39  ;;  %v16222_v15 = vld [vmem:[#allocation109_spill] sm:$0xff]  ;;  %v16223_v63 = vld [vmem:[#allocation48_spill] sm:$0xff]  ;;  %v16225_v41 = vld [vmem:[#allocation110_spill] sm:$0xff] }
 0x1bf   :  { %v10830_v14 = vmul.f32 %v16110_v18, %v1329_v52  ;;  %v10834_v28 = vadd.f32 %v1591_v61, %v1421_v47  ;;  %v10837_v0 = vadd.f32 %v1377_v56, %v10729_v19  ;;  %v1209_v45 = vmul.f32 %v16222_v15, %v10471_v32  ;;  %v16226_v5 = vld [vmem:[#allocation82_spill] sm:$0xff] }
 0x1c0   :  { %16218 = vst [vmem:[#allocation31_spill] sm:$0xff] %v10824_v48  ;;  %v10832_v8 = vpop.permute.xlu1 %1990  ;;  %v878_v12 = vadd.f32 %v840_v1, %v680_v50  ;;  %v1053_v49 = vsel %vm262_vm1, %v15693_v24, %v1052_v46  ;;  %v1055_v52 = vsel %vm262_vm1, %v1052_v46, %v1054_v60  ;;  %v1386_v20 = vrot.slane %v1347_v35, 1 }
 0x1c1   :  { %16220 = vst [vmem:[#allocation40_spill] sm:$0xff] %v10832_v8  ;;  %16221 = vst [vmem:[#allocation92_spill] sm:$0xff] %v10834_v28  ;;  %8676 = vset.pattern.permute.xlu1 %v16049_v57  ;;  %v16224_v25 = vrot.slane %v16223_v63, 7  ;;  %v1095_v19 = vadd.f32 %v1053_v49, %v876_v43  ;;  %v1096_v56 = vadd.f32 %v1055_v52, %v877_v40  ;;  %v16227_v61 = vrot.slane %v16226_v5, 7  ;;  %v16229_v63 = vld [vmem:[#allocation91_spill] sm:$0xff]  ;;  %v10861_v43 = vpop.permute.xlu0 %1685  ;;  %v16269_v8 = vld [vmem:[#allocation120_spill] sm:$0xff] }
 0x1c2   :  { %2029 = vperm.xlu1 %8676, %v10211_v17   ;;  %v1210_v1 = vmul.f32 %v16225_v41, %v10493_v44  ;;  %v1229_v9 = vmul.f32 %v16178_v55, %v1208_v33  ;;  %v16228_v46 = vrot.slane %v10639_v37, 2  ;;  %v1230_v49 = vmul.f32 %v16178_v55, %v1209_v45  ;;  %v16235_v45 = vld [vmem:[#allocation98_spill] sm:$0xff]  ;;  %v16266_v28 = vld [vmem:[#allocation127_spill] sm:$0xff] }
 0x1c3   :  { %v1490_v47 = vsel %vm933_vm3, %v16224_v25, %v1489_v7  ;;  %v1492_v50 = vsel %vm933_vm3, %v1489_v7, %v16227_v61  ;;  %v16231_v52 = vrot.slane %v10541_v22, 2  ;;  %v16232_v7 = vrot.slane %v10474_v21, 2  ;;  %v16271_v5 = vld [vmem:[#allocation43_spill] sm:$0xff] }
 0x1c4   :  { %v1057_v35 = vsel %vm262_vm1, %v1054_v60, %v16228_v46  ;;  %v10863_v40 = vpop.permute.xlu1 %2005  ;;  %v1535_v60 = vmul.f32 %v1490_v47, %v10375_v13  ;;  %v16233_v41 = vrot.slane %v10710_v30, 1  ;;  %v16234_v46 = vrot.slane %v10760_v16, 1  ;;  %v16236_v47 = vld [vmem:[#allocation45_spill] sm:$0xff] }
 0x1c5   :  { %16230 = vst [vmem:[#allocation72_spill] sm:$0xff] %v10863_v40  ;;  %v1603_v33 = vsel %vm262_vm1, %v16232_v7, %v16231_v52  ;;  %v1097_v37 = vadd.f32 %v1057_v35, %v878_v12  ;;  %v1536_v25 = vmul.f32 %v1492_v50, %v10381_v53  ;;  %v1246_v57 = vadd.f32 %v1229_v9, %v1095_v19  ;;  %v9279_v52 = vld [vmem:[%s9381_s17 + $0x30] sm:$0xff] }
 0x1c6   :  { %v1387_v61 = vsel %vm600_vm4, %v16233_v41, %v1386_v20  ;;  %v1389_v24 = vsel %vm600_vm4, %v1386_v20, %v16234_v46  ;;  %8678 = vset.pattern.permute.xlu1 %v16020_v29  ;;  %v1247_v39 = vadd.f32 %v1230_v49, %v1096_v56  ;;  %v1231_v12 = vmul.f32 %v16178_v55, %v1210_v1  ;;  %v16241_v56 = vld [vmem:[#allocation119_spill] sm:$0xff]  ;;  %v16242_v9 = vld [vmem:[#allocation101_spill] sm:$0xff]  ;;  %v16243_v49 = vld [vmem:[#allocation50_spill] sm:$0xff] }
 0x1c7   :  { %v782_v35 = vmul.f32 %v16236_v47, %v10684_v27  ;;  %1830 = vperm.xlu1 %8678, %v9279_v52   ;;  %v16237_v7 = vrot.slane %v10830_v14, 1  ;;  %v16238_v41 = vmov %v16234_v46  ;;  %v16239_v50 = vrot.slane %v16229_v63, 7  ;;  %v16245_v40 = vld [vmem:[#allocation76_spill] sm:$0xff] }
 0x1c8   :  { %v16240_v46 = vrot.slane %v16109_v4, 7  ;;  %v774_v1 = vmul.f32 %v16242_v9, %v16241_v56  ;;  %v10898_v47 = vpop.permute.xlu1 %2008  ;;  %v1427_v52 = vadd.f32 %v1387_v61, %v1246_v57  ;;  %v1428_v29 = vadd.f32 %v1389_v24, %v1247_v39  ;;  %v16253_v39 = vld [vmem:[#allocation56_spill] sm:$0xff] }
 0x1c9   :  { %v1391_v20 = vsel %vm600_vm4, %v16238_v41, %v16237_v7  ;;  %16244 = vst [vmem:[#allocation37_spill] sm:$0xff] %v10898_v47  ;;  %v1248_v21 = vadd.f32 %v1231_v12, %v1097_v37  ;;  %v10901_v16 = vmul.f32 %v16245_v40, %v1535_v60  ;;  %v16246_v7 = vrot.slane %v10567_v62, 2  ;;  %v10921_v60 = vpop.permute.xlu0 %1664  ;;  %v16256_v61 = vld [vmem:[#allocation124_spill] sm:$0xff]  ;;  %v16257_v62 = vld [vmem:[#allocation107_spill] sm:$0xff] }
 0x1ca   :  { %v1506_v19 = vsel %vm933_vm3, %v16240_v46, %v16239_v50  ;;  %v16247_v41 = vrot.slane %v10541_v22, 2  ;;  %v16248_v50 = vld [vmem:[#allocation129_spill] sm:$0xff]  ;;  %v10914_v47 = vmul.f32 %v16245_v40, %v1536_v25  ;;  %v16252_v57 = vrot.slane %v16235_v45, 1  ;;  %16255 = vst [vmem:[#allocation57_spill] sm:$0xff] %v10921_v60 }
 0x1cb   :  { %v16249_v46 = vrot.slane %v16248_v50, 2  ;;  %v16250_v9 = vmov %v16246_v7  ;;  %v16254_v24 = vrot.slane %v16253_v39, 1  ;;  %v1429_v22 = vadd.f32 %v1391_v20, %v1248_v21  ;;  %1862 = vperm.xlu1 %8678, %v10211_v17   ;;  %v16260_v39 = vld [vmem:[#allocation60_spill] sm:$0xff] }
 0x1cc   :  { %v1605_v4 = vsel %vm262_vm1, %v16247_v41, %v16246_v7  ;;  %16251 = vst [vmem:[#allocation27_spill] sm:$0xff] %v10914_v47  ;;  %v1543_v12 = vmul.f32 %v1506_v19, %v16256_v61  ;;  %v10925_v7 = vmul.f32 %v10015_v36, %v782_v35  ;;  %v653_v41 = vmul.f32 %v16257_v62, %v10331_v59  ;;  %v16262_v35 = vld [vmem:[#allocation111_spill] sm:$0xff]  ;;  %v10940_v19 = vpop.permute.xlu1 %2014 }
 0x1cd   :  { %v1607_v15 = vsel %vm262_vm1, %v16250_v9, %v16249_v46  ;;  %v629_v37 = vsel %vm600_vm4, %v16254_v24, %v16252_v57  ;;  %v794_v25 = vmul.f32 %v10015_v36, %v774_v1  ;;  %v16258_v46 = vld [vmem:[#allocation90_spill] sm:$0xff]  ;;  %v16259_v57 = vrot.slane %v16243_v49, 1  ;;  %16263 = vst [vmem:[#allocation84_spill] sm:$0xff] %v10940_v19 }
 0x1ce   :  { %v988_v9 = vmul.f32 %v16258_v46, %v16241_v56  ;;  %v16261_v24 = vrot.slane %v16260_v39, 1  ;;  %v1323_v20 = vmul.f32 %v16262_v35, %v10381_v53  ;;  %v10942_v62 = vadd.f32 %v1603_v33, %v1427_v52  ;;  %v16267_v39 = vld [vmem:[#allocation104_spill] sm:$0xff]  ;;  %v9280_v1 = vld [vmem:[%s9381_s17 + $0x78] sm:$0xff]  ;;  %s17035_s17 = sld [smem:[#allocation8_spill]] }
 0x1cf   :  { %v10944_v17 = vadd.f32 %v1605_v4, %v1428_v29  ;;  %v663_v46 = vmul.f32 %v629_v37, %v16266_v28  ;;  %v655_v32 = vmul.f32 %v16267_v39, %v10381_v53  ;;  %v16270_v35 = vrot.slane %v16269_v8, 1  ;;  %1866 = vperm.xlu1 %8678, %v9280_v1   ;;  %v16280_v39 = vld [vmem:[#allocation42_spill] sm:$0xff] }
 0x1d0   :  { %v1160_v21 = vsel %vm600_vm4, %v16261_v24, %v16259_v57  ;;  %16264 = vst [vmem:[#allocation85_spill] sm:$0xff] %v10942_v62  ;;  %v16268_v57 = vld [vmem:[#allocation105_spill] sm:$0xff]  ;;  %v16272_v19 = vrot.slane %v16271_v5, 1  ;;  %v10958_v29 = vadd.f32 %v1607_v15, %v1429_v22  ;;  %v10961_v52 = vmul.f32 %v16245_v40, %v1543_v12  ;;  %v16276_v12 = vld [vmem:[#allocation106_spill] sm:$0xff] }
 0x1d1   :  { %16265 = vst [vmem:[#allocation95_spill] sm:$0xff] %v10944_v17  ;;  %v656_v24 = vmul.f32 %v16268_v57, %v16241_v56  ;;  %v674_v4 = vmul.f32 %v10011_v31, %v653_v41  ;;  %v1204_v37 = vmul.f32 %v1160_v21, %v10375_v13  ;;  %v831_v57 = vrot.slane %v794_v25, 1  ;;  %v10977_v48 = vpop.permute.xlu1 %1123 }
 0x1d2   :  { %v828_v33 = vsel %vm600_vm4, %v16272_v19, %v16270_v35  ;;  %16273 = vst [vmem:[#allocation81_spill] sm:$0xff] %v10958_v29  ;;  %v1009_v8 = vmul.f32 %v16131_v54, %v988_v9  ;;  %v10969_v5 = vmul.f32 %v16110_v18, %v1323_v20  ;;  %v10971_v19 = vpop.permute.xlu0 %1691  ;;  %v684_v15 = vmul.f32 %v10011_v31, %v663_v46  ;;  %v16277_v35 = vld [vmem:[#allocation39_spill] sm:$0xff]  ;;  %v16279_v9 = vld [vmem:[#allocation100_spill] sm:$0xff] }
 0x1d3   :  { %16275 = vst [vmem:[#allocation77_spill] sm:$0xff] %v10971_v19  ;;  %v872_v22 = vadd.f32 %v828_v33, %v674_v4  ;;  %v994_v41 = vmul.f32 %v16276_v12, %v16256_v61  ;;  %16278 = vst [vmem:[#allocation97_spill] sm:$0xff] %v10977_v48  ;;  %v676_v1 = vmul.f32 %v10011_v31, %v655_v32  ;;  %v16281_v33 = vld [vmem:[#allocation68_spill] sm:$0xff]  ;;  %v16283_v12 = vrot.slane %v10602_v34, 2  ;;  %v16288_v46 = vld [vmem:[#allocation79_spill] sm:$0xff] }
 0x1d4   :  { %16274 = vst [vmem:[#allocation96_spill] sm:$0xff] %v10969_v5  ;;  %v677_v25 = vmul.f32 %v10011_v31, %v656_v24  ;;  %v661_v20 = vmul.f32 %v16279_v9, %v10435_v3  ;;  %v1330_v29 = vmul.f32 %v16280_v39, %v16256_v61  ;;  %v16282_v4 = vrot.slane %v16281_v33, 2  ;;  %v16284_v32 = vld [vmem:[#allocation116_spill] sm:$0xff] }
 0x1d5   :  { %v1225_v17 = vmul.f32 %v16178_v55, %v1204_v37  ;;  %v1325_v48 = vmul.f32 %v16284_v32, %v10429_v6  ;;  %v16285_v24 = vmov 2   ;;  %v16286_v9 = vrot.slane %v10925_v7, 1 }
 0x1d6   :  { %v1045_v21 = vsel %vm262_vm1, %v16283_v12, %v16282_v4  ;;  %8679 = vset.pattern.permute.xlu1 %v16285_v24  ;;  %v16287_v62 = vrot.slane %v10570_v58, 1  ;;  %v16289_v3 = vrot.slane %v16288_v46, 1  ;;  %v1048_v34 = vrot.slane %v1009_v8, 2  ;;  %v16300_v4 = vld [vmem:[#allocation86_spill] sm:$0xff] }
 0x1d7   :  { %v16290_v37 = vrot.slane %v10747_v51, 1  ;;  %v1091_v32 = vadd.f32 %v1045_v21, %v872_v22  ;;  %v11008_v24 = vmul.f32 %v16131_v54, %v994_v41  ;;  %v16291_v13 = vrot.slane %v16277_v35, 1  ;;  %v16295_v22 = vld [vmem:[#allocation113_spill] sm:$0xff]  ;;  %v11025_v21 = vpop.permute.xlu0 %1700 }
 0x1d8   :  { %v848_v39 = vsel %vm600_vm4, %v16287_v62, %v16286_v9  ;;  %v832_v33 = vsel %vm600_vm4, %v16289_v3, %v831_v57  ;;  %v16292_v58 = vrot.slane %v16154_v23, 1  ;;  %v16293_v46 = vrot.slane %v10914_v47, 2  ;;  %16296 = vst [vmem:[#allocation83_spill] sm:$0xff] %v11025_v21  ;;  %v11027_v9 = vpop.permute.xlu1 %1276 }
 0x1d9   :  { %v834_v12 = vsel %vm600_vm4, %v831_v57, %v16290_v37  ;;  %v16294_v3 = vrot.slane %v10901_v16, 2  ;;  %v682_v51 = vmul.f32 %v10011_v31, %v661_v20  ;;  %v11022_v57 = vmul.f32 %v16110_v18, %v1330_v29  ;;  %16297 = vst [vmem:[#allocation89_spill] sm:$0xff] %v11027_v9 }
 0x1da   :  { %v1176_v62 = vsel %vm600_vm4, %v16292_v58, %v16291_v13  ;;  %v963_v41 = vrot.slane %v16295_v22, 7  ;;  %v874_v23 = vadd.f32 %v832_v33, %v676_v1  ;;  %v1242_v37 = vadd.f32 %v1225_v17, %v1091_v32  ;;  %v16298_v13 = vld [vmem:[#allocation32_spill] sm:$0xff]  ;;  %v16305_v1 = vld [vmem:[#allocation103_spill] sm:$0xff]  ;;  %v16306_v17 = vld [vmem:[#allocation121_spill] sm:$0xff] }
 0x1db   :  { %v1595_v8 = vsel %vm262_vm1, %v16294_v3, %v16293_v46  ;;  %v16299_v58 = vrot.slane %v16298_v13, 1  ;;  %v16301_v47 = vrot.slane %v16300_v4, 1  ;;  %v11035_v46 = vmul.f32 %v16110_v18, %v1325_v48  ;;  %v16307_v4 = vld [vmem:[#allocation30_spill] sm:$0xff] }
 0x1dc   :  { %v875_v20 = vadd.f32 %v834_v12, %v677_v25  ;;  %v16303_v29 = vrot.slane %v10969_v5, 1  ;;  %v16304_v3 = vrot.slane %v10755_v11, 1  ;;  %v1212_v9 = vmul.f32 %v1176_v62, %v16256_v61  ;;  %v16309_v25 = vld [vmem:[#allocation128_spill] sm:$0xff]  ;;  %v16314_v5 = vld [vmem:[#allocation117_spill] sm:$0xff] }
 0x1dd   :  { %v844_v19 = vsel %vm600_vm4, %v16301_v47, %v16299_v58  ;;  %16302 = vst [vmem:[#allocation108_spill] sm:$0xff] %v11035_v46  ;;  %v1334_v33 = vmul.f32 %v16306_v17, %v16305_v1  ;;  %v11045_v32 = vadd.f32 %v848_v39, %v684_v15  ;;  %v16308_v13 = vrot.slane %v16307_v4, 2  ;;  %v11060_v39 = vpop.permute.xlu1 %1308 }
 0x1de   :  { %v1379_v22 = vsel %vm600_vm4, %v16304_v3, %v16303_v29  ;;  %v1870_v12 = vmul.f32 %v16309_v25, %v10331_v59  ;;  %v16310_v11 = vrot.slane %v10798_v10, 2  ;;  %v880_v29 = vadd.f32 %v844_v19, %v682_v51  ;;  %v16311_v3 = vld [vmem:[#allocation29_spill] sm:$0xff] }
 0x1df   :  { %v1049_v47 = vsel %vm262_vm1, %v16308_v13, %v1048_v34  ;;  %v15711_v62 = vrot.slane %v11022_v57, 1  ;;  %v16312_v17 = vrot.slane %v16311_v3, 7  ;;  %v1423_v13 = vadd.f32 %v1379_v22, %v1242_v37  ;;  %v16319_v22 = vld [vmem:[#allocation78_spill] sm:$0xff] }
 0x1e0   :  { %v1051_v58 = vsel %vm262_vm1, %v1048_v34, %v16310_v11  ;;  %v11062_v4 = vadd.f32 %v1049_v47, %v874_v23  ;;  %v1507_v25 = vrot.slane %v16314_v5, 7  ;;  %v1233_v10 = vmul.f32 %v16178_v55, %v1212_v9  ;;  %v11077_v23 = vpop.permute.xlu0 %1993  ;;  %v16322_v9 = vld [vmem:[#allocation28_spill] sm:$0xff] }
 0x1e1   :  { %v964_v15 = vsel %vm933_vm3, %v16312_v17, %v963_v41  ;;  %v11066_v59 = vadd.f32 %v1051_v58, %v875_v20  ;;  %v16315_v19 = vrot.slane %v10961_v52, 2  ;;  %v16316_v34 = vrot.slane %v16248_v50, 2  ;;  %v16321_v20 = vld [vmem:[#allocation41_spill] sm:$0xff] }
 0x1e2   :  { %16313 = vst [vmem:[#allocation109_spill] sm:$0xff] %v11062_v4  ;;  %v11075_v11 = vmul.f32 %v16110_v18, %v1334_v33  ;;  %v16318_v37 = vrot.slane %v11008_v24, 2  ;;  %v16320_v47 = vrot.slane %v16319_v22, 2  ;;  %v11085_v58 = vmul.f32 %v16321_v20, %v1870_v12  ;;  %v16325_v22 = vld [vmem:[#allocation47_spill] sm:$0xff] }
 0x1e3   :  { %v1609_v51 = vsel %vm262_vm1, %v16316_v34, %v16315_v19  ;;  %v997_v3 = vmul.f32 %v964_v15, %v16322_v9  ;;  %v998_v50 = vmul.f32 %v963_v41, %v16305_v1  ;;  %v16323_v33 = vrot.slane %v10830_v14, 1  ;;  %v16324_v34 = vld [vmem:[#allocation35_spill] sm:$0xff] }
 0x1e4   :  { %16317 = vst [vmem:[#allocation48_spill] sm:$0xff] %v11075_v11  ;;  %v1061_v5 = vsel %vm262_vm1, %v16320_v47, %v16318_v37  ;;  %v630_v48 = vrot.slane %v16324_v34, 1  ;;  %v783_v4 = vmul.f32 %v16325_v22, %v16322_v9  ;;  %v11097_v37 = vadd.f32 %v1595_v8, %v1423_v13  ;;  %v16332_v13 = vld [vmem:[#allocation88_spill] sm:$0xff] }
 0x1e5   :  { %v1099_v17 = vadd.f32 %v1061_v5, %v880_v29  ;;  %v1393_v19 = vsel %vm600_vm4, %v16323_v33, %v15711_v62  ;;  %v16327_v12 = vrot.slane %v10710_v30, 1  ;;  %v16328_v15 = vrot.slane %v11035_v46, 1  ;;  %v16330_v29 = vld [vmem:[#allocation80_spill] sm:$0xff]  ;;  %v11111_v33 = vpop.permute.xlu1 %1688  ;;  %v16334_v62 = vld [vmem:[#allocation125_spill] sm:$0xff] }
 0x1e6   :  { %16326 = vst [vmem:[#allocation110_spill] sm:$0xff] %v11097_v37  ;;  %v1877_v47 = vmul.f32 %v16330_v29, %v10493_v44  ;;  %v16331_v14 = vrot.slane %v16229_v63, 7  ;;  %v16333_v30 = vrot.slane %v16332_v13, 7  ;;  %v11123_v63 = vmul.f32 %v16131_v54, %v997_v3  ;;  %v16341_v11 = vld [vmem:[#allocation36_spill] sm:$0xff]  ;;  %v16342_v37 = vld [vmem:[#allocation34_spill] sm:$0xff] }
 0x1e7   :  { %v11104_v41 = vsel %vm600_vm4, %v16328_v15, %v16327_v12  ;;  %v11113_v34 = vadd.f32 %v1233_v10, %v1099_v17  ;;  %v1430_v15 = vadd.f32 %v1393_v19, %v10752_v38  ;;  %v16335_v17 = vrot.slane %v16235_v45, 1  ;;  %v11135_v38 = vpop.permute.xlu0 %2011 }
 0x1e8   :  { %16329 = vst [vmem:[#allocation91_spill] sm:$0xff] %v11104_v41  ;;  %v1508_v5 = vsel %vm933_vm3, %v16331_v14, %v1507_v25  ;;  %v1510_v22 = vsel %vm933_vm3, %v1507_v25, %v16333_v30  ;;  %v11126_v14 = vmul.f32 %v16131_v54, %v998_v50  ;;  %v803_v25 = vmul.f32 %v10015_v36, %v783_v4  ;;  %v16336_v30 = vld [vmem:[#allocation67_spill] sm:$0xff] }
 0x1e9   :  { %v1544_v10 = vmul.f32 %v1508_v5, %v16266_v28  ;;  %v631_v8 = vsel %vm600_vm4, %v16335_v17, %v630_v48  ;;  %v1873_v12 = vmul.f32 %v16336_v30, %v16241_v56  ;;  %v11138_v19 = vmul.f32 %v16321_v20, %v1877_v47  ;;  %v16337_v50 = vld [vmem:[#allocation63_spill] sm:$0xff]  ;;  %v16340_v17 = vld [vmem:[#allocation114_spill] sm:$0xff]  ;;  %v11155_v1 = vpop.permute.xlu1 %1806 }
 0x1ea   :  { %v1545_v3 = vmul.f32 %v1510_v22, %v10684_v27  ;;  %v1879_v29 = vmul.f32 %v16337_v50, %v16256_v61  ;;  %v1874_v45 = vmul.f32 %v10737_v26, %v10429_v6  ;;  %v16338_v5 = vrot.slane %v16334_v62, 1 }
 0x1eb   :  { %v16339_v36 = vrot.slane %v16243_v49, 1  ;;  %v995_v30 = vmul.f32 %v16340_v17, %v16266_v28  ;;  %v1177_v47 = vrot.slane %v16341_v11, 1  ;;  %v1331_v22 = vmul.f32 %v16342_v37, %v16266_v28  ;;  %v16345_v11 = vld [vmem:[#allocation115_spill] sm:$0xff] }
 0x1ec   :  { %v11157_v50 = vadd.f32 %v1609_v51, %v1430_v15  ;;  %v664_v13 = vmul.f32 %v631_v8, %v10684_v27  ;;  %v665_v49 = vmul.f32 %v630_v48, %v16322_v9  ;;  %v11166_v17 = vmul.f32 %v16321_v20, %v1873_v12 }
 0x1ed   :  { %v1162_v4 = vsel %vm600_vm4, %v16339_v36, %v16338_v5  ;;  %v11163_v5 = vmul.f32 %v16245_v40, %v1544_v10  ;;  %v849_v36 = vrot.slane %v803_v25, 1  ;;  %v996_v37 = vmul.f32 %v16345_v11, %v10684_v27  ;;  %v16350_v25 = vld [vmem:[#allocation59_spill] sm:$0xff] }
 0x1ee   :  { %16343 = vst [vmem:[#allocation98_spill] sm:$0xff] %v11157_v50  ;;  %16344 = vst [vmem:[#allocation45_spill] sm:$0xff] %v11166_v17  ;;  %v11171_v46 = vmul.f32 %v16245_v40, %v1545_v3  ;;  %v11174_v51 = vmul.f32 %v16321_v20, %v1879_v29  ;;  %v1205_v8 = vmul.f32 %v1162_v4, %v10381_v53  ;;  %v16349_v10 = vrot.slane %v16277_v35, 1  ;;  %v11190_v29 = vpop.permute.xlu0 %2017  ;;  %v11192_v50 = vpop.permute.xlu1 %1814 }
 0x1ef   :  { %v11178_v48 = vmul.f32 %v16321_v20, %v1874_v45  ;;  %v1016_v15 = vmul.f32 %v16131_v54, %v995_v30  ;;  %v16351_v26 = vrot.slane %v16350_v25, 1  ;;  %v11188_v3 = vmul.f32 %v16110_v18, %v1331_v22  ;;  %v16355_v45 = vld [vmem:[#allocation99_spill] sm:$0xff] }
 0x1f0   :  { %16346 = vst [vmem:[#allocation101_spill] sm:$0xff] %v11171_v46  ;;  %16347 = vst [vmem:[#allocation50_spill] sm:$0xff] %v11174_v51  ;;  %v1178_v12 = vsel %vm600_vm4, %v16349_v10, %v1177_v47  ;;  %v685_v30 = vmul.f32 %v10011_v31, %v664_v13  ;;  %v686_v35 = vmul.f32 %v10011_v31, %v665_v49  ;;  %v1610_v10 = vrot.slane %v11163_v5, 2 }
 0x1f1   :  { %16348 = vst [vmem:[#allocation76_spill] sm:$0xff] %v11178_v48  ;;  %v1180_v11 = vsel %vm600_vm4, %v1177_v47, %v16351_v26  ;;  %16352 = vst [vmem:[#allocation129_spill] sm:$0xff] %v11188_v3  ;;  %v16353_v25 = vrot.slane %v10925_v7, 1  ;;  %v11204_v26 = vmul.f32 %v16131_v54, %v996_v37  ;;  %v1226_v9 = vmul.f32 %v16178_v55, %v1205_v8  ;;  %v16354_v37 = vld [vmem:[#allocation55_spill] sm:$0xff] }
 0x1f2   :  { %v1213_v4 = vmul.f32 %v1178_v12, %v16266_v28  ;;  %v1214_v13 = vmul.f32 %v1180_v11, %v10684_v27  ;;  %v1062_v7 = vrot.slane %v1016_v15, 2  ;;  %v11217_v54 = vadd.f32 %v849_v36, %v686_v35  ;;  %v11227_v5 = vpop.permute.xlu0 %1996 }
 0x1f3   :  { %v850_v47 = vsel %vm600_vm4, %v16353_v25, %v849_v36  ;;  %v11213_v25 = vpop.permute.xlu1 %1834  ;;  %v1703_v8 = vrot.slane %v16354_v37, 1  ;;  %v1702_v41 = vrot.slane %v16355_v45, 1  ;;  %v1064_v12 = vrot.slane %v11204_v26, 2  ;;  %16357 = vst [vmem:[#allocation56_spill] sm:$0xff] %v11227_v5 }
 0x1f4   :  { %v11215_v22 = vadd.f32 %v850_v47, %v685_v30  ;;  %v1717_v11 = vrot.slane %v10815_v42, 1  ;;  %v16356_v31 = vrot.slane %v10961_v52, 2  ;;  %v16358_v30 = vld [vmem:[#allocation102_spill] sm:$0xff]  ;;  %v16360_v36 = vrot.slane %v11178_v48, 1 }
 0x1f5   :  { %v11230_v47 = vadd.f32 %v1226_v9, %v16358_v30  ;;  %v16361_v35 = vrot.slane %v11166_v17, 1  ;;  %v1234_v42 = vmul.f32 %v16178_v55, %v1213_v4  ;;  %v1235_v52 = vmul.f32 %v16178_v55, %v1214_v13  ;;  %v16368_v13 = vld [vmem:[#allocation130_spill] sm:$0xff] }
 0x1f6   :  { %v1611_v15 = vsel %vm262_vm1, %v16356_v31, %v1610_v10  ;;  %v16363_v26 = vrot.slane %v11008_v24, 2  ;;  %v16364_v37 = vrot.slane %v11188_v3, 1  ;;  %v16365_v9 = vrot.slane %v11022_v57, 1  ;;  %v16374_v57 = vld [vmem:[#allocation61_spill] sm:$0xff] }
 0x1f7   :  { %16359 = vst [vmem:[#allocation107_spill] sm:$0xff] %v11230_v47  ;;  %v11237_v45 = vsel %vm600_vm4, %v16361_v35, %v16360_v36  ;;  %v16366_v48 = vrot.slane %v10901_v16, 2  ;;  %v16367_v36 = vrot.slane %v10396_v2, 2  ;;  %v11255_v35 = vpop.permute.xlu1 %1842  ;;  %v1704_v24 = vsel %vm600_vm4, %v1702_v41, %v1703_v8  ;;  %v16370_v16 = vld [vmem:[#allocation46_spill] sm:$0xff] }
 0x1f8   :  { %16362 = vst [vmem:[#allocation90_spill] sm:$0xff] %v11237_v45  ;;  %v1063_v31 = vsel %vm262_vm1, %v16363_v26, %v1062_v7  ;;  %v1395_v30 = vsel %vm600_vm4, %v16365_v9, %v16364_v37  ;;  %v1705_v26 = vrot.slane %v16368_v13, 1  ;;  %v1065_v37 = vsel %vm262_vm1, %v1062_v7, %v1064_v12  ;;  %v16369_v9 = vld [vmem:[#allocation75_spill] sm:$0xff]  ;;  %v16385_v47 = vld [vmem:[#allocation82_spill] sm:$0xff] }
 0x1f9   :  { %v1593_v4 = vsel %vm262_vm1, %v16367_v36, %v16366_v48  ;;  %v1100_v49 = vadd.f32 %v1063_v31, %v16369_v9  ;;  %v1750_v17 = vmul.f32 %v1702_v41, %v16370_v16  ;;  %v16371_v2 = vrot.slane %v11025_v21, 1  ;;  %v16372_v13 = vld [vmem:[#allocation71_spill] sm:$0xff]  ;;  %v535_v9 = vld [vmem:[%s9391_s25] sm:$0x3]  ;;  %s17039_s25 = sld [smem:[#allocation10_spill]] }
 0x1fa   :  { %v1101_v36 = vadd.f32 %v1065_v37, %v11045_v32  ;;  %v1431_v28 = vadd.f32 %v1395_v30, %v11113_v34  ;;  %v1493_v3 = vrot.slane %v16372_v13, 7  ;;  %v1751_v51 = vmul.f32 %v1704_v24, %v16374_v57  ;;  %v16377_v37 = vld [vmem:[#allocation87_spill] sm:$0xff]  ;;  %v16380_v24 = vld [vmem:[#allocation118_spill] sm:$0xff] }
 0x1fb   :  { %v1766_v48 = vmul.f32 0.0, %v16371_v2  ;;  %v11270_v45 = vadd.f32 %v1234_v42, %v1100_v49  ;;  %v11274_v7 = vadd.f32 %v1593_v4, %v10837_v0  ;;  %v1706_v32 = vsel %vm600_vm4, %v1703_v8, %v1705_v26  ;;  %v11287_v42 = vpop.permute.xlu1 %1479  ;;  %v16383_v8 = vld [vmem:[#allocation93_spill] sm:$0xff] }
 0x1fc   :  { %v11278_v16 = vadd.f32 %v1235_v52, %v1101_v36  ;;  %v16378_v30 = vrot.slane %v11227_v5, 7  ;;  %v16379_v2 = vrot.slane %v11077_v23, 7  ;;  %v1771_v0 = vmul.f32 %v16380_v24, %v1750_v17 }
 0x1fd   :  { %16373 = vst [vmem:[#allocation60_spill] sm:$0xff] %v11270_v45  ;;  %v16381_v4 = vrot.slane %v10921_v60, 1  ;;  %v11294_v52 = vmul.f32 %v16380_v24, %v1766_v48  ;;  %v1719_v36 = vrot.slane %v16383_v8, 1  ;;  %v11297_v41 = vadd.f32 %v1611_v15, %v1431_v28  ;;  %v16390_v48 = vld [vmem:[#allocation44_spill] sm:$0xff] }
 0x1fe   :  { %16376 = vst [vmem:[#allocation111_spill] sm:$0xff] %v11278_v16  ;;  %v2040_v49 = vsel %vm933_vm3, %v16379_v2, %v16378_v30  ;;  %v16386_v34 = vrot.slane %v16385_v47, 7  ;;  %v16387_v30 = vrot.slane %v11171_v46, 2  ;;  %v16389_v2 = vld [vmem:[#allocation62_spill] sm:$0xff]  ;;  %v16391_v15 = vld [vmem:[#allocation64_spill] sm:$0xff] }
 0x1ff   :  { %v1708_v13 = vsel %vm600_vm4, %v1705_v26, %v16381_v4  ;;  %16382 = vst [vmem:[#allocation104_spill] sm:$0xff] %v11294_v52  ;;  %16384 = vst [vmem:[#allocation105_spill] sm:$0xff] %v11297_v41  ;;  %v11308_v16 = vrot.slane %v535_v9, %v16389_v2  ;;  %v1772_v26 = vmul.f32 %v16380_v24, %v1751_v51  ;;  %v16393_v52 = vrot.slane %v16377_v37, 1  ;;  %v16396_v41 = vld [vmem:[#allocation40_spill] sm:$0xff]  ;;  %v16397_v51 = vld [vmem:[#allocation33_spill] sm:$0xff] }
 0x200   :  { %v1494_v21 = vsel %vm933_vm3, %v16386_v34, %v1493_v3  ;;  %v11305_v17 = vsel %vm262_vm1, %v1610_v10, %v16387_v30  ;;  %v1752_v4 = vmul.f32 %v1706_v32, %v16390_v48  ;;  %v2085_v28 = vmul.f32 %v2040_v49, %v10381_v53  ;;  %v16392_v34 = vld [vmem:[#allocation66_spill] sm:$0xff]  ;;  %v16394_v30 = vld [vmem:[#allocation49_spill] sm:$0xff]  ;;  %v11329_v49 = vpop.permute.xlu1 %2020 }
 0x201   :  { %16388 = vst [vmem:[#allocation120_spill] sm:$0xff] %v11305_v17  ;;  %v11314_v47 = vrot.slane %v535_v9, %v16391_v15  ;;  %v1753_v8 = vmul.f32 %v1708_v13, %v16392_v34  ;;  %v1718_v10 = vsel %vm600_vm4, %v16393_v52, %v1717_v11  ;;  %v16395_v46 = vrot.slane %v16394_v30, 7  ;;  %16398 = vst [vmem:[#allocation43_spill] sm:$0xff] %v11329_v49  ;;  %v8786_v52 = vld [vmem:[%s9396_s29] sm:$0xff]  }
 0x202   :  { %v2035_v60 = vrot.slane %v16396_v41, 7  ;;  %v11325_v5 = vadd.f32 %v1771_v0, %v16397_v51  ;;  %v1720_v32 = vsel %vm600_vm4, %v1717_v11, %v1719_v36  ;;  %v1537_v9 = vmul.f32 %v1494_v21, %v16241_v56  ;;  %v16401_v41 = vld [vmem:[#allocation38_spill] sm:$0xff] }
 0x203   :  { %v1496_v2 = vsel %vm933_vm3, %v1493_v3, %v16395_v46  ;;  %v16399_v13 = vrot.slane %v11123_v63, 2  ;;  %v16400_v30 = vrot.slane %v10861_v43, 1  ;;  %v11339_v3 = vld [vmem:[%s9386_s21 + $0x8] ss:$0 sm:$0xff]  ;;  %v2034_v0 = vrot.slane %v16401_v41, 7  ;;  %v16402_v21 = vld [vmem:[#allocation122_spill] sm:$0xff] }
 0x204   :  { %v1869_v11 = vmul.f32 %v11155_v1, %v16374_v57  ;;  %v1758_v51 = vmul.f32 %v1718_v10, %v16402_v21  ;;  %v1538_v37 = vmul.f32 %v1496_v2, %v10429_v6  ;;  %v11347_v17 = vmul.f32 %v11339_v3, %v2085_v28  ;;  %v8787_v10 = vld [vmem:[%s9396_s29 + $0x8] sm:$0xff]   ;;  %v16403_v28 = vld [vmem:[#allocation54_spill] sm:$0xff]  ;;  %v11367_v49 = vpop.permute.xlu1 %1150  ;;  %s17038_s21 = sld [smem:[#allocation11_spill]] }
 0x205   :  { %v1067_v15 = vsel %vm262_vm1, %v1064_v12, %v16399_v13  ;;  %v1722_v46 = vsel %vm600_vm4, %v1719_v36, %v16400_v30  ;;  %v15730_v12 = vmov 0.0   ;;  %v1773_v36 = vmul.f32 %v16380_v24, %v1752_v4  ;;  %16405 = vst [vmem:[#allocation106_spill] sm:$0xff] %v11367_v49 }
 0x206   :  { %8297 = vmatprep.subr.bf16.mxu1 %v15730_v12  ;;  %8317 = vmatprep.subr.bf16.mxu0 %v15730_v12  ;;  %v1774_v13 = vmul.f32 %v16380_v24, %v1753_v8  ;;  %v2049_v30 = vrot.slane %v11135_v38, 7  ;;  %v2036_v1 = vsel %vm933_vm3, %v2034_v0, %v2035_v60  ;;  %v1759_v2 = vmul.f32 %v1720_v32, %v10493_v44  ;;  %v16404_v38 = vld [vmem:[#allocation31_spill] sm:$0xff] }
 0x207   :  { %8298 = vmatpush3.bf16.msra.mxu1 %v8786_v52  ;;  %8313 = vmatprep.mubr.msk.bf16.mxu1 %vm9356_vm5, %v15730_v12  ;;  %v1760_v41 = vmul.f32 %v1722_v46, %v16403_v28  ;;  %v1558_v53 = vmul.f32 %v16245_v40, %v1537_v9  ;;  %v1789_v8 = vadd.f32 %v1772_v26, %v16404_v38  ;;  %v16406_v32 = vrot.slane %v11126_v14, 2  ;;  %v16409_v38 = vld [vmem:[#allocation92_spill] sm:$0xff] }
 0x208   :  { %8299 = vmatprep.subr.bf16.mxu1 %v15730_v12  ;;  %8333 = vmatprep.mubr.msk.bf16.mxu0 %vm9356_vm5, %v15730_v12  ;;  %v1889_v52 = vmul.f32 %v16321_v20, %v1869_v11  ;;  %v16407_v46 = vrot.slane %v11123_v63, 2  ;;  %v11375_v4 = vadd.f32 %v1067_v15, %v11215_v22  ;;  %v1779_v45 = vmul.f32 %v16380_v24, %v1758_v51  ;;  %v16410_v63 = vld [vmem:[#allocation37_spill] sm:$0xff] }
 0x209   :  { %v11379_v31 = vmul.f32 %v16245_v40, %v1538_v37  ;;  %v2083_v26 = vmul.f32 %v2036_v1, %v16390_v48  ;;  %v11384_v12 = vadd.f32 %v1773_v36, %v16409_v38  ;;  %v2082_v14 = vmul.f32 %v2034_v0, %v16374_v57  ;;  %v8788_v22 = vld [vmem:[%s9396_s29 + $0x10] sm:$0xff]  }
 0x20a   :  { %v1069_v9 = vsel %vm262_vm1, %v16407_v46, %v16406_v32  ;;  %16408 = vst [vmem:[#allocation39_spill] sm:$0xff] %v11375_v4  ;;  %v2047_v49 = vrot.slane %v16410_v63, 7  ;;  %v11393_v15 = vadd.f32 %v1774_v13, %v11274_v7  ;;  %v1780_v37 = vmul.f32 %v16380_v24, %v1759_v2  ;;  %v16412_v36 = vld [vmem:[#allocation72_spill] sm:$0xff] }
 0x20b   :  { %v11389_v32 = vadd.f32 %v1069_v9, %v11217_v54  ;;  %8300 = vmatpush3.bf16.msra.mxu1 %v8787_v10  ;;  %v1781_v51 = vmul.f32 %v16380_v24, %v1760_v41  ;;  %v1596_v1 = vrot.slane %v1558_v53, 2  ;;  %v16411_v46 = vmov 0.0   ;;  %v16413_v38 = vld [vmem:[#allocation84_spill] sm:$0xff]  ;;  %v16414_v10 = vld [vmem:[#allocation85_spill] sm:$0xff]  ;;  %v11410_v41 = vpop.permute.xlu1 %1312 }
 0x20c   :  { %8301 = vmatprep.subr.bf16.mxu1 %v16411_v46  ;;  %v2051_v63 = vrot.slane %v16413_v38, 7  ;;  %v1921_v11 = vrot.slane %v1889_v52, 1  ;;  %v1871_v54 = vmul.f32 %v11192_v50, %v16392_v34  ;;  %v11403_v9 = vadd.f32 %v1779_v45, %v16414_v10  ;;  %v16415_v53 = vld [vmem:[#allocation97_spill] sm:$0xff]  ;;  %v16418_v10 = vld [vmem:[#allocation95_spill] sm:$0xff] }
 0x20d   :  { %v1598_v7 = vrot.slane %v11379_v31, 2  ;;  %v11407_v13 = vmul.f32 %v11339_v3, %v2083_v26  ;;  %v1163_v2 = vrot.slane %v16415_v53, 1  ;;  %v2103_v0 = vmul.f32 %v11339_v3, %v2082_v14  ;;  %v8789_v26 = vld [vmem:[%s9396_s29 + $0x18] sm:$0xff]  }
 0x20e   :  { %v16416_v38 = vrot.slane %v11077_v23, 7  ;;  %v16417_v50 = vrot.slane %v16412_v36, 7  ;;  %v1876_v31 = vmul.f32 %v11213_v25, %v16402_v21  ;;  %v11423_v57 = vadd.f32 %v1780_v37, %v16418_v10  ;;  %v16419_v53 = vld [vmem:[#allocation81_spill] sm:$0xff]  ;;  %v16420_v23 = vld [vmem:[#allocation27_spill] sm:$0xff] }
 0x20f   :  { %8302 = vmatpush3.bf16.msra.mxu1 %v8788_v22  ;;  %v11426_v48 = vadd.f32 %v1781_v51, %v16419_v53  ;;  %v2050_v14 = vsel %vm933_vm3, %v2047_v49, %v2049_v30  ;;  %v16421_v4 = vrot.slane %v16420_v23, 2  ;;  %v2052_v25 = vsel %vm933_vm3, %v2049_v30, %v2051_v63  ;;  %v16423_v10 = vld [vmem:[#allocation53_spill] sm:$0xff] }
 0x210   :  { %v2038_v52 = vsel %vm933_vm3, %v2035_v60, %v16416_v38  ;;  %v2048_v45 = vsel %vm933_vm3, %v16417_v50, %v2047_v49  ;;  %8303 = vmatprep.subr.bf16.mxu1 %v16411_v46  ;;  %v16422_v22 = vrot.slane %v11085_v58, 1  ;;  %v1969_v38 = vadd.f32 %v1921_v11, %v11325_v5 }
 0x211   :  { %v11432_v60 = vsel %vm262_vm1, %v16421_v4, %v1596_v1  ;;  %v11441_v51 = vmul.f32 %v16321_v20, %v1871_v54  ;;  %v2084_v49 = vmul.f32 %v2038_v52, %v16392_v34  ;;  %v2089_v4 = vmul.f32 %v2048_v45, %v16402_v21  ;;  %v8790_v54 = vld [vmem:[%s9396_s29 + $0x20] sm:$0xff]  }
 0x212   :  { %v1923_v37 = vsel %vm600_vm4, %v1921_v11, %v16422_v22  ;;  %v16424_v53 = vrot.slane %v16423_v10, 1  ;;  %v2137_v30 = vrot.slane %v2103_v0, 2  ;;  %v2090_v36 = vmul.f32 %v2050_v14, %v10493_v44  ;;  %v11456_v11 = vpop.permute.xlu1 %1667 }
 0x213   :  { %v11451_v22 = vsel %vm262_vm1, %v1596_v1, %v1598_v7  ;;  %v11454_v5 = vmul.f32 %v16321_v20, %v1876_v31  ;;  %8304 = vmatpush3.bf16.msra.mxu1 %v8789_v26  ;;  %v16425_v52 = vrot.slane %v11190_v29, 7  ;;  %v2091_v10 = vmul.f32 %v2052_v25, %v16403_v28 }
 0x214   :  { %v1166_v23 = vsel %vm600_vm4, %v1163_v2, %v16424_v53  ;;  %v16426_v0 = vrot.slane %v16334_v62, 1  ;;  %v1970_v53 = vadd.f32 %v1923_v37, %v1789_v8  ;;  %8305 = vmatprep.subr.bf16.mxu1 %v16411_v46  ;;  %v2187_v31 = vadd.f32 %v2137_v30, %v1969_v38  ;;  %v16428_v62 = vld [vmem:[#allocation89_spill] sm:$0xff] }
 0x215   :  { %v2054_v45 = vsel %vm933_vm3, %v2051_v63, %v16425_v52  ;;  %v1207_v1 = vmul.f32 %v1166_v23, %v10429_v6  ;;  %v1878_v50 = vmul.f32 %v11255_v35, %v16403_v28  ;;  %v2105_v63 = vmul.f32 %v11339_v3, %v2084_v49  ;;  %v11485_v49 = vpop.permute.xlu0 %2026  ;;  %v16443_v28 = vld [vmem:[#allocation91_spill] sm:$0xff] }
 0x216   :  { %v1164_v14 = vsel %vm600_vm4, %v16426_v0, %v1163_v2  ;;  %v11473_v25 = vmul.f32 %v11339_v3, %v2089_v4  ;;  %v1324_v2 = vmul.f32 %v16428_v62, %v16241_v56  ;;  %v16429_v8 = vrot.slane %v11407_v13, 2  ;;  %v8791_v4 = vld [vmem:[%s9396_s29 + $0x28] sm:$0xff]  }
 0x217   :  { %v2111_v23 = vmul.f32 %v11339_v3, %v2090_v36  ;;  %v2092_v38 = vmul.f32 %v2054_v45, %v16256_v61  ;;  %v1332_v52 = vmul.f32 %v11060_v39, %v10684_v27  ;;  %8306 = vmatpush3.bf16.msra.mxu1 %v8790_v54  ;;  %v11489_v0 = vmul.f32 %v11339_v3, %v2091_v10  ;;  %v16430_v36 = vld [vmem:[#allocation123_spill] sm:$0xff] }
 0x218   :  { %16427 = vst [vmem:[#allocation100_spill] sm:$0xff] %v11473_v25  ;;  %v2139_v37 = vsel %vm262_vm1, %v2137_v30, %v16429_v8  ;;  %v1206_v62 = vmul.f32 %v1164_v14, %v16241_v56  ;;  %v11492_v30 = vpop.permute.xlu1 %1818  ;;  %v16431_v8 = vrot.slane %v16430_v36, 2  ;;  %8307 = vmatprep.subr.bf16.mxu1 %v16411_v46  ;;  %v1228_v39 = vmul.f32 %v16178_v55, %v1207_v1 }
 0x219   :  { %v2188_v26 = vadd.f32 %v2139_v37, %v1970_v53  ;;  %v2208_v54 = vmul.f32 %v11308_v16, %v2187_v31  ;;  %v16432_v10 = vrot.slane %v11441_v51, 1  ;;  %v16433_v35 = vrot.slane %v11085_v58, 1 }
 0x21a   :  { %v11497_v45 = vsel %vm262_vm1, %v1598_v7, %v16431_v8  ;;  %v1898_v53 = vmul.f32 %v16321_v20, %v1878_v50  ;;  %v2140_v37 = vrot.slane %v2105_v63, 2  ;;  %v1344_v7 = vmul.f32 %v16110_v18, %v1324_v2  ;;  %v11522_v63 = vpop.permute.xlu0 %2032 }
 0x21b   :  { %v1925_v14 = vsel %vm600_vm4, %v16433_v35, %v16432_v10  ;;  %v2152_v44 = vrot.slane %v2111_v23, 2  ;;  %v11512_v1 = vmul.f32 %v11339_v3, %v2092_v38  ;;  %v11515_v31 = vmul.f32 %v16110_v18, %v1332_v52  ;;  %8308 = vmatpush3.bf16.msra.mxu1 %v8791_v4  ;;  %v8792_v10 = vld [vmem:[%s9396_s29 + $0x30] sm:$0xff]  }
 0x21c   :  { %v16434_v58 = vrot.slane %v11138_v19, 1  ;;  %v16435_v35 = vrot.slane %v11454_v5, 1  ;;  %v2154_v2 = vrot.slane %v11489_v0, 2  ;;  %v1723_v23 = vrot.slane %v11111_v33, 1  ;;  %v11529_v52 = vpop.permute.xlu1 %1850  ;;  %8309 = vmatprep.subr.bf16.mxu1 %v16411_v46 }
 0x21d   :  { %v2209_v38 = vmul.f32 %v11308_v16, %v2188_v26  ;;  %v1971_v8 = vadd.f32 %v1925_v14, %v11384_v12  ;;  %v1227_v36 = vmul.f32 %v16178_v55, %v1206_v62  ;;  %v11535_v4 = vadd.f32 %v11314_v47, %v2208_v54 }
 0x21e   :  { %v1937_v50 = vsel %vm600_vm4, %v16435_v35, %v16434_v58  ;;  %v1245_v58 = vadd.f32 %v1228_v39, %v11066_v59  ;;  %v1938_v35 = vrot.slane %v1898_v53, 1  ;;  %v1380_v0 = vrot.slane %v1344_v7, 1 }
 0x21f   :  { %16436 = vst [vmem:[#allocation42_spill] sm:$0xff] %v11535_v4  ;;  %v16437_v33 = vrot.slane %v11407_v13, 2  ;;  %v1977_v12 = vadd.f32 %v1937_v50, %v11403_v9  ;;  %v16438_v62 = vrot.slane %v11473_v25, 2  ;;  %v16439_v39 = vrot.slane %v11347_v17, 2  ;;  %8310 = vmatpush3.bf16.msra.mxu1 %v8792_v10  ;;  %v8793_v13 = vld [vmem:[%s9396_s29 + $0x38] sm:$0xff]   ;;  %s17040_s29 = sld [smem:[#allocation13_spill]] }
 0x220   :  { %v16440_v53 = vrot.slane %v10861_v43, 1  ;;  %v11557_v7 = vadd.f32 %v11314_v47, %v2209_v38  ;;  %8311 = vmatprep.subr.bf16.mxu1 %v16411_v46  ;;  %v1426_v14 = vadd.f32 %v16443_v28, %v1245_v58  ;;  %v16444_v10 = vrot.slane %v11138_v19, 1  ;;  %v16450_v58 = vld [vmem:[#allocation108_spill] sm:$0xff] }
 0x221   :  { %v2141_v26 = vsel %vm262_vm1, %v16437_v33, %v2140_v37  ;;  %v2153_v59 = vsel %vm262_vm1, %v16438_v62, %v2152_v44  ;;  %v11550_v54 = vsel %vm262_vm1, %v2140_v37, %v16439_v39  ;;  %v2155_v33 = vsel %vm262_vm1, %v2152_v44, %v2154_v2  ;;  %v16442_v62 = vld [vmem:[#allocation109_spill] sm:$0xff]  ;;  %v11567_v39 = vpop.permute.xlu1 %1999  ;;  %v16447_v44 = vld [vmem:[#allocation50_spill] sm:$0xff] }
 0x222   :  { %v1724_v9 = vsel %vm600_vm4, %v16440_v53, %v1723_v23  ;;  %16441 = vst [vmem:[#allocation68_spill] sm:$0xff] %v11557_v7  ;;  %v2189_v50 = vadd.f32 %v2141_v26, %v1971_v8  ;;  %v1244_v21 = vadd.f32 %v1227_v36, %v16442_v62  ;;  %v7889_v37 = vmul.f32 -1.442695, %v11535_v4  ;;  %v16445_v53 = vld [vmem:[#allocation96_spill] sm:$0xff]  ;;  %v16453_v4 = vld [vmem:[#allocation129_spill] sm:$0xff] }
 0x223   :  { %v1939_v43 = vsel %vm600_vm4, %v16444_v10, %v1938_v35  ;;  %v16446_v38 = vrot.slane %v16445_v53, 1  ;;  %v2195_v26 = vadd.f32 %v2153_v59, %v1977_v12  ;;  %v16448_v34 = vrot.slane %v16447_v44, 1  ;;  %8312 = vmatpush3.bf16.msra.mxu1 %v8793_v13  ;;  %v16455_v59 = vld [vmem:[#allocation77_spill] sm:$0xff]  ;;  %v16458_v13 = vld [vmem:[#allocation107_spill] sm:$0xff] }
 0x224   :  { %v16449_v36 = vrot.slane %v11522_v63, 7  ;;  %v16451_v62 = vrot.slane %v16450_v58, 1  ;;  %v16452_v10 = vrot.slane %v11515_v31, 1  ;;  %v16454_v25 = vrot.slane %v16453_v4, 1 }
 0x225   :  { %v1381_v8 = vsel %vm600_vm4, %v16446_v38, %v1380_v0  ;;  %v1941_v46 = vsel %vm600_vm4, %v1938_v35, %v16448_v34  ;;  %v1761_v38 = vmul.f32 %v1724_v9, %v16256_v61  ;;  %v1511_v12 = vrot.slane %v11287_v42, 7 }
 0x226   :  { %v2098_v28 = vmul.f32 0.0, %v16449_v36  ;;  %v1383_v19 = vsel %vm600_vm4, %v1380_v0, %v16451_v62  ;;  %v1397_v53 = vsel %vm600_vm4, %v16454_v25, %v16452_v10  ;;  %v16456_v34 = vrot.slane %v16455_v59, 1  ;;  %v11597_v62 = vpop.permute.xlu1 %2023 }
 0x227   :  { %v7890_v36 = vmul.f32 -1.442695, %v11557_v7  ;;  %v2210_v58 = vmul.f32 %v11308_v16, %v2189_v50  ;;  %v1978_v0 = vadd.f32 %v1939_v43, %v11423_v57  ;;  %9002 = vpow2.f32 %v7889_v37  ;;  %v16459_v57 = vld [vmem:[#allocation60_spill] sm:$0xff] }
 0x228   :  { %v1726_v35 = vsel %vm600_vm4, %v1723_v23, %v16456_v34  ;;  %v1979_v4 = vadd.f32 %v1941_v46, %v11426_v48  ;;  %v16457_v25 = vrot.slane %v11512_v1, 2  ;;  %v11600_v42 = vadd.f32 %v11497_v45, %v1426_v14  ;;  %v16460_v48 = vld [vmem:[#allocation127_spill] sm:$0xff] }
 0x229   :  { %v1424_v23 = vadd.f32 %v1381_v8, %v16458_v13  ;;  %v1425_v10 = vadd.f32 %v1383_v19, %v1244_v21  ;;  %v2216_v34 = vmul.f32 %v11308_v16, %v2195_v26  ;;  %v11605_v50 = vmul.f32 %v11339_v3, %v2098_v28  ;;  %v16464_v26 = vld [vmem:[#allocation94_spill] sm:$0xff]  ;;  %v16467_v13 = vld [vmem:[#allocation52_spill] sm:$0xff] }
 0x22a   :  { %v2157_v9 = vsel %vm262_vm1, %v2154_v2, %v16457_v25  ;;  %v1432_v37 = vadd.f32 %v1397_v53, %v16459_v57  ;;  %v1762_v46 = vmul.f32 %v1726_v35, %v16460_v48  ;;  %v1782_v43 = vmul.f32 %v16380_v24, %v1761_v38  ;;  %v16461_v2 = vld [vmem:[#allocation88_spill] sm:$0xff]  ;;  %v16466_v53 = vld [vmem:[#allocation43_spill] sm:$0xff] }
 0x22b   :  { %v16462_v25 = vrot.slane %v16461_v2, 7  ;;  %9004 = vpow2.f32 %v7890_v36  ;;  %v11614_v45 = vadd.f32 %v11314_v47, %v2210_v58  ;;  %v2196_v21 = vadd.f32 %v2155_v33, %v1978_v0  ;;  %v16469_v58 = vld [vmem:[#allocation28_spill] sm:$0xff] }
 0x22c   :  { %v15743_v14 = vrot.slane %v11567_v39, 7  ;;  %v2197_v8 = vadd.f32 %v2157_v9, %v1979_v4  ;;  %v16465_v28 = vrot.slane %v16464_v26, 7  ;;  %v2055_v35 = vrot.slane %v16466_v53, 7  ;;  %v11631_v4 = vpop.permute.xlu1 %1670 }
 0x22d   :  { %v1512_v61 = vsel %vm933_vm3, %v16462_v25, %v1511_v12  ;;  %16463 = vst [vmem:[#allocation116_spill] sm:$0xff] %v11614_v45  ;;  %v1872_v38 = vmul.f32 %v11492_v30, %v16467_v13  ;;  %v11624_v57 = vadd.f32 %v11432_v60, %v1424_v23  ;;  %v11627_v36 = vadd.f32 %v11314_v47, %v2216_v34  ;;  %v16471_v23 = vld [vmem:[#allocation98_spill] sm:$0xff] }
 0x22e   :  { %v1514_v19 = vsel %vm933_vm3, %v1511_v12, %v16465_v28  ;;  %v1546_v33 = vmul.f32 %v1512_v61, %v16469_v58  ;;  %v1709_v0 = vrot.slane %v11456_v11, 1  ;;  %v11634_v9 = vadd.f32 %v11451_v22, %v1425_v10  ;;  %v16470_v12 = vld [vmem:[#allocation120_spill] sm:$0xff]  ;;  %v16472_v61 = vld [vmem:[#allocation103_spill] sm:$0xff] }
 0x22f   :  { %16468 = vst [vmem:[#allocation79_spill] sm:$0xff] %v11627_v36  ;;  %v11637_v2 = vadd.f32 %v16470_v12, %v1432_v37  ;;  %v1783_v30 = vmul.f32 %v16380_v24, %v1762_v46  ;;  %v11642_v25 = vadd.f32 %v1782_v43, %v16471_v23  ;;  %v2217_v34 = vmul.f32 %v11308_v16, %v2196_v21  ;;  %v16473_v11 = vld [vmem:[#allocation56_spill] sm:$0xff]  ;;  %v16476_v12 = vld [vmem:[#allocation57_spill] sm:$0xff] }
 0x230   :  { %v1547_v26 = vmul.f32 %v1514_v19, %v16472_v61  ;;  %v16474_v28 = vrot.slane %v16473_v11, 7  ;;  %v7891_v10 = vmul.f32 -1.442695, %v11614_v45  ;;  %v2218_v37 = vmul.f32 %v11308_v16, %v2197_v8  ;;  %v11666_v60 = vpop.permute.xlu1 %1694 }
 0x231   :  { %v16475_v46 = vrot.slane %v11190_v29, 7  ;;  %v1892_v43 = vmul.f32 %v16321_v20, %v1872_v38  ;;  %v7897_v21 = vmul.f32 -1.442695, %v11627_v36  ;;  %v11659_v19 = vmul.f32 %v16245_v40, %v1546_v33  ;;  %v9003_v8 = vpop.eup %9002  ;;  %v16478_v29 = vld [vmem:[#allocation106_spill] sm:$0xff]  ;;  %v16479_v33 = vld [vmem:[#allocation105_spill] sm:$0xff] }
 0x232   :  { %v2042_v22 = vsel %vm933_vm3, %v16474_v28, %v15743_v14  ;;  %v16477_v23 = vrot.slane %v16476_v12, 1  ;;  %v1880_v28 = vmul.f32 %v11529_v52, %v16460_v48  ;;  %v1181_v14 = vrot.slane %v16478_v29, 1 }
 0x233   :  { %v2056_v53 = vsel %vm933_vm3, %v16475_v46, %v2055_v35  ;;  %v2086_v46 = vmul.f32 %v2042_v22, %v16241_v56  ;;  %v2057_v38 = vrot.slane %v11597_v62, 7  ;;  %v11673_v7 = vadd.f32 %v1783_v30, %v16479_v33 }
 0x234   :  { %v1710_v11 = vsel %vm600_vm4, %v16477_v23, %v1709_v0  ;;  %v11676_v12 = vadd.f32 %v11314_v47, %v2217_v34  ;;  %v11679_v23 = vmul.f32 %v16245_v40, %v1547_v26  ;;  %v2093_v52 = vmul.f32 %v2056_v53, %v16460_v48  ;;  %v1855_v53 = vpop.permute.xlu1 %1854 }
 0x235   :  { %9006 = vpow2.f32 %v7891_v10  ;;  %v11683_v29 = vadd.f32 %v11314_v47, %v2218_v37  ;;  %v1754_v22 = vmul.f32 %v1710_v11, %v16467_v13  ;;  %v1926_v62 = vrot.slane %v1892_v43, 1  ;;  %v9005_v45 = vpop.eup %9004 }
 0x236   :  { %v2297_v36 = vadd.f32 1.0, %v9003_v8  ;;  %9008 = vpow2.f32 %v7897_v21  ;;  %v1900_v34 = vmul.f32 %v16321_v20, %v1880_v28  ;;  %v1216_v33 = vmul.f32 %v1181_v14, %v16472_v61 }
 0x237   :  { %16480 = vst [vmem:[#allocation113_spill] sm:$0xff] %v11683_v29  ;;  %v11690_v40 = vmul.f32 %v11339_v3, %v2086_v46  ;;  %v2058_v26 = vsel %vm933_vm3, %v2055_v35, %v2057_v38  ;;  %v16481_v10 = vrot.slane %v11631_v4, 1  ;;  %v7898_v43 = vmul.f32 -1.442695, %v11676_v12 }
 0x238   :  { %v11699_v11 = vmul.f32 %v11339_v3, %v2093_v52  ;;  %v1881_v28 = vmul.f32 %v1855_v53, %v10684_v27  ;;  %v2298_v8 = vadd.f32 1.0, %v9005_v45  ;;  %v7899_v46 = vmul.f32 -1.442695, %v11683_v29  ;;  %v16484_v53 = vld [vmem:[#allocation101_spill] sm:$0xff] }
 0x239   :  { %v1712_v37 = vsel %vm600_vm4, %v1709_v0, %v16481_v10  ;;  %v1775_v30 = vmul.f32 %v16380_v24, %v1754_v22  ;;  %v16482_v35 = vrot.slane %v11441_v51, 1  ;;  %v1942_v0 = vrot.slane %v1900_v34, 1 }
 0x23a   :  { %v2094_v10 = vmul.f32 %v2058_v26, %v10684_v27  ;;  %v1755_v13 = vmul.f32 %v1712_v37, %v16241_v56  ;;  %v11710_v21 = vmul.f32 %v16321_v20, %v1881_v28  ;;  %9010 = vrcp.f32 %v2297_v36  ;;  %v16486_v26 = vld [vmem:[#allocation59_spill] sm:$0xff]  ;;  %v11728_v28 = vpop.permute.xlu1 %2002 }
 0x23b   :  { %v1927_v48 = vsel %vm600_vm4, %v16482_v35, %v1926_v62  ;;  %v1237_v52 = vmul.f32 %v16178_v55, %v1216_v33  ;;  %v16483_v45 = vrot.slane %v11659_v19, 2  ;;  %v16485_v29 = vrot.slane %v16484_v53, 2  ;;  %v16488_v53 = vld [vmem:[#allocation45_spill] sm:$0xff] }
 0x23c   :  { %v2144_v51 = vrot.slane %v11690_v40, 2  ;;  %v2158_v34 = vrot.slane %v11699_v11, 2  ;;  %v16487_v35 = vrot.slane %v16486_v26, 1  ;;  %v1333_v36 = vmul.f32 %v11410_v41, %v16469_v58 }
 0x23d   :  { %v11718_v22 = vsel %vm262_vm1, %v16485_v29, %v16483_v45  ;;  %9012 = vrcp.f32 %v2298_v8  ;;  %v16489_v56 = vrot.slane %v16488_v53, 1  ;;  %v1972_v40 = vadd.f32 %v1927_v48, %v11393_v15  ;;  %v16490_v45 = vld [vmem:[#allocation110_spill] sm:$0xff] }
 0x23e   :  { %v1182_v37 = vsel %vm600_vm4, %v16487_v35, %v1181_v14  ;;  %v15751_v11 = vrot.slane %v11728_v28, 7  ;;  %v1792_v26 = vadd.f32 %v1775_v30, %v16490_v45  ;;  %v16491_v14 = vrot.slane %v16447_v44, 1 }
 0x23f   :  { %v1929_v29 = vsel %vm600_vm4, %v1926_v62, %v16489_v56  ;;  %v11740_v41 = vmul.f32 %v11339_v3, %v2094_v10  ;;  %v1776_v33 = vmul.f32 %v16380_v24, %v1755_v13  ;;  %v9007_v8 = vpop.eup %9006  ;;  %v1215_v53 = vmul.f32 %v1182_v37, %v16469_v58 }
 0x240   :  { %v1943_v35 = vsel %vm600_vm4, %v16491_v14, %v1942_v0  ;;  %v1254_v56 = vadd.f32 %v1237_v52, %v11389_v32  ;;  %v16492_v15 = vrot.slane %v11347_v17, 2  ;;  %v16493_v44 = vrot.slane %v11567_v39, 7  ;;  %v9009_v30 = vpop.eup %9008 }
 0x241   :  { %v1353_v10 = vmul.f32 %v16110_v18, %v1333_v36  ;;  %v1973_v45 = vadd.f32 %v1929_v29, %v1792_v26  ;;  %v16494_v13 = vrot.slane %v11710_v21, 1  ;;  %v2190_v17 = vadd.f32 %v11550_v54, %v1972_v40  ;;  %v16497_v26 = vld [vmem:[#allocation48_spill] sm:$0xff] }
 0x242   :  { %v2145_v48 = vsel %vm262_vm1, %v16492_v15, %v2144_v51  ;;  %v2044_v62 = vsel %vm933_vm3, %v16493_v44, %v15751_v11  ;;  %v1980_v52 = vadd.f32 %v1943_v35, %v11642_v25  ;;  %v16495_v14 = vrot.slane %v11485_v49, 7  ;;  %v1674_v44 = vpop.permute.xlu1 %1673 }
 0x243   :  { %v1945_v37 = vsel %vm600_vm4, %v1942_v0, %v16494_v13  ;;  %v2087_v32 = vmul.f32 %v2044_v62, %v10429_v6  ;;  %v1727_v15 = vrot.slane %v11666_v60, 1  ;;  %v2191_v11 = vadd.f32 %v2145_v48, %v1973_v45 }
 0x244   :  { %v2060_v39 = vsel %vm933_vm3, %v2057_v38, %v16495_v14  ;;  %v2160_v18 = vrot.slane %v11740_v41, 2  ;;  %v1793_v36 = vadd.f32 %v1776_v33, %v11624_v57  ;;  %v2299_v29 = vadd.f32 1.0, %v9007_v8  ;;  %v11777_v57 = vpop.eup %9010 }
 0x245   :  { %v11767_v0 = vmul.f32 %v11339_v3, %v2087_v32  ;;  %9014 = vpow2.f32 %v7898_v43  ;;  %v16496_v54 = vrot.slane %v11512_v1, 2  ;;  %v1981_v40 = vadd.f32 %v1945_v37, %v11673_v7 }
 0x246   :  { %v1236_v38 = vmul.f32 %v16178_v55, %v1215_v53  ;;  %v16498_v35 = vrot.slane %v16497_v26, 1  ;;  %v1398_v62 = vrot.slane %v1353_v10, 1  ;;  %v2211_v33 = vmul.f32 %v11308_v16, %v2190_v17  ;;  %v11786_v55 = vpop.permute.xlu1 %1697 }
 0x247   :  { %v2159_v25 = vsel %vm262_vm1, %v16496_v54, %v2158_v34  ;;  %v2146_v45 = vrot.slane %v11767_v0, 2  ;;  %v2095_v43 = vmul.f32 %v2060_v39, %v16469_v58  ;;  %v16499_v1 = vrot.slane %v16455_v59, 1  ;;  %v11796_v32 = vpop.eup %9012 }
 0x248   :  { %v1435_v48 = vadd.f32 %v16498_v35, %v1254_v56  ;;  %v2198_v8 = vadd.f32 %v2159_v25, %v1980_v52  ;;  %v2212_v53 = vmul.f32 %v11308_v16, %v2191_v11  ;;  %v16500_v56 = vld [vmem:[#allocation90_spill] sm:$0xff]  ;;  %v2161_v13 = vsel %vm262_vm1, %v2158_v34, %v2160_v18 }
 0x249   :  { %v1728_v7 = vsel %vm600_vm4, %v16499_v1, %v1727_v15  ;;  %v1974_v10 = vadd.f32 %v16500_v56, %v1793_v36  ;;  %v2147_v37 = vsel %vm262_vm1, %v2144_v51, %v2146_v45  ;;  %v2305_v17 = vadd.f32 1.0, %v9009_v30  ;;  %v16501_v52 = vld [vmem:[#allocation58_spill] sm:$0xff]  ;;  %v16504_v36 = vld [vmem:[#allocation39_spill] sm:$0xff] }
 0x24a   :  { %9016 = vpow2.f32 %v7899_v46  ;;  %v2199_v59 = vadd.f32 %v2161_v13, %v1981_v40  ;;  %v16502_v14 = vrot.slane %v16501_v52, 2  ;;  %v16503_v39 = vrot.slane %v11679_v23, 2  ;;  %v16510_v23 = vld [vmem:[#allocation72_spill] sm:$0xff] }
 0x24b   :  { %9018 = vrcp.f32 %v2299_v29  ;;  %v1253_v54 = vadd.f32 %v1236_v38, %v16504_v36  ;;  %v1763_v34 = vmul.f32 %v1728_v7, %v10684_v27  ;;  %v2192_v25 = vadd.f32 %v2147_v37, %v1974_v10 }
 0x24c   :  { %v1619_v11 = vsel %vm262_vm1, %v16503_v39, %v16502_v14  ;;  %v16505_v35 = vrot.slane %v11515_v31, 1  ;;  %v16506_v30 = vrot.slane %v16497_v26, 1  ;;  %v2219_v40 = vmul.f32 %v11308_v16, %v2198_v8  ;;  %v1859_v31 = vpop.permute.xlu1 %1858  ;;  %v16509_v8 = vld [vmem:[#allocation111_spill] sm:$0xff] }
 0x24d   :  { %v1653_v1 = vadd.f32 %v1619_v11, %v1435_v48  ;;  %v11813_v56 = vadd.f32 %v11314_v47, %v2211_v33  ;;  %v11816_v29 = vadd.f32 %v11314_v47, %v2212_v53  ;;  %v11819_v38 = vmul.f32 %v11339_v3, %v2095_v43 }
 0x24e   :  { %v1399_v51 = vsel %vm600_vm4, %v16505_v35, %v1398_v62  ;;  %v1401_v46 = vsel %vm600_vm4, %v1398_v62, %v16506_v30  ;;  %v1713_v7 = vrot.slane %v1674_v44, 1  ;;  %9020 = vrcp.f32 %v2305_v17 }
 0x24f   :  { %v16507_v10 = vmov %v16503_v39  ;;  %v16508_v26 = vrot.slane %v11659_v19, 2  ;;  %v2220_v48 = vmul.f32 %v11308_v16, %v2199_v59  ;;  %v1882_v33 = vmul.f32 %v1859_v31, %v16469_v58  ;;  %v9015_v44 = vpop.eup %9014  ;;  %v16513_v39 = vld [vmem:[#allocation104_spill] sm:$0xff] }
 0x250   :  { %v1433_v13 = vadd.f32 %v1399_v51, %v16509_v8  ;;  %v1434_v53 = vadd.f32 %v1401_v46, %v1253_v54  ;;  %v1784_v37 = vmul.f32 %v16380_v24, %v1763_v34  ;;  %v2213_v43 = vmul.f32 %v11308_v16, %v2192_v25  ;;  %v16515_v51 = vld [vmem:[#allocation87_spill] sm:$0xff]  ;;  %v2030_v31 = vpop.permute.xlu1 %2029 }
 0x251   :  { %v1617_v62 = vsel %vm262_vm1, %v16508_v26, %v16507_v10  ;;  %v11832_v17 = vadd.f32 %v11314_v47, %v2219_v40  ;;  %v16511_v52 = vrot.slane %v16510_v23, 7  ;;  %v16512_v19 = vrot.slane %v11728_v28, 7  ;;  %v16517_v26 = vld [vmem:[#allocation73_spill] sm:$0xff] }
 0x252   :  { %v11840_v59 = vmul.f32 %v16321_v20, %v1882_v33  ;;  %v11843_v11 = vadd.f32 %v16513_v39, %v1653_v1  ;;  %v7892_v36 = vmul.f32 -1.442695, %v11813_v56  ;;  %v7893_v54 = vmul.f32 -1.442695, %v11816_v29 }
 0x253   :  { %v2046_v14 = vsel %vm933_vm3, %v16512_v19, %v16511_v52  ;;  %v2162_v34 = vrot.slane %v11819_v38, 2  ;;  %v16514_v25 = vrot.slane %v11631_v4, 1  ;;  %v11852_v28 = vadd.f32 %v11314_v47, %v2220_v48 }
 0x254   :  { %v16516_v30 = vrot.slane %v16515_v51, 1  ;;  %v1729_v40 = vrot.slane %v11786_v55, 1  ;;  %v1946_v1 = vrot.slane %v11840_v59, 1  ;;  %v1801_v10 = vadd.f32 %v1784_v37, %v11637_v2  ;;  %v11864_v23 = vpop.eup %9016  ;;  %v1831_v51 = vpop.permute.xlu1 %1830 }
 0x255   :  { %v1714_v35 = vsel %vm600_vm4, %v16514_v25, %v1713_v7  ;;  %v2088_v33 = vmul.f32 %v2046_v14, %v16517_v26  ;;  %v11862_v4 = vadd.f32 %v11314_v47, %v2213_v43  ;;  %v2061_v8 = vrot.slane %v2030_v31, 7  ;;  %v11874_v37 = vpop.eup %9018 }
 0x256   :  { %v1716_v46 = vsel %vm600_vm4, %v1713_v7, %v16516_v30  ;;  %v1651_v48 = vadd.f32 %v11718_v22, %v1433_v13  ;;  %v7900_v52 = vmul.f32 -1.442695, %v11832_v17  ;;  %v1756_v7 = vmul.f32 %v1714_v35, %v10429_v6 }
 0x257   :  { %v16518_v55 = vrot.slane %v11710_v21, 1  ;;  %9022 = vpow2.f32 %v7892_v36  ;;  %v1757_v43 = vmul.f32 %v1716_v46, %v16517_v26  ;;  %v16519_v14 = vrot.slane %v11485_v49, 7  ;;  %v16521_v46 = vld [vmem:[#allocation83_spill] sm:$0xff] }
 0x258   :  { %9024 = vpow2.f32 %v7893_v54  ;;  %v7901_v13 = vmul.f32 -1.442695, %v11852_v28  ;;  %v1730_v39 = vsel %vm600_vm4, %v1727_v15, %v1729_v40  ;;  %v2163_v21 = vsel %vm262_vm1, %v2160_v18, %v2162_v34  ;;  %v11894_v30 = vpop.eup %9020 }
 0x259   :  { %v1947_v2 = vsel %vm600_vm4, %v16518_v55, %v1946_v1  ;;  %v2062_v22 = vsel %vm933_vm3, %v16519_v14, %v2061_v8  ;;  %v2109_v36 = vmul.f32 %v11339_v3, %v2088_v33  ;;  %v7894_v25 = vmul.f32 -1.442695, %v11862_v4 }
 0x25a   :  { %v1982_v19 = vadd.f32 %v1947_v2, %v1801_v10  ;;  %v16520_v35 = vrot.slane %v11522_v63, 7  ;;  %9026 = vpow2.f32 %v7900_v52  ;;  %v1777_v60 = vmul.f32 %v16380_v24, %v1756_v7 }
 0x25b   :  { %v2096_v15 = vmul.f32 %v2062_v22, %v16472_v61  ;;  %v1875_v41 = vmul.f32 %v1831_v51, %v16517_v26  ;;  %v1778_v18 = vmul.f32 %v16380_v24, %v1757_v43  ;;  %v16522_v31 = vrot.slane %v16521_v46, 1  ;;  %v1863_v43 = vpop.permute.xlu1 %1862 }
 0x25c   :  { %v2200_v49 = vadd.f32 %v2163_v21, %v1982_v19  ;;  %v2064_v54 = vsel %vm933_vm3, %v2061_v8, %v16520_v35  ;;  %v1764_v63 = vmul.f32 %v1730_v39, %v16469_v58  ;;  %v1652_v8 = vadd.f32 %v1617_v62, %v1434_v53 }
 0x25d   :  { %v1732_v10 = vsel %vm600_vm4, %v1729_v40, %v16522_v31  ;;  %9028 = vpow2.f32 %v7901_v13  ;;  %v2097_v55 = vmul.f32 0.0, %v2064_v54  ;;  %v1895_v52 = vmul.f32 %v16321_v20, %v1875_v41  ;;  %v16526_v41 = vld [vmem:[#allocation100_spill] sm:$0xff] }
 0x25e   :  { %v2221_v33 = vmul.f32 %v11308_v16, %v2200_v49  ;;  %v2306_v7 = vadd.f32 1.0, %v9015_v44  ;;  %v2148_v2 = vrot.slane %v2109_v36, 2  ;;  %9030 = vpow2.f32 %v7894_v25  ;;  %v16523_v36 = vld [vmem:[#allocation76_spill] sm:$0xff] }
 0x25f   :  { %v1765_v14 = vmul.f32 %v1732_v10, %v16472_v61  ;;  %v2117_v40 = vmul.f32 %v11339_v3, %v2096_v15  ;;  %v1932_v22 = vrot.slane %v1895_v52, 1  ;;  %v1883_v39 = vmul.f32 %v1863_v43, %v16472_v61  ;;  %v1867_v46 = vpop.permute.xlu1 %1866 }
 0x260   :  { %v11907_v19 = vadd.f32 %v11314_v47, %v2221_v33  ;;  %v1794_v62 = vadd.f32 %v1777_v60, %v11634_v9  ;;  %v1795_v53 = vadd.f32 %v1778_v18, %v11600_v42  ;;  %v1785_v13 = vmul.f32 %v16380_v24, %v1764_v63 }
 0x261   :  { %v2118_v21 = vmul.f32 %v11339_v3, %v2097_v55  ;;  %v16524_v25 = vrot.slane %v16523_v36, 1  ;;  %v16525_v35 = vrot.slane %v11454_v5, 1  ;;  %v1903_v51 = vmul.f32 %v16321_v20, %v1883_v39  ;;  %v9023_v15 = vpop.eup %9022 }
 0x262   :  { %v7902_v44 = vmul.f32 -1.442695, %v11907_v19  ;;  %v2149_v42 = vsel %vm262_vm1, %v2146_v45, %v2148_v2  ;;  %v16527_v18 = vrot.slane %v16526_v41, 2  ;;  %v9025_v31 = vpop.eup %9024  ;;  %v1786_v10 = vmul.f32 %v16380_v24, %v1765_v14 }
 0x263   :  { %v1933_v49 = vsel %vm600_vm4, %v16524_v25, %v1932_v22  ;;  %v1935_v54 = vsel %vm600_vm4, %v1932_v22, %v16525_v35  ;;  %v2164_v5 = vrot.slane %v2117_v40, 2  ;;  %v1948_v63 = vrot.slane %v1903_v51, 1 }
 0x264   :  { %v1975_v9 = vadd.f32 %v1933_v49, %v1794_v62  ;;  %v1976_v60 = vadd.f32 %v1935_v54, %v1795_v53  ;;  %v2151_v3 = vsel %vm262_vm1, %v2148_v2, %v16527_v18  ;;  %v1884_v33 = vmul.f32 0.0, %v1867_v46  ;;  %v9027_v22 = vpop.eup %9026 }
 0x265   :  { %v1802_v55 = vadd.f32 %v1785_v13, %v1651_v48  ;;  %9032 = vpow2.f32 %v7902_v44  ;;  %v2300_v39 = vadd.f32 1.0, %v9023_v15  ;;  %v2166_v0 = vrot.slane %v2118_v21, 2 }
 0x266   :  { %v2193_v52 = vadd.f32 %v2149_v42, %v1975_v9  ;;  %v2194_v43 = vadd.f32 %v2151_v3, %v1976_v60  ;;  %v1949_v45 = vsel %vm600_vm4, %v1946_v1, %v1948_v63  ;;  %v1904_v2 = vmul.f32 %v16321_v20, %v1884_v33 }
 0x267   :  { %v2307_v62 = vadd.f32 1.0, %v11864_v23  ;;  %v1983_v40 = vadd.f32 %v1949_v45, %v1802_v55  ;;  %v9029_v48 = vpop.eup %9028  ;;  %9034 = vrcp.f32 %v2306_v7  ;;  %v2301_v53 = vadd.f32 1.0, %v9025_v31  ;;  %v16531_v45 = vld [vmem:[#allocation68_spill] sm:$0xff] }
 0x268   :  { %v2214_v24 = vmul.f32 %v11308_v16, %v2193_v52  ;;  %v2215_v14 = vmul.f32 %v11308_v16, %v2194_v43  ;;  %v2165_v13 = vsel %vm262_vm1, %v2162_v34, %v2164_v5  ;;  %v1950_v44 = vrot.slane %v1904_v2, 1  ;;  %v9031_v59 = vpop.eup %9030  ;;  %v16529_v52 = vld [vmem:[#allocation116_spill] sm:$0xff] }
 0x269   :  { %v1803_v21 = vadd.f32 %v1786_v10, %v1652_v8  ;;  %v2201_v23 = vadd.f32 %v2165_v13, %v1983_v40  ;;  %9036 = vrcp.f32 %v2300_v39  ;;  %v16528_v25 = vrot.slane %v11605_v50, 2  ;;  %v16530_v39 = vld [vmem:[#allocation42_spill] sm:$0xff] }
 0x26a   :  { %v11942_v1 = vadd.f32 %v11314_v47, %v2214_v24  ;;  %v11945_v20 = vadd.f32 %v11314_v47, %v2215_v14  ;;  %v1951_v36 = vsel %vm600_vm4, %v1948_v63, %v1950_v44  ;;  %v1985_v7 = vadd.f32 %v1950_v44, %v11843_v11 }
 0x26b   :  { %v2169_v38 = vsel %vm262_vm1, %v2166_v0, %v16528_v25  ;;  %v2222_v49 = vmul.f32 %v11308_v16, %v2201_v23  ;;  %v1984_v35 = vadd.f32 %v1951_v36, %v1803_v21  ;;  %9038 = vrcp.f32 %v2301_v53 }
 0x26c   :  { %v7895_v34 = vmul.f32 -1.442695, %v11942_v1  ;;  %v7896_v8 = vmul.f32 -1.442695, %v11945_v20  ;;  %v2302_v54 = vadd.f32 1.0, %v9031_v59  ;;  %v2167_v51 = vsel %vm262_vm1, %v2164_v5, %v2166_v0 }
 0x26d   :  { %v2203_v15 = vadd.f32 %v2169_v38, %v1985_v7  ;;  %v2308_v9 = vadd.f32 1.0, %v9027_v22  ;;  %v11957_v11 = vadd.f32 %v11314_v47, %v2222_v49  ;;  %v2202_v50 = vadd.f32 %v2167_v51, %v1984_v35 }
 0x26e   :  { %9040 = vpow2.f32 %v7895_v34  ;;  %v2309_v41 = vadd.f32 1.0, %v9029_v48  ;;  %v11972_v43 = vmul.f32 %v11874_v37, %v16529_v52  ;;  %v11976_v0 = vmul.f32 %v11777_v57, %v16530_v39  ;;  %v16533_v34 = vld [vmem:[#allocation79_spill] sm:$0xff] }
 0x26f   :  { %9042 = vpow2.f32 %v7896_v8  ;;  %v2224_v60 = vmul.f32 %v11308_v16, %v2203_v15  ;;  %v9033_v42 = vpop.eup %9032  ;;  %v7903_v18 = vmul.f32 -1.442695, %v11957_v11  ;;  %v2223_v3 = vmul.f32 %v11308_v16, %v2202_v50 }
 0x270   :  { %9044 = vrcp.f32 %v2307_v62  ;;  %v2310_v5 = vadd.f32 1.0, %v9033_v42  ;;  %v11980_v2 = vmul.f32 %v11796_v32, %v16531_v45  ;;  %v2411_v37 = vrot.slane %v11972_v43, 7 }
 0x271   :  { %9046 = vrcp.f32 %v2302_v54  ;;  %v11963_v46 = vadd.f32 %v11314_v47, %v2224_v60  ;;  %v11966_v31 = vadd.f32 %v11314_v47, %v2223_v3  ;;  %v9035_v10 = vpop.eup %9034  ;;  %v2408_v44 = vrot.slane %v11976_v0, 7 }
 0x272   :  { %9048 = vrcp.f32 %v2308_v9  ;;  %v2409_v32 = vrot.slane %v11980_v2, 7  ;;  %v11992_v59 = vmul.f32 %v9035_v10, %v11676_v12  ;;  %v12004_v8 = vmul.f32 %v11894_v30, %v16533_v34 }
 0x273   :  { %9050 = vpow2.f32 %v7903_v18  ;;  %v7905_v63 = vmul.f32 -1.442695, %v11963_v46  ;;  %v7904_v33 = vmul.f32 -1.442695, %v11966_v31  ;;  %v9037_v55 = vpop.eup %9036 }
 0x274   :  { %9052 = vrcp.f32 %v2309_v41  ;;  %v11983_v14 = vmul.f32 %v9037_v55, %v11813_v56  ;;  %v16532_v56 = vld [vmem:[#allocation113_spill] sm:$0xff]  ;;  %v2412_v38 = vsel %vm933_vm3, %v2409_v32, %v2411_v37  ;;  %v2456_v15 = vrot.slane %v11992_v59, 7 }
 0x275   :  { %9054 = vpow2.f32 %v7905_v63  ;;  %v9039_v16 = vpop.eup %9038  ;;  %v2423_v41 = vrot.slane %v12004_v8, 7 }
 0x276   :  { %9056 = vpow2.f32 %v7904_v33  ;;  %v11987_v13 = vmul.f32 %v9039_v16, %v11816_v29  ;;  %v2413_v36 = vrot.slane %v11983_v14, 7 }
 0x277   :  { %9058 = vrcp.f32 %v2310_v5  ;;  %v2457_v33 = vsel %vm933_vm3, %v2423_v41, %v2456_v15 }
 0x278   :  { %v9041_v22 = vpop.eup %9040  ;;  %v2415_v35 = vrot.slane %v11987_v13, 7  ;;  %v2414_v60 = vsel %vm933_vm3, %v2411_v37, %v2413_v36 }
 0x279   :  { %v9043_v47 = vpop.eup %9042  ;;  %v2303_v62 = vadd.f32 1.0, %v9041_v22 }
 0x27a   :  { %v9045_v24 = vpop.eup %9044  ;;  %v2304_v40 = vadd.f32 1.0, %v9043_v47  ;;  %v2416_v10 = vsel %vm933_vm3, %v2413_v36, %v2415_v35 }
 0x27b   :  { %v9047_v48 = vpop.eup %9046  ;;  %9060 = vrcp.f32 %v2303_v62  ;;  %v11995_v21 = vmul.f32 %v9045_v24, %v16532_v56 }
 0x27c   :  { %v9049_v53 = vpop.eup %9048  ;;  %9062 = vrcp.f32 %v2304_v40  ;;  %v11999_v7 = vmul.f32 %v9047_v48, %v11862_v4  ;;  %v2410_v4 = vsel %vm933_vm3, %v2408_v44, %v2409_v32 }
 0x27d   :  { %v9051_v57 = vpop.eup %9050  ;;  %v12007_v12 = vmul.f32 %v9049_v53, %v11832_v17  ;;  %v2458_v9 = vrot.slane %v11995_v21, 7  ;;  %v2433_v42 = vadd.f32 %v2412_v38, %v2410_v4 }
 0x27e   :  { %v9053_v23 = vpop.eup %9052  ;;  %v2311_v29 = vadd.f32 1.0, %v9051_v57  ;;  %v2417_v17 = vrot.slane %v11999_v7, 7 }
 0x27f   :  { %v9055_v25 = vpop.eup %9054  ;;  %v12015_v30 = vmul.f32 %v9053_v23, %v11852_v28  ;;  %v2460_v18 = vrot.slane %v12007_v12, 7  ;;  %v2434_v63 = vadd.f32 %v2433_v42, %v2414_v60  ;;  %v2459_v55 = vsel %vm933_vm3, %v2456_v15, %v2458_v9 }
 0x280   :  { %v9057_v49 = vpop.eup %9056  ;;  %9064 = vrcp.f32 %v2311_v29  ;;  %v2313_v54 = vadd.f32 1.0, %v9055_v25  ;;  %v2418_v22 = vsel %vm933_vm3, %v2415_v35, %v2417_v17  ;;  %v2480_v48 = vadd.f32 %v2459_v55, %v2457_v33 }
 0x281   :  { %v9059_v51 = vpop.eup %9058  ;;  %v2312_v50 = vadd.f32 1.0, %v9057_v49  ;;  %v2462_v16 = vrot.slane %v12015_v30, 7  ;;  %v2461_v39 = vsel %vm933_vm3, %v2458_v9, %v2460_v18 }
 0x282   :  { %9066 = vrcp.f32 %v2313_v54  ;;  %v12021_v3 = vmul.f32 %v9059_v51, %v11907_v19  ;;  %v2435_v19 = vadd.f32 %v2434_v63, %v2416_v10  ;;  %v2481_v44 = vadd.f32 %v2480_v48, %v2461_v39  ;;  %v12062_v48 = vld [vmem:[%s9426_s30] sm:$0xff] }
 0x283   :  { %9068 = vrcp.f32 %v2312_v50  ;;  %v2463_v53 = vsel %vm933_vm3, %v2460_v18, %v2462_v16  ;;  %3712 = vperm.xlu1 %8679, %v12062_v48  }
 0x284   :  { %v2464_v45 = vrot.slane %v12021_v3, 7  ;;  %v2436_v40 = vadd.f32 %v2435_v19, %v2418_v22  ;;  %v2482_v34 = vadd.f32 %v2481_v44, %v2463_v53  ;;  %v12070_v53 = vld [vmem:[%s9426_s30 + $0x10] sm:$0xff] }
 0x285   :  { %v9061_v5 = vpop.eup %9060  ;;  %v8796_v44 = vld [vmem:[%s9406_s8 + $0x10] sm:$0xff]  }
 0x286   :  { %v9063_v28 = vpop.eup %9062  ;;  %v12028_v52 = vmul.f32 %v9061_v5, %v11942_v1  ;;  %v2465_v23 = vsel %vm933_vm3, %v2462_v16, %v2464_v45 }
 0x287   :  { %v12032_v47 = vmul.f32 %v9063_v28, %v11945_v20  ;;  %v2483_v51 = vadd.f32 %v2482_v34, %v2465_v23  ;;  %3718 = vperm.xlu1 %8679, %v12070_v53   ;;  %v16535_v23 = vmov 0   ;;  %v16536_v34 = vmov 1  }
 0x288   :  { %v2419_v62 = vrot.slane %v12028_v52, 7 }
 0x289   :  { %v2421_v24 = vrot.slane %v12032_v47, 7 }
 0x28a   :  { %v9065_v37 = vpop.eup %9064  ;;  %v2420_v1 = vsel %vm933_vm3, %v2417_v17, %v2419_v62 }
 0x28b   :  { %v12041_v57 = vmul.f32 %v9065_v37, %v11957_v11  ;;  %v2437_v20 = vadd.f32 %v2436_v40, %v2420_v1  ;;  %v2422_v56 = vsel %vm933_vm3, %v2419_v62, %v2421_v24  ;;  %v2424_v11 = vsel %vm933_vm3, %v2421_v24, %v2423_v41  ;;  %v8794_v24 = vld [vmem:[%s9406_s8] sm:$0xff]   ;;  %v8795_v40 = vld [vmem:[%s9406_s8 + $0x8] sm:$0xff]   ;;  %8681 = vset.pattern.permute.xlu1 %v16535_v23 }
 0x28c   :  { %v9067_v32 = vpop.eup %9066  ;;  %8318 = vmatpush3.bf16.msra.mxu0 %v8794_v24  ;;  %v16534_v37 = vmov 0.0   ;;  %v12067_v1 = vld [vmem:[%s9426_s30 + $0x8] sm:$0xff]  ;;  %3365 = vperm.xlu1 %8681, %v12062_v48  }
 0x28d   :  { %v9069_v36 = vpop.eup %9068  ;;  %v2466_v29 = vrot.slane %v12041_v57, 7  ;;  %v12047_v25 = vmul.f32 %v9067_v32, %v11963_v46  ;;  %v2438_v38 = vadd.f32 %v2437_v20, %v2422_v56  ;;  %8319 = vmatprep.subr.bf16.mxu0 %v16534_v37  ;;  %3715 = vperm.xlu0 %8680, %v12067_v1   ;;  %v12074_v20 = vld [vmem:[%s9426_s30 + $0x20] sm:$0xff]  ;;  %v12081_v32 = vld [vmem:[%s9426_s30 + $0x30] sm:$0xff]  ;;  %v8797_v56 = vld [vmem:[%s9406_s8 + $0x18] sm:$0xff]  }
 0x28e   :  { %v12050_v49 = vmul.f32 %v9069_v36, %v11966_v31  ;;  %v12089_v36 = vld [vmem:[%s9426_s30 + $0x40] sm:$0xff] }
 0x28f   :  { %v2439_v35 = vadd.f32 %v2438_v38, %v2424_v11  ;;  %v2467_v54 = vsel %vm933_vm3, %v2464_v45, %v2466_v29  ;;  %v2470_v15 = vrot.slane %v12047_v25, 7  ;;  %v8799_v38 = vld [vmem:[%s9406_s8 + $0x28] sm:$0xff]   ;;  %v8800_v11 = vld [vmem:[%s9406_s8 + $0x30] sm:$0xff]  }
 0x290   :  { %v2468_v4 = vrot.slane %v12050_v49, 7  ;;  %v2484_v50 = vadd.f32 %v2483_v51, %v2467_v54  ;;  %8320 = vmatpush3.bf16.msra.mxu0 %v8795_v40  ;;  %3373 = vperm.xlu1 %8681, %v12070_v53   ;;  %v8801_v54 = vld [vmem:[%s9406_s8 + $0x38] sm:$0xff]   ;;  %v12110_v51 = vld [vmem:[%s9426_s30 + $0x28] sm:$0xff] }
 0x291   :  { %v2440_v9 = vrot.slane %v2439_v35, 4  ;;  %8321 = vmatprep.subr.bf16.mxu0 %v16534_v37  ;;  %3724 = vperm.xlu0 %8680, %v12074_v20  }
 0x292   :  { %v2469_v46 = vsel %vm933_vm3, %v2466_v29, %v2468_v4  ;;  %v2471_v42 = vsel %vm933_vm3, %v2468_v4, %v2470_v15  ;;  %v8798_v29 = vld [vmem:[%s9406_s8 + $0x20] sm:$0xff]   ;;  %v16537_v4 = vmov 2   ;;  %v12117_v15 = vld [vmem:[%s9426_s30 + $0x38] sm:$0xff]  ;;  %s17043_s8 = sld [smem:[#allocation12_spill]] }
 0x293   :  { %v2441_v60 = vadd.f32 %v2440_v9, %v2439_v35  ;;  %v2485_v17 = vadd.f32 %v2484_v50, %v2469_v46  ;;  %v12104_v35 = vld [vmem:[%s9426_s30 + $0x18] sm:$0xff]  ;;  %v12126_v9 = vld [vmem:[%s9426_s30 + $0x50] sm:$0xff]  ;;  %v12131_v50 = vld [vmem:[%s9426_s30 + $0x60] sm:$0xff] }
 0x294   :  { %8322 = vmatpush3.bf16.msra.mxu0 %v8796_v44  ;;  %8682 = vset.pattern.permute.xlu1 %v16536_v34  ;;  %v12136_v46 = vld [vmem:[%s9426_s30 + $0x70] sm:$0xff]  ;;  %v16543_v44 = vmov 7  }
 0x295   :  { %v2442_v31 = vrot.slane %v2441_v60, 2  ;;  %v2486_v18 = vadd.f32 %v2485_v17, %v2471_v42  ;;  %8323 = vmatprep.subr.bf16.mxu0 %v16534_v37  ;;  %3730 = vperm.xlu0 %8680, %v12081_v32   ;;  %v16539_v17 = vmov 8   ;;  %v16540_v42 = vmov 5  }
 0x296   :  { %3531 = vperm.xlu1 %8682, %v12062_v48  }
 0x297   :  { %v2443_v41 = vadd.f32 %v2442_v31, %v2441_v60  ;;  %v2487_v10 = vrot.slane %v2486_v18, 4  ;;  %v16538_v60 = vmov 3   ;;  %v16541_v31 = vmov 4  }
 0x298   :  { %8324 = vmatpush3.bf16.msra.mxu0 %v8797_v56  ;;  %v8803_v56 = vld [vmem:[%s9416_s19 + $0x8] sm:$0xff]  }
 0x299   :  { %v2488_v5 = vadd.f32 %v2487_v10, %v2486_v18  ;;  %v2444_v63 = vrot.slane %v2443_v41, 1  ;;  %8325 = vmatprep.subr.bf16.mxu0 %v16534_v37  ;;  %3736 = vperm.xlu0 %8680, %v12089_v36   ;;  %v12166_v18 = vld [vmem:[%s9426_s30 + $0x48] sm:$0xff]  ;;  %v7906_v10 = vld [vmem:[%s9401_s3] ss:$0 sm:$0xff]  ;;  %s17042_s3 = sld [smem:[#allocation16_spill]] }
 0x29a   :  { %3539 = vperm.xlu1 %8682, %v12070_v53  }
 0x29b   :  { %v2489_v33 = vrot.slane %v2488_v5, 2  ;;  %v2445_v55 = vadd.f32 %v2444_v63, %v2443_v41  ;;  %v12171_v41 = vld [vmem:[%s9426_s30 + $0x58] sm:$0xff]  ;;  %v12178_v63 = vld [vmem:[%s9426_s30 + $0x68] sm:$0xff] }
 0x29c   :  { %8326 = vmatpush3.bf16.msra.mxu0 %v8798_v29 }
 0x29d   :  { %v2490_v28 = vadd.f32 %v2489_v33, %v2488_v5  ;;  %v2447_v19 = vmul.f32 0.015625, %v2445_v55  ;;  %8327 = vmatprep.subr.bf16.mxu0 %v16534_v37  ;;  %8697 = vset.pattern.permute.xlu0 %v16536_v34 }
 0x29e   :  { %3535 = vperm.xlu0 %8697, %v12067_v1   ;;  %8683 = vset.pattern.permute.xlu1 %v16537_v4 }
 0x29f   :  { %v2491_v16 = vrot.slane %v2490_v28, 1  ;;  %3721 = vperm.xlu1 %8683, %v12104_v35  }
 0x2a0   :  { %8328 = vmatpush3.bf16.msra.mxu0 %v8799_v38  ;;  %v12242_v38 = vld [vmem:[%s9426_s30 + $0x78] sm:$0xff]  ;;  %s17059_s30 = sld [smem:[#allocation18_spill]] }
 0x2a1   :  { %v2492_v22 = vadd.f32 %v2491_v16, %v2490_v28  ;;  %8329 = vmatprep.subr.bf16.mxu0 %v16534_v37 }
 0x2a2   :  { %3543 = vperm.xlu0 %8697, %v12104_v35  }
 0x2a3   :  { %v2493_v39 = vmul.f32 0.015625, %v2492_v22  ;;  %8684 = vset.pattern.permute.xlu1 %v16535_v23 }
 0x2a4   :  { %8330 = vmatpush3.bf16.msra.mxu0 %v8800_v11  ;;  %3377 = vperm.xlu1 %8684, %v12104_v35   ;;  %v8804_v11 = vld [vmem:[%s9416_s19 + $0x10] sm:$0xff]  }
 0x2a5   :  { %v2494_v45 = vsel %vm933_vm3, %v2447_v19, %v2493_v39  ;;  %8331 = vmatprep.subr.bf16.mxu0 %v16534_v37 }
 0x2a6   :  { %v2495_v62 = vpack.c.bf16 %v2494_v45, %v2494_v45  ;;  %3551 = vperm.xlu0 %8697, %v12110_v51   ;;  %v16542_v45 = vmov 6  }
 0x2a8   :  { %8314 = vmatmul.mubr.bf16.vlgmr.msra.gmra.mrb[0].mxu1 %v2495_v62  ;;  %8332 = vmatpush3.bf16.msra.mxu0 %v8801_v54  ;;  %v8805_v54 = vld [vmem:[%s9416_s19 + $0x18] sm:$0xff]  }
 0x2a9   :  { %3381 = vperm.xlu1 %8684, %v12074_v20  }
 0x2aa   :  { %3559 = vperm.xlu0 %8697, %v12117_v15  }
 0x2ad   :  { %8685 = vset.pattern.permute.xlu1 %v16536_v34 }
 0x2ae   :  { %8700 = vset.pattern.permute.xlu0 %v16535_v23  ;;  %3547 = vperm.xlu1 %8685, %v12074_v20  }
 0x2af   :  { %3369 = vperm.xlu0 %8700, %v12067_v1  }
 0x2b2   :  { %8686 = vset.pattern.permute.xlu1 %v16538_v60 }
 0x2b3   :  { %3405 = vperm.xlu0 %8700, %v12126_v9   ;;  %3930 = vperm.xlu1 %8686, %v12062_v48  }
 0x2b7   :  { %3413 = vperm.xlu0 %8700, %v12131_v50   ;;  %3936 = vperm.xlu1 %8686, %v12070_v53  }
 0x2bb   :  { %3421 = vperm.xlu0 %8700, %v12136_v46   ;;  %8687 = vset.pattern.permute.xlu1 %v16540_v42 }
 0x2bc   :  { %4262 = vperm.xlu1 %8687, %v12062_v48  }
 0x2bf   :  { %8728 = vset.pattern.permute.xlu0 %v16539_v17 }
 0x2c0   :  { %4818 = vperm.xlu0 %8728, %v12070_v53   ;;  %4268 = vperm.xlu1 %8687, %v12070_v53  }
 0x2c4   :  { %4821 = vperm.xlu0 %8728, %v12104_v35   ;;  %8688 = vset.pattern.permute.xlu1 %v16541_v31 }
 0x2c5   :  { %4081 = vperm.xlu1 %8688, %v12062_v48  }
 0x2c8   :  { %4827 = vperm.xlu0 %8728, %v12110_v51  }
 0x2c9   :  { %4089 = vperm.xlu1 %8688, %v12070_v53  }
 0x2cc   :  { %4833 = vperm.xlu0 %8728, %v12117_v15  }
 0x2cd   :  { %8689 = vset.pattern.permute.xlu1 %v16537_v4 }
 0x2ce   :  { %3727 = vperm.xlu1 %8689, %v12110_v51  }
 0x2d0   :  { %4842 = vperm.xlu0 %8728, %v12126_v9  }
 0x2d2   :  { %8690 = vset.pattern.permute.xlu1 %v16535_v23 }
 0x2d3   :  { %3385 = vperm.xlu1 %8690, %v12110_v51  }
 0x2d4   :  { %8737 = vset.pattern.permute.xlu0 %v16541_v31 }
 0x2d5   :  { %4085 = vperm.xlu0 %8737, %v12067_v1  }
 0x2d7   :  { %3389 = vperm.xlu1 %8690, %v12081_v32  }
 0x2d9   :  { %4093 = vperm.xlu0 %8737, %v12104_v35  }
 0x2db   :  { %8691 = vset.pattern.permute.xlu1 %v16536_v34 }
 0x2dc   :  { %3555 = vperm.xlu1 %8691, %v12081_v32  }
 0x2dd   :  { %4101 = vperm.xlu0 %8737, %v12110_v51  }
 0x2e0   :  { %8692 = vset.pattern.permute.xlu1 %v16538_v60 }
 0x2e1   :  { %4109 = vperm.xlu0 %8737, %v12117_v15   ;;  %3939 = vperm.xlu1 %8692, %v12104_v35  }
 0x2e5   :  { %4117 = vperm.xlu0 %8737, %v12166_v18   ;;  %8693 = vset.pattern.permute.xlu1 %v16540_v42 }
 0x2e6   :  { %4271 = vperm.xlu1 %8693, %v12104_v35  }
 0x2e9   :  { %4125 = vperm.xlu0 %8737, %v12171_v41  }
 0x2ea   :  { %4274 = vperm.xlu1 %8693, %v12074_v20  }
 0x2ed   :  { %4133 = vperm.xlu0 %8737, %v12178_v63  }
 0x2ee   :  { %8694 = vset.pattern.permute.xlu1 %v16541_v31 }
 0x2ef   :  { %4097 = vperm.xlu1 %8694, %v12074_v20  }
 0x2f1   :  { %8743 = vset.pattern.permute.xlu0 %v16538_v60 }
 0x2f2   :  { %3933 = vperm.xlu0 %8743, %v12067_v1  }
 0x2f3   :  { %8695 = vset.pattern.permute.xlu1 %v16542_v45 }
 0x2f4   :  { %4480 = vperm.xlu1 %8695, %v12062_v48  }
 0x2f6   :  { %3942 = vperm.xlu0 %8743, %v12074_v20  }
 0x2f8   :  { %4486 = vperm.xlu1 %8695, %v12070_v53  }
 0x2fa   :  { %3948 = vperm.xlu0 %8743, %v12081_v32  }
 0x2fc   :  { %8696 = vset.pattern.permute.xlu1 %v16537_v4 }
 0x2fd   :  { %3733 = vperm.xlu1 %8696, %v12117_v15  }
 0x2fe   :  { %3951 = vperm.xlu0 %8743, %v12117_v15  }
 0x301   :  { %8698 = vset.pattern.permute.xlu1 %v16539_v17 }
 0x302   :  { %3957 = vperm.xlu0 %8743, %v12166_v18   ;;  %4812 = vperm.xlu1 %8698, %v12062_v48  }
 0x306   :  { %3963 = vperm.xlu0 %8743, %v12171_v41   ;;  %4815 = vperm.xlu1 %8698, %v12067_v1  }
 0x30a   :  { %3969 = vperm.xlu0 %8743, %v12178_v63   ;;  %8699 = vset.pattern.permute.xlu1 %v16535_v23 }
 0x30b   :  { %3393 = vperm.xlu1 %8699, %v12117_v15  }
 0x30c   :  { %v12239_v29 = vpop.permute.xlu0 %3715 }
 0x30d   :  { %16544 = vst [vmem:[#allocation32_spill] sm:$0xff] %v12239_v29 }
 0x30e   :  { %3975 = vperm.xlu0 %8743, %v12242_v38  }
 0x30f   :  { %3397 = vperm.xlu1 %8699, %v12089_v36  }
 0x312   :  { %8747 = vset.pattern.permute.xlu0 %v16540_v42 }
 0x313   :  { %8701 = vset.pattern.permute.xlu1 %v16536_v34  ;;  %4265 = vperm.xlu0 %8747, %v12067_v1  }
 0x314   :  { %3563 = vperm.xlu1 %8701, %v12089_v36  }
 0x317   :  { %4307 = vperm.xlu0 %8747, %v12242_v38  }
 0x318   :  { %8702 = vset.pattern.permute.xlu1 %v16538_v60 }
 0x319   :  { %3945 = vperm.xlu1 %8702, %v12110_v51  }
 0x31b   :  { %8749 = vset.pattern.permute.xlu0 %v16542_v45 }
 0x31c   :  { %4483 = vperm.xlu0 %8749, %v12067_v1  }
 0x31d   :  { %8703 = vset.pattern.permute.xlu1 %v16543_v44 }
 0x31e   :  { %4631 = vperm.xlu1 %8703, %v12062_v48   ;;  %v8802_v48 = vld [vmem:[%s9416_s19] sm:$0xff]  }
 0x31f   :  { %8337 = vmatprep.subr.bf16.mxu1 %v8802_v48 }
 0x320   :  { %8338 = vmatpush3.bf16.msra.mxu1 %v8802_v48  ;;  %4492 = vperm.xlu0 %8749, %v12074_v20  }
 0x321   :  { %8339 = vmatprep.subr.bf16.mxu1 %v8803_v56 }
 0x322   :  { %4635 = vperm.xlu1 %8703, %v12067_v1  }
 0x324   :  { %8340 = vmatpush3.bf16.msra.mxu1 %v8803_v56  ;;  %4498 = vperm.xlu0 %8749, %v12081_v32  }
 0x325   :  { %8341 = vmatprep.subr.bf16.mxu1 %v8804_v11 }
 0x326   :  { %8704 = vset.pattern.permute.xlu1 %v16540_v42 }
 0x327   :  { %4277 = vperm.xlu1 %8704, %v12110_v51  }
 0x328   :  { %8342 = vmatpush3.bf16.msra.mxu1 %v8804_v11  ;;  %4504 = vperm.xlu0 %8749, %v12089_v36  }
 0x329   :  { %8343 = vmatprep.subr.bf16.mxu1 %v8805_v54 }
 0x32b   :  { %4280 = vperm.xlu1 %8704, %v12081_v32  }
 0x32c   :  { %8344 = vmatpush3.bf16.msra.mxu1 %v8805_v54  ;;  %4510 = vperm.xlu0 %8749, %v12126_v9  }
 0x32f   :  { %8705 = vset.pattern.permute.xlu1 %v16541_v31 }
 0x330   :  { %4105 = vperm.xlu1 %8705, %v12081_v32   ;;  %4516 = vperm.xlu0 %8749, %v12131_v50  }
 0x334   :  { %8706 = vset.pattern.permute.xlu1 %v16542_v45  ;;  %4522 = vperm.xlu0 %8749, %v12136_v46  }
 0x335   :  { %4489 = vperm.xlu1 %8706, %v12104_v35  }
 0x338   :  { %8752 = vset.pattern.permute.xlu0 %v16543_v44 }
 0x339   :  { %8707 = vset.pattern.permute.xlu1 %v16537_v4  ;;  %4639 = vperm.xlu0 %8752, %v12070_v53  }
 0x33a   :  { %3739 = vperm.xlu1 %8707, %v12166_v18  }
 0x33d   :  { %4647 = vperm.xlu0 %8752, %v12074_v20  }
 0x33e   :  { %3742 = vperm.xlu1 %8707, %v12126_v9  }
 0x341   :  { %4655 = vperm.xlu0 %8752, %v12081_v32  }
 0x342   :  { %8708 = vset.pattern.permute.xlu1 %v16539_v17 }
 0x343   :  { %4824 = vperm.xlu1 %8708, %v12074_v20  }
 0x345   :  { %4663 = vperm.xlu0 %8752, %v12089_v36  }
 0x347   :  { %8709 = vset.pattern.permute.xlu1 %v16535_v23 }
 0x348   :  { %3401 = vperm.xlu1 %8709, %v12166_v18  }
 0x349   :  { %4671 = vperm.xlu0 %8752, %v12126_v9  }
 0x34c   :  { %8710 = vset.pattern.permute.xlu1 %v16536_v34 }
 0x34d   :  { %3567 = vperm.xlu1 %8710, %v12166_v18   ;;  %4683 = vperm.xlu0 %8752, %v12178_v63  }
 0x351   :  { %3571 = vperm.xlu1 %8710, %v12126_v9   ;;  %8756 = vset.pattern.permute.xlu0 %v16539_v17 }
 0x352   :  { %4857 = vperm.xlu0 %8756, %v12242_v38  }
 0x355   :  { %8711 = vset.pattern.permute.xlu1 %v16538_v60 }
 0x356   :  { %3954 = vperm.xlu1 %8711, %v12089_v36   ;;  %8759 = vset.pattern.permute.xlu0 %v16536_v34 }
 0x35a   :  { %8712 = vset.pattern.permute.xlu1 %v16543_v44 }
 0x35b   :  { %4643 = vperm.xlu1 %8712, %v12104_v35   ;;  %v12246_v35 = vpop.permute.xlu0 %3724 }
 0x35c   :  { %16545 = vst [vmem:[#allocation86_spill] sm:$0xff] %v12246_v35 }
 0x35f   :  { %8713 = vset.pattern.permute.xlu1 %v16540_v42 }
 0x360   :  { %4283 = vperm.xlu1 %8713, %v12117_v15  }
 0x364   :  { %4286 = vperm.xlu1 %8713, %v12089_v36  }
 0x368   :  { %8714 = vset.pattern.permute.xlu1 %v16541_v31 }
 0x37b   :  { %v2584_v5 = vpop.f32.mrb[0].mxu1 }
 0x37c   :  { %v2585_v33 = vadd.f32 %v7906_v10, %v2584_v5  ;;  %v8315_v28 = vpop.f32.mrb[1].mxu1  ;;  %v12251_v10 = vpop.permute.xlu0 %3730  ;;  %v8806_v5 = vld [vmem:[%s9416_s19 + $0x20] sm:$0xff]  }
 0x37d   :  { %v2587_v55 = vpop.f32.mrb[2].mxu1  ;;  %16546 = vst [vmem:[#allocation121_spill] sm:$0xff] %v12251_v10  ;;  %8345 = vmatprep.subr.bf16.mxu1 %v8806_v5  ;;  %v8807_v28 = vld [vmem:[%s9416_s19 + $0x28] sm:$0xff]  }
 0x37e   :  { %v7915_v16 = vmul.f32 -1.442695, %v2585_v33  ;;  %v8316_v22 = vpop.f32.mrb[3].mxu1  ;;  %8346 = vmatpush3.bf16.msra.mxu1 %v8806_v5  ;;  %v12293_v5 = vld [vmem:[%s9446_s27] sm:$0xff] }
 0x37f   :  { %8347 = vmatprep.subr.bf16.mxu1 %v8807_v28 }
 0x380   :  { %9070 = vpow2.f32 %v7915_v16  ;;  %v8808_v16 = vld [vmem:[%s9416_s19 + $0x30] sm:$0xff]  }
 0x382   :  { %8348 = vmatpush3.bf16.msra.mxu1 %v8807_v28 }
 0x383   :  { %8349 = vmatprep.subr.bf16.mxu1 %v8808_v16 }
 0x386   :  { %8350 = vmatpush3.bf16.msra.mxu1 %v8808_v16 }
 0x38a   :  { %v9071_v19 = vpop.eup %9070 }
 0x38b   :  { %v2593_v39 = vadd.f32 1.0, %v9071_v19  ;;  %v8809_v19 = vld [vmem:[%s9416_s19 + $0x38] sm:$0xff]   ;;  %s17052_s19 = sld [smem:[#allocation14_spill]] }
 0x38c   :  { %8351 = vmatprep.subr.bf16.mxu1 %v8809_v19 }
 0x38d   :  { %9072 = vrcp.f32 %v2593_v39  ;;  %8352 = vmatpush3.bf16.msra.mxu1 %v8809_v19  ;;  %v16555_v19 = vld [vmem:[#allocation65_spill] sm:$0xff] }
 0x397   :  { %v9073_v62 = vpop.eup %9072 }
 0x398   :  { %v2596_v24 = vmul.f32 %v9073_v62, %v2585_v33  ;;  %v12255_v33 = vpop.permute.xlu0 %3736  ;;  %v12270_v62 = vpop.permute.xlu1 %3712  ;;  %4113 = vperm.xlu1 %8714, %v12089_v36  }
 0x399   :  { %16547 = vst [vmem:[#allocation30_spill] sm:$0xff] %v12255_v33  ;;  %16551 = vst [vmem:[#allocation78_spill] sm:$0xff] %v12270_v62  ;;  %v15753_v56 = vrot.slane %v12270_v62, 7  ;;  %v16560_v33 = vld [vmem:[#allocation64_spill] sm:$0xff] }
 0x39a   :  { %v2597_v40 = vpack.c.bf16 %v2596_v24, %v2596_v24 }
 0x39b   :  { %v3807_v16 = vmul.f32 0.0, %v15753_v56  ;;  %v12315_v56 = vrot.slane %v12293_v5, %v16560_v33 }
 0x39c   :  { %8334 = vmatmul.mubr.bf16.vlgmr.msra.gmra.mrb[16].mxu0 %v2597_v40  ;;  %v12259_v55 = vpop.permute.xlu0 %3535  ;;  %v12276_v24 = vpop.permute.xlu1 %3718  ;;  %8715 = vset.pattern.permute.xlu1 %v16542_v45 }
 0x39d   :  { %16548 = vst [vmem:[#allocation128_spill] sm:$0xff] %v12259_v55  ;;  %4495 = vperm.xlu1 %8715, %v12110_v51   ;;  %16561 = vst [vmem:[#allocation63_spill] sm:$0xff] %v12315_v56 }
 0x3a0   :  { %v12263_v22 = vpop.permute.xlu0 %3543  ;;  %v12283_v48 = vpop.permute.xlu1 %3365 }
 0x3a1   :  { %16549 = vst [vmem:[#allocation29_spill] sm:$0xff] %v12263_v22  ;;  %8716 = vset.pattern.permute.xlu1 %v16537_v4  ;;  %v15756_v54 = vrot.slane %v12283_v48, 1  ;;  %v16558_v22 = vld [vmem:[#allocation62_spill] sm:$0xff] }
 0x3a2   :  { %3745 = vperm.xlu1 %8716, %v12171_v41  }
 0x3a3   :  { %v3475_v55 = vmul.f32 0.0, %v15756_v54 }
 0x3a4   :  { %v12267_v39 = vpop.permute.xlu0 %3551  ;;  %v12295_v28 = vpop.permute.xlu1 %3373 }
 0x3a5   :  { %16550 = vst [vmem:[#allocation117_spill] sm:$0xff] %v12267_v39  ;;  %16554 = vst [vmem:[#allocation47_spill] sm:$0xff] %v12295_v28 }
 0x3a6   :  { %3748 = vperm.xlu1 %8716, %v12131_v50  }
 0x3a8   :  { %v12273_v1 = vpop.permute.xlu0 %3559  ;;  %v3532_v62 = vpop.permute.xlu1 %3531 }
 0x3a9   :  { %16552 = vst [vmem:[#allocation41_spill] sm:$0xff] %v12273_v1  ;;  %v12301_v1 = vrot.slane %v12293_v5, %v16555_v19  ;;  %v3594_v10 = vmul.f32 0.0, %v3532_v62 }
 0x3aa   :  { %8717 = vset.pattern.permute.xlu1 %v16539_v17 }
 0x3ab   :  { %16556 = vst [vmem:[#allocation80_spill] sm:$0xff] %v12301_v1  ;;  %v12318_v19 = vmul.f32 %v12301_v1, %v3807_v16  ;;  %v12327_v35 = vmul.f32 %v12315_v56, %v3594_v10  ;;  %4830 = vperm.xlu1 %8717, %v12081_v32  }
 0x3ac   :  { %v12279_v40 = vpop.permute.xlu0 %3369  ;;  %v12330_v29 = vpop.permute.xlu1 %3539 }
 0x3ad   :  { %16562 = vst [vmem:[#allocation114_spill] sm:$0xff] %v12318_v19  ;;  %16564 = vst [vmem:[#allocation34_spill] sm:$0xff] %v12327_v35  ;;  %v15764_v16 = vrot.slane %v12318_v19, 2  ;;  %v15762_v1 = vrot.slane %v12327_v35, 1 }
 0x3ae   :  { %16565 = vst [vmem:[#allocation115_spill] sm:$0xff] %v12330_v29 }
 0x3af   :  { %8718 = vset.pattern.permute.xlu1 %v16535_v23 }
 0x3b0   :  { %v12286_v11 = vpop.permute.xlu0 %3405  ;;  %v12341_v10 = vpop.permute.xlu1 %3721  ;;  %3409 = vperm.xlu1 %8718, %v12171_v41  }
 0x3b1   :  { %16553 = vst [vmem:[#allocation35_spill] sm:$0xff] %v12286_v11  ;;  %v12311_v11 = vrot.slane %v12293_v5, %v16558_v22  ;;  %16566 = vst [vmem:[#allocation55_spill] sm:$0xff] %v12341_v10  ;;  %v15765_v56 = vrot.slane %v12341_v10, 7 }
 0x3b3   :  { %16559 = vst [vmem:[#allocation67_spill] sm:$0xff] %v12311_v11  ;;  %v3496_v54 = vmul.f32 %v12311_v11, %v3475_v55 }
 0x3b4   :  { %v12303_v39 = vpop.permute.xlu0 %3413  ;;  %8719 = vset.pattern.permute.xlu1 %v16536_v34 }
 0x3b5   :  { %16557 = vst [vmem:[#allocation125_spill] sm:$0xff] %v12303_v39  ;;  %v3694_v53 = vadd.f32 %v15762_v1, %v3496_v54  ;;  %v15768_v54 = vrot.slane %v12295_v28, 1  ;;  %v16567_v1 = vrot.slane %v12276_v24, 7  ;;  %3575 = vperm.xlu1 %8719, %v12171_v41  }
 0x3b7   :  { %v3912_v55 = vadd.f32 %v15764_v16, %v3694_v53  ;;  %v12358_v35 = vsel %vm933_vm3, %v16567_v1, %v15765_v56  ;;  %v3378_v16 = vpop.permute.xlu1 %3377 }
 0x3b8   :  { %v12320_v39 = vpop.permute.xlu0 %3421  ;;  %16568 = vst [vmem:[#allocation99_spill] sm:$0xff] %v12358_v35  ;;  %v3432_v32 = vrot.slane %v3378_v16, 1 }
 0x3b9   :  { %16563 = vst [vmem:[#allocation36_spill] sm:$0xff] %v12320_v39  ;;  %3579 = vperm.xlu1 %8719, %v12131_v50  }
 0x3ba   :  { %v12373_v1 = vsel %vm600_vm4, %v15768_v54, %v3432_v32 }
 0x3bb   :  { %16570 = vst [vmem:[#allocation130_spill] sm:$0xff] %v12373_v1  ;;  %v3382_v56 = vpop.permute.xlu1 %3381  ;;  %v8811_v1 = vld [vmem:[%s9436_s12 + $0x8] sm:$0xff]  }
 0x3bc   :  { %v12334_v62 = vpop.permute.xlu0 %4818  ;;  %v3434_v19 = vrot.slane %v3382_v56, 1 }
 0x3bd   :  { %v15769_v20 = vrot.slane %v12334_v62, 7  ;;  %8720 = vset.pattern.permute.xlu1 %v16538_v60 }
 0x3be   :  { %3960 = vperm.xlu1 %8720, %v12126_v9  }
 0x3bf   :  { %v12380_v16 = vpop.permute.xlu1 %3547 }
 0x3c0   :  { %v12346_v29 = vpop.permute.xlu0 %4821  ;;  %16572 = vst [vmem:[#allocation71_spill] sm:$0xff] %v12380_v16  ;;  %v8810_v16 = vld [vmem:[%s9436_s12] sm:$0xff]  }
 0x3c1   :  { %v15767_v39 = vrot.slane %v12346_v29, 7  ;;  %8369 = vmatprep.subr.bf16.mxu0 %v8810_v16 }
 0x3c2   :  { %8721 = vset.pattern.permute.xlu1 %v16543_v44  ;;  %8370 = vmatpush3.bf16.msra.mxu0 %v8810_v16  ;;  %v8813_v16 = vld [vmem:[%s9436_s12 + $0x18] sm:$0xff]  }
 0x3c3   :  { %v12365_v53 = vsel %vm933_vm3, %v15769_v20, %v15767_v39  ;;  %v12378_v39 = vsel %vm600_vm4, %v3432_v32, %v3434_v19  ;;  %v12385_v54 = vpop.permute.xlu1 %3930  ;;  %v16574_v20 = vld [vmem:[#allocation69_spill] sm:$0xff]  ;;  %4651 = vperm.xlu1 %8721, %v12110_v51   ;;  %8371 = vmatprep.subr.bf16.mxu0 %v8811_v1 }
 0x3c4   :  { %16569 = vst [vmem:[#allocation102_spill] sm:$0xff] %v12365_v53  ;;  %16571 = vst [vmem:[#allocation75_spill] sm:$0xff] %v12378_v39  ;;  %v15770_v56 = vrot.slane %v12385_v54, 1  ;;  %v12390_v53 = vrot.slane %v12293_v5, %v16574_v20  ;;  %v8812_v51 = vld [vmem:[%s9436_s12 + $0x10] sm:$0xff]  }
 0x3c5   :  { %16573 = vst [vmem:[#allocation118_spill] sm:$0xff] %v12385_v54 }
 0x3c6   :  { %16575 = vst [vmem:[#allocation93_spill] sm:$0xff] %v12390_v53  ;;  %v4025_v32 = vmul.f32 0.0, %v15770_v56  ;;  %8372 = vmatpush3.bf16.msra.mxu0 %v8811_v1 }
 0x3c7   :  { %v12399_v39 = vpop.permute.xlu1 %3936  ;;  %8722 = vset.pattern.permute.xlu1 %v16540_v42  ;;  %8373 = vmatprep.subr.bf16.mxu0 %v8812_v51 }
 0x3c8   :  { %16576 = vst [vmem:[#allocation82_spill] sm:$0xff] %v12399_v39  ;;  %v4046_v20 = vmul.f32 %v12390_v53, %v4025_v32  ;;  %4289 = vperm.xlu1 %8722, %v12166_v18  }
 0x3ca   :  { %v12403_v35 = vadd.f32 %v4046_v20, %v3912_v55  ;;  %8374 = vmatpush3.bf16.msra.mxu0 %v8812_v51  ;;  %v8814_v20 = vld [vmem:[%s9436_s12 + $0x20] sm:$0xff]  }
 0x3cb   :  { %v12406_v56 = vpop.permute.xlu1 %4262  ;;  %8375 = vmatprep.subr.bf16.mxu0 %v8813_v16 }
 0x3cc   :  { %16577 = vst [vmem:[#allocation49_spill] sm:$0xff] %v12403_v35  ;;  %16578 = vst [vmem:[#allocation40_spill] sm:$0xff] %v12406_v56  ;;  %4292 = vperm.xlu1 %8722, %v12126_v9  }
 0x3ce   :  { %8376 = vmatpush3.bf16.msra.mxu0 %v8813_v16 }
 0x3cf   :  { %v12411_v54 = vpop.permute.xlu1 %4268  ;;  %8377 = vmatprep.subr.bf16.mxu0 %v8814_v20 }
 0x3d0   :  { %16579 = vst [vmem:[#allocation33_spill] sm:$0xff] %v12411_v54  ;;  %8723 = vset.pattern.permute.xlu1 %v16541_v31 }
 0x3d1   :  { %4121 = vperm.xlu1 %8723, %v12126_v9  }
 0x3d2   :  { %8378 = vmatpush3.bf16.msra.mxu0 %v8814_v20 }
 0x3d3   :  { %v12415_v55 = vpop.permute.xlu1 %4081 }
 0x3d4   :  { %16580 = vst [vmem:[#allocation38_spill] sm:$0xff] %v12415_v55  ;;  %v7916_v55 = vld [vmem:[%s9411_s14] ss:$0 sm:$0xff]  ;;  %s17044_s14 = sld [smem:[#allocation15_spill]] }
 0x3d5   :  { %8724 = vset.pattern.permute.xlu1 %v16542_v45 }
 0x3d6   :  { %4501 = vperm.xlu1 %8724, %v12117_v15  }
 0x3d7   :  { %v12420_v32 = vpop.permute.xlu1 %4089 }
 0x3d8   :  { %16581 = vst [vmem:[#allocation31_spill] sm:$0xff] %v12420_v32 }
 0x3da   :  { %8725 = vset.pattern.permute.xlu1 %v16537_v4 }
 0x3db   :  { %v12424_v1 = vpop.permute.xlu1 %3727  ;;  %3751 = vperm.xlu1 %8725, %v12178_v63  }
 0x3dc   :  { %16582 = vst [vmem:[#allocation92_spill] sm:$0xff] %v12424_v1 }
 0x3df   :  { %v3386_v51 = vpop.permute.xlu1 %3385  ;;  %3754 = vperm.xlu1 %8725, %v12136_v46  }
 0x3e0   :  { %v3436_v35 = vrot.slane %v3386_v51, 1 }
 0x3e2   :  { %v12430_v9 = vsel %vm600_vm4, %v3434_v19, %v3436_v35 }
 0x3e3   :  { %16583 = vst [vmem:[#allocation37_spill] sm:$0xff] %v12430_v9  ;;  %v12433_v32 = vpop.permute.xlu1 %3389  ;;  %8726 = vset.pattern.permute.xlu1 %v16539_v17 }
 0x3e4   :  { %v15779_v20 = vrot.slane %v12433_v32, 1  ;;  %4836 = vperm.xlu1 %8726, %v12089_v36  }
 0x3e6   :  { %v12439_v51 = vsel %vm600_vm4, %v3436_v35, %v15779_v20  ;;  %v15781_v35 = vrot.slane %v12411_v54, 7 }
 0x3e7   :  { %16584 = vst [vmem:[#allocation84_spill] sm:$0xff] %v12439_v51  ;;  %v12442_v19 = vpop.permute.xlu1 %3555 }
 0x3e8   :  { %16585 = vst [vmem:[#allocation85_spill] sm:$0xff] %v12442_v19  ;;  %8727 = vset.pattern.permute.xlu1 %v16535_v23 }
 0x3e9   :  { %3417 = vperm.xlu1 %8727, %v12178_v63  }
 0x3ed   :  { %8729 = vset.pattern.permute.xlu1 %v16536_v34 }
 0x3ee   :  { %3583 = vperm.xlu1 %8729, %v12178_v63  }
 0x3f2   :  { %3587 = vperm.xlu1 %8729, %v12136_v46  }
 0x3f6   :  { %8730 = vset.pattern.permute.xlu1 %v16538_v60 }
 0x46f   :  { %v2686_v16 = vpop.f32.mrb[16].mxu0 }
 0x470   :  { %v2687_v53 = vadd.f32 %v7916_v55, %v2686_v16  ;;  %v8335_v56 = vpop.f32.mrb[17].mxu0  ;;  %v15782_v55 = vrot.slane %v12399_v39, 1 }
 0x471   :  { %v2689_v10 = vpop.f32.mrb[18].mxu0  ;;  %v12446_v56 = vpop.permute.xlu1 %3939  ;;  %3966 = vperm.xlu1 %8730, %v12131_v50  }
 0x472   :  { %v7925_v28 = vmul.f32 -1.442695, %v2687_v53  ;;  %v8336_v11 = vpop.f32.mrb[19].mxu0  ;;  %16586 = vst [vmem:[#allocation97_spill] sm:$0xff] %v12446_v56 }
 0x473   :  { %v15780_v11 = vrot.slane %v12446_v56, 1 }
 0x474   :  { %9074 = vpow2.f32 %v7925_v28 }
 0x475   :  { %v12457_v10 = vsel %vm600_vm4, %v15782_v55, %v15780_v11  ;;  %v4272_v36 = vpop.permute.xlu1 %4271  ;;  %8731 = vset.pattern.permute.xlu1 %v16543_v44 }
 0x476   :  { %16587 = vst [vmem:[#allocation95_spill] sm:$0xff] %v12457_v10  ;;  %v4314_v28 = vrot.slane %v4272_v36, 7  ;;  %4659 = vperm.xlu1 %8731, %v12117_v15  }
 0x478   :  { %v12464_v16 = vsel %vm933_vm3, %v15781_v35, %v4314_v28 }
 0x479   :  { %16588 = vst [vmem:[#allocation81_spill] sm:$0xff] %v12464_v16  ;;  %v12466_v19 = vpop.permute.xlu1 %4274 }
 0x47a   :  { %v15783_v51 = vrot.slane %v12466_v19, 7  ;;  %8732 = vset.pattern.permute.xlu1 %v16540_v42 }
 0x47b   :  { %4295 = vperm.xlu1 %8732, %v12171_v41  }
 0x47c   :  { %v12473_v36 = vsel %vm933_vm3, %v4314_v28, %v15783_v51 }
 0x47d   :  { %16589 = vst [vmem:[#allocation27_spill] sm:$0xff] %v12473_v36  ;;  %v12475_v11 = vpop.permute.xlu1 %4097 }
 0x47e   :  { %v9075_v53 = vpop.eup %9074  ;;  %16590 = vst [vmem:[#allocation53_spill] sm:$0xff] %v12475_v11 }
 0x47f   :  { %v2695_v20 = vadd.f32 1.0, %v9075_v53  ;;  %4298 = vperm.xlu1 %8732, %v12131_v50  }
 0x481   :  { %9076 = vrcp.f32 %v2695_v20  ;;  %v12479_v35 = vpop.permute.xlu1 %4480 }
 0x482   :  { %16591 = vst [vmem:[#allocation89_spill] sm:$0xff] %v12479_v35 }
 0x483   :  { %8733 = vset.pattern.permute.xlu1 %v16541_v31 }
 0x484   :  { %4129 = vperm.xlu1 %8733, %v12131_v50  }
 0x485   :  { %v12482_v55 = vpop.permute.xlu1 %4486 }
 0x488   :  { %8734 = vset.pattern.permute.xlu1 %v16542_v45 }
 0x489   :  { %v12497_v56 = vpop.permute.xlu1 %3733  ;;  %4507 = vperm.xlu1 %8734, %v12166_v18  }
 0x48a   :  { %16592 = vst [vmem:[#allocation123_spill] sm:$0xff] %v12497_v56 }
 0x48b   :  { %v9077_v53 = vpop.eup %9076 }
 0x48c   :  { %v2701_v20 = vrot.slane %v9077_v53, %v16558_v22  ;;  %v12487_v28 = vrot.slane %v9077_v53, %v16560_v33 }
 0x48d   :  { %8735 = vset.pattern.permute.xlu1 %v16537_v4 }
 0x48e   :  { %v2702_v51 = vmul.f32 %v2701_v20, %v11976_v0  ;;  %v2703_v36 = vmul.f32 %v2701_v20, %v11980_v2  ;;  %v2704_v11 = vmul.f32 %v2701_v20, %v11972_v43  ;;  %v2705_v9 = vmul.f32 %v2701_v20, %v11983_v14  ;;  %3757 = vperm.xlu1 %8735, %v12242_v38  }
 0x48f   :  { %v2706_v16 = vmul.f32 %v2701_v20, %v11987_v13  ;;  %v2707_v10 = vmul.f32 %v2701_v20, %v11999_v7  ;;  %v2708_v54 = vmul.f32 %v2701_v20, %v12028_v52  ;;  %v2709_v15 = vmul.f32 %v2701_v20, %v12032_v47 }
 0x490   :  { %v2733_v53 = vrot.slane %v2702_v51, 7  ;;  %v2734_v0 = vrot.slane %v2703_v36, 7  ;;  %v2736_v39 = vrot.slane %v2704_v11, 7  ;;  %v2738_v2 = vrot.slane %v2705_v9, 7  ;;  %v12508_v11 = vpop.permute.xlu1 %4812 }
 0x491   :  { %v2740_v43 = vrot.slane %v2706_v16, 7  ;;  %v2742_v14 = vrot.slane %v2707_v10, 7  ;;  %v2744_v35 = vrot.slane %v2708_v54, 7  ;;  %v2710_v13 = vmul.f32 %v2701_v20, %v12004_v8  ;;  %16593 = vst [vmem:[#allocation109_spill] sm:$0xff] %v12508_v11 }
 0x492   :  { %v2735_v7 = vsel %vm933_vm3, %v2733_v53, %v2734_v0  ;;  %v2737_v52 = vsel %vm933_vm3, %v2734_v0, %v2736_v39  ;;  %v2739_v47 = vsel %vm933_vm3, %v2736_v39, %v2738_v2  ;;  %v2746_v54 = vrot.slane %v2709_v15, 7  ;;  %8736 = vset.pattern.permute.xlu1 %v16539_v17 }
 0x493   :  { %v2809_v56 = vpack.c.bf16 %v2737_v52, %v2735_v7  ;;  %v2741_v1 = vsel %vm933_vm3, %v2738_v2, %v2740_v43  ;;  %v2743_v51 = vsel %vm933_vm3, %v2740_v43, %v2742_v14  ;;  %v2745_v9 = vsel %vm933_vm3, %v2742_v14, %v2744_v35  ;;  %4839 = vperm.xlu1 %8736, %v12166_v18  }
 0x494   :  { %v2810_v16 = vpack.c.bf16 %v2741_v1, %v2739_v47  ;;  %v2811_v10 = vpack.c.bf16 %v2745_v9, %v2743_v51  ;;  %v2748_v36 = vrot.slane %v2710_v13, 7  ;;  %v2715_v20 = vmul.f32 %v12487_v28, %v12004_v8  ;;  %v4816_v43 = vpop.permute.xlu1 %4815 }
 0x495   :  { %8353 = vmatprep.mubr.bf16.mxu1 %v2809_v56  ;;  %v2716_v39 = vmul.f32 %v12487_v28, %v11992_v59  ;;  %v2717_v53 = vmul.f32 %v12487_v28, %v11995_v21  ;;  %v2718_v15 = vmul.f32 %v12487_v28, %v12007_v12  ;;  %v2747_v56 = vsel %vm933_vm3, %v2744_v35, %v2746_v54 }
 0x496   :  { %8354 = vmatmul.mubr.bf16.vlgmr.msra.gmra.mrb[4].mxu1 %v2810_v16  ;;  %v2767_v0 = vrot.slane %v2715_v20, 7  ;;  %v2749_v8 = vsel %vm933_vm3, %v2746_v54, %v2748_v36  ;;  %v2719_v59 = vmul.f32 %v12487_v28, %v12015_v30  ;;  %v2720_v13 = vmul.f32 %v12487_v28, %v12021_v3 }
 0x497   :  { %8357 = vmatprep.mubr.bf16.mxu1 %v2811_v10  ;;  %v2768_v2 = vrot.slane %v2716_v39, 7  ;;  %v2770_v1 = vrot.slane %v2717_v53, 7  ;;  %v2721_v12 = vmul.f32 %v12487_v28, %v12041_v57  ;;  %v2812_v52 = vpack.c.bf16 %v2749_v8, %v2747_v56  ;;  %8738 = vset.pattern.permute.xlu1 %v16535_v23 }
 0x498   :  { %v3394_v7 = vpop.permute.xlu1 %3393  ;;  %v2772_v35 = vrot.slane %v2718_v15, 7  ;;  %v2774_v51 = vrot.slane %v2719_v59, 7  ;;  %v15788_v9 = vrot.slane %v12508_v11, 7  ;;  %v4860_v30 = vrot.slane %v4816_v43, 7  ;;  %3425 = vperm.xlu1 %8738, %v12242_v38  }
 0x499   :  { %v2769_v21 = vsel %vm933_vm3, %v2767_v0, %v2768_v2  ;;  %v2771_v14 = vsel %vm933_vm3, %v2768_v2, %v2770_v1  ;;  %v2776_v16 = vrot.slane %v2720_v13, 7  ;;  %v2778_v10 = vrot.slane %v2721_v12, 7 }
 0x49a   :  { %v2813_v47 = vpack.c.bf16 %v2771_v14, %v2769_v21  ;;  %v12536_v3 = vsel %vm933_vm3, %v15788_v9, %v4860_v30  ;;  %v16595_v57 = vrot.slane %v12334_v62, 7  ;;  %v3440_v36 = vrot.slane %v3394_v7, 1 }
 0x49b   :  { %16594 = vst [vmem:[#allocation91_spill] sm:$0xff] %v12536_v3  ;;  %v2722_v39 = vmul.f32 %v12487_v28, %v12050_v49  ;;  %v2773_v0 = vsel %vm933_vm3, %v2770_v1, %v2772_v35  ;;  %v2775_v2 = vsel %vm933_vm3, %v2772_v35, %v2774_v51  ;;  %v2723_v62 = vmul.f32 %v12487_v28, %v12047_v25 }
 0x49c   :  { %v12541_v54 = vsel %vm933_vm3, %v4860_v30, %v16595_v57  ;;  %v12543_v20 = vpop.permute.xlu1 %3397  ;;  %v16597_v43 = vrot.slane %v12433_v32, 1  ;;  %v2777_v56 = vsel %vm933_vm3, %v2774_v51, %v2776_v16  ;;  %v2779_v8 = vsel %vm933_vm3, %v2776_v16, %v2778_v10  ;;  %8739 = vset.pattern.permute.xlu1 %v16536_v34 }
 0x49d   :  { %16596 = vst [vmem:[#allocation96_spill] sm:$0xff] %v12541_v54  ;;  %v3442_v53 = vrot.slane %v12543_v20, 1  ;;  %v2814_v59 = vpack.c.bf16 %v2775_v2, %v2773_v0  ;;  %v2815_v25 = vpack.c.bf16 %v2779_v8, %v2777_v56  ;;  %v2780_v32 = vrot.slane %v2722_v39, 7  ;;  %3591 = vperm.xlu1 %8739, %v12242_v38   ;;  %v12622_v8 = vpop.permute.xlu0 %4827 }
 0x49e   :  { %8358 = vmatmul.mubr.bf16.gmra.mrb[8].mxu1 %v2812_v52  ;;  %v12556_v15 = vsel %vm600_vm4, %v16597_v43, %v3440_v36  ;;  %v2782_v28 = vrot.slane %v2723_v62, 7  ;;  %v16603_v51 = vrot.slane %v12466_v19, 7  ;;  %v15795_v19 = vrot.slane %v12482_v55, 1 }
 0x49f   :  { %8361 = vmatprep.mubr.bf16.mxu1 %v2813_v47  ;;  %16598 = vst [vmem:[#allocation50_spill] sm:$0xff] %v12556_v15  ;;  %v12563_v49 = vsel %vm600_vm4, %v3440_v36, %v3442_v53  ;;  %v2781_v14 = vsel %vm933_vm3, %v2778_v10, %v2780_v32 }
 0x4a0   :  { %16599 = vst [vmem:[#allocation108_spill] sm:$0xff] %v12563_v49  ;;  %v12565_v1 = vpop.permute.xlu1 %3563  ;;  %v2783_v13 = vsel %vm933_vm3, %v2780_v32, %v2782_v28 }
 0x4a1   :  { %16600 = vst [vmem:[#allocation129_spill] sm:$0xff] %v12565_v1  ;;  %v2816_v7 = vpack.c.bf16 %v2783_v13, %v2781_v14  ;;  %8740 = vset.pattern.permute.xlu1 %v16538_v60  ;;  %v16609_v14 = vrot.slane %v12346_v29, 7 }
 0x4a2   :  { %3972 = vperm.xlu1 %8740, %v12136_v46  }
 0x4a4   :  { %v12569_v21 = vpop.permute.xlu1 %3945 }
 0x4a6   :  { %8362 = vmatmul.mubr.bf16.gmra.mrb[12].mxu1 %v2814_v59  ;;  %8741 = vset.pattern.permute.xlu1 %v16543_v44  ;;  %v15790_v59 = vrot.slane %v12622_v8, 7 }
 0x4a7   :  { %8365 = vmatprep.mubr.bf16.mxu1 %v2815_v25  ;;  %4667 = vperm.xlu1 %8741, %v12166_v18  }
 0x4a8   :  { %v12575_v12 = vpop.permute.xlu1 %4631 }
 0x4a9   :  { %16601 = vst [vmem:[#allocation77_spill] sm:$0xff] %v12575_v12  ;;  %v2808_v12 = vld [vmem:[%s16620_s0] sm:$0x3] }
 0x4ab   :  { %8742 = vset.pattern.permute.xlu1 %v16540_v42 }
 0x4ac   :  { %v12579_v52 = vpop.permute.xlu1 %4635  ;;  %4301 = vperm.xlu1 %8742, %v12178_v63  }
 0x4ad   :  { %16602 = vst [vmem:[#allocation107_spill] sm:$0xff] %v12579_v52  ;;  %v3428_v52 = vrot.slane %v12279_v40, 1  ;;  %v16669_v40 = vld [vmem:[#allocation121_spill] sm:$0xff] }
 0x4ae   :  { %8366 = vmatmul.mubr.bf16.gmra.mrb[16].mxu1 %v2816_v7 }
 0x4b0   :  { %v4278_v35 = vpop.permute.xlu1 %4277  ;;  %4304 = vperm.xlu1 %8742, %v12136_v46  }
 0x4b1   :  { %v4318_v47 = vrot.slane %v4278_v35, 7 }
 0x4b3   :  { %v12586_v30 = vsel %vm933_vm3, %v16603_v51, %v4318_v47 }
 0x4b4   :  { %16604 = vst [vmem:[#allocation60_spill] sm:$0xff] %v12586_v30  ;;  %v12588_v16 = vpop.permute.xlu1 %4280  ;;  %8744 = vset.pattern.permute.xlu1 %v16541_v31 }
 0x4b5   :  { %v15792_v10 = vrot.slane %v12588_v16, 7  ;;  %4137 = vperm.xlu1 %8744, %v12136_v46  }
 0x4b7   :  { %v12596_v57 = vsel %vm933_vm3, %v4318_v47, %v15792_v10 }
 0x4b8   :  { %16605 = vst [vmem:[#allocation88_spill] sm:$0xff] %v12596_v57  ;;  %v12598_v36 = vpop.permute.xlu1 %4105  ;;  %v16630_v57 = vld [vmem:[#allocation46_spill] sm:$0xff] }
 0x4b9   :  { %16606 = vst [vmem:[#allocation94_spill] sm:$0xff] %v12598_v36  ;;  %8745 = vset.pattern.permute.xlu1 %v16542_v45  ;;  %v16631_v36 = vld [vmem:[#allocation61_spill] sm:$0xff] }
 0x4ba   :  { %4513 = vperm.xlu1 %8745, %v12171_v41  }
 0x4bc   :  { %v12603_v39 = vpop.permute.xlu1 %4489 }
 0x4bd   :  { %v15789_v0 = vrot.slane %v12603_v39, 1 }
 0x4be   :  { %8746 = vset.pattern.permute.xlu1 %v16539_v17 }
 0x4bf   :  { %v12612_v2 = vsel %vm600_vm4, %v15795_v19, %v15789_v0  ;;  %4845 = vperm.xlu1 %8746, %v12171_v41   ;;  %v8817_v0 = vld [vmem:[%s9436_s12 + $0x38] sm:$0xff]  }
 0x4c0   :  { %16607 = vst [vmem:[#allocation43_spill] sm:$0xff] %v12612_v2  ;;  %v12615_v62 = vpop.permute.xlu1 %3739 }
 0x4c1   :  { %v15794_v18 = vrot.slane %v12615_v62, 7 }
 0x4c3   :  { %4848 = vperm.xlu1 %8746, %v12131_v50  }
 0x4c4   :  { %v12619_v43 = vpop.permute.xlu1 %3742 }
 0x4c5   :  { %v15791_v56 = vrot.slane %v12619_v43, 7 }
 0x4c7   :  { %v12630_v25 = vsel %vm933_vm3, %v15794_v18, %v15791_v56  ;;  %8748 = vset.pattern.permute.xlu1 %v16543_v44 }
 0x4c8   :  { %16608 = vst [vmem:[#allocation28_spill] sm:$0xff] %v12630_v25  ;;  %v4825_v32 = vpop.permute.xlu1 %4824  ;;  %4675 = vperm.xlu1 %8748, %v12171_v41  }
 0x4c9   :  { %v4866_v28 = vrot.slane %v4825_v32, 7 }
 0x4cb   :  { %v12637_v13 = vsel %vm933_vm3, %v16609_v14, %v4866_v28  ;;  %v12642_v7 = vsel %vm933_vm3, %v4866_v28, %v15790_v59  ;;  %v8815_v14 = vld [vmem:[%s9436_s12 + $0x28] sm:$0xff]  }
 0x4cc   :  { %16610 = vst [vmem:[#allocation120_spill] sm:$0xff] %v12637_v13  ;;  %16611 = vst [vmem:[#allocation98_spill] sm:$0xff] %v12642_v7  ;;  %v12644_v35 = vpop.permute.xlu1 %3401  ;;  %4679 = vperm.xlu1 %8748, %v12131_v50   ;;  %8379 = vmatprep.subr.bf16.mxu0 %v8815_v14  ;;  %v8816_v50 = vld [vmem:[%s9436_s12 + $0x30] sm:$0xff]   ;;  %s17062_s12 = sld [smem:[#allocation17_spill]] }
 0x4cd   :  { %v15793_v47 = vrot.slane %v12644_v35, 1  ;;  %8380 = vmatpush3.bf16.msra.mxu0 %v8815_v14 }
 0x4ce   :  { %8381 = vmatprep.subr.bf16.mxu0 %v8816_v50 }
 0x4cf   :  { %v12654_v29 = vsel %vm600_vm4, %v3442_v53, %v15793_v47 }
 0x4d0   :  { %16612 = vst [vmem:[#allocation103_spill] sm:$0xff] %v12654_v29  ;;  %v12656_v51 = vpop.permute.xlu1 %3567  ;;  %8750 = vset.pattern.permute.xlu1 %v16541_v31  ;;  %v16628_v29 = vld [vmem:[#allocation44_spill] sm:$0xff] }
 0x4d1   :  { %16613 = vst [vmem:[#allocation56_spill] sm:$0xff] %v12656_v51  ;;  %4141 = vperm.xlu1 %8750, %v12242_v38   ;;  %8382 = vmatpush3.bf16.msra.mxu0 %v8816_v50 }
 0x4d2   :  { %8383 = vmatprep.subr.bf16.mxu0 %v8817_v0 }
 0x4d4   :  { %v12660_v32 = vpop.permute.xlu1 %3571 }
 0x4d5   :  { %16614 = vst [vmem:[#allocation57_spill] sm:$0xff] %v12660_v32  ;;  %8751 = vset.pattern.permute.xlu1 %v16542_v45  ;;  %8384 = vmatpush3.bf16.msra.mxu0 %v8817_v0 }
 0x4d6   :  { %4519 = vperm.xlu1 %8751, %v12178_v63   ;;  %8439 = vmatprep.subr.bf16.mxu0 %v16534_v37 }
 0x4d8   :  { %v12663_v28 = vpop.permute.xlu1 %3954 }
 0x4da   :  { %8753 = vset.pattern.permute.xlu1 %v16539_v17 }
 0x4db   :  { %4851 = vperm.xlu1 %8753, %v12178_v63  }
 0x4dc   :  { %v12668_v20 = vpop.permute.xlu1 %4643 }
 0x4dd   :  { %16615 = vst [vmem:[#allocation106_spill] sm:$0xff] %v12668_v20 }
 0x4df   :  { %4854 = vperm.xlu1 %8753, %v12136_v46  }
 0x4e0   :  { %v12672_v53 = vpop.permute.xlu1 %4283 }
 0x4e3   :  { %8754 = vset.pattern.permute.xlu1 %v16543_v44 }
 0x4e4   :  { %v12677_v9 = vpop.permute.xlu1 %4286  ;;  %4687 = vperm.xlu1 %8754, %v12136_v46  }
 0x4e8   :  { %v12682_v41 = vpop.permute.xlu1 %4113  ;;  %8755 = vset.pattern.permute.xlu1 %v16542_v45 }
 0x4e9   :  { %16616 = vst [vmem:[#allocation105_spill] sm:$0xff] %v12682_v41  ;;  %4525 = vperm.xlu1 %8755, %v12242_v38  }
 0x4ec   :  { %v12686_v59 = vpop.permute.xlu1 %4495 }
 0x4ed   :  { %8757 = vset.pattern.permute.xlu1 %v16543_v44 }
 0x4ee   :  { %4691 = vperm.xlu1 %8757, %v12242_v38  }
 0x4f0   :  { %v12690_v56 = vpop.permute.xlu1 %3745 }
 0x4f2   :  { %8758 = vset.pattern.permute.xlu1 %v16536_v34 }
 0x4f4   :  { %v12694_v63 = vpop.permute.xlu1 %3748 }
 0x4f8   :  { %v12697_v14 = vpop.permute.xlu1 %4830 }
 0x4fc   :  { %v12701_v50 = vpop.permute.xlu1 %3409 }
 0x500   :  { %v12704_v46 = vpop.permute.xlu1 %3575 }
 0x501   :  { %16617 = vst [vmem:[#allocation101_spill] sm:$0xff] %v12704_v46 }
 0x504   :  { %v12706_v0 = vpop.permute.xlu1 %3579 }
 0x505   :  { %16618 = vst [vmem:[#allocation59_spill] sm:$0xff] %v12706_v0 }
 0x508   :  { %v12708_v10 = vpop.permute.xlu1 %3960 }
 0x50c   :  { %v12710_v47 = vpop.permute.xlu1 %4651 }
 0x50d   :  { %16619 = vst [vmem:[#allocation45_spill] sm:$0xff] %v12710_v47 }
 0x510   :  { %v12712_v18 = vpop.permute.xlu1 %4289 }
 0x514   :  { %v12714_v19 = vpop.permute.xlu1 %4292 }
 0x518   :  { %v12716_v17 = vpop.permute.xlu1 %4121 }
 0x519   :  { %16621 = vst [vmem:[#allocation110_spill] sm:$0xff] %v12716_v17 }
 0x51c   :  { %v12718_v38 = vpop.permute.xlu1 %4501 }
 0x520   :  { %v12720_v45 = vpop.permute.xlu1 %3751 }
 0x524   :  { %v12722_v34 = vpop.permute.xlu1 %3754 }
 0x528   :  { %v12724_v44 = vpop.permute.xlu1 %4836 }
 0x52c   :  { %v12726_v31 = vpop.permute.xlu1 %3417 }
 0x530   :  { %v12728_v42 = vpop.permute.xlu1 %3583 }
 0x531   :  { %16622 = vst [vmem:[#allocation48_spill] sm:$0xff] %v12728_v42  ;;  %v12754_v42 = vrot.slane %v2808_v12, %v16560_v33 }
 0x534   :  { %v12730_v60 = vpop.permute.xlu1 %3587 }
 0x535   :  { %16623 = vst [vmem:[#allocation90_spill] sm:$0xff] %v12730_v60  ;;  %v12751_v60 = vrot.slane %v2808_v12, %v16558_v22 }
 0x538   :  { %v12732_v4 = vpop.permute.xlu1 %3966 }
 0x53c   :  { %v12734_v23 = vpop.permute.xlu1 %4659 }
 0x53d   :  { %16624 = vst [vmem:[#allocation58_spill] sm:$0xff] %v12734_v23 }
 0x540   :  { %v12736_v7 = vpop.permute.xlu1 %4295 }
 0x541   :  { %16625 = vst [vmem:[#allocation39_spill] sm:$0xff] %v12736_v7  ;;  %v15806_v54 = vrot.slane %v12736_v7, 7  ;;  %v16670_v7 = vld [vmem:[#allocation30_spill] sm:$0xff] }
 0x544   :  { %v12738_v13 = vpop.permute.xlu1 %4298 }
 0x545   :  { %16626 = vst [vmem:[#allocation111_spill] sm:$0xff] %v12738_v13  ;;  %v15805_v3 = vrot.slane %v12738_v13, 7  ;;  %v16665_v13 = vld [vmem:[#allocation32_spill] sm:$0xff] }
 0x547   :  { %v12747_v11 = vsel %vm933_vm3, %v15806_v54, %v15805_v3 }
 0x548   :  { %16627 = vst [vmem:[#allocation72_spill] sm:$0xff] %v12747_v11 }
 0x569   :  { %v8355_v0 = vpop.f32.mrb[4].mxu1 }
 0x56a   :  { %v2968_v17 = vmul.f32 %v8355_v0, %v12751_v60  ;;  %v2899_v25 = vpop.f32.mrb[5].mxu1  ;;  %v16629_v0 = vld [vmem:[#allocation66_spill] sm:$0xff] }
 0x56b   :  { %v2966_v46 = vmul.f32 %v12751_v60, %v2899_v25  ;;  %v8356_v32 = vpop.f32.mrb[6].mxu1 }
 0x56c   :  { %v2988_v41 = vadd.f32 %v12754_v42, %v2968_v17  ;;  %v2969_v51 = vmul.f32 %v8356_v32, %v12751_v60  ;;  %v2902_v3 = vpop.f32.mrb[7].mxu1 }
 0x56d   :  { %v2986_v54 = vadd.f32 %v12754_v42, %v2966_v46  ;;  %v2967_v11 = vmul.f32 %v12751_v60, %v2902_v3 }
 0x56e   :  { %v2989_v1 = vadd.f32 %v12754_v42, %v2969_v51  ;;  %v3004_v49 = vadd.f32 %v2988_v41, %v16628_v29  ;;  %v16633_v41 = vld [vmem:[#allocation119_spill] sm:$0xff] }
 0x56f   :  { %v2987_v12 = vadd.f32 %v12754_v42, %v2967_v11  ;;  %v3002_v25 = vadd.f32 %v2986_v54, %v16630_v57 }
 0x570   :  { %v3005_v23 = vadd.f32 %v2989_v1, %v16629_v0 }
 0x571   :  { %v3003_v15 = vadd.f32 %v2987_v12, %v16631_v36  ;;  %v8359_v17 = vpop.f32.mrb[8].mxu1 }
 0x572   :  { %v3056_v47 = vpack.c.bf16 %v3005_v23, %v3004_v49  ;;  %v2972_v32 = vmul.f32 %v8359_v17, %v12751_v60  ;;  %v2915_v30 = vpop.f32.mrb[9].mxu1 }
 0x573   :  { %v2970_v46 = vmul.f32 %v12751_v60, %v2915_v30  ;;  %v8360_v3 = vpop.f32.mrb[10].mxu1  ;;  %v3055_v20 = vpack.c.bf16 %v3003_v15, %v3002_v25  ;;  %v16632_v15 = vld [vmem:[#allocation52_spill] sm:$0xff] }
 0x574   :  { %v2992_v51 = vadd.f32 %v12754_v42, %v2972_v32  ;;  %v2973_v11 = vmul.f32 %v8360_v3, %v12751_v60  ;;  %v2918_v29 = vpop.f32.mrb[11].mxu1 }
 0x575   :  { %v2990_v1 = vadd.f32 %v12754_v42, %v2970_v46  ;;  %v2971_v54 = vmul.f32 %v12751_v60, %v2918_v29  ;;  %8385 = vmatprep.mubr.bf16.mxu0 %v3055_v20 }
 0x576   :  { %v2993_v57 = vadd.f32 %v12754_v42, %v2973_v11  ;;  %8386 = vmatmul.mubr.bf16.vlgmr.msra.gmra.mrb[20].mxu0 %v3056_v47  ;;  %v3008_v49 = vadd.f32 %v2992_v51, %v10429_v6 }
 0x577   :  { %v2991_v23 = vadd.f32 %v12754_v42, %v2971_v54  ;;  %v3006_v36 = vadd.f32 %v2990_v1, %v16632_v15  ;;  %v16634_v54 = vld [vmem:[#allocation54_spill] sm:$0xff] }
 0x578   :  { %v3009_v30 = vadd.f32 %v2993_v57, %v16517_v26 }
 0x579   :  { %v3007_v12 = vadd.f32 %v2991_v23, %v16633_v41  ;;  %v8363_v0 = vpop.f32.mrb[12].mxu1  ;;  %v16635_v23 = vld [vmem:[#allocation124_spill] sm:$0xff] }
 0x57a   :  { %v2976_v25 = vmul.f32 %v8363_v0, %v12751_v60  ;;  %v2931_v17 = vpop.f32.mrb[13].mxu1  ;;  %v3058_v32 = vpack.c.bf16 %v3009_v30, %v3008_v49  ;;  %v16636_v30 = vld [vmem:[#allocation122_spill] sm:$0xff] }
 0x57b   :  { %v2974_v20 = vmul.f32 %v12751_v60, %v2931_v17  ;;  %v8364_v46 = vpop.f32.mrb[14].mxu1  ;;  %v3057_v3 = vpack.c.bf16 %v3007_v12, %v3006_v36  ;;  %v16637_v36 = vld [vmem:[#allocation126_spill] sm:$0xff] }
 0x57c   :  { %v2996_v47 = vadd.f32 %v12754_v42, %v2976_v25  ;;  %v2977_v11 = vmul.f32 %v8364_v46, %v12751_v60  ;;  %v2934_v6 = vpop.f32.mrb[15].mxu1 }
 0x57d   :  { %v2994_v26 = vadd.f32 %v12754_v42, %v2974_v20  ;;  %v2975_v51 = vmul.f32 %v12751_v60, %v2934_v6  ;;  %8389 = vmatprep.mubr.bf16.mxu0 %v3057_v3 }
 0x57e   :  { %v2997_v29 = vadd.f32 %v12754_v42, %v2977_v11  ;;  %8390 = vmatmul.mubr.bf16.gmra.mrb[24].mxu0 %v3058_v32  ;;  %v3012_v57 = vadd.f32 %v2996_v47, %v16634_v54 }
 0x57f   :  { %v2995_v1 = vadd.f32 %v12754_v42, %v2975_v51  ;;  %v3010_v15 = vadd.f32 %v2994_v26, %v16636_v30 }
 0x580   :  { %v3013_v49 = vadd.f32 %v2997_v29, %v16635_v23 }
 0x581   :  { %v3011_v41 = vadd.f32 %v2995_v1, %v16637_v36  ;;  %v8367_v12 = vpop.f32.mrb[16].mxu1 }
 0x582   :  { %v2980_v0 = vmul.f32 %v8367_v12, %v12751_v60  ;;  %v2947_v25 = vpop.f32.mrb[17].mxu1  ;;  %v3060_v17 = vpack.c.bf16 %v3013_v49, %v3012_v57  ;;  %v16638_v57 = vld [vmem:[#allocation127_spill] sm:$0xff] }
 0x583   :  { %v2978_v20 = vmul.f32 %v12751_v60, %v2947_v25  ;;  %v8368_v46 = vpop.f32.mrb[18].mxu1  ;;  %v3059_v3 = vpack.c.bf16 %v3011_v41, %v3010_v15  ;;  %v12824_v25 = vpop.permute.xlu1 %4129 }
 0x584   :  { %v3000_v32 = vadd.f32 %v12754_v42, %v2980_v0  ;;  %v2981_v11 = vmul.f32 %v8368_v46, %v12751_v60  ;;  %v2950_v47 = vpop.f32.mrb[19].mxu1  ;;  %16646 = vst [vmem:[#allocation42_spill] sm:$0xff] %v12824_v25 }
 0x585   :  { %v2998_v6 = vadd.f32 %v12754_v42, %v2978_v20  ;;  %v2979_v26 = vmul.f32 %v12751_v60, %v2950_v47  ;;  %8393 = vmatprep.mubr.bf16.mxu0 %v3059_v3  ;;  %v12806_v60 = vpop.permute.xlu0 %4833 }
 0x586   :  { %v3001_v51 = vadd.f32 %v12754_v42, %v2981_v11  ;;  %8394 = vmatmul.mubr.bf16.gmra.mrb[28].mxu0 %v3060_v17  ;;  %v3016_v1 = vadd.f32 %v3000_v32, %v16469_v58 }
 0x587   :  { %v2999_v29 = vadd.f32 %v12754_v42, %v2979_v26  ;;  %v3014_v23 = vadd.f32 %v2998_v6, %v16638_v57  ;;  %v12828_v20 = vpop.permute.xlu1 %4507 }
 0x588   :  { %v3017_v54 = vadd.f32 %v3001_v51, %v16472_v61  ;;  %16647 = vst [vmem:[#allocation68_spill] sm:$0xff] %v12828_v20 }
 0x589   :  { %v3015_v49 = vadd.f32 %v2999_v29, %v10684_v27  ;;  %v12808_v36 = vpop.permute.xlu0 %4842 }
 0x58a   :  { %v3062_v30 = vpack.c.bf16 %v3017_v54, %v3016_v1 }
 0x58b   :  { %v3061_v15 = vpack.c.bf16 %v3015_v49, %v3014_v23  ;;  %v12832_v3 = vpop.permute.xlu1 %3757 }
 0x58c   :  { %16648 = vst [vmem:[#allocation113_spill] sm:$0xff] %v12832_v3  ;;  %v3774_v3 = vrot.slane %v16670_v7, 7  ;;  %v16679_v7 = vld [vmem:[#allocation67_spill] sm:$0xff] }
 0x58d   :  { %8397 = vmatprep.mubr.bf16.mxu0 %v3061_v15  ;;  %v12810_v42 = vpop.permute.xlu0 %4085 }
 0x58e   :  { %8398 = vmatmul.mubr.bf16.gmra.mrb[32].mxu0 %v3062_v30  ;;  %16639 = vst [vmem:[#allocation104_spill] sm:$0xff] %v12810_v42 }
 0x58f   :  { %8455 = vmatprep.mubr.msk.bf16.mxu0 %vm9356_vm5, %v16534_v37  ;;  %v12836_v11 = vpop.permute.xlu1 %4839 }
 0x590   :  { %16649 = vst [vmem:[#allocation79_spill] sm:$0xff] %v12836_v11  ;;  %v3770_v11 = vrot.slane %v16669_v40, 7 }
 0x591   :  { %v12812_v58 = vpop.permute.xlu0 %4093 }
 0x592   :  { %16640 = vst [vmem:[#allocation87_spill] sm:$0xff] %v12812_v58 }
 0x593   :  { %v12840_v6 = vpop.permute.xlu1 %3425 }
 0x594   :  { %16650 = vst [vmem:[#allocation44_spill] sm:$0xff] %v12840_v6  ;;  %v16667_v6 = vld [vmem:[#allocation74_spill] sm:$0xff] }
 0x595   :  { %v12814_v61 = vpop.permute.xlu0 %4101 }
 0x596   :  { %16641 = vst [vmem:[#allocation73_spill] sm:$0xff] %v12814_v61 }
 0x597   :  { %v12844_v51 = vpop.permute.xlu1 %3591 }
 0x598   :  { %16651 = vst [vmem:[#allocation66_spill] sm:$0xff] %v12844_v51 }
 0x599   :  { %v12816_v41 = vpop.permute.xlu0 %4109 }
 0x59a   :  { %16642 = vst [vmem:[#allocation83_spill] sm:$0xff] %v12816_v41 }
 0x59b   :  { %v12848_v1 = vpop.permute.xlu1 %3972 }
 0x59c   :  { %16652 = vst [vmem:[#allocation46_spill] sm:$0xff] %v12848_v1 }
 0x59d   :  { %v12818_v27 = vpop.permute.xlu0 %4117 }
 0x59e   :  { %16643 = vst [vmem:[#allocation76_spill] sm:$0xff] %v12818_v27 }
 0x59f   :  { %v12852_v57 = vpop.permute.xlu1 %4667 }
 0x5a0   :  { %16653 = vst [vmem:[#allocation61_spill] sm:$0xff] %v12852_v57 }
 0x5a1   :  { %v12820_v12 = vpop.permute.xlu0 %4125 }
 0x5a2   :  { %16644 = vst [vmem:[#allocation100_spill] sm:$0xff] %v12820_v12 }
 0x5a3   :  { %v12856_v49 = vpop.permute.xlu1 %4301 }
 0x5a4   :  { %16655 = vst [vmem:[#allocation119_spill] sm:$0xff] %v12856_v49 }
 0x5a5   :  { %v12822_v0 = vpop.permute.xlu0 %4133 }
 0x5a6   :  { %16645 = vst [vmem:[#allocation116_spill] sm:$0xff] %v12822_v0 }
 0x5a7   :  { %v12860_v15 = vpop.permute.xlu1 %4304 }
 0x5a8   :  { %16656 = vst [vmem:[#allocation54_spill] sm:$0xff] %v12860_v15  ;;  %v3760_v15 = vrot.slane %v16665_v13, 7  ;;  %v16675_v13 = vrot.slane %v12276_v24, 7  ;;  %v16685_v24 = vld [vmem:[#allocation36_spill] sm:$0xff] }
 0x5a9   :  { %v12826_v17 = vpop.permute.xlu0 %3933 }
 0x5ab   :  { %v12864_v0 = vpop.permute.xlu1 %4137 }
 0x5ac   :  { %16657 = vst [vmem:[#allocation124_spill] sm:$0xff] %v12864_v0  ;;  %v16663_v0 = vrot.slane %v12283_v48, 1 }
 0x5ad   :  { %v12830_v46 = vpop.permute.xlu0 %3942 }
 0x5ae   :  { %v3429_v42 = vsel %vm600_vm4, %v16663_v0, %v3428_v52  ;;  %v16672_v0 = vld [vmem:[#allocation78_spill] sm:$0xff] }
 0x5af   :  { %v12868_v25 = vpop.permute.xlu1 %4513  ;;  %v3476_v49 = vmul.f32 0.0, %v3429_v42  ;;  %v16673_v33 = vrot.slane %v16672_v0, 7  ;;  %v12909_v42 = vsel %vm933_vm3, %v3760_v15, %v16675_v13  ;;  %v16682_v0 = vld [vmem:[#allocation47_spill] sm:$0xff] }
 0x5b0   :  { %16658 = vst [vmem:[#allocation122_spill] sm:$0xff] %v12868_v25  ;;  %16676 = vst [vmem:[#allocation30_spill] sm:$0xff] %v12909_v42  ;;  %v16683_v22 = vrot.slane %v16682_v0, 1  ;;  %v3984_v42 = vrot.slane %v12830_v46, 1 }
 0x5b1   :  { %v12834_v32 = vpop.permute.xlu0 %3948 }
 0x5b3   :  { %v12874_v57 = vpop.permute.xlu1 %4845 }
 0x5b4   :  { %16659 = vst [vmem:[#allocation126_spill] sm:$0xff] %v12874_v57  ;;  %v16666_v57 = vld [vmem:[#allocation86_spill] sm:$0xff] }
 0x5b5   :  { %v12838_v47 = vpop.permute.xlu0 %3951  ;;  %v3766_v1 = vrot.slane %v16666_v57, 7  ;;  %v16677_v57 = vld [vmem:[#allocation35_spill] sm:$0xff] }
 0x5b6   :  { %v3990_v46 = vrot.slane %v12838_v47, 1  ;;  %v16701_v47 = vld [vmem:[#allocation82_spill] sm:$0xff] }
 0x5b7   :  { %v12878_v61 = vpop.permute.xlu1 %4848 }
 0x5b8   :  { %16660 = vst [vmem:[#allocation127_spill] sm:$0xff] %v12878_v61  ;;  %v12894_v61 = vrot.slane %v12293_v5, %v16667_v6 }
 0x5b9   :  { %v12842_v26 = vpop.permute.xlu0 %3957 }
 0x5ba   :  { %16668 = vst [vmem:[#allocation32_spill] sm:$0xff] %v12894_v61  ;;  %v16678_v61 = vld [vmem:[#allocation92_spill] sm:$0xff] }
 0x5bb   :  { %v12883_v58 = vpop.permute.xlu1 %4675  ;;  %v3768_v40 = vrot.slane %v16678_v61, 7  ;;  %v3978_v61 = vrot.slane %v12826_v17, 1  ;;  %v3988_v17 = vrot.slane %v12834_v32, 1 }
 0x5bc   :  { %16662 = vst [vmem:[#allocation132_spill] sm:$0xff] %v12883_v58  ;;  %v12916_v58 = vmul.f32 %v16679_v7, %v3476_v49  ;;  %v16689_v49 = vld [vmem:[#allocation70_spill] sm:$0xff] }
 0x5bd   :  { %v12846_v29 = vpop.permute.xlu0 %3963  ;;  %v12950_v0 = vsel %vm933_vm3, %v3768_v40, %v3770_v11 }
 0x5be   :  { %16680 = vst [vmem:[#allocation78_spill] sm:$0xff] %v12916_v58  ;;  %v12934_v58 = vrot.slane %v12293_v5, %v16689_v49  ;;  %16694 = vst [vmem:[#allocation36_spill] sm:$0xff] %v12950_v0  ;;  %v16703_v49 = vld [vmem:[#allocation97_spill] sm:$0xff] }
 0x5bf   :  { %v12899_v48 = vpop.permute.xlu1 %4679  ;;  %v16704_v0 = vrot.slane %v16703_v49, 1 }
 0x5c0   :  { %16671 = vst [vmem:[#allocation86_spill] sm:$0xff] %v12899_v48  ;;  %v16681_v48 = vld [vmem:[#allocation125_spill] sm:$0xff] }
 0x5c1   :  { %v12850_v54 = vpop.permute.xlu0 %3969 }
 0x5c5   :  { %v12854_v23 = vpop.permute.xlu0 %3975 }
 0x5c6   :  { %16654 = vst [vmem:[#allocation52_spill] sm:$0xff] %v12854_v23 }
 0x5c9   :  { %v12858_v30 = vpop.permute.xlu0 %4265 }
 0x5cd   :  { %v12862_v37 = vpop.permute.xlu0 %4307 }
 0x5d1   :  { %v12866_v51 = vpop.permute.xlu0 %4483 }
 0x5d5   :  { %v12870_v12 = vpop.permute.xlu0 %4492 }
 0x5d9   :  { %v12872_v27 = vpop.permute.xlu0 %4498 }
 0x5dd   :  { %v12876_v41 = vpop.permute.xlu0 %4504 }
 0x5e1   :  { %v12881_v2 = vpop.permute.xlu0 %4510 }
 0x5e2   :  { %16661 = vst [vmem:[#allocation131_spill] sm:$0xff] %v12881_v2  ;;  %v16696_v2 = vld [vmem:[#allocation123_spill] sm:$0xff] }
 0x5e3   :  { %v3772_v7 = vrot.slane %v16696_v2, 7  ;;  %v12973_v2 = vsel %vm600_vm4, %v16704_v0, %v3984_v42  ;;  %v16707_v0 = vld [vmem:[#allocation33_spill] sm:$0xff] }
 0x5e5   :  { %v12888_v25 = vpop.permute.xlu0 %4516 }
 0x5e6   :  { %16664 = vst [vmem:[#allocation133_spill] sm:$0xff] %v12888_v25  ;;  %v12904_v25 = vsel %vm933_vm3, %v16673_v33, %v3760_v15  ;;  %v12922_v33 = vsel %vm600_vm4, %v3428_v52, %v16683_v22  ;;  %v16686_v15 = vld [vmem:[#allocation55_spill] sm:$0xff]  ;;  %v16690_v52 = vld [vmem:[#allocation40_spill] sm:$0xff]  ;;  %v16695_v22 = vld [vmem:[#allocation89_spill] sm:$0xff] }
 0x5e7   :  { %16674 = vst [vmem:[#allocation121_spill] sm:$0xff] %v12904_v25  ;;  %16684 = vst [vmem:[#allocation35_spill] sm:$0xff] %v12922_v33  ;;  %v16687_v13 = vrot.slane %v16686_v15, 7  ;;  %v16691_v25 = vrot.slane %v12862_v37, 7  ;;  %v12955_v33 = vpop.permute.xlu1 %4141 }
 0x5e8   :  { %16697 = vst [vmem:[#allocation55_spill] sm:$0xff] %v12955_v33  ;;  %v16708_v33 = vrot.slane %v16707_v0, 7  ;;  %v4324_v0 = vrot.slane %v12677_v9, 7 }
 0x5e9   :  { %v12913_v20 = vpop.permute.xlu0 %4522  ;;  %v12928_v6 = vsel %vm933_vm3, %v16687_v13, %v3766_v1  ;;  %v4373_v15 = vmul.f32 0.0, %v16691_v25  ;;  %v12942_v13 = vsel %vm933_vm3, %v3766_v1, %v3768_v40  ;;  %v4528_v25 = vrot.slane %v12866_v51, 1  ;;  %v16698_v1 = vld [vmem:[#allocation118_spill] sm:$0xff] }
 0x5ea   :  { %16688 = vst [vmem:[#allocation92_spill] sm:$0xff] %v12928_v6  ;;  %16692 = vst [vmem:[#allocation125_spill] sm:$0xff] %v12942_v13  ;;  %v4310_v6 = vrot.slane %v12858_v30, 7  ;;  %v16699_v13 = vrot.slane %v16698_v1, 1  ;;  %v16702_v30 = vrot.slane %v16701_v47, 1  ;;  %v12968_v40 = vsel %vm600_vm4, %v3988_v17, %v3990_v46 }
 0x5eb   :  { %v3994_v51 = vrot.slane %v12842_v26, 1  ;;  %v12994_v1 = vsel %vm933_vm3, %v3770_v11, %v3772_v7 }
 0x5ec   :  { %v12960_v32 = vsel %vm600_vm4, %v16699_v13, %v3978_v61  ;;  %v3986_v13 = vrot.slane %v12569_v21, 1  ;;  %v12991_v26 = vsel %vm933_vm3, %v4310_v6, %v16708_v33  ;;  %v12997_v21 = vsel %vm933_vm3, %v3772_v7, %v3774_v3 }
 0x5ed   :  { %v12947_v5 = vpop.permute.xlu0 %4639  ;;  %16700 = vst [vmem:[#allocation123_spill] sm:$0xff] %v12960_v32  ;;  %v12979_v32 = vmul.f32 %v12934_v58, %v4373_v15  ;;  %16709 = vst [vmem:[#allocation82_spill] sm:$0xff] %v12997_v21  ;;  %v16710_v15 = vrot.slane %v16695_v22, 1  ;;  %v3782_v33 = vrot.slane %v12694_v63, 7  ;;  %v16716_v22 = vrot.slane %v12644_v35, 1 }
 0x5ee   :  { %16693 = vst [vmem:[#allocation47_spill] sm:$0xff] %v12947_v5  ;;  %v12965_v5 = vsel %vm600_vm4, %v3978_v61, %v16702_v30  ;;  %v16706_v30 = vrot.slane %v16690_v52, 7  ;;  %v3992_v61 = vrot.slane %v12663_v28, 1  ;;  %v13012_v7 = vsel %vm600_vm4, %v3984_v42, %v3986_v13 }
 0x5ef   :  { %16705 = vst [vmem:[#allocation118_spill] sm:$0xff] %v12979_v32  ;;  %v13002_v47 = vsel %vm600_vm4, %v16710_v15, %v4528_v25  ;;  %v16712_v15 = vrot.slane %v12482_v55, 1  ;;  %v4870_v28 = vrot.slane %v12697_v14, 7  ;;  %v13024_v9 = vsel %vm600_vm4, %v3986_v13, %v3988_v17  ;;  %v16744_v32 = vld [vmem:[#allocation64_spill] sm:$0xff] }
 0x5f0   :  { %v12986_v49 = vsel %vm933_vm3, %v16706_v30, %v4310_v6  ;;  %16711 = vst [vmem:[#allocation97_spill] sm:$0xff] %v13002_v47  ;;  %v4322_v30 = vrot.slane %v12672_v53, 7  ;;  %v3780_v6 = vrot.slane %v12690_v56, 7  ;;  %v13021_v53 = vpop.permute.xlu1 %4519  ;;  %v16713_v56 = vrot.slane %v12615_v62, 7 }
 0x5f1   :  { %v13009_v11 = vpop.permute.xlu0 %4647  ;;  %v13018_v47 = vsel %vm600_vm4, %v4528_v25, %v16712_v15  ;;  %v16715_v42 = vrot.slane %v16677_v57, 1  ;;  %v3448_v25 = vrot.slane %v12701_v50, 1  ;;  %v13040_v14 = vsel %vm600_vm4, %v3990_v46, %v3992_v61 }
 0x5f2   :  { %v13029_v63 = vsel %vm933_vm3, %v3774_v3, %v16713_v56  ;;  %16718 = vst [vmem:[#allocation135_spill] sm:$0xff] %v13040_v14  ;;  %v13043_v17 = vsel %vm600_vm4, %v3992_v61, %v3994_v51  ;;  %v4536_v62 = vrot.slane %v12686_v59, 1  ;;  %v4534_v3 = vrot.slane %v12870_v12, 1  ;;  %v16829_v14 = vld [vmem:[#allocation93_spill] sm:$0xff] }
 0x5f3   :  { %16714 = vst [vmem:[#allocation33_spill] sm:$0xff] %v13029_v63  ;;  %v13036_v55 = vsel %vm600_vm4, %v16716_v22, %v16715_v42  ;;  %16720 = vst [vmem:[#allocation136_spill] sm:$0xff] %v13043_v17  ;;  %v16721_v13 = vrot.slane %v12588_v16, 7  ;;  %v13053_v22 = vsel %vm933_vm3, %v4322_v30, %v4324_v0  ;;  %v16723_v50 = vrot.slane %v12619_v43, 7 }
 0x5f4   :  { %16717 = vst [vmem:[#allocation134_spill] sm:$0xff] %v13036_v55  ;;  %16722 = vst [vmem:[#allocation137_spill] sm:$0xff] %v13053_v22  ;;  %v13061_v61 = vsel %vm933_vm3, %v3780_v6, %v3782_v33  ;;  %v16726_v59 = vrot.slane %v12622_v8, 7  ;;  %v16728_v16 = vrot.slane %v12806_v60, 7  ;;  %v4538_v43 = vrot.slane %v12872_v27, 1 }
 0x5f5   :  { %v13050_v35 = vsel %vm933_vm3, %v16721_v13, %v4322_v30  ;;  %v13058_v46 = vsel %vm933_vm3, %v16723_v50, %v3780_v6  ;;  %16725 = vst [vmem:[#allocation139_spill] sm:$0xff] %v13061_v61  ;;  %v3996_v30 = vrot.slane %v12708_v10, 1  ;;  %v16730_v56 = vmov %v16715_v42  ;;  %v16759_v61 = vld [vmem:[#allocation39_spill] sm:$0xff] }
 0x5f6   :  { %16724 = vst [vmem:[#allocation138_spill] sm:$0xff] %v13058_v46  ;;  %v13066_v12 = vsel %vm933_vm3, %v16726_v59, %v4870_v28  ;;  %v13071_v15 = vsel %vm933_vm3, %v4870_v28, %v16728_v16  ;;  %v13078_v42 = vsel %vm600_vm4, %v16730_v56, %v3448_v25  ;;  %v16732_v6 = vrot.slane %v16681_v48, 1  ;;  %v3054_v28 = vld [vmem:[%s16719_s5] sm:$0x3]  ;;  %v13088_v59 = vpop.permute.xlu0 %4655  ;;  %v13100_v56 = vpop.permute.xlu1 %4851 }
 0x5f7   :  { %16727 = vst [vmem:[#allocation140_spill] sm:$0xff] %v13066_v12  ;;  %16729 = vst [vmem:[#allocation141_spill] sm:$0xff] %v13071_v15  ;;  %v4326_v13 = vrot.slane %v12712_v18, 7  ;;  %v4328_v50 = vrot.slane %v12714_v19, 7  ;;  %v16734_v10 = vrot.slane %v12603_v39, 1  ;;  %v13096_v57 = vsel %vm600_vm4, %v4534_v3, %v4536_v62 }
 0x5f8   :  { %16731 = vst [vmem:[#allocation142_spill] sm:$0xff] %v13078_v42  ;;  %v13083_v8 = vsel %vm600_vm4, %v3448_v25, %v16732_v6  ;;  %v4540_v16 = vrot.slane %v12718_v38, 1  ;;  %v4542_v25 = vrot.slane %v12876_v41, 1  ;;  %v3784_v18 = vrot.slane %v12720_v45, 7 }
 0x5f9   :  { %16733 = vst [vmem:[#allocation143_spill] sm:$0xff] %v13083_v8  ;;  %v13093_v27 = vsel %vm600_vm4, %v16734_v10, %v4534_v3  ;;  %v3786_v19 = vrot.slane %v12722_v34, 7  ;;  %v4874_v6 = vrot.slane %v12724_v44, 7  ;;  %v3452_v39 = vrot.slane %v12726_v31, 1  ;;  %v16736_v8 = vld [vmem:[#allocation62_spill] sm:$0xff]  ;;  %v16741_v34 = vld [vmem:[#allocation131_spill] sm:$0xff] }
 0x5fa   :  { %v13107_v10 = vsel %vm600_vm4, %v3994_v51, %v3996_v30  ;;  %v13110_v3 = vsel %vm600_vm4, %v4536_v62, %v4538_v43  ;;  %v4000_v38 = vrot.slane %v12732_v4, 1  ;;  %v13114_v41 = vrot.slane %v3054_v28, %v16736_v8  ;;  %v16742_v4 = vld [vmem:[#allocation68_spill] sm:$0xff]  ;;  %v13154_v51 = vpop.permute.xlu0 %4663 }
 0x5fb   :  { %16735 = vst [vmem:[#allocation144_spill] sm:$0xff] %v13107_v10  ;;  %v16737_v15 = vrot.slane %v12846_v29, 1  ;;  %v13122_v44 = vsel %vm933_vm3, %v4324_v0, %v4326_v13  ;;  %v13125_v31 = vsel %vm933_vm3, %v4326_v13, %v4328_v50  ;;  %v13129_v62 = vsel %vm600_vm4, %v4538_v43, %v4540_v16  ;;  %16751 = vst [vmem:[#allocation151_spill] sm:$0xff] %v13154_v51 }
 0x5fc   :  { %16739 = vst [vmem:[#allocation146_spill] sm:$0xff] %v13122_v44  ;;  %16740 = vst [vmem:[#allocation147_spill] sm:$0xff] %v13125_v31  ;;  %v4544_v12 = vrot.slane %v16742_v4, 1  ;;  %v13133_v8 = vsel %vm600_vm4, %v4540_v16, %v4542_v25  ;;  %v13136_v52 = vrot.slane %v3054_v28, %v16744_v32  ;;  %v13142_v0 = vsel %vm933_vm3, %v3784_v18, %v3786_v19 }
 0x5fd   :  { %v13119_v45 = vsel %vm600_vm4, %v3996_v30, %v16737_v15  ;;  %16743 = vst [vmem:[#allocation131_spill] sm:$0xff] %v13133_v8  ;;  %v13139_v15 = vsel %vm933_vm3, %v3782_v33, %v3784_v18  ;;  %16746 = vst [vmem:[#allocation148_spill] sm:$0xff] %v13142_v0  ;;  %v16747_v30 = vrot.slane %v12806_v60, 7  ;;  %v16749_v43 = vrot.slane %v16681_v48, 1 }
 0x5fe   :  { %16738 = vst [vmem:[#allocation145_spill] sm:$0xff] %v13119_v45  ;;  %16745 = vst [vmem:[#allocation68_spill] sm:$0xff] %v13139_v15  ;;  %v16752_v28 = vrot.slane %v16685_v24, 1  ;;  %v16754_v18 = vrot.slane %v12846_v29, 1  ;;  %v16757_v0 = vrot.slane %v12850_v54, 1  ;;  %v16762_v29 = vld [vmem:[#allocation79_spill] sm:$0xff] }
 0x5ff   :  { %v13147_v13 = vsel %vm933_vm3, %v16747_v30, %v4874_v6  ;;  %v13152_v4 = vsel %vm600_vm4, %v16749_v43, %v3452_v39  ;;  %v16756_v30 = vld [vmem:[#allocation113_spill] sm:$0xff]  ;;  %v13168_v43 = vpop.permute.xlu1 %4854  ;;  %v9281_v45 = vld [vmem:[%s9446_s27] sm:$0xff] }
 0x600   :  { %16748 = vst [vmem:[#allocation149_spill] sm:$0xff] %v13147_v13  ;;  %16750 = vst [vmem:[#allocation150_spill] sm:$0xff] %v13152_v4  ;;  %v13159_v33 = vsel %vm600_vm4, %v3452_v39, %v16752_v28  ;;  %v13164_v60 = vsel %vm600_vm4, %v16754_v18, %v4000_v38  ;;  %v13173_v15 = vsel %vm600_vm4, %v4000_v38, %v16757_v0  ;;  %v16760_v39 = vrot.slane %v16759_v61, 7  ;;  %v16765_v61 = vld [vmem:[#allocation46_spill] sm:$0xff] }
 0x601   :  { %16753 = vst [vmem:[#allocation152_spill] sm:$0xff] %v13159_v33  ;;  %16755 = vst [vmem:[#allocation153_spill] sm:$0xff] %v13164_v60  ;;  %v4876_v18 = vrot.slane %v16762_v29, 7  ;;  %v16763_v33 = vld [vmem:[#allocation44_spill] sm:$0xff]  ;;  %v13184_v4 = vsel %vm600_vm4, %v4542_v25, %v4544_v12  ;;  %v16768_v25 = vrot.slane %v16756_v30, 7 }
 0x602   :  { %16758 = vst [vmem:[#allocation154_spill] sm:$0xff] %v13173_v15  ;;  %v13178_v28 = vsel %vm933_vm3, %v4328_v50, %v16760_v39  ;;  %16764 = vst [vmem:[#allocation79_spill] sm:$0xff] %v13184_v4  ;;  %v4004_v15 = vrot.slane %v16765_v61, 1  ;;  %v16766_v50 = vrot.slane %v16741_v34, 1 }
 0x603   :  { %16761 = vst [vmem:[#allocation39_spill] sm:$0xff] %v13178_v28 }
 0x604   :  { %v13194_v39 = vsel %vm600_vm4, %v4544_v12, %v16766_v50  ;;  %v13211_v12 = vsel %vm933_vm3, %v4874_v6, %v4876_v18  ;;  %v16778_v6 = vld [vmem:[#allocation54_spill] sm:$0xff] }
 0x605   :  { %16767 = vst [vmem:[#allocation46_spill] sm:$0xff] %v13194_v39 }
 0x649   :  { %v8387_v16 = vpop.f32.mrb[20].mxu0 }
 0x64a   :  { %v3214_v48 = vmul.f32 %v8387_v16, %v13114_v41  ;;  %v3145_v13 = vpop.f32.mrb[21].mxu0  ;;  %v16770_v16 = vld [vmem:[#allocation119_spill] sm:$0xff] }
 0x64b   :  { %v3212_v60 = vmul.f32 %v13114_v41, %v3145_v13  ;;  %v8388_v32 = vpop.f32.mrb[22].mxu0  ;;  %16771 = vst [vmem:[#allocation119_spill] sm:$0xff] %v13211_v12  ;;  %v4336_v12 = vrot.slane %v16778_v6, 7 }
 0x64c   :  { %v13187_v31 = vadd.f32 %v13136_v52, %v3214_v48  ;;  %v3215_v38 = vmul.f32 %v8388_v32, %v13114_v41  ;;  %v3148_v0 = vpop.f32.mrb[23].mxu0  ;;  %v13203_v48 = vsel %vm933_vm3, %v3786_v19, %v16768_v25  ;;  %v4334_v32 = vrot.slane %v16770_v16, 7  ;;  %v13222_v25 = vpop.permute.xlu0 %4671 }
 0x64d   :  { %v13197_v13 = vadd.f32 %v13136_v52, %v3212_v60  ;;  %v3213_v29 = vmul.f32 %v13114_v41, %v3148_v0  ;;  %16769 = vst [vmem:[#allocation155_spill] sm:$0xff] %v13203_v48  ;;  %v16772_v60 = vrot.slane %v12808_v36, 7  ;;  %16774 = vst [vmem:[#allocation157_spill] sm:$0xff] %v13222_v25  ;;  %v16775_v16 = vrot.slane %v16763_v33, 1  ;;  %v16789_v25 = vld [vmem:[#allocation127_spill] sm:$0xff] }
 0x64e   :  { %v7944_v28 = vmul.f32 -1.442695, %v13187_v31  ;;  %v13208_v61 = vadd.f32 %v13136_v52, %v3215_v38  ;;  %v16776_v38 = vrot.slane %v16685_v24, 1  ;;  %v16782_v48 = vrot.slane %v12854_v23, 1 }
 0x64f   :  { %v13216_v50 = vsel %vm933_vm3, %v4876_v18, %v16772_v60  ;;  %v7942_v0 = vmul.f32 -1.442695, %v13197_v13  ;;  %v13220_v19 = vadd.f32 %v13136_v52, %v3213_v29  ;;  %v13233_v60 = vpop.permute.xlu1 %4687 }
 0x650   :  { %16773 = vst [vmem:[#allocation156_spill] sm:$0xff] %v13216_v50  ;;  %v13229_v30 = vsel %vm600_vm4, %v16776_v38, %v16775_v16  ;;  %9078 = vpow2.f32 %v7944_v28  ;;  %v7945_v18 = vmul.f32 -1.442695, %v13208_v61  ;;  %16779 = vst [vmem:[#allocation54_spill] sm:$0xff] %v13233_v60  ;;  %v16780_v50 = vrot.slane %v12850_v54, 1  ;;  %v16784_v38 = vld [vmem:[#allocation111_spill] sm:$0xff] }
 0x651   :  { %16777 = vst [vmem:[#allocation158_spill] sm:$0xff] %v13229_v30  ;;  %v13243_v33 = vsel %vm600_vm4, %v4004_v15, %v16782_v48  ;;  %9080 = vpow2.f32 %v7942_v0  ;;  %v7943_v24 = vmul.f32 -1.442695, %v13220_v19  ;;  %v8391_v16 = vpop.f32.mrb[24].mxu0  ;;  %v16785_v28 = vrot.slane %v16784_v38, 7  ;;  %v16787_v30 = vld [vmem:[#allocation122_spill] sm:$0xff] }
 0x652   :  { %v13238_v29 = vsel %vm600_vm4, %v16780_v50, %v4004_v15  ;;  %16783 = vst [vmem:[#allocation160_spill] sm:$0xff] %v13243_v33  ;;  %v4548_v60 = vrot.slane %v16787_v30, 1  ;;  %9082 = vpow2.f32 %v7945_v18  ;;  %v3218_v54 = vmul.f32 %v8391_v16, %v13114_v41  ;;  %v3161_v50 = vpop.f32.mrb[25].mxu0 }
 0x653   :  { %16781 = vst [vmem:[#allocation159_spill] sm:$0xff] %v13238_v29  ;;  %v13249_v6 = vsel %vm933_vm3, %v16785_v28, %v4334_v32  ;;  %v16788_v29 = vld [vmem:[#allocation126_spill] sm:$0xff]  ;;  %v4882_v15 = vrot.slane %v16789_v25, 7  ;;  %9084 = vpow2.f32 %v7943_v24  ;;  %v3216_v48 = vmul.f32 %v13114_v41, %v3161_v50  ;;  %v8392_v0 = vpop.f32.mrb[26].mxu0  ;;  %v13274_v50 = vpop.permute.xlu0 %4683 }
 0x654   :  { %16786 = vst [vmem:[#allocation111_spill] sm:$0xff] %v13249_v6  ;;  %v4880_v23 = vrot.slane %v16788_v29, 7  ;;  %v13257_v33 = vsel %vm933_vm3, %v4334_v32, %v4336_v12  ;;  %v4884_v38 = vrot.slane %v13100_v56, 7  ;;  %v13261_v28 = vadd.f32 %v13136_v52, %v3218_v54  ;;  %v3164_v18 = vpop.f32.mrb[27].mxu0  ;;  %16793 = vst [vmem:[#allocation127_spill] sm:$0xff] %v13274_v50 }
 0x655   :  { %16790 = vst [vmem:[#allocation122_spill] sm:$0xff] %v13257_v33  ;;  %v3219_v30 = vmul.f32 %v8392_v0, %v13114_v41  ;;  %v16791_v16 = vrot.slane %v12862_v37, 7  ;;  %v13270_v25 = vadd.f32 %v13136_v52, %v3216_v48  ;;  %v3217_v32 = vmul.f32 %v13114_v41, %v3164_v18  ;;  %v4526_v48 = vpop.permute.xlu1 %4525 }
 0x656   :  { %v16794_v56 = vrot.slane %v16741_v34, 1  ;;  %v7948_v0 = vmul.f32 -1.442695, %v13261_v28  ;;  %v13292_v18 = vsel %vm933_vm3, %v4880_v23, %v4882_v15  ;;  %v4552_v50 = vrot.slane %v13021_v53, 1 }
 0x657   :  { %v13267_v29 = vsel %vm933_vm3, %v4336_v12, %v16791_v16  ;;  %v13283_v37 = vadd.f32 %v13136_v52, %v3219_v30  ;;  %v16796_v12 = vld [vmem:[#allocation133_spill] sm:$0xff]  ;;  %16799 = vst [vmem:[#allocation162_spill] sm:$0xff] %v13292_v18  ;;  %v7946_v34 = vmul.f32 -1.442695, %v13270_v25  ;;  %v13300_v30 = vsel %vm933_vm3, %v4882_v15, %v4884_v38 }
 0x658   :  { %16792 = vst [vmem:[#allocation126_spill] sm:$0xff] %v13267_v29  ;;  %v13279_v54 = vsel %vm600_vm4, %v16794_v56, %v4548_v60  ;;  %v4550_v16 = vrot.slane %v16796_v12, 1  ;;  %v16797_v29 = vrot.slane %v12808_v36, 7  ;;  %v13296_v56 = vadd.f32 %v13136_v52, %v3217_v32  ;;  %16800 = vst [vmem:[#allocation163_spill] sm:$0xff] %v13300_v30  ;;  %v13309_v32 = vpop.permute.xlu0 %4857 }
 0x659   :  { %16795 = vst [vmem:[#allocation161_spill] sm:$0xff] %v13279_v54  ;;  %9086 = vpow2.f32 %v7948_v0  ;;  %v7949_v12 = vmul.f32 -1.442695, %v13283_v37  ;;  %v16801_v36 = vrot.slane %v13168_v43, 7  ;;  %v8395_v18 = vpop.f32.mrb[28].mxu0 }
 0x65a   :  { %v13289_v24 = vsel %vm933_vm3, %v16797_v29, %v4880_v23  ;;  %9088 = vpow2.f32 %v7946_v34  ;;  %v7947_v23 = vmul.f32 -1.442695, %v13296_v56  ;;  %v9079_v33 = vpop.eup %9078  ;;  %v13312_v53 = vsel %vm600_vm4, %v4548_v60, %v4550_v16  ;;  %v3177_v0 = vpop.f32.mrb[29].mxu0 }
 0x65b   :  { %16798 = vst [vmem:[#allocation133_spill] sm:$0xff] %v13289_v24  ;;  %v13306_v29 = vsel %vm933_vm3, %v4884_v38, %v16801_v36  ;;  %v4556_v24 = vrot.slane %v4526_v48, 1  ;;  %9090 = vpow2.f32 %v7949_v12  ;;  %16803 = vst [vmem:[#allocation165_spill] sm:$0xff] %v13312_v53  ;;  %v3222_v15 = vmul.f32 %v8395_v18, %v13114_v41  ;;  %v9081_v30 = vpop.eup %9080 }
 0x65c   :  { %16802 = vst [vmem:[#allocation164_spill] sm:$0xff] %v13306_v29  ;;  %v4554_v34 = vrot.slane %v12913_v20, 1  ;;  %v3298_v6 = vadd.f32 1.0, %v9079_v33  ;;  %9092 = vpow2.f32 %v7947_v23  ;;  %v3220_v38 = vmul.f32 %v13114_v41, %v3177_v0  ;;  %v8396_v29 = vpop.f32.mrb[30].mxu0  ;;  %v9083_v48 = vpop.eup %9082 }
 0x65d   :  { %v4591_v36 = vmul.f32 0.0, %v4556_v24  ;;  %v3296_v54 = vadd.f32 1.0, %v9081_v30  ;;  %v13318_v12 = vadd.f32 %v13136_v52, %v3222_v15  ;;  %v3223_v60 = vmul.f32 %v8396_v29, %v13114_v41  ;;  %v3180_v53 = vpop.f32.mrb[31].mxu0  ;;  %v9085_v39 = vpop.eup %9084 }
 0x65e   :  { %v4888_v18 = vrot.slane %v13309_v32, 7  ;;  %9094 = vrcp.f32 %v3298_v6  ;;  %v3299_v20 = vadd.f32 1.0, %v9083_v48  ;;  %v13323_v33 = vadd.f32 %v13136_v52, %v3220_v38  ;;  %v16804_v32 = vld [vmem:[#allocation112_spill] sm:$0xff]  ;;  %v4692_v38 = vpop.permute.xlu1 %4691 }
 0x65f   :  { %v3221_v23 = vmul.f32 %v13114_v41, %v3180_v53  ;;  %9096 = vrcp.f32 %v3296_v54  ;;  %v3297_v0 = vadd.f32 1.0, %v9085_v39  ;;  %v7952_v30 = vmul.f32 -1.442695, %v13318_v12 }
 0x660   :  { %v13328_v15 = vadd.f32 %v13136_v52, %v3223_v60  ;;  %9098 = vrcp.f32 %v3299_v20  ;;  %v7950_v29 = vmul.f32 -1.442695, %v13323_v33  ;;  %v13333_v10 = vrot.slane %v9281_v45, %v16804_v32 }
 0x661   :  { %v13336_v6 = vadd.f32 %v13136_v52, %v3221_v23  ;;  %9100 = vrcp.f32 %v3297_v0  ;;  %v13339_v53 = vsel %vm600_vm4, %v4550_v16, %v4552_v50  ;;  %v13342_v39 = vsel %vm600_vm4, %v4552_v50, %v4554_v34  ;;  %v8399_v23 = vpop.f32.mrb[32].mxu0  ;;  %v16809_v50 = vld [vmem:[#allocation51_spill] sm:$0xff] }
 0x662   :  { %16805 = vst [vmem:[#allocation166_spill] sm:$0xff] %v13339_v53  ;;  %16806 = vst [vmem:[#allocation167_spill] sm:$0xff] %v13342_v39  ;;  %v7953_v54 = vmul.f32 -1.442695, %v13328_v15  ;;  %9102 = vpow2.f32 %v7952_v30  ;;  %v13346_v48 = vmul.f32 %v13333_v10, %v4591_v36  ;;  %v13349_v60 = vsel %vm600_vm4, %v4554_v34, %v4556_v24  ;;  %v3193_v32 = vpop.f32.mrb[33].mxu0 }
 0x663   :  { %16808 = vst [vmem:[#allocation169_spill] sm:$0xff] %v13349_v60  ;;  %v7951_v20 = vmul.f32 -1.442695, %v13336_v6  ;;  %v9087_v0 = vpop.eup %9086  ;;  %9104 = vpow2.f32 %v7950_v29  ;;  %v3226_v16 = vmul.f32 %v8399_v23, %v13114_v41  ;;  %v13354_v39 = vrot.slane %v9281_v45, %v16809_v50  ;;  %v8400_v34 = vpop.f32.mrb[34].mxu0 }
 0x664   :  { %16807 = vst [vmem:[#allocation168_spill] sm:$0xff] %v13346_v48  ;;  %v16810_v53 = vrot.slane %v13168_v43, 7  ;;  %v9089_v36 = vpop.eup %9088  ;;  %v3302_v48 = vadd.f32 1.0, %v9087_v0  ;;  %9106 = vpow2.f32 %v7953_v54  ;;  %v3224_v24 = vmul.f32 %v13114_v41, %v3193_v32  ;;  %v3196_v23 = vpop.f32.mrb[35].mxu0 }
 0x665   :  { %v4709_v60 = vmul.f32 0.0, %v4692_v38  ;;  %v9091_v46 = vpop.eup %9090  ;;  %v3300_v42 = vadd.f32 1.0, %v9089_v36  ;;  %9108 = vpow2.f32 %v7951_v20  ;;  %v13361_v29 = vadd.f32 %v13136_v52, %v3226_v16 }
 0x666   :  { %v4889_v30 = vsel %vm933_vm3, %v16810_v53, %v4888_v18  ;;  %v3227_v45 = vmul.f32 %v8400_v34, %v13114_v41  ;;  %v9093_v50 = vpop.eup %9092  ;;  %9110 = vrcp.f32 %v3302_v48  ;;  %v3303_v43 = vadd.f32 1.0, %v9091_v46 }
 0x667   :  { %v13365_v53 = vadd.f32 %v13136_v52, %v3224_v24  ;;  %v3225_v54 = vmul.f32 %v13114_v41, %v3196_v23  ;;  %9112 = vrcp.f32 %v3300_v42  ;;  %v3301_v32 = vadd.f32 1.0, %v9093_v50  ;;  %v16815_v23 = vld [vmem:[#allocation29_spill] sm:$0xff] }
 0x668   :  { %v7956_v38 = vmul.f32 -1.442695, %v13361_v29  ;;  %v13370_v20 = vadd.f32 %v13136_v52, %v3227_v45  ;;  %v9095_v0 = vpop.eup %9094  ;;  %9114 = vrcp.f32 %v3303_v43  ;;  %v13376_v46 = vmul.f32 0.0, %v4889_v30  ;;  %v16816_v43 = vld [vmem:[#allocation99_spill] sm:$0xff] }
 0x669   :  { %v7954_v16 = vmul.f32 -1.442695, %v13365_v53  ;;  %v13374_v36 = vadd.f32 %v13136_v52, %v3225_v54  ;;  %v9097_v48 = vpop.eup %9096  ;;  %v13379_v24 = vmul.f32 %v9095_v0, %v13187_v31  ;;  %9116 = vrcp.f32 %v3301_v32  ;;  %v16818_v0 = vld [vmem:[#allocation128_spill] sm:$0xff] }
 0x66a   :  { %16811 = vst [vmem:[#allocation170_spill] sm:$0xff] %v13376_v46  ;;  %v7957_v42 = vmul.f32 -1.442695, %v13370_v20  ;;  %v13382_v41 = vmul.f32 0.0, %v4888_v18  ;;  %v9099_v50 = vpop.eup %9098  ;;  %v13385_v34 = vmul.f32 %v9097_v48, %v13197_v13  ;;  %9118 = vpow2.f32 %v7956_v38  ;;  %v16817_v38 = vld [vmem:[#allocation35_spill] sm:$0xff] }
 0x66b   :  { %v13388_v45 = vmul.f32 -1.442695, %v13374_v36  ;;  %v13391_v52 = vmul.f32 %v13354_v39, %v4709_v60  ;;  %v9101_v30 = vpop.eup %9100  ;;  %v13394_v31 = vmul.f32 %v9099_v50, %v13208_v61  ;;  %9120 = vpow2.f32 %v7954_v16  ;;  %v16819_v16 = vld [vmem:[#allocation63_spill] sm:$0xff] }
 0x66c   :  { %16812 = vst [vmem:[#allocation171_spill] sm:$0xff] %v13382_v41  ;;  %16813 = vst [vmem:[#allocation172_spill] sm:$0xff] %v13385_v34  ;;  %v3597_v18 = vmul.f32 %v16815_v23, %v13379_v24  ;;  %v3810_v54 = vmul.f32 %v16816_v43, %v13379_v24  ;;  %v9103_v13 = vpop.eup %9102  ;;  %v13401_v32 = vmul.f32 %v9101_v30, %v13220_v19  ;;  %9122 = vpow2.f32 %v7957_v42  ;;  %v16820_v23 = vld [vmem:[#allocation121_spill] sm:$0xff]  ;;  %v16821_v43 = vld [vmem:[#allocation80_spill] sm:$0xff] }
 0x66d   :  { %16814 = vst [vmem:[#allocation173_spill] sm:$0xff] %v13391_v52  ;;  %v3477_v60 = vmul.f32 %v16817_v38, %v13385_v34  ;;  %v3595_v48 = vmul.f32 %v16818_v0, %v13385_v34  ;;  %v9105_v61 = vpop.eup %9104  ;;  %v3306_v50 = vadd.f32 1.0, %v9103_v13  ;;  %v3808_v52 = vmul.f32 %v16820_v23, %v13385_v34  ;;  %v16822_v42 = vld [vmem:[#allocation130_spill] sm:$0xff]  ;;  %v16823_v38 = vld [vmem:[#allocation67_spill] sm:$0xff] }
 0x66e   :  { %v13408_v41 = vmul.f32 %v16819_v16, %v3597_v18  ;;  %v13413_v46 = vmul.f32 %v16821_v43, %v3810_v54  ;;  %v9107_v19 = vpop.eup %9106  ;;  %v3304_v30 = vadd.f32 1.0, %v9105_v61  ;;  %v3478_v55 = vmul.f32 %v16822_v42, %v13401_v32  ;;  %v16824_v0 = vld [vmem:[#allocation115_spill] sm:$0xff] }
 0x66f   :  { %v3498_v51 = vmul.f32 %v16823_v38, %v3477_v60  ;;  %v3596_v4 = vmul.f32 %v16824_v0, %v13401_v32  ;;  %v9109_v13 = vpop.eup %9108  ;;  %9124 = vrcp.f32 %v3306_v50  ;;  %v3307_v18 = vadd.f32 1.0, %v9107_v19  ;;  %v16826_v19 = vld [vmem:[#allocation30_spill] sm:$0xff] }
 0x670   :  { %v13421_v8 = vmul.f32 %v16819_v16, %v3595_v48  ;;  %v9111_v54 = vpop.eup %9110  ;;  %9126 = vrcp.f32 %v3304_v30  ;;  %v3305_v34 = vadd.f32 1.0, %v9109_v13  ;;  %v3499_v61 = vmul.f32 %v16823_v38, %v3478_v55 }
 0x671   :  { %v3616_v42 = vmul.f32 %v16819_v16, %v3596_v4  ;;  %v9113_v44 = vpop.eup %9112  ;;  %v13427_v60 = vmul.f32 %v9111_v54, %v13261_v28  ;;  %9128 = vrcp.f32 %v3307_v18  ;;  %v3809_v48 = vmul.f32 %v16826_v19, %v13401_v32 }
 0x672   :  { %16825 = vst [vmem:[#allocation29_spill] sm:$0xff] %v13421_v8  ;;  %v15826_v50 = vrot.slane %v13421_v8, 1  ;;  %v9115_v0 = vpop.eup %9114  ;;  %v13433_v23 = vmul.f32 %v9113_v44, %v13270_v25  ;;  %9130 = vrcp.f32 %v3305_v34  ;;  %v13436_v55 = vmul.f32 %v16821_v43, %v3808_v52 }
 0x673   :  { %v3649_v30 = vrot.slane %v3616_v42, 1  ;;  %v9117_v4 = vpop.eup %9116  ;;  %v13439_v13 = vmul.f32 %v9115_v0, %v13283_v37  ;;  %v3830_v28 = vmul.f32 %v16821_v43, %v3809_v48  ;;  %v4027_v54 = vmul.f32 %v12965_v5, %v13401_v32 }
 0x674   :  { %v9119_v19 = vpop.eup %9118  ;;  %v13446_v44 = vmul.f32 %v9117_v4, %v13296_v56  ;;  %v16827_v34 = vrot.slane %v13408_v41, 1  ;;  %v15827_v52 = vrot.slane %v13436_v55, 2  ;;  %v16828_v56 = vld [vmem:[#allocation95_spill] sm:$0xff] }
 0x675   :  { %v3650_v25 = vsel %vm600_vm4, %v15826_v50, %v3649_v30  ;;  %v9121_v42 = vpop.eup %9120  ;;  %v3310_v48 = vadd.f32 1.0, %v9119_v19  ;;  %v3865_v22 = vrot.slane %v3830_v28, 2  ;;  %v4028_v4 = vmul.f32 %v16828_v56, %v13379_v24  ;;  %v16830_v50 = vld [vmem:[#allocation104_spill] sm:$0xff] }
 0x676   :  { %v3652_v37 = vsel %vm600_vm4, %v3649_v30, %v16827_v34  ;;  %v3696_v0 = vadd.f32 %v3650_v25, %v3498_v51  ;;  %v9123_v5 = vpop.eup %9122  ;;  %v3308_v17 = vadd.f32 1.0, %v9121_v42  ;;  %v4048_v8 = vmul.f32 %v16829_v14, %v4027_v54  ;;  %v16832_v54 = vld [vmem:[#allocation31_spill] sm:$0xff] }
 0x677   :  { %v3697_v18 = vadd.f32 %v3652_v37, %v3499_v61  ;;  %v4145_v63 = vmul.f32 %v16830_v50, %v13401_v32  ;;  %9132 = vrcp.f32 %v3310_v48  ;;  %v3311_v21 = vadd.f32 1.0, %v9123_v5  ;;  %v16833_v37 = vld [vmem:[#allocation87_spill] sm:$0xff]  ;;  %v16834_v48 = vld [vmem:[#allocation32_spill] sm:$0xff] }
 0x678   :  { %v3866_v30 = vsel %vm262_vm1, %v15827_v52, %v3865_v22  ;;  %v16831_v51 = vrot.slane %v13413_v46, 2  ;;  %9134 = vrcp.f32 %v3308_v17  ;;  %v4049_v25 = vmul.f32 %v16829_v14, %v4028_v4 }
 0x679   :  { %v3914_v28 = vadd.f32 %v3866_v30, %v3696_v0  ;;  %v9125_v34 = vpop.eup %9124  ;;  %9136 = vrcp.f32 %v3311_v21  ;;  %v4146_v50 = vmul.f32 %v16832_v54, %v13379_v24  ;;  %v4147_v42 = vmul.f32 %v16833_v37, %v13394_v31 }
 0x67a   :  { %v3868_v61 = vsel %vm262_vm1, %v3865_v22, %v16831_v51  ;;  %v13472_v5 = vmul.f32 %v16834_v48, %v4145_v63  ;;  %v9127_v56 = vpop.eup %9126  ;;  %v13475_v52 = vmul.f32 %v9125_v34, %v13318_v12  ;;  %v4577_v34 = vmul.f32 %v13018_v47, %v13379_v24 }
 0x67b   :  { %v3915_v19 = vadd.f32 %v3868_v61, %v3697_v18  ;;  %v4065_v17 = vadd.f32 %v4048_v8, %v3914_v28  ;;  %v4358_v18 = vmul.f32 %v12986_v49, %v13401_v32  ;;  %v9129_v0 = vpop.eup %9128  ;;  %v13480_v21 = vmul.f32 %v9127_v56, %v13323_v33  ;;  %v16836_v49 = vld [vmem:[#allocation81_spill] sm:$0xff]  ;;  %v16838_v56 = vld [vmem:[#allocation107_spill] sm:$0xff] }
 0x67c   :  { %16835 = vst [vmem:[#allocation99_spill] sm:$0xff] %v13472_v5  ;;  %v4166_v4 = vmul.f32 %v16834_v48, %v4146_v50  ;;  %v13484_v30 = vmul.f32 %v16834_v48, %v4147_v42  ;;  %v15828_v63 = vrot.slane %v13472_v5, 1  ;;  %v9131_v51 = vpop.eup %9130  ;;  %v13488_v12 = vmul.f32 %v9129_v0, %v13328_v15  ;;  %v16837_v50 = vld [vmem:[#allocation43_spill] sm:$0xff] }
 0x67d   :  { %v4066_v22 = vadd.f32 %v4049_v25, %v3915_v19  ;;  %v4359_v8 = vmul.f32 %v12991_v26, %v13379_v24  ;;  %v4360_v61 = vmul.f32 %v16836_v49, %v13394_v31  ;;  %v13495_v33 = vmul.f32 %v12934_v58, %v4358_v18  ;;  %v16840_v26 = vld [vmem:[#allocation106_spill] sm:$0xff] }
 0x67e   :  { %v13498_v28 = vmul.f32 %v9131_v51, %v13336_v6  ;;  %v4199_v19 = vrot.slane %v4166_v4, 1  ;;  %v15831_v25 = vrot.slane %v13484_v30, 1  ;;  %v4578_v37 = vmul.f32 %v16837_v50, %v13394_v31  ;;  %v16839_v50 = vld [vmem:[#allocation47_spill] sm:$0xff] }
 0x67f   :  { %v4380_v15 = vmul.f32 %v12934_v58, %v4359_v8  ;;  %v13505_v54 = vmul.f32 %v12934_v58, %v4360_v61  ;;  %v4598_v47 = vmul.f32 %v13333_v10, %v4577_v34  ;;  %v4695_v18 = vmul.f32 %v16838_v56, %v13379_v24 }
 0x680   :  { %v4200_v6 = vsel %vm600_vm4, %v15828_v63, %v4199_v19  ;;  %v4202_v42 = vsel %vm600_vm4, %v4199_v19, %v15831_v25  ;;  %v4599_v61 = vmul.f32 %v13333_v10, %v4578_v37  ;;  %v4696_v63 = vmul.f32 %v16839_v50, %v13394_v31 }
 0x681   :  { %v4246_v0 = vadd.f32 %v4200_v6, %v4065_v17  ;;  %v4247_v4 = vadd.f32 %v4202_v42, %v4066_v22  ;;  %v4415_v51 = vrot.slane %v4380_v15, 2  ;;  %v15830_v8 = vrot.slane %v13505_v54, 2  ;;  %v9133_v49 = vpop.eup %9132 }
 0x682   :  { %v4697_v5 = vmul.f32 %v16840_v26, %v13433_v23  ;;  %v13526_v19 = vmul.f32 %v13354_v39, %v4695_v18  ;;  %v9135_v34 = vpop.eup %9134  ;;  %v13529_v56 = vmul.f32 %v9133_v49, %v13361_v29  ;;  %v16843_v17 = vrot.slane %v13495_v33, 2 }
 0x683   :  { %v4418_v15 = vsel %vm262_vm1, %v4415_v51, %v15830_v8  ;;  %9138 = vpow2.f32 %v13388_v45  ;;  %v9137_v37 = vpop.eup %9136  ;;  %v13539_v26 = vmul.f32 %v9135_v34, %v13365_v53  ;;  %v4716_v18 = vmul.f32 %v13354_v39, %v4696_v63  ;;  %v16847_v53 = vld [vmem:[#allocation37_spill] sm:$0xff] }
 0x684   :  { %16841 = vst [vmem:[#allocation35_spill] sm:$0xff] %v13526_v19  ;;  %16842 = vst [vmem:[#allocation128_spill] sm:$0xff] %v13529_v56  ;;  %v4416_v22 = vsel %vm262_vm1, %v16843_v17, %v4415_v51  ;;  %v4465_v42 = vadd.f32 %v4418_v15, %v4247_v4  ;;  %v13543_v29 = vmul.f32 %v9137_v37, %v13370_v20  ;;  %v15832_v50 = vrot.slane %v13526_v19, 1  ;;  %v16846_v51 = vld [vmem:[#allocation75_spill] sm:$0xff] }
 0x685   :  { %16844 = vst [vmem:[#allocation63_spill] sm:$0xff] %v13539_v26  ;;  %v4464_v6 = vadd.f32 %v4416_v22, %v4246_v0  ;;  %v13546_v49 = vmul.f32 %v13354_v39, %v4697_v5  ;;  %v3479_v17 = vmul.f32 %v16846_v51, %v13379_v24  ;;  %v4749_v25 = vrot.slane %v4716_v18, 1  ;;  %v16848_v20 = vld [vmem:[#allocation71_spill] sm:$0xff]  ;;  %v16849_v5 = vld [vmem:[#allocation117_spill] sm:$0xff] }
 0x686   :  { %16845 = vst [vmem:[#allocation121_spill] sm:$0xff] %v13543_v29  ;;  %v4616_v8 = vadd.f32 %v4599_v61, %v4465_v42  ;;  %v3480_v0 = vmul.f32 %v16847_v53, %v13394_v31  ;;  %v3598_v34 = vmul.f32 %v16848_v20, %v13394_v31  ;;  %v3599_v22 = vmul.f32 %v16849_v5, %v13433_v23  ;;  %v16850_v61 = vld [vmem:[#allocation92_spill] sm:$0xff] }
 0x687   :  { %v4615_v45 = vadd.f32 %v4598_v47, %v4464_v6  ;;  %v15833_v4 = vrot.slane %v13546_v49, 1  ;;  %v3500_v63 = vmul.f32 %v16823_v38, %v3479_v17  ;;  %v4750_v15 = vsel %vm600_vm4, %v15832_v50, %v4749_v25  ;;  %v16851_v6 = vld [vmem:[#allocation125_spill] sm:$0xff] }
 0x688   :  { %v3501_v47 = vmul.f32 %v16823_v38, %v3480_v0  ;;  %v3811_v37 = vmul.f32 %v16850_v61, %v13394_v31  ;;  %v3812_v42 = vmul.f32 %v16851_v6, %v13433_v23  ;;  %v3618_v17 = vmul.f32 %v16819_v16, %v3598_v34  ;;  %v16854_v34 = vld [vmem:[#allocation53_spill] sm:$0xff] }
 0x689   :  { %v4752_v18 = vsel %vm600_vm4, %v4749_v25, %v15833_v4  ;;  %v13570_v51 = vadd.f32 %v4750_v15, %v4615_v45  ;;  %v13574_v53 = vmul.f32 %v16819_v16, %v3599_v22  ;;  %v4029_v61 = vmul.f32 %v12973_v2, %v13394_v31 }
 0x68a   :  { %v13576_v20 = vadd.f32 %v4752_v18, %v4616_v8  ;;  %v3832_v0 = vmul.f32 %v16821_v43, %v3811_v37  ;;  %v13580_v5 = vmul.f32 %v16821_v43, %v3812_v42  ;;  %v3653_v6 = vrot.slane %v3618_v17, 1  ;;  %v16855_v42 = vld [vmem:[#allocation73_spill] sm:$0xff] }
 0x68b   :  { %16852 = vst [vmem:[#allocation80_spill] sm:$0xff] %v13570_v51  ;;  %v3655_v25 = vrot.slane %v13574_v53, 1  ;;  %v4030_v45 = vmul.f32 %v13012_v7, %v13433_v23  ;;  %v4148_v22 = vmul.f32 %v16854_v34, %v13433_v23  ;;  %v4050_v37 = vmul.f32 %v16829_v14, %v4029_v61 }
 0x68c   :  { %16853 = vst [vmem:[#allocation130_spill] sm:$0xff] %v13576_v20  ;;  %v3869_v15 = vrot.slane %v3832_v0, 2  ;;  %v4149_v18 = vmul.f32 %v16855_v42, %v13446_v44  ;;  %v16856_v2 = vrot.slane %v13408_v41, 1  ;;  %v16857_v61 = vrot.slane %v13413_v46, 2 }
 0x68d   :  { %v9139_v50 = vpop.eup %9138  ;;  %v3656_v7 = vsel %vm600_vm4, %v3653_v6, %v3655_v25  ;;  %v4051_v4 = vmul.f32 %v16829_v14, %v4030_v45  ;;  %v4168_v0 = vmul.f32 %v16834_v48, %v4148_v22  ;;  %v16858_v51 = vrot.slane %v13580_v5, 2 }
 0x68e   :  { %v3654_v17 = vsel %vm600_vm4, %v16856_v2, %v3653_v6  ;;  %v3309_v34 = vadd.f32 1.0, %v9139_v50  ;;  %v3699_v20 = vadd.f32 %v3656_v7, %v3501_v47  ;;  %v3870_v42 = vsel %vm262_vm1, %v16857_v61, %v3869_v15  ;;  %v16859_v6 = vld [vmem:[#allocation27_spill] sm:$0xff] }
 0x68f   :  { %v3698_v8 = vadd.f32 %v3654_v17, %v3500_v63  ;;  %v3872_v41 = vsel %vm262_vm1, %v3869_v15, %v16858_v51  ;;  %v13608_v2 = vmul.f32 %v16834_v48, %v4149_v18  ;;  %v4203_v19 = vrot.slane %v4168_v0, 1  ;;  %v16860_v63 = vld [vmem:[#allocation60_spill] sm:$0xff] }
 0x690   :  { %v4361_v45 = vmul.f32 %v16859_v6, %v13433_v23  ;;  %9140 = vrcp.f32 %v3309_v34  ;;  %v3917_v50 = vadd.f32 %v3872_v41, %v3699_v20  ;;  %v4362_v47 = vmul.f32 %v16860_v63, %v13446_v44 }
 0x691   :  { %v3916_v22 = vadd.f32 %v3870_v42, %v3698_v8  ;;  %v16861_v46 = vrot.slane %v13484_v30, 1  ;;  %v4205_v7 = vrot.slane %v13608_v2, 1  ;;  %v4579_v15 = vmul.f32 %v13093_v27, %v13433_v23 }
 0x692   :  { %v4382_v51 = vmul.f32 %v12934_v58, %v4361_v45  ;;  %v4068_v0 = vadd.f32 %v4051_v4, %v3917_v50  ;;  %v13622_v34 = vmul.f32 %v12934_v58, %v4362_v47  ;;  %v4580_v20 = vmul.f32 %v13096_v57, %v13446_v44  ;;  %v16863_v45 = vld [vmem:[#allocation45_spill] sm:$0xff]  ;;  %v16864_v50 = vld [vmem:[#allocation84_spill] sm:$0xff] }
 0x693   :  { %v4204_v17 = vsel %vm600_vm4, %v16861_v46, %v4203_v19  ;;  %v4067_v18 = vadd.f32 %v4050_v37, %v3916_v22  ;;  %v4206_v30 = vsel %vm600_vm4, %v4203_v19, %v4205_v7  ;;  %v4600_v61 = vmul.f32 %v13333_v10, %v4579_v15  ;;  %v16865_v46 = vld [vmem:[#allocation50_spill] sm:$0xff] }
 0x694   :  { %v4419_v8 = vrot.slane %v4382_v51, 2  ;;  %v4698_v42 = vmul.f32 %v13009_v11, %v13446_v44  ;;  %v4249_v27 = vadd.f32 %v4206_v30, %v4068_v0  ;;  %v4421_v4 = vrot.slane %v13622_v34, 2 }
 0x695   :  { %v4248_v41 = vadd.f32 %v4204_v17, %v4067_v18  ;;  %v4601_v37 = vmul.f32 %v13333_v10, %v4580_v20  ;;  %v16862_v6 = vrot.slane %v13505_v54, 2  ;;  %v4699_v22 = vmul.f32 %v16863_v45, %v13427_v60  ;;  %v16866_v54 = vld [vmem:[#allocation85_spill] sm:$0xff] }
 0x696   :  { %v4718_v19 = vmul.f32 %v13354_v39, %v4698_v42  ;;  %v3481_v63 = vmul.f32 %v16864_v50, %v13433_v23  ;;  %v4422_v11 = vsel %vm262_vm1, %v4419_v8, %v4421_v4  ;;  %v3482_v17 = vmul.f32 %v16865_v46, %v13446_v44 }
 0x697   :  { %v4420_v57 = vsel %vm262_vm1, %v16862_v6, %v4419_v8  ;;  %v3600_v51 = vmul.f32 %v16866_v54, %v13446_v44  ;;  %v4467_v15 = vadd.f32 %v4422_v11, %v4249_v27  ;;  %v13650_v18 = vmul.f32 %v13354_v39, %v4699_v22  ;;  %v16867_v6 = vld [vmem:[#allocation41_spill] sm:$0xff]  ;;  %v16869_v22 = vld [vmem:[#allocation36_spill] sm:$0xff] }
 0x698   :  { %v4466_v47 = vadd.f32 %v4420_v57, %v4248_v41  ;;  %v4753_v0 = vrot.slane %v4718_v19, 1  ;;  %v3502_v20 = vmul.f32 %v16823_v38, %v3481_v63  ;;  %v3503_v42 = vmul.f32 %v16823_v38, %v3482_v17 }
 0x699   :  { %v3601_v8 = vmul.f32 %v16867_v6, %v13427_v60  ;;  %v3620_v41 = vmul.f32 %v16819_v16, %v3600_v51  ;;  %v4618_v57 = vadd.f32 %v4601_v37, %v4467_v15  ;;  %v16868_v45 = vrot.slane %v13546_v49, 1 }
 0x69a   :  { %v4617_v30 = vadd.f32 %v4600_v61, %v4466_v47  ;;  %v4755_v27 = vrot.slane %v13650_v18, 1  ;;  %v3813_v19 = vmul.f32 %v16869_v22, %v13446_v44  ;;  %v9141_v11 = vpop.eup %9140  ;;  %v3814_v46 = vmul.f32 %v12994_v1, %v13427_v60 }
 0x69b   :  { %v4754_v50 = vsel %vm600_vm4, %v16868_v45, %v4753_v0  ;;  %v13666_v61 = vmul.f32 %v16819_v16, %v3601_v8  ;;  %v3657_v47 = vrot.slane %v3620_v41, 1  ;;  %v13671_v37 = vmul.f32 %v9141_v11, %v13374_v36 }
 0x69c   :  { %v13663_v63 = vadd.f32 %v4754_v50, %v4617_v30  ;;  %v4756_v49 = vsel %vm600_vm4, %v4753_v0, %v4755_v27  ;;  %v3834_v17 = vmul.f32 %v16821_v43, %v3813_v19  ;;  %v4031_v54 = vmul.f32 %v13024_v9, %v13446_v44  ;;  %v16874_v19 = vld [vmem:[#allocation88_spill] sm:$0xff] }
 0x69d   :  { %16870 = vst [vmem:[#allocation67_spill] sm:$0xff] %v13671_v37  ;;  %v13679_v51 = vadd.f32 %v4756_v49, %v4618_v57  ;;  %v3658_v15 = vsel %vm600_vm4, %v3655_v25, %v3657_v47  ;;  %v3659_v1 = vrot.slane %v13666_v61, 1  ;;  %v13686_v36 = vmul.f32 %v16821_v43, %v3814_v46  ;;  %v16871_v25 = vld [vmem:[#allocation94_spill] sm:$0xff]  ;;  %v16872_v57 = vld [vmem:[#allocation83_spill] sm:$0xff]  ;;  %v16885_v61 = vld [vmem:[#allocation105_spill] sm:$0xff] }
 0x69e   :  { %v3700_v30 = vadd.f32 %v3658_v15, %v3502_v20  ;;  %v3873_v6 = vrot.slane %v3834_v17, 2  ;;  %v4032_v0 = vmul.f32 %v12968_v40, %v13427_v60  ;;  %v4052_v8 = vmul.f32 %v16829_v14, %v4031_v54 }
 0x69f   :  { %v3660_v9 = vsel %vm600_vm4, %v3657_v47, %v3659_v1  ;;  %v3875_v53 = vrot.slane %v13686_v36, 2  ;;  %v4150_v41 = vmul.f32 %v16871_v25, %v13427_v60  ;;  %v4151_v45 = vmul.f32 %v16872_v57, %v13439_v13 }
 0x6a0   :  { %v3701_v50 = vadd.f32 %v3660_v9, %v3503_v42  ;;  %v16873_v20 = vrot.slane %v13580_v5, 2  ;;  %v4053_v40 = vmul.f32 %v16829_v14, %v4032_v0  ;;  %v4363_v11 = vmul.f32 %v16874_v19, %v13427_v60 }
 0x6a1   :  { %v3876_v47 = vsel %vm262_vm1, %v3873_v6, %v3875_v53  ;;  %v4170_v49 = vmul.f32 %v16834_v48, %v4150_v41  ;;  %v13710_v17 = vmul.f32 %v16834_v48, %v4151_v45  ;;  %v4364_v5 = vmul.f32 %v13050_v35, %v13439_v13  ;;  %v3034_v35 = vld [vmem:[%s16875_s9] sm:$0xff] }
 0x6a2   :  { %v3874_v22 = vsel %vm262_vm1, %v16873_v20, %v3873_v6  ;;  %v3919_v42 = vadd.f32 %v3876_v47, %v3701_v50  ;;  %v4384_v54 = vmul.f32 %v12934_v58, %v4363_v11  ;;  %v4581_v15 = vmul.f32 %v13110_v3, %v13427_v60  ;;  %8433 = vmatprep.mubr.f32.mxu1 %v3034_v35  ;;  %v16877_v47 = vld [vmem:[#allocation108_spill] sm:$0xff] }
 0x6a3   :  { %v3918_v46 = vadd.f32 %v3874_v22, %v3700_v30  ;;  %v4207_v9 = vrot.slane %v4170_v49, 1  ;;  %v4209_v6 = vrot.slane %v13710_v17, 1  ;;  %v4582_v30 = vmul.f32 %v13129_v62, %v13439_v13  ;;  %v16878_v49 = vld [vmem:[#allocation103_spill] sm:$0xff] }
 0x6a4   :  { %v4070_v25 = vadd.f32 %v4053_v40, %v3919_v42  ;;  %v13721_v41 = vmul.f32 %v12934_v58, %v4364_v5  ;;  %v4423_v57 = vrot.slane %v4384_v54, 2  ;;  %v4602_v45 = vmul.f32 %v13333_v10, %v4581_v15  ;;  %v16880_v54 = vld [vmem:[#allocation56_spill] sm:$0xff] }
 0x6a5   :  { %v4069_v0 = vadd.f32 %v4052_v8, %v3918_v46  ;;  %v4208_v50 = vsel %vm600_vm4, %v4205_v7, %v4207_v9  ;;  %v4210_v3 = vsel %vm600_vm4, %v4207_v9, %v4209_v6  ;;  %v4603_v8 = vmul.f32 %v13333_v10, %v4582_v30  ;;  %v16876_v7 = vld [vmem:[#allocation58_spill] sm:$0xff] }
 0x6a6   :  { %v4700_v62 = vmul.f32 %v13088_v59, %v13439_v13  ;;  %v4251_v22 = vadd.f32 %v4210_v3, %v4070_v25  ;;  %v4424_v40 = vsel %vm262_vm1, %v4421_v4, %v4423_v57  ;;  %v4425_v2 = vrot.slane %v13721_v41, 2  ;;  %v16879_v4 = vld [vmem:[#allocation129_spill] sm:$0xff] }
 0x6a7   :  { %v4250_v20 = vadd.f32 %v4208_v50, %v4069_v0  ;;  %v4701_v19 = vmul.f32 %v16876_v7, %v13480_v21  ;;  %v3483_v46 = vmul.f32 %v16877_v47, %v13427_v60  ;;  %v3484_v59 = vmul.f32 %v16878_v49, %v13439_v13  ;;  %v16882_v47 = vld [vmem:[#allocation33_spill] sm:$0xff] }
 0x6a8   :  { %v4720_v11 = vmul.f32 %v13354_v39, %v4700_v62  ;;  %v4426_v42 = vsel %vm262_vm1, %v4423_v57, %v4425_v2  ;;  %v3602_v5 = vmul.f32 %v16879_v4, %v13439_v13  ;;  %v3603_v15 = vmul.f32 %v16880_v54, %v13480_v21  ;;  %v16895_v41 = vld [vmem:[#allocation57_spill] sm:$0xff] }
 0x6a9   :  { %v4468_v34 = vadd.f32 %v4424_v40, %v4250_v20  ;;  %v4469_v0 = vadd.f32 %v4426_v42, %v4251_v22  ;;  %v13753_v9 = vmul.f32 %v13354_v39, %v4701_v19  ;;  %v3504_v25 = vmul.f32 %v16823_v38, %v3483_v46  ;;  %v16881_v40 = vld [vmem:[#allocation82_spill] sm:$0xff] }
 0x6aa   :  { %v4757_v30 = vrot.slane %v4720_v11, 1  ;;  %v3505_v50 = vmul.f32 %v16823_v38, %v3484_v59  ;;  %v3622_v3 = vmul.f32 %v16819_v16, %v3602_v5  ;;  %v13759_v57 = vmul.f32 %v16819_v16, %v3603_v15  ;;  %v16884_v59 = vld [vmem:[#allocation136_spill] sm:$0xff] }
 0x6ab   :  { %v4619_v35 = vadd.f32 %v4602_v45, %v4468_v34  ;;  %v4620_v62 = vadd.f32 %v4603_v8, %v4469_v0  ;;  %v4759_v22 = vrot.slane %v13753_v9, 1  ;;  %v3815_v7 = vmul.f32 %v16881_v40, %v13439_v13 }
 0x6ac   :  { %v4758_v20 = vsel %vm600_vm4, %v4755_v27, %v4757_v30  ;;  %v3661_v45 = vrot.slane %v3622_v3, 1  ;;  %v3663_v11 = vrot.slane %v13759_v57, 1  ;;  %v3816_v46 = vmul.f32 %v16882_v47, %v13480_v21  ;;  %v16883_v27 = vld [vmem:[#allocation135_spill] sm:$0xff] }
 0x6ad   :  { %v13767_v19 = vadd.f32 %v4758_v20, %v4619_v35  ;;  %v4760_v8 = vsel %vm600_vm4, %v4757_v30, %v4759_v22  ;;  %v3836_v18 = vmul.f32 %v16821_v43, %v3815_v7  ;;  %v4033_v49 = vmul.f32 %v16883_v27, %v13439_v13 }
 0x6ae   :  { %v4034_v42 = vmul.f32 %v16884_v59, %v13480_v21  ;;  %v13780_v34 = vadd.f32 %v4760_v8, %v4620_v62  ;;  %v3662_v4 = vsel %vm600_vm4, %v3659_v1, %v3661_v45  ;;  %v3664_v5 = vsel %vm600_vm4, %v3661_v45, %v3663_v11  ;;  %v16886_v1 = vld [vmem:[#allocation76_spill] sm:$0xff]  ;;  %v16888_v45 = vld [vmem:[#allocation146_spill] sm:$0xff] }
 0x6af   :  { %v13789_v54 = vmul.f32 %v16821_v43, %v3816_v46  ;;  %v3702_v15 = vadd.f32 %v3662_v4, %v3504_v25  ;;  %v3703_v0 = vadd.f32 %v3664_v5, %v3505_v50  ;;  %v3877_v30 = vrot.slane %v3836_v18, 2  ;;  %v16887_v25 = vld [vmem:[#allocation137_spill] sm:$0xff]  ;;  %v16889_v46 = vld [vmem:[#allocation131_spill] sm:$0xff] }
 0x6b0   :  { %v4054_v35 = vmul.f32 %v16829_v14, %v4033_v49  ;;  %v4055_v62 = vmul.f32 %v16829_v14, %v4034_v42  ;;  %v4152_v20 = vmul.f32 %v16885_v61, %v13480_v21  ;;  %v4153_v40 = vmul.f32 %v16886_v1, %v13498_v28  ;;  %v16890_v4 = vld [vmem:[#allocation79_spill] sm:$0xff] }
 0x6b1   :  { %v3879_v3 = vrot.slane %v13789_v54, 2  ;;  %v3878_v7 = vsel %vm262_vm1, %v3875_v53, %v3877_v30  ;;  %v4365_v50 = vmul.f32 %v16887_v25, %v13480_v21  ;;  %v4366_v47 = vmul.f32 %v16888_v45, %v13498_v28 }
 0x6b2   :  { %v4583_v8 = vmul.f32 %v16889_v46, %v13480_v21  ;;  %v3920_v27 = vadd.f32 %v3878_v7, %v3702_v15  ;;  %v4172_v49 = vmul.f32 %v16834_v48, %v4152_v20  ;;  %v13812_v36 = vmul.f32 %v16834_v48, %v4153_v40 }
 0x6b3   :  { %v3880_v18 = vsel %vm262_vm1, %v3877_v30, %v3879_v3  ;;  %v4386_v59 = vmul.f32 %v12934_v58, %v4365_v50  ;;  %v13816_v42 = vmul.f32 %v12934_v58, %v4366_v47  ;;  %v4584_v5 = vmul.f32 %v16890_v4, %v13498_v28  ;;  %v16892_v47 = vld [vmem:[#allocation61_spill] sm:$0xff] }
 0x6b4   :  { %v3921_v53 = vadd.f32 %v3880_v18, %v3703_v0  ;;  %v4071_v61 = vadd.f32 %v4054_v35, %v3920_v27  ;;  %v4211_v1 = vrot.slane %v4172_v49, 1  ;;  %v4213_v25 = vrot.slane %v13812_v36, 1  ;;  %v16891_v35 = vld [vmem:[#allocation151_spill] sm:$0xff]  ;;  %v16893_v49 = vld [vmem:[#allocation134_spill] sm:$0xff]  ;;  %v16910_v36 = vld [vmem:[#allocation132_spill] sm:$0xff] }
 0x6b5   :  { %v4604_v15 = vmul.f32 %v13333_v10, %v4583_v8  ;;  %v4427_v20 = vrot.slane %v4386_v59, 2  ;;  %v4429_v40 = vrot.slane %v13816_v42, 2  ;;  %v4605_v0 = vmul.f32 %v13333_v10, %v4584_v5  ;;  %v16894_v59 = vld [vmem:[#allocation142_spill] sm:$0xff] }
 0x6b6   :  { %v4072_v30 = vadd.f32 %v4055_v62, %v3921_v53  ;;  %v4212_v7 = vsel %vm600_vm4, %v4209_v6, %v4211_v1  ;;  %v4214_v50 = vsel %vm600_vm4, %v4211_v1, %v4213_v25  ;;  %v4702_v45 = vmul.f32 %v16891_v35, %v13498_v28  ;;  %v16896_v1 = vld [vmem:[#allocation101_spill] sm:$0xff] }
 0x6b7   :  { %v4703_v46 = vmul.f32 %v16892_v47, %v13475_v52  ;;  %v4252_v62 = vadd.f32 %v4212_v7, %v4071_v61  ;;  %v4428_v18 = vsel %vm262_vm1, %v4425_v2, %v4427_v20  ;;  %v4430_v17 = vsel %vm262_vm1, %v4427_v20, %v4429_v40 }
 0x6b8   :  { %v4253_v8 = vadd.f32 %v4214_v50, %v4072_v30  ;;  %v4722_v6 = vmul.f32 %v13354_v39, %v4702_v45  ;;  %v3485_v53 = vmul.f32 %v16893_v49, %v13480_v21  ;;  %v3486_v4 = vmul.f32 %v16894_v59, %v13498_v28  ;;  %v16898_v49 = vld [vmem:[#allocation138_spill] sm:$0xff] }
 0x6b9   :  { %v13842_v27 = vmul.f32 %v13354_v39, %v4703_v46  ;;  %v4470_v5 = vadd.f32 %v4428_v18, %v4252_v62  ;;  %v3604_v2 = vmul.f32 %v16895_v41, %v13498_v28  ;;  %v3605_v30 = vmul.f32 %v16896_v1, %v13475_v52  ;;  %v16901_v41 = vld [vmem:[#allocation145_spill] sm:$0xff] }
 0x6ba   :  { %v4471_v61 = vadd.f32 %v4430_v17, %v4253_v8  ;;  %v4761_v20 = vrot.slane %v4722_v6, 1  ;;  %v3506_v50 = vmul.f32 %v16823_v38, %v3485_v53  ;;  %v3507_v35 = vmul.f32 %v16823_v38, %v3486_v4  ;;  %v16897_v17 = vld [vmem:[#allocation28_spill] sm:$0xff] }
 0x6bb   :  { %v4763_v7 = vrot.slane %v13842_v27, 1  ;;  %v4621_v45 = vadd.f32 %v4604_v15, %v4470_v5  ;;  %v3624_v46 = vmul.f32 %v16819_v16, %v3604_v2  ;;  %v13857_v62 = vmul.f32 %v16819_v16, %v3605_v30  ;;  %v16900_v5 = vld [vmem:[#allocation144_spill] sm:$0xff] }
 0x6bc   :  { %v4622_v47 = vadd.f32 %v4605_v0, %v4471_v61  ;;  %v4762_v8 = vsel %vm600_vm4, %v4759_v22, %v4761_v20  ;;  %v3817_v6 = vmul.f32 %v16897_v17, %v13498_v28  ;;  %v3818_v15 = vmul.f32 %v16898_v49, %v13475_v52 }
 0x6bd   :  { %v4764_v18 = vsel %vm600_vm4, %v4761_v20, %v4763_v7  ;;  %v13869_v0 = vadd.f32 %v4762_v8, %v4621_v45  ;;  %v3665_v59 = vrot.slane %v3624_v46, 1  ;;  %v15839_v4 = vrot.slane %v13857_v62, 1  ;;  %v16902_v20 = vld [vmem:[#allocation110_spill] sm:$0xff] }
 0x6be   :  { %v13871_v53 = vadd.f32 %v4764_v18, %v4622_v47  ;;  %v3838_v9 = vmul.f32 %v16821_v43, %v3817_v6  ;;  %v13876_v22 = vmul.f32 %v16821_v43, %v3818_v15  ;;  %v4035_v61 = vmul.f32 %v16900_v5, %v13498_v28  ;;  %v16903_v47 = vld [vmem:[#allocation100_spill] sm:$0xff]  ;;  %v16905_v5 = vld [vmem:[#allocation39_spill] sm:$0xff] }
 0x6bf   :  { %v4036_v2 = vmul.f32 %v16901_v41, %v13475_v52  ;;  %v3666_v1 = vsel %vm600_vm4, %v3663_v11, %v3665_v59  ;;  %v3668_v30 = vsel %vm600_vm4, %v3665_v59, %v15839_v4  ;;  %v4154_v45 = vmul.f32 %v16902_v20, %v13475_v52 }
 0x6c0   :  { %16899 = vst [vmem:[#allocation115_spill] sm:$0xff] %v13871_v53  ;;  %v4155_v46 = vmul.f32 %v16903_v47, %v13488_v12  ;;  %v3704_v8 = vadd.f32 %v3666_v1, %v3506_v50  ;;  %v3705_v18 = vadd.f32 %v3668_v30, %v3507_v35  ;;  %v3881_v17 = vrot.slane %v3838_v9, 2  ;;  %v16904_v35 = vld [vmem:[#allocation147_spill] sm:$0xff]  ;;  %v16908_v47 = vld [vmem:[#allocation161_spill] sm:$0xff] }
 0x6c1   :  { %v15838_v6 = vrot.slane %v13876_v22, 2  ;;  %v4056_v49 = vmul.f32 %v16829_v14, %v4035_v61  ;;  %v4057_v57 = vmul.f32 %v16829_v14, %v4036_v2  ;;  %v4174_v11 = vmul.f32 %v16834_v48, %v4154_v45  ;;  %v16967_v53 = vld [vmem:[#allocation123_spill] sm:$0xff] }
 0x6c2   :  { %v13897_v15 = vmul.f32 %v16834_v48, %v4155_v46  ;;  %v3882_v59 = vsel %vm262_vm1, %v3879_v3, %v3881_v17  ;;  %v4367_v9 = vmul.f32 %v16904_v35, %v13475_v52  ;;  %v4368_v61 = vmul.f32 %v16905_v5, %v13488_v12  ;;  %v16907_v3 = vld [vmem:[#allocation46_spill] sm:$0xff] }
 0x6c3   :  { %v3884_v50 = vsel %vm262_vm1, %v3881_v17, %v15838_v6  ;;  %v3922_v41 = vadd.f32 %v3882_v59, %v3704_v8  ;;  %v4215_v1 = vrot.slane %v4174_v11, 1  ;;  %v4585_v45 = vmul.f32 %v16907_v3, %v13475_v52  ;;  %v16912_v3 = vld [vmem:[#allocation152_spill] sm:$0xff] }
 0x6c4   :  { %v3923_v2 = vadd.f32 %v3884_v50, %v3705_v18  ;;  %v15837_v30 = vrot.slane %v13897_v15, 1  ;;  %v4388_v20 = vmul.f32 %v12934_v58, %v4367_v9  ;;  %v13912_v54 = vmul.f32 %v12934_v58, %v4368_v61 }
 0x6c5   :  { %v4586_v46 = vmul.f32 %v16908_v47, %v13488_v12  ;;  %v4073_v17 = vadd.f32 %v4056_v49, %v3922_v41  ;;  %v4216_v8 = vsel %vm600_vm4, %v4213_v25, %v4215_v1  ;;  %v4606_v50 = vmul.f32 %v13333_v10, %v4585_v45  ;;  %v16909_v49 = vld [vmem:[#allocation157_spill] sm:$0xff] }
 0x6c6   :  { %16906 = vst [vmem:[#allocation30_spill] sm:$0xff] %v13912_v54  ;;  %v4074_v35 = vadd.f32 %v4057_v57, %v3923_v2  ;;  %v4218_v18 = vsel %vm600_vm4, %v4215_v1, %v15837_v30  ;;  %v4431_v11 = vrot.slane %v4388_v20, 2  ;;  %v15836_v59 = vrot.slane %v13912_v54, 2  ;;  %v16911_v1 = vld [vmem:[#allocation150_spill] sm:$0xff]  ;;  %v16925_v30 = vld [vmem:[#allocation116_spill] sm:$0xff] }
 0x6c7   :  { %v4607_v9 = vmul.f32 %v13333_v10, %v4586_v46  ;;  %v4254_v5 = vadd.f32 %v4216_v8, %v4073_v17  ;;  %v4704_v57 = vmul.f32 %v16909_v49, %v13488_v12  ;;  %v4705_v41 = vmul.f32 %v16910_v36, %v13539_v26  ;;  %v16914_v8 = vld [vmem:[#allocation59_spill] sm:$0xff] }
 0x6c8   :  { %v4255_v61 = vadd.f32 %v4218_v18, %v4074_v35  ;;  %v4432_v25 = vsel %vm262_vm1, %v4429_v40, %v4431_v11  ;;  %v4434_v2 = vsel %vm262_vm1, %v4431_v11, %v15836_v59  ;;  %v3488_v20 = vmul.f32 %v16911_v1, %v13488_v12  ;;  %v16915_v11 = vld [vmem:[#allocation48_spill] sm:$0xff] }
 0x6c9   :  { %v3489_v45 = vmul.f32 %v16912_v3, %v13539_v26  ;;  %v4472_v47 = vadd.f32 %v4432_v25, %v4254_v5  ;;  %v4724_v17 = vmul.f32 %v13354_v39, %v4704_v57  ;;  %v13943_v35 = vmul.f32 %v13354_v39, %v4705_v41 }
 0x6ca   :  { %v4473_v46 = vadd.f32 %v4434_v2, %v4255_v61  ;;  %v3509_v42 = vmul.f32 %v16823_v38, %v3488_v20  ;;  %v3606_v18 = vmul.f32 %v16914_v8, %v13488_v12  ;;  %v3607_v49 = vmul.f32 %v16915_v11, %v13539_v26  ;;  %v16916_v61 = vld [vmem:[#allocation90_spill] sm:$0xff]  ;;  %v16917_v2 = vld [vmem:[#allocation139_spill] sm:$0xff] }
 0x6cb   :  { %16913 = vst [vmem:[#allocation95_spill] sm:$0xff] %v13943_v35  ;;  %v3510_v40 = vmul.f32 %v16823_v38, %v3489_v45  ;;  %v4623_v36 = vadd.f32 %v4606_v50, %v4472_v47  ;;  %v4765_v3 = vrot.slane %v4724_v17, 1  ;;  %v15835_v5 = vrot.slane %v13943_v35, 1 }
 0x6cc   :  { %v4624_v1 = vadd.f32 %v4607_v9, %v4473_v46  ;;  %v3608_v57 = vmul.f32 %v16916_v61, %v13671_v37  ;;  %v13955_v41 = vmul.f32 %v16819_v16, %v3606_v18  ;;  %v3627_v25 = vmul.f32 %v16819_v16, %v3607_v49  ;;  %v16918_v9 = vld [vmem:[#allocation68_spill] sm:$0xff] }
 0x6cd   :  { %v3819_v20 = vmul.f32 %v16917_v2, %v13488_v12  ;;  %v4766_v45 = vsel %vm600_vm4, %v4763_v7, %v4765_v3  ;;  %v4768_v50 = vsel %vm600_vm4, %v4765_v3, %v15835_v5  ;;  %v3820_v47 = vmul.f32 %v16918_v9, %v13539_v26  ;;  %v16919_v46 = vld [vmem:[#allocation148_spill] sm:$0xff] }
 0x6ce   :  { %v3821_v17 = vmul.f32 %v16919_v46, %v13671_v37  ;;  %v13970_v8 = vadd.f32 %v4766_v45, %v4623_v36  ;;  %v13972_v18 = vadd.f32 %v4768_v50, %v4624_v1  ;;  %v13975_v11 = vmul.f32 %v16819_v16, %v3608_v57  ;;  %v16922_v36 = vld [vmem:[#allocation154_spill] sm:$0xff]  ;;  %v16923_v45 = vld [vmem:[#allocation159_spill] sm:$0xff] }
 0x6cf   :  { %v15841_v27 = vrot.slane %v13955_v41, 1  ;;  %v3671_v7 = vrot.slane %v3627_v25, 1  ;;  %v13979_v49 = vmul.f32 %v16821_v43, %v3819_v20  ;;  %v3841_v3 = vmul.f32 %v16821_v43, %v3820_v47  ;;  %v16924_v50 = vld [vmem:[#allocation42_spill] sm:$0xff] }
 0x6d0   :  { %16920 = vst [vmem:[#allocation93_spill] sm:$0xff] %v13970_v8  ;;  %16921 = vst [vmem:[#allocation104_spill] sm:$0xff] %v13972_v18  ;;  %v13983_v61 = vmul.f32 %v16821_v43, %v3821_v17  ;;  %v15843_v2 = vrot.slane %v13975_v11, 1  ;;  %v4038_v1 = vmul.f32 %v16922_v36, %v13539_v26  ;;  %v4039_v57 = vmul.f32 %v16923_v45, %v13671_v37  ;;  %v14100_v8 = vld [vmem:[%s9446_s27 + $0x8] ss:$0 sm:$0xff]  ;;  %s17091_s27 = sld [smem:[#allocation19_spill]] }
 0x6d1   :  { %v4156_v9 = vmul.f32 %v16924_v50, %v13539_v26  ;;  %v3672_v25 = vsel %vm600_vm4, %v15841_v27, %v3671_v7  ;;  %v15840_v20 = vrot.slane %v13979_v49, 2  ;;  %v3887_v47 = vrot.slane %v3841_v3, 2 }
 0x6d2   :  { %v15842_v46 = vrot.slane %v13983_v61, 2  ;;  %v3674_v17 = vsel %vm600_vm4, %v3671_v7, %v15843_v2  ;;  %v3707_v36 = vadd.f32 %v3672_v25, %v3509_v42  ;;  %v4059_v5 = vmul.f32 %v16829_v14, %v4038_v1  ;;  %v16926_v7 = vld [vmem:[#allocation124_spill] sm:$0xff] }
 0x6d3   :  { %v4060_v45 = vmul.f32 %v16829_v14, %v4039_v57  ;;  %v3708_v59 = vadd.f32 %v3674_v17, %v3510_v40  ;;  %v3888_v50 = vsel %vm262_vm1, %v15840_v20, %v3887_v47  ;;  %v4157_v6 = vmul.f32 %v16925_v30, %v13671_v37  ;;  %v16927_v40 = vld [vmem:[#allocation72_spill] sm:$0xff]  ;;  %v16928_v20 = vld [vmem:[#allocation111_spill] sm:$0xff] }
 0x6d4   :  { %v3890_v3 = vsel %vm262_vm1, %v3887_v47, %v15842_v46  ;;  %v3925_v4 = vadd.f32 %v3888_v50, %v3707_v36  ;;  %v4158_v42 = vmul.f32 %v16926_v7, %v13529_v56  ;;  %v14013_v1 = vmul.f32 %v16834_v48, %v4156_v9  ;;  %v16929_v47 = vld [vmem:[#allocation122_spill] sm:$0xff] }
 0x6d5   :  { %v4369_v57 = vmul.f32 %v16927_v40, %v13539_v26  ;;  %v3926_v25 = vadd.f32 %v3890_v3, %v3708_v59  ;;  %v4177_v17 = vmul.f32 %v16834_v48, %v4157_v6  ;;  %v4370_v27 = vmul.f32 %v16928_v20, %v13671_v37 }
 0x6d6   :  { %v4371_v46 = vmul.f32 %v16929_v47, %v13529_v56  ;;  %v4076_v30 = vadd.f32 %v4059_v5, %v3925_v4  ;;  %v14023_v36 = vmul.f32 %v16834_v48, %v4158_v42  ;;  %v15844_v50 = vrot.slane %v14013_v1, 1  ;;  %v16930_v4 = vld [vmem:[#allocation166_spill] sm:$0xff]  ;;  %v16931_v42 = vld [vmem:[#allocation167_spill] sm:$0xff] }
 0x6d7   :  { %v14027_v9 = vmul.f32 %v12934_v58, %v4369_v57  ;;  %v4077_v7 = vadd.f32 %v4060_v45, %v3926_v25  ;;  %v4221_v40 = vrot.slane %v4177_v17, 1  ;;  %v4391_v59 = vmul.f32 %v12934_v58, %v4370_v27 }
 0x6d8   :  { %v14031_v6 = vmul.f32 %v12934_v58, %v4371_v46  ;;  %v15848_v20 = vrot.slane %v14023_v36, 1  ;;  %v4588_v5 = vmul.f32 %v16930_v4, %v13671_v37  ;;  %v4589_v47 = vmul.f32 %v16931_v42, %v13529_v56  ;;  %v16932_v46 = vld [vmem:[#allocation86_spill] sm:$0xff] }
 0x6d9   :  { %v4222_v45 = vsel %vm600_vm4, %v15844_v50, %v4221_v40  ;;  %v4437_v57 = vrot.slane %v4391_v59, 2  ;;  %v4706_v25 = vmul.f32 %v16932_v46, %v13671_v37  ;;  %v16933_v18 = vrot.slane %v14027_v9, 2  ;;  %v16934_v46 = vld [vmem:[#allocation127_spill] sm:$0xff] }
 0x6da   :  { %v15849_v27 = vrot.slane %v14031_v6, 2  ;;  %v4224_v17 = vsel %vm600_vm4, %v4221_v40, %v15848_v20  ;;  %v4257_v2 = vadd.f32 %v4222_v45, %v4076_v30  ;;  %v4609_v4 = vmul.f32 %v13333_v10, %v4588_v5  ;;  %v16935_v40 = vld [vmem:[#allocation54_spill] sm:$0xff] }
 0x6db   :  { %v4610_v3 = vmul.f32 %v13333_v10, %v4589_v47  ;;  %v4258_v42 = vadd.f32 %v4224_v17, %v4077_v7  ;;  %v4438_v50 = vsel %vm262_vm1, %v16933_v18, %v4437_v57  ;;  %v4707_v26 = vmul.f32 %v16934_v46, %v13529_v56  ;;  %v16937_v7 = vld [vmem:[#allocation158_spill] sm:$0xff]  ;;  %v16938_v17 = vld [vmem:[#allocation44_spill] sm:$0xff] }
 0x6dc   :  { %v4440_v59 = vsel %vm262_vm1, %v4437_v57, %v15849_v27  ;;  %v4475_v35 = vadd.f32 %v4438_v50, %v4257_v2  ;;  %v4708_v30 = vmul.f32 %v16935_v40, %v13543_v29  ;;  %v14061_v5 = vmul.f32 %v13354_v39, %v4706_v25  ;;  %v16940_v27 = vld [vmem:[#allocation66_spill] sm:$0xff]  ;;  %v16944_v25 = vld [vmem:[#allocation160_spill] sm:$0xff] }
 0x6dd   :  { %v3490_v47 = vmul.f32 %v16937_v7, %v13671_v37  ;;  %v4476_v45 = vadd.f32 %v4440_v59, %v4258_v42  ;;  %v4727_v18 = vmul.f32 %v13354_v39, %v4707_v26  ;;  %v16939_v20 = vrot.slane %v16938_v17, 1  ;;  %v16941_v17 = vld [vmem:[#allocation155_spill] sm:$0xff] }
 0x6de   :  { %16936 = vst [vmem:[#allocation31_spill] sm:$0xff] %v14061_v5  ;;  %v3609_v46 = vmul.f32 %v16940_v27, %v13529_v56  ;;  %v4626_v2 = vadd.f32 %v4609_v4, %v4475_v35  ;;  %v14072_v50 = vmul.f32 %v13354_v39, %v4708_v30  ;;  %v3822_v27 = vmul.f32 %v16941_v17, %v13529_v56  ;;  %v16942_v35 = vld [vmem:[#allocation113_spill] sm:$0xff] }
 0x6df   :  { %v3491_v57 = vmul.f32 %v16939_v20, %v13529_v56  ;;  %v3511_v40 = vmul.f32 %v16823_v38, %v3490_v47  ;;  %v4627_v7 = vadd.f32 %v4610_v3, %v4476_v45  ;;  %v4771_v42 = vrot.slane %v4727_v18, 1  ;;  %v16946_v18 = vld [vmem:[#allocation52_spill] sm:$0xff] }
 0x6e0   :  { %v3629_v59 = vmul.f32 %v16819_v16, %v3609_v46  ;;  %v16943_v4 = vrot.slane %v16942_v35, 7  ;;  %v4040_v37 = vmul.f32 %v16944_v25, %v13529_v56  ;;  %v16945_v47 = vrot.slane %v14061_v5, 1  ;;  %v16948_v46 = vld [vmem:[#allocation55_spill] sm:$0xff]  ;;  %v16952_v56 = vld [vmem:[#allocation170_spill] sm:$0xff] }
 0x6e1   :  { %v3512_v26 = vmul.f32 %v16823_v38, %v3491_v57  ;;  %v16947_v16 = vrot.slane %v16946_v18, 1  ;;  %v4159_v20 = vmul.f32 %v16948_v46, %v13543_v29  ;;  %v16949_v17 = vrot.slane %v14072_v50, 1 }
 0x6e2   :  { %v3823_v30 = vmul.f32 %v16943_v4, %v13543_v29  ;;  %v4772_v3 = vsel %vm600_vm4, %v16945_v47, %v4771_v42  ;;  %v3675_v45 = vrot.slane %v3629_v59, 1  ;;  %v3843_v25 = vmul.f32 %v16821_v43, %v3822_v27 }
 0x6e3   :  { %v4041_v57 = vmul.f32 %v16947_v16, %v13543_v29  ;;  %v4774_v35 = vsel %vm600_vm4, %v4771_v42, %v16949_v17  ;;  %v14097_v4 = vadd.f32 %v4772_v3, %v4626_v2  ;;  %v14108_v18 = vmul.f32 %v14100_v8, %v16952_v56  ;;  %v16954_v17 = vld [vmem:[#allocation173_spill] sm:$0xff] }
 0x6e4   :  { %v3844_v47 = vmul.f32 %v16821_v43, %v3823_v30  ;;  %v14104_v59 = vadd.f32 %v4774_v35, %v4627_v7  ;;  %v16953_v16 = vrot.slane %v13975_v11, 1  ;;  %v3710_v5 = vadd.f32 %v3675_v45, %v3512_v26  ;;  %v16955_v7 = vld [vmem:[#allocation126_spill] sm:$0xff]  ;;  %v16956_v56 = vld [vmem:[#allocation169_spill] sm:$0xff] }
 0x6e5   :  { %16950 = vst [vmem:[#allocation87_spill] sm:$0xff] %v14097_v4  ;;  %v3891_v2 = vrot.slane %v3843_v25, 2  ;;  %v4061_v27 = vmul.f32 %v16829_v14, %v4040_v37  ;;  %v4179_v43 = vmul.f32 %v16834_v48, %v4159_v20  ;;  %v4372_v30 = vmul.f32 %v16955_v7, %v13543_v29 }
 0x6e6   :  { %16951 = vst [vmem:[#allocation32_spill] sm:$0xff] %v14104_v59  ;;  %v3676_v46 = vsel %vm600_vm4, %v16953_v16, %v3675_v45  ;;  %v3893_v3 = vrot.slane %v3844_v47, 2  ;;  %v4590_v35 = vmul.f32 %v16956_v56, %v13543_v29  ;;  %v16957_v11 = vrot.slane %v13983_v61, 2  ;;  %v16958_v45 = vld [vmem:[#allocation29_spill] sm:$0xff]  ;;  %v16960_v47 = vld [vmem:[#allocation34_spill] sm:$0xff] }
 0x6e7   :  { %v3709_v42 = vadd.f32 %v3676_v46, %v3511_v40  ;;  %v4062_v26 = vmul.f32 %v16829_v14, %v4041_v57  ;;  %v16959_v25 = vrot.slane %v16958_v45, 1  ;;  %v16961_v37 = vrot.slane %v16960_v47, 1  ;;  %v16962_v61 = vld [vmem:[#allocation78_spill] sm:$0xff]  ;;  %v16966_v45 = vld [vmem:[#allocation172_spill] sm:$0xff] }
 0x6e8   :  { %v3892_v16 = vsel %vm262_vm1, %v16957_v11, %v3891_v2  ;;  %v3894_v40 = vsel %vm262_vm1, %v3891_v2, %v3893_v3  ;;  %v4225_v7 = vrot.slane %v4179_v43, 1  ;;  %v4393_v59 = vmul.f32 %v12934_v58, %v4372_v30  ;;  %v16964_v2 = vld [vmem:[#allocation114_spill] sm:$0xff] }
 0x6e9   :  { %v3648_v20 = vsel %vm600_vm4, %v16961_v37, %v16959_v25  ;;  %v3927_v46 = vadd.f32 %v3892_v16, %v3709_v42  ;;  %v3928_v4 = vadd.f32 %v3894_v40, %v3710_v5  ;;  %v4611_v56 = vmul.f32 %v13333_v10, %v4590_v35  ;;  %v16969_v16 = vld [vmem:[#allocation38_spill] sm:$0xff]  ;;  %v16970_v40 = vld [vmem:[#allocation40_spill] sm:$0xff] }
 0x6ea   :  { %v3695_v29 = vadd.f32 %v3648_v20, %v16962_v61  ;;  %v16963_v11 = vrot.slane %v13436_v55, 2  ;;  %v16965_v3 = vrot.slane %v16964_v2, 2  ;;  %v4026_v47 = vmul.f32 %v16967_v53, %v16966_v45  ;;  %v16975_v2 = vld [vmem:[#allocation89_spill] sm:$0xff] }
 0x6eb   :  { %v4078_v54 = vadd.f32 %v4061_v27, %v3927_v46  ;;  %v4079_v25 = vadd.f32 %v4062_v26, %v3928_v4  ;;  %v16968_v5 = vrot.slane %v14023_v36, 1  ;;  %v4441_v43 = vrot.slane %v4393_v59, 2  ;;  %v16973_v36 = vld [vmem:[#allocation118_spill] sm:$0xff] }
 0x6ec   :  { %v3864_v57 = vsel %vm262_vm1, %v16965_v3, %v16963_v11  ;;  %v4047_v35 = vmul.f32 %v16829_v14, %v4026_v47  ;;  %v4144_v55 = vmul.f32 %v16969_v16, %v16966_v45  ;;  %v16971_v37 = vrot.slane %v16970_v40, 7 }
 0x6ed   :  { %v4226_v42 = vsel %vm600_vm4, %v16968_v5, %v4225_v7  ;;  %v3913_v30 = vadd.f32 %v3864_v57, %v3695_v29  ;;  %v4260_v11 = vadd.f32 %v4225_v7, %v4079_v25  ;;  %v16972_v53 = vrot.slane %v14031_v6, 2  ;;  %v16977_v6 = vld [vmem:[#allocation97_spill] sm:$0xff] }
 0x6ee   :  { %v4357_v20 = vmul.f32 %v16971_v37, %v16966_v45  ;;  %v4259_v61 = vadd.f32 %v4226_v42, %v4078_v54  ;;  %v16974_v27 = vrot.slane %v16973_v36, 2  ;;  %v4164_v26 = vmul.f32 %v16834_v48, %v4144_v55  ;;  %v16978_v25 = vld [vmem:[#allocation77_spill] sm:$0xff]  ;;  %v16979_v42 = vld [vmem:[#allocation171_spill] sm:$0xff] }
 0x6ef   :  { %v4442_v4 = vsel %vm262_vm1, %v16972_v53, %v4441_v43  ;;  %v4064_v29 = vadd.f32 %v4047_v35, %v3913_v30  ;;  %v16976_v3 = vrot.slane %v16975_v2, 1  ;;  %v4576_v7 = vmul.f32 %v16977_v6, %v13401_v32  ;;  %v16986_v36 = vld [vmem:[#allocation49_spill] sm:$0xff] }
 0x6f0   :  { %v4444_v59 = vsel %vm262_vm1, %v4441_v43, %v16974_v27  ;;  %v4378_v46 = vmul.f32 %v12934_v58, %v4357_v20  ;;  %v4477_v47 = vadd.f32 %v4442_v4, %v4259_v61  ;;  %v4694_v5 = vmul.f32 %v16978_v25, %v13401_v32  ;;  %v16980_v58 = vld [vmem:[#allocation109_spill] sm:$0xff] }
 0x6f1   :  { %v4575_v57 = vmul.f32 %v16976_v3, %v16966_v45  ;;  %v14160_v54 = vadd.f32 %v4444_v59, %v4260_v11  ;;  %v14168_v43 = vmul.f32 %v14100_v8, %v16979_v42  ;;  %v4196_v48 = vrot.slane %v4164_v26, 1  ;;  %v16984_v11 = vld [vmem:[#allocation99_spill] sm:$0xff] }
 0x6f2   :  { %v4412_v30 = vrot.slane %v4378_v46, 2  ;;  %v16981_v35 = vrot.slane %v16980_v58, 7  ;;  %v4991_v45 = vrot.slane %v14108_v18, 2  ;;  %v4628_v55 = vadd.f32 %v4611_v56, %v4477_v47  ;;  %v16988_v56 = vld [vmem:[#allocation91_spill] sm:$0xff]  ;;  %v16989_v47 = vld [vmem:[#allocation96_spill] sm:$0xff] }
 0x6f3   :  { %v16982_v40 = vrot.slane %v16954_v17, 1  ;;  %v16983_v37 = vrot.slane %v14072_v50, 1  ;;  %v4714_v61 = vmul.f32 %v13354_v39, %v4694_v5  ;;  %v16985_v53 = vrot.slane %v16984_v11, 1 }
 0x6f4   :  { %v4907_v16 = vmul.f32 %v16981_v35, %v13401_v32  ;;  %v4244_v27 = vadd.f32 %v4196_v48, %v16986_v36  ;;  %v16987_v59 = vrot.slane %v13495_v33, 2  ;;  %v4908_v26 = vmul.f32 %v16988_v56, %v13379_v24 }
 0x6f5   :  { %v4776_v20 = vsel %vm600_vm4, %v16983_v37, %v16982_v40  ;;  %v4198_v4 = vsel %vm600_vm4, %v4196_v48, %v16985_v53  ;;  %v4596_v2 = vmul.f32 %v13333_v10, %v4575_v57  ;;  %v4746_v3 = vrot.slane %v4714_v61, 1  ;;  %v16990_v48 = vld [vmem:[#allocation35_spill] sm:$0xff]  ;;  %v16993_v37 = vld [vmem:[#allocation120_spill] sm:$0xff] }
 0x6f6   :  { %v4414_v32 = vsel %vm262_vm1, %v4412_v30, %v16987_v59  ;;  %v14189_v46 = vadd.f32 %v4776_v20, %v4628_v55  ;;  %v4245_v50 = vadd.f32 %v4198_v4, %v4064_v29  ;;  %v4462_v39 = vadd.f32 %v4412_v30, %v4244_v27  ;;  %v16992_v29 = vld [vmem:[#allocation102_spill] sm:$0xff] }
 0x6f7   :  { %v4909_v6 = vmul.f32 %v16989_v47, %v13394_v31  ;;  %v4928_v25 = vmul.f32 %v14100_v8, %v4907_v16  ;;  %v4929_v5 = vmul.f32 %v14100_v8, %v4908_v26  ;;  %v4597_v42 = vmul.f32 %v13333_v10, %v4576_v7  ;;  %v16994_v4 = vld [vmem:[#allocation98_spill] sm:$0xff]  ;;  %v16997_v47 = vld [vmem:[#allocation80_spill] sm:$0xff] }
 0x6f8   :  { %v4463_v33 = vadd.f32 %v4414_v32, %v4245_v50  ;;  %v16991_v58 = vrot.slane %v16990_v48, 1  ;;  %v4910_v35 = vmul.f32 %v16992_v29, %v13433_v23  ;;  %v4613_v57 = vadd.f32 %v4596_v2, %v4462_v39  ;;  %v16995_v32 = vld [vmem:[#allocation140_spill] sm:$0xff]  ;;  %v16996_v2 = vld [vmem:[#allocation141_spill] sm:$0xff] }
 0x6f9   :  { %v4930_v30 = vmul.f32 %v14100_v8, %v4909_v6  ;;  %v4962_v55 = vrot.slane %v4928_v25, 2  ;;  %v4963_v40 = vrot.slane %v4929_v5, 2  ;;  %v4993_v31 = vrot.slane %v14168_v43, 2 }
 0x6fa   :  { %v4748_v24 = vsel %vm600_vm4, %v4746_v3, %v16991_v58  ;;  %v4614_v16 = vadd.f32 %v4597_v42, %v4463_v33  ;;  %v4911_v20 = vmul.f32 %v16993_v37, %v13446_v44  ;;  %v4931_v7 = vmul.f32 %v14100_v8, %v4910_v35  ;;  %v16998_v33 = vld [vmem:[#allocation130_spill] sm:$0xff]  ;;  %v16999_v35 = vld [vmem:[#allocation149_spill] sm:$0xff] }
 0x6fb   :  { %v4794_v61 = vadd.f32 %v4746_v3, %v4613_v57  ;;  %v4964_v11 = vsel %vm262_vm1, %v4962_v55, %v4963_v40  ;;  %v4965_v53 = vrot.slane %v4930_v30, 2  ;;  %v4912_v23 = vmul.f32 %v16994_v4, %v13427_v60 }
 0x6fc   :  { %v4795_v36 = vadd.f32 %v4748_v24, %v4614_v16  ;;  %v4932_v27 = vmul.f32 %v14100_v8, %v4911_v20  ;;  %v4967_v59 = vrot.slane %v4931_v7, 2  ;;  %v4913_v56 = vmul.f32 %v16995_v32, %v13439_v13  ;;  %v17001_v32 = vld [vmem:[#allocation156_spill] sm:$0xff] }
 0x6fd   :  { %v4966_v26 = vsel %vm262_vm1, %v4963_v40, %v4965_v53  ;;  %v5012_v50 = vadd.f32 %v4962_v55, %v4794_v61  ;;  %v4933_v44 = vmul.f32 %v14100_v8, %v4912_v23  ;;  %v4914_v3 = vmul.f32 %v16996_v2, %v13480_v21 }
 0x6fe   :  { %v5013_v39 = vadd.f32 %v4964_v11, %v4795_v36  ;;  %v5014_v6 = vadd.f32 %v4966_v26, %v16997_v47  ;;  %v4968_v60 = vsel %vm262_vm1, %v4965_v53, %v4967_v59  ;;  %v4969_v25 = vrot.slane %v4932_v27, 2  ;;  %v17002_v26 = vld [vmem:[#allocation143_spill] sm:$0xff] }
 0x6ff   :  { %v5046_v5 = vrot.slane %v5012_v50, 7  ;;  %v5015_v42 = vadd.f32 %v4968_v60, %v16998_v33  ;;  %v4934_v48 = vmul.f32 %v14100_v8, %v4913_v56  ;;  %v4971_v13 = vrot.slane %v4933_v44, 2 }
 0x700   :  { %v5047_v58 = vrot.slane %v5013_v39, 7  ;;  %v5049_v24 = vrot.slane %v5014_v6, 7  ;;  %v4970_v29 = vsel %vm262_vm1, %v4967_v59, %v4969_v25  ;;  %v4915_v57 = vmul.f32 %v16999_v35, %v13498_v28  ;;  %v17000_v59 = vld [vmem:[#allocation119_spill] sm:$0xff] }
 0x701   :  { %v5016_v21 = vadd.f32 %v4970_v29, %v13663_v63  ;;  %v5051_v30 = vrot.slane %v5015_v42, 7  ;;  %v4972_v55 = vsel %vm262_vm1, %v4969_v25, %v4971_v13  ;;  %v4973_v40 = vrot.slane %v4934_v48, 2 }
 0x702   :  { %v5048_v16 = vsel %vm933_vm3, %v5046_v5, %v5047_v58  ;;  %v5050_v37 = vsel %vm933_vm3, %v5047_v58, %v5049_v24  ;;  %v5017_v20 = vadd.f32 %v4972_v55, %v13679_v51  ;;  %v4935_v7 = vmul.f32 %v14100_v8, %v4914_v3 }
 0x703   :  { %v8539_v61 = vpack.c.bf16 %v5050_v37, %v5048_v16  ;;  %v5052_v11 = vsel %vm933_vm3, %v5049_v24, %v5051_v30  ;;  %v5053_v53 = vrot.slane %v5016_v21, 7  ;;  %v4974_v28 = vsel %vm262_vm1, %v4971_v13, %v4973_v40  ;;  %v17011_v37 = vld [vmem:[#allocation30_spill] sm:$0xff] }
 0x704   :  { %v5018_v63 = vadd.f32 %v4974_v28, %v13767_v19  ;;  %v5055_v4 = vrot.slane %v5017_v20, 7  ;;  %v4936_v23 = vmul.f32 %v14100_v8, %v4915_v57  ;;  %v4975_v36 = vrot.slane %v4935_v7, 2  ;;  %v17014_v28 = vld [vmem:[#allocation168_spill] sm:$0xff] }
 0x705   :  { %8540 = vmatprep.subr.bf16.mxu1 %v8539_v61  ;;  %v5054_v27 = vsel %vm933_vm3, %v5051_v30, %v5053_v53  ;;  %v4916_v51 = vmul.f32 %v17000_v59, %v13475_v52  ;;  %v4917_v56 = vmul.f32 %v17001_v32, %v13488_v12  ;;  %v3487_v50 = vmul.f32 %v17002_v26, %v13475_v52  ;;  %v17021_v26 = vld [vmem:[#allocation133_spill] sm:$0xff] }
 0x706   :  { %8542 = vmatpush3.bf16.msra.mxu1 %v8539_v61  ;;  %v8543_v44 = vpack.c.bf16 %v5054_v27, %v5052_v11  ;;  %v5056_v19 = vsel %vm933_vm3, %v5053_v53, %v5055_v4  ;;  %v5057_v2 = vrot.slane %v5018_v63, 7  ;;  %v4976_v3 = vsel %vm262_vm1, %v4973_v40, %v4975_v36  ;;  %v17013_v61 = vld [vmem:[#allocation115_spill] sm:$0xff] }
 0x707   :  { %v4977_v39 = vrot.slane %v4936_v23, 2  ;;  %v5019_v47 = vadd.f32 %v4976_v3, %v13780_v34  ;;  %v4937_v6 = vmul.f32 %v14100_v8, %v4916_v51  ;;  %v4938_v60 = vmul.f32 %v14100_v8, %v4917_v56  ;;  %v17016_v23 = vld [vmem:[#allocation31_spill] sm:$0xff] }
 0x708   :  { %8544 = vmatprep.subr.bf16.mxu1 %v8543_v44  ;;  %v5058_v25 = vsel %vm933_vm3, %v5055_v4, %v5057_v2  ;;  %v3508_v5 = vmul.f32 %v16823_v38, %v3487_v50  ;;  %v17003_v52 = vrot.slane %v13955_v41, 1  ;;  %v17004_v33 = vrot.slane %v13857_v62, 1  ;;  %v17007_v62 = vld [vmem:[#allocation153_spill] sm:$0xff]  ;;  %v17020_v56 = vld [vmem:[#allocation63_spill] sm:$0xff] }
 0x709   :  { %v17005_v48 = vrot.slane %v13979_v49, 2  ;;  %v17006_v13 = vrot.slane %v13876_v22, 2  ;;  %v8547_v58 = vpack.c.bf16 %v5058_v25, %v5056_v19  ;;  %v4978_v24 = vsel %vm262_vm1, %v4975_v36, %v4977_v39  ;;  %v17023_v19 = vld [vmem:[#allocation162_spill] sm:$0xff] }
 0x70a   :  { %v3670_v42 = vsel %vm600_vm4, %v17004_v33, %v17003_v52  ;;  %v5059_v29 = vrot.slane %v5019_v47, 7  ;;  %v4979_v35 = vrot.slane %v4937_v6, 2  ;;  %8546 = vmatpush3.bf16.msra.mxu1 %v8543_v44  ;;  %v5020_v38 = vadd.f32 %v4978_v24, %v13869_v0  ;;  %v17022_v44 = vld [vmem:[#allocation67_spill] sm:$0xff]  ;;  %v17029_v24 = vld [vmem:[#allocation164_spill] sm:$0xff] }
 0x70b   :  { %v3886_v34 = vsel %vm262_vm1, %v17006_v13, %v17005_v48  ;;  %v4981_v57 = vrot.slane %v4938_v60, 2  ;;  %v3706_v41 = vadd.f32 %v3670_v42, %v3508_v5  ;;  %v4037_v21 = vmul.f32 %v17007_v62, %v13488_v12  ;;  %8548 = vmatprep.subr.bf16.mxu1 %v8547_v58  ;;  %v17025_v5 = vld [vmem:[#allocation128_spill] sm:$0xff]  ;;  %v17026_v52 = vld [vmem:[#allocation163_spill] sm:$0xff] }
 0x70c   :  { %v5060_v49 = vsel %vm933_vm3, %v5057_v2, %v5059_v29  ;;  %v4980_v22 = vsel %vm262_vm1, %v4977_v39, %v4979_v35  ;;  %v17008_v30 = vrot.slane %v14013_v1, 1  ;;  %v17009_v55 = vrot.slane %v13897_v15, 1  ;;  %v17015_v1 = vld [vmem:[#allocation93_spill] sm:$0xff] }
 0x70d   :  { %v17010_v16 = vrot.slane %v14027_v9, 2  ;;  %v17012_v0 = vrot.slane %v17011_v37, 2  ;;  %v5061_v7 = vrot.slane %v5020_v38, 7  ;;  %v4982_v12 = vsel %vm262_vm1, %v4979_v35, %v4981_v57  ;;  %v17018_v9 = vld [vmem:[#allocation95_spill] sm:$0xff]  ;;  %v17030_v37 = vld [vmem:[#allocation104_spill] sm:$0xff] }
 0x70e   :  { %v4220_v40 = vsel %vm600_vm4, %v17009_v55, %v17008_v30  ;;  %v5021_v11 = vadd.f32 %v4980_v22, %v17013_v61  ;;  %v3924_v53 = vadd.f32 %v3886_v34, %v3706_v41  ;;  %v4629_v63 = vadd.f32 %v17014_v28, %v14160_v54  ;;  %8550 = vmatpush3.bf16.msra.mxu1 %v8547_v58  ;;  %v17028_v58 = vld [vmem:[#allocation121_spill] sm:$0xff]  ;;  %v17031_v61 = vld [vmem:[#allocation87_spill] sm:$0xff] }
 0x70f   :  { %v4436_v20 = vsel %vm262_vm1, %v17012_v0, %v17010_v16  ;;  %v5022_v4 = vadd.f32 %v4982_v12, %v17015_v1  ;;  %v4058_v15 = vmul.f32 %v16829_v14, %v4037_v21  ;;  %v17017_v36 = vrot.slane %v17016_v23, 1  ;;  %v17024_v14 = vld [vmem:[#allocation165_spill] sm:$0xff] }
 0x710   :  { %v17019_v27 = vrot.slane %v17018_v9, 1  ;;  %v5062_v51 = vsel %vm933_vm3, %v5059_v29, %v5061_v7  ;;  %v5063_v32 = vrot.slane %v5021_v11, 7  ;;  %v4918_v50 = vmul.f32 %v17021_v26, %v17020_v56  ;;  %v3035_v26 = vld [vmem:[%s16875_s9 + $0x8] sm:$0xff] }
 0x711   :  { %v4919_v54 = vmul.f32 %v17023_v19, %v17022_v44  ;;  %v8551_v2 = vpack.c.bf16 %v5062_v51, %v5060_v49  ;;  %v5065_v3 = vrot.slane %v5022_v4, 7  ;;  %v4075_v39 = vadd.f32 %v4058_v15, %v3924_v53  ;;  %v17032_v53 = vld [vmem:[#allocation32_spill] sm:$0xff]  ;;  %v3037_v19 = vld [vmem:[%s16875_s9 + $0x18] sm:$0xff] }
 0x712   :  { %v4770_v59 = vsel %vm600_vm4, %v17019_v27, %v17017_v36  ;;  %v4587_v47 = vmul.f32 %v17024_v14, %v17020_v56  ;;  %v5064_v6 = vsel %vm933_vm3, %v5061_v7, %v5063_v32  ;;  %v4939_v60 = vmul.f32 %v14100_v8, %v4918_v50  ;;  %v3036_v50 = vld [vmem:[%s16875_s9 + $0x10] sm:$0xff]  ;;  %v8822_v14 = vld [vmem:[%s17033_s13 + $0x20] sm:$0xff]  }
 0x713   :  { %v4940_v25 = vmul.f32 %v14100_v8, %v4919_v54  ;;  %v4920_v33 = vmul.f32 %v17026_v52, %v17025_v5  ;;  %v17027_v42 = vrot.slane %v16954_v17, 1  ;;  %8552 = vmatprep.subr.bf16.mxu1 %v8551_v2  ;;  %v5066_v13 = vsel %vm933_vm3, %v5063_v32, %v5065_v3  ;;  %v8818_v54 = vld [vmem:[%s17033_s13] sm:$0xff]  }
 0x714   :  { %v4256_v34 = vadd.f32 %v4220_v40, %v4075_v39  ;;  %v4921_v29 = vmul.f32 %v17029_v24, %v17028_v58  ;;  %8554 = vmatpush3.bf16.msra.mxu1 %v8551_v2  ;;  %v8555_v35 = vpack.c.bf16 %v5066_v13, %v5064_v6  ;;  %v4983_v38 = vrot.slane %v4939_v60, 2  ;;  %8440 = vmatpush3.bf16.msra.mxu0 %v8818_v54  ;;  %v8819_v2 = vld [vmem:[%s17033_s13 + $0x8] sm:$0xff]   ;;  %v8821_v39 = vld [vmem:[%s17033_s13 + $0x18] sm:$0xff]   ;;  %v8824_v6 = vld [vmem:[%s17033_s13 + $0x30] sm:$0xff]  }
 0x715   :  { %v4810_v48 = vadd.f32 %v17027_v42, %v4629_v63  ;;  %v4985_v41 = vrot.slane %v4940_v25, 2  ;;  %v4941_v62 = vmul.f32 %v14100_v8, %v4920_v33  ;;  %v4608_v49 = vmul.f32 %v13333_v10, %v4587_v47  ;;  %v8823_v47 = vld [vmem:[%s17033_s13 + $0x28] sm:$0xff]   ;;  %v8825_v60 = vld [vmem:[%s17033_s13 + $0x38] sm:$0xff]   ;;  %v3362_v25 = vld [vmem:[%s17035_s17] sm:$0x3] }
 0x716   :  { %v4474_v21 = vadd.f32 %v4436_v20, %v4256_v34  ;;  %v4942_v22 = vmul.f32 %v14100_v8, %v4921_v29  ;;  %8556 = vmatprep.subr.bf16.mxu1 %v8555_v35  ;;  %v4984_v17 = vsel %vm262_vm1, %v4981_v57, %v4983_v38  ;;  %v4994_v40 = vsel %vm262_vm1, %v4991_v45, %v4993_v31  ;;  %v17036_v5 = vld [vmem:[#allocation62_spill] sm:$0xff]  ;;  %v17037_v33 = vld [vmem:[#allocation64_spill] sm:$0xff] }
 0x717   :  { %v4986_v30 = vsel %vm262_vm1, %v4983_v38, %v4985_v41  ;;  %v4987_v55 = vrot.slane %v4941_v62, 2  ;;  %v5023_v0 = vadd.f32 %v4984_v17, %v17030_v37  ;;  %v5028_v7 = vadd.f32 %v4994_v40, %v4810_v48  ;;  %v8826_v54 = vld [vmem:[%s17038_s21] sm:$0xff]  }
 0x718   :  { %v4625_v16 = vadd.f32 %v4608_v49, %v4474_v21  ;;  %v4989_v20 = vrot.slane %v4942_v22, 2  ;;  %8558 = vmatpush3.bf16.msra.mxu1 %v8555_v35  ;;  %v17034_v44 = vmov 0.0   ;;  %v5183_v52 = vrot.slane %v3362_v25, %v17036_v5 }
 0x719   :  { %v4988_v10 = vsel %vm262_vm1, %v4985_v41, %v4987_v55  ;;  %v5067_v12 = vrot.slane %v5023_v0, 7  ;;  %v5077_v23 = vrot.slane %v5028_v7, 7  ;;  %8441 = vmatprep.subr.bf16.mxu0 %v17034_v44  ;;  %v5191_v42 = vrot.slane %v3362_v25, %v17037_v33  ;;  %v7963_v25 = vld [vmem:[%s17039_s25] ss:$0 sm:$0xff] }
 0x71a   :  { %v4806_v8 = vadd.f32 %v4770_v59, %v4625_v16  ;;  %v4990_v57 = vsel %vm262_vm1, %v4987_v55, %v4989_v20  ;;  %v5025_v11 = vadd.f32 %v4988_v10, %v17031_v61  ;;  %v4992_v31 = vsel %vm262_vm1, %v4989_v20, %v4991_v45  ;;  %8442 = vmatpush3.bf16.msra.mxu0 %v8819_v2  ;;  %v8827_v2 = vld [vmem:[%s17038_s21 + $0x8] sm:$0xff]  }
 0x71b   :  { %v5026_v43 = vadd.f32 %v4990_v57, %v17032_v53  ;;  %v5068_v63 = vsel %vm933_vm3, %v5065_v3, %v5067_v12  ;;  %v5027_v4 = vadd.f32 %v4992_v31, %v14189_v46  ;;  %8443 = vmatprep.subr.bf16.mxu0 %v17034_v44  ;;  %v8820_v3 = vld [vmem:[%s17033_s13 + $0x10] sm:$0xff]  }
 0x71c   :  { %v5024_v28 = vadd.f32 %v4986_v30, %v4806_v8  ;;  %v5071_v1 = vrot.slane %v5025_v11, 7 }
 0x71d   :  { %v5073_v15 = vrot.slane %v5026_v43, 7  ;;  %v5075_v9 = vrot.slane %v5027_v4, 7 }
 0x71e   :  { %v5069_v36 = vrot.slane %v5024_v28, 7  ;;  %8444 = vmatpush3.bf16.msra.mxu0 %v8820_v3  ;;  %v8828_v3 = vld [vmem:[%s17038_s21 + $0x10] sm:$0xff]  }
 0x71f   :  { %v5074_v27 = vsel %vm933_vm3, %v5071_v1, %v5073_v15  ;;  %v5076_v45 = vsel %vm933_vm3, %v5073_v15, %v5075_v9  ;;  %v5078_v51 = vsel %vm933_vm3, %v5075_v9, %v5077_v23  ;;  %8445 = vmatprep.subr.bf16.mxu0 %v17034_v44 }
 0x720   :  { %v5070_v59 = vsel %vm933_vm3, %v5067_v12, %v5069_v36  ;;  %v5072_v18 = vsel %vm933_vm3, %v5069_v36, %v5071_v1  ;;  %v8567_v46 = vpack.c.bf16 %v5078_v51, %v5076_v45 }
 0x721   :  { %v8559_v32 = vpack.c.bf16 %v5070_v59, %v5068_v63  ;;  %v8563_v56 = vpack.c.bf16 %v5074_v27, %v5072_v18 }
 0x722   :  { %8446 = vmatpush3.bf16.msra.mxu0 %v8821_v39  ;;  %v8829_v39 = vld [vmem:[%s17038_s21 + $0x18] sm:$0xff]  }
 0x723   :  { %8560 = vmatprep.subr.bf16.mxu1 %v8559_v32  ;;  %8447 = vmatprep.subr.bf16.mxu0 %v17034_v44 }
 0x724   :  { %8562 = vmatpush3.bf16.msra.mxu1 %v8559_v32 }
 0x725   :  { %8564 = vmatprep.subr.bf16.mxu1 %v8563_v56 }
 0x726   :  { %8448 = vmatpush3.bf16.msra.mxu0 %v8822_v14  ;;  %v8830_v14 = vld [vmem:[%s17038_s21 + $0x20] sm:$0xff]  }
 0x727   :  { %8449 = vmatprep.subr.bf16.mxu0 %v17034_v44 }
 0x728   :  { %8566 = vmatpush3.bf16.msra.mxu1 %v8563_v56 }
 0x729   :  { %8568 = vmatprep.subr.bf16.mxu1 %v8567_v46 }
 0x72a   :  { %8450 = vmatpush3.bf16.msra.mxu0 %v8823_v47  ;;  %v8831_v47 = vld [vmem:[%s17038_s21 + $0x28] sm:$0xff]  }
 0x72b   :  { %8451 = vmatprep.subr.bf16.mxu0 %v17034_v44 }
 0x72c   :  { %8570 = vmatpush3.bf16.msra.mxu1 %v8567_v46 }
 0x72d   :  { %8459 = vmatprep.subr.bf16.mxu1 %v17034_v44 }
 0x72e   :  { %8452 = vmatpush3.bf16.msra.mxu0 %v8824_v6  ;;  %v8832_v6 = vld [vmem:[%s17038_s21 + $0x30] sm:$0xff]  }
 0x72f   :  { %8434 = vmatmul.mubr.f32.vlgmr.msra.gmra.mrb[20].mxu1 %v3035_v26  ;;  %8453 = vmatprep.subr.bf16.mxu0 %v17034_v44 }
 0x730   :  { %8436 = vmatprep.mubr.f32.mxu1 %v3036_v50  ;;  %8460 = vmatpush3.bf16.msra.mxu1 %v8826_v54 }
 0x731   :  { %8461 = vmatprep.subr.bf16.mxu1 %v17034_v44 }
 0x732   :  { %8454 = vmatpush3.bf16.msra.mxu0 %v8825_v60  ;;  %v8833_v60 = vld [vmem:[%s17038_s21 + $0x38] sm:$0xff]  }
 0x733   :  { %8437 = vmatmul.mubr.f32.gmra.mrb[22].mxu1 %v3037_v19 }
 0x734   :  { %8475 = vmatprep.mubr.msk.bf16.mxu1 %vm9356_vm5, %v17034_v44  ;;  %8462 = vmatpush3.bf16.msra.mxu1 %v8827_v2 }
 0x735   :  { %8463 = vmatprep.subr.bf16.mxu1 %v17034_v44 }
 0x738   :  { %8464 = vmatpush3.bf16.msra.mxu1 %v8828_v3  ;;  %v8860_v3 = vld [vmem:[%s17042_s3 + $0x60] ss:$8 sps:$4 sm:$0xff]  }
 0x739   :  { %8465 = vmatprep.subr.bf16.mxu1 %v17034_v44 }
 0x73c   :  { %8466 = vmatpush3.bf16.msra.mxu1 %v8829_v39  ;;  %v8862_v39 = vld [vmem:[%s17042_s3 + $0x64] ss:$8 sps:$4 sm:$0xff]  }
 0x73d   :  { %8467 = vmatprep.subr.bf16.mxu1 %v17034_v44 }
 0x740   :  { %8468 = vmatpush3.bf16.msra.mxu1 %v8830_v14  ;;  %v8863_v14 = vld [vmem:[%s17042_s3 + $0x70] ss:$8 sps:$4 sm:$0xff]  }
 0x741   :  { %8469 = vmatprep.subr.bf16.mxu1 %v17034_v44 }
 0x744   :  { %8470 = vmatpush3.bf16.msra.mxu1 %v8831_v47  ;;  %v5625_v47 = vld [vmem:[%s17044_s14 + $0x10] sm:$0xff] }
 0x745   :  { %8471 = vmatprep.subr.bf16.mxu1 %v17034_v44 }
 0x748   :  { %8472 = vmatpush3.bf16.msra.mxu1 %v8832_v6  ;;  %v17045_v6 = vmov 2  }
 0x749   :  { %8473 = vmatprep.subr.bf16.mxu1 %v17034_v44 }
 0x74c   :  { %8474 = vmatpush3.bf16.msra.mxu1 %v8833_v60  ;;  %v17046_v60 = vmov 3  }
 0x802   :  { %v8435_v48 = vpop.f32.mrb[20].mxu1 }
 0x803   :  { %v5185_v13 = vmul.f32 %v8435_v48, %v5183_v52  ;;  %v5161_v34 = vpop.f32.mrb[21].mxu1 }
 0x804   :  { %v5184_v58 = vmul.f32 %v5183_v52, %v5161_v34 }
 0x805   :  { %v5193_v24 = vadd.f32 %v5191_v42, %v5185_v13 }
 0x806   :  { %v5192_v29 = vadd.f32 %v5191_v42, %v5184_v58  ;;  %v8438_v35 = vpop.f32.mrb[22].mxu1 }
 0x807   :  { %v7960_v38 = vmul.f32 -1.442695, %v5193_v24  ;;  %v5187_v41 = vmul.f32 %v8438_v35, %v5183_v52  ;;  %v5171_v62 = vpop.f32.mrb[23].mxu1 }
 0x808   :  { %v7959_v21 = vmul.f32 -1.442695, %v5192_v29  ;;  %v5186_v49 = vmul.f32 %v5183_v52, %v5171_v62  ;;  %v17041_v62 = vmov 0  }
 0x809   :  { %9142 = vpow2.f32 %v7960_v38  ;;  %v5195_v22 = vadd.f32 %v5191_v42, %v5187_v41 }
 0x80a   :  { %9144 = vpow2.f32 %v7959_v21  ;;  %v5194_v17 = vadd.f32 %v5191_v42, %v5186_v49  ;;  %v8834_v21 = vld [vmem:[%s17040_s29] sm:$0xff]   ;;  %v8835_v49 = vld [vmem:[%s17040_s29 + $0x8] sm:$0xff]  }
 0x80b   :  { %v7962_v30 = vmul.f32 -1.442695, %v5195_v22  ;;  %8479 = vmatprep.subr.bf16.mxu0 %v8834_v21 }
 0x80c   :  { %v7961_v55 = vmul.f32 -1.442695, %v5194_v17 }
 0x80d   :  { %9146 = vpow2.f32 %v7962_v30  ;;  %v8838_v30 = vld [vmem:[%s17040_s29 + $0x20] sm:$0xff]  }
 0x80e   :  { %9148 = vpow2.f32 %v7961_v55  ;;  %v8839_v55 = vld [vmem:[%s17040_s29 + $0x28] sm:$0xff]  }
 0x813   :  { %v9143_v40 = vpop.eup %9142 }
 0x814   :  { %v9145_v16 = vpop.eup %9144  ;;  %v5209_v37 = vadd.f32 1.0, %v9143_v40  ;;  %v8840_v40 = vld [vmem:[%s17040_s29 + $0x30] sm:$0xff]  }
 0x815   :  { %v5208_v0 = vadd.f32 1.0, %v9145_v16  ;;  %v8842_v16 = vld [vmem:[%s17042_s3] ss:$8 sps:$4 sm:$0xff]  }
 0x816   :  { %9150 = vrcp.f32 %v5209_v37  ;;  %v8844_v37 = vld [vmem:[%s17042_s3 + $0x4] ss:$8 sps:$4 sm:$0xff]  }
 0x817   :  { %v9147_v20 = vpop.eup %9146  ;;  %9152 = vrcp.f32 %v5208_v0  ;;  %v8847_v0 = vld [vmem:[%s17042_s3 + $0x14] ss:$8 sps:$4 sm:$0xff]   ;;  %5726 = vmatprep.subr.bf16.mxu1 %v8844_v37 }
 0x818   :  { %v9149_v7 = vpop.eup %9148  ;;  %v5211_v10 = vadd.f32 1.0, %v9147_v20  ;;  %v8841_v20 = vld [vmem:[%s17040_s29 + $0x38] sm:$0xff]  }
 0x819   :  { %v5210_v8 = vadd.f32 1.0, %v9149_v7  ;;  %v8845_v7 = vld [vmem:[%s17042_s3 + $0x10] ss:$8 sps:$4 sm:$0xff]  }
 0x81a   :  { %9154 = vrcp.f32 %v5211_v10  ;;  %v8850_v10 = vld [vmem:[%s17042_s3 + $0x24] ss:$8 sps:$4 sm:$0xff]  }
 0x81b   :  { %9156 = vrcp.f32 %v5210_v8  ;;  %v8848_v8 = vld [vmem:[%s17042_s3 + $0x20] ss:$8 sps:$4 sm:$0xff]  }
 0x820   :  { %v9151_v12 = vpop.eup %9150 }
 0x821   :  { %v9153_v57 = vpop.eup %9152  ;;  %v14351_v61 = vmul.f32 %v9151_v12, %v5193_v24  ;;  %v8853_v12 = vld [vmem:[%s17042_s3 + $0x34] ss:$8 sps:$4 sm:$0xff]  }
 0x822   :  { %v14353_v11 = vmul.f32 %v9153_v57, %v5192_v29  ;;  %v8851_v57 = vld [vmem:[%s17042_s3 + $0x30] ss:$8 sps:$4 sm:$0xff]  }
 0x824   :  { %v9155_v53 = vpop.eup %9154  ;;  %v5258_v43 = vadd.f32 %v14351_v61, %v14353_v11 }
 0x825   :  { %v9157_v31 = vpop.eup %9156  ;;  %v14357_v28 = vmul.f32 %v9155_v53, %v5195_v22  ;;  %v8836_v22 = vld [vmem:[%s17040_s29 + $0x10] sm:$0xff]   ;;  %v8856_v53 = vld [vmem:[%s17042_s3 + $0x44] ss:$8 sps:$4 sm:$0xff]  }
 0x826   :  { %v5259_v63 = vrot.slane %v5258_v43, 4  ;;  %v14359_v1 = vmul.f32 %v9157_v31, %v5194_v17  ;;  %v8837_v17 = vld [vmem:[%s17040_s29 + $0x18] sm:$0xff]  }
 0x827   :  { %v8859_v31 = vld [vmem:[%s17042_s3 + $0x54] ss:$8 sps:$4 sm:$0xff]  }
 0x828   :  { %v5260_v4 = vadd.f32 %v5259_v63, %v5258_v43  ;;  %v5267_v15 = vadd.f32 %v14357_v28, %v14359_v1  ;;  %v8854_v43 = vld [vmem:[%s17042_s3 + $0x40] ss:$8 sps:$4 sm:$0xff]   ;;  %v8857_v63 = vld [vmem:[%s17042_s3 + $0x50] ss:$8 sps:$4 sm:$0xff]  }
 0x82a   :  { %v5261_v23 = vrot.slane %v5260_v4, 2  ;;  %v5268_v36 = vrot.slane %v5267_v15, 4 }
 0x82c   :  { %v5262_v9 = vadd.f32 %v5261_v23, %v5260_v4  ;;  %v5269_v27 = vadd.f32 %v5268_v36, %v5267_v15  ;;  %v7973_v4 = vld [vmem:[%s17043_s8] ss:$0 sm:$0xff] }
 0x82e   :  { %v5263_v59 = vrot.slane %v5262_v9, 1  ;;  %v5270_v18 = vrot.slane %v5269_v27, 2 }
 0x830   :  { %v5271_v45 = vadd.f32 %v5270_v18, %v5269_v27  ;;  %v5264_v51 = vadd.f32 %v5263_v59, %v5262_v9 }
 0x832   :  { %v5272_v32 = vrot.slane %v5271_v45, 1  ;;  %v5266_v46 = vmul.f32 0.0625, %v5264_v51 }
 0x834   :  { %v5273_v56 = vadd.f32 %v5272_v32, %v5271_v45 }
 0x836   :  { %v5274_v26 = vmul.f32 0.0625, %v5273_v56 }
 0x838   :  { %v5275_v50 = vsel %vm933_vm3, %v5266_v46, %v5274_v26 }
 0x839   :  { %v5276_v19 = vpack.c.bf16 %v5275_v50, %v5275_v50 }
 0x83b   :  { %8456 = vmatmul.mubr.bf16.vlgmr.msra.gmra.mrb[36].mxu0 %v5276_v19 }
 0x83c   :  { %8480 = vmatpush3.bf16.msra.mxu0 %v8834_v21 }
 0x83d   :  { %8481 = vmatprep.subr.bf16.mxu0 %v8835_v49 }
 0x840   :  { %8482 = vmatpush3.bf16.msra.mxu0 %v8835_v49 }
 0x841   :  { %8483 = vmatprep.subr.bf16.mxu0 %v8836_v22 }
 0x844   :  { %8484 = vmatpush3.bf16.msra.mxu0 %v8836_v22 }
 0x845   :  { %8485 = vmatprep.subr.bf16.mxu0 %v8837_v17 }
 0x848   :  { %8486 = vmatpush3.bf16.msra.mxu0 %v8837_v17 }
 0x849   :  { %8487 = vmatprep.subr.bf16.mxu0 %v8838_v30 }
 0x84c   :  { %8488 = vmatpush3.bf16.msra.mxu0 %v8838_v30 }
 0x84d   :  { %8489 = vmatprep.subr.bf16.mxu0 %v8839_v55 }
 0x850   :  { %8490 = vmatpush3.bf16.msra.mxu0 %v8839_v55 }
 0x851   :  { %8491 = vmatprep.subr.bf16.mxu0 %v8840_v40 }
 0x854   :  { %8492 = vmatpush3.bf16.msra.mxu0 %v8840_v40 }
 0x855   :  { %8493 = vmatprep.subr.bf16.mxu0 %v8841_v20 }
 0x858   :  { %8494 = vmatpush3.bf16.msra.mxu0 %v8841_v20 }
 0x90e   :  { %v5365_v52 = vpop.f32.mrb[36].mxu0 }
 0x90f   :  { %v5366_v42 = vadd.f32 %v7963_v25, %v5365_v52  ;;  %v8457_v48 = vpop.f32.mrb[37].mxu0  ;;  %v17047_v25 = vmov 5   ;;  %v17048_v52 = vmov 4  }
 0x910   :  { %v5368_v13 = vpop.f32.mrb[38].mxu0  ;;  %v17050_v48 = vmov 6  }
 0x911   :  { %v7972_v34 = vmul.f32 -1.442695, %v5366_v42  ;;  %v8458_v58 = vpop.f32.mrb[39].mxu0  ;;  %v17051_v13 = vmov 8  }
 0x913   :  { %9158 = vpow2.f32 %v7972_v34  ;;  %v5507_v34 = vld [vmem:[%s17052_s19] sm:$0x3] }
 0x914   :  { %v5610_v58 = vrot.slane %v5507_v34, %v17036_v5 }
 0x91d   :  { %v9159_v24 = vpop.eup %9158 }
 0x91e   :  { %v5374_v29 = vadd.f32 1.0, %v9159_v24 }
 0x920   :  { %9160 = vrcp.f32 %v5374_v29 }
 0x92a   :  { %v9161_v35 = vpop.eup %9160 }
 0x92b   :  { %v5377_v38 = vmul.f32 %v9161_v35, %v5366_v42  ;;  %v17049_v42 = vmov 7   ;;  %v5618_v35 = vrot.slane %v5507_v34, %v17037_v33 }
 0x92d   :  { %v5378_v41 = vpack.c.bf16 %v5377_v38, %v5377_v38 }
 0x92f   :  { %8476 = vmatmul.mubr.bf16.vlgmr.msra.gmra.mrb[24].mxu1 %v5378_v41 }
 0x930   :  { %5758 = vmatprep.mubr.bf16.mxu1 %v17041_v62  ;;  %5727 = vmatpush1.bf16.msra.mxu1 %v8842_v16 }
 0x931   :  { %5728 = vmatprep.subr.bf16.mxu1 %v8847_v0 }
 0x934   :  { %5729 = vmatpush1.bf16.msra.mxu1 %v8845_v7 }
 0x935   :  { %5730 = vmatprep.subr.bf16.mxu1 %v8850_v10 }
 0x938   :  { %5731 = vmatpush1.bf16.msra.mxu1 %v8848_v8 }
 0x939   :  { %5732 = vmatprep.subr.bf16.mxu1 %v8853_v12 }
 0x93c   :  { %5733 = vmatpush1.bf16.msra.mxu1 %v8851_v57 }
 0x93d   :  { %5734 = vmatprep.subr.bf16.mxu1 %v8856_v53 }
 0x940   :  { %5735 = vmatpush1.bf16.msra.mxu1 %v8854_v43 }
 0x941   :  { %5736 = vmatprep.subr.bf16.mxu1 %v8859_v31 }
 0x944   :  { %5737 = vmatpush1.bf16.msra.mxu1 %v8857_v63 }
 0x945   :  { %5738 = vmatprep.subr.bf16.mxu1 %v8862_v39 }
 0x948   :  { %5739 = vmatpush1.bf16.msra.mxu1 %v8860_v3  ;;  %v14503_v3 = vld [vmem:[%s17059_s30 + $0x8] sm:$0xff] }
 0xa02   :  { %v5467_v15 = vpop.f32.mrb[24].mxu1 }
 0xa03   :  { %v5468_v23 = vadd.f32 %v7973_v4, %v5467_v15  ;;  %v8477_v36 = vpop.f32.mrb[25].mxu1 }
 0xa04   :  { %v5470_v9 = vpop.f32.mrb[26].mxu1 }
 0xa05   :  { %v7982_v27 = vmul.f32 -1.442695, %v5468_v23  ;;  %v8478_v59 = vpop.f32.mrb[27].mxu1 }
 0xa07   :  { %9162 = vpow2.f32 %v7982_v27 }
 0xa11   :  { %v9163_v18 = vpop.eup %9162 }
 0xa12   :  { %v5476_v45 = vadd.f32 1.0, %v9163_v18 }
 0xa14   :  { %9164 = vrcp.f32 %v5476_v45 }
 0xa1e   :  { %v9165_v51 = vpop.eup %9164 }
 0xa1f   :  { %v5482_v32 = vrot.slane %v9165_v51, %v17036_v5  ;;  %v5488_v56 = vrot.slane %v9165_v51, %v17037_v33 }
 0xa21   :  { %v5483_v46 = vmul.f32 %v5482_v32, %v14353_v11  ;;  %v5484_v26 = vmul.f32 %v5482_v32, %v14351_v61  ;;  %v5489_v50 = vmul.f32 %v5488_v56, %v14359_v1  ;;  %v5490_v19 = vmul.f32 %v5488_v56, %v14357_v28  ;;  %v8865_v11 = vld [vmem:[%s17042_s3 + $0x74] ss:$8 sps:$4 sm:$0xff]   ;;  %v5623_v61 = vld [vmem:[%s17044_s14] sm:$0xff]  ;;  %v5624_v1 = vld [vmem:[%s17044_s14 + $0x8] sm:$0xff] }
 0xa22   :  { %5740 = vmatprep.subr.bf16.mxu1 %v8865_v11  ;;  %5960 = vperm.xlu1 %8758, %v5623_v61   ;;  %v5626_v28 = vld [vmem:[%s17044_s14 + $0x18] sm:$0xff] }
 0xa23   :  { %v5508_v54 = vpack.c.bf16 %v5484_v26, %v5483_v46  ;;  %v5509_v2 = vpack.c.bf16 %v5490_v19, %v5489_v50  ;;  %5741 = vmatpush1.bf16.msra.mxu1 %v8863_v14  ;;  %5963 = vperm.xlu0 %8759, %v5624_v1  }
 0xa25   :  { %8495 = vmatprep.mubr.bf16.mxu0 %v5508_v54 }
 0xa26   :  { %8496 = vmatmul.mubr.bf16.vlgmr.msra.gmra.mrb[40].mxu0 %v5509_v2  ;;  %5966 = vperm.xlu1 %8758, %v5625_v47   ;;  %v14500_v2 = vld [vmem:[%s17059_s30] sm:$0xff] }
 0xa27   :  { %8760 = vset.pattern.permute.xlu0 %v17045_v6 }
 0xa28   :  { %6060 = vperm.xlu0 %8760, %v5623_v61  }
 0xa2a   :  { %5969 = vperm.xlu1 %8758, %v5626_v28  }
 0xa2c   :  { %6069 = vperm.xlu0 %8760, %v5626_v28  }
 0xa2e   :  { %8761 = vset.pattern.permute.xlu1 %v17045_v6 }
 0xa2f   :  { %6063 = vperm.xlu1 %8761, %v5624_v1  }
 0xa30   :  { %8763 = vset.pattern.permute.xlu0 %v17041_v62 }
 0xa31   :  { %5899 = vperm.xlu0 %8763, %v5624_v1  }
 0xa33   :  { %6066 = vperm.xlu1 %8761, %v5625_v47  }
 0xa35   :  { %8764 = vset.pattern.permute.xlu0 %v17046_v60 }
 0xa36   :  { %6159 = vperm.xlu0 %8764, %v5623_v61  }
 0xa37   :  { %8762 = vset.pattern.permute.xlu1 %v17041_v62 }
 0xa38   :  { %5895 = vperm.xlu1 %8762, %v5623_v61  }
 0xa3a   :  { %6168 = vperm.xlu0 %8764, %v5626_v28  }
 0xa3c   :  { %5903 = vperm.xlu1 %8762, %v5625_v47  }
 0xa3e   :  { %8767 = vset.pattern.permute.xlu0 %v17047_v25 }
 0xa3f   :  { %6343 = vperm.xlu0 %8767, %v5624_v1  }
 0xa40   :  { %5907 = vperm.xlu1 %8762, %v5626_v28  }
 0xa43   :  { %8768 = vset.pattern.permute.xlu0 %v17048_v52 }
 0xa44   :  { %8765 = vset.pattern.permute.xlu1 %v17046_v60  ;;  %6258 = vperm.xlu0 %8768, %v5623_v61   ;;  %v17064_v60 = vld [vmem:[#allocation65_spill] sm:$0xff] }
 0xa45   :  { %6162 = vperm.xlu1 %8765, %v5624_v1  }
 0xa48   :  { %6270 = vperm.xlu0 %8768, %v5626_v28  }
 0xa49   :  { %6165 = vperm.xlu1 %8765, %v5625_v47  }
 0xa4c   :  { %8771 = vset.pattern.permute.xlu0 %v17049_v42 }
 0xa4d   :  { %8766 = vset.pattern.permute.xlu1 %v17047_v25  ;;  %6504 = vperm.xlu0 %8771, %v5624_v1   ;;  %v14520_v25 = vrot.slane %v14500_v2, %v17064_v60 }
 0xa4e   :  { %6340 = vperm.xlu1 %8766, %v5623_v61  }
 0xa51   :  { %8772 = vset.pattern.permute.xlu0 %v17050_v48 }
 0xa52   :  { %6346 = vperm.xlu1 %8766, %v5625_v47   ;;  %6440 = vperm.xlu0 %8772, %v5623_v61  }
 0xa56   :  { %6349 = vperm.xlu1 %8766, %v5626_v28   ;;  %6449 = vperm.xlu0 %8772, %v5626_v28  }
 0xa5a   :  { %8769 = vset.pattern.permute.xlu1 %v17048_v52  ;;  %8775 = vset.pattern.permute.xlu0 %v17051_v13  ;;  %v14524_v52 = vrot.slane %v14503_v3, %v17064_v60 }
 0xa5b   :  { %6262 = vperm.xlu1 %8769, %v5624_v1   ;;  %6603 = vperm.xlu0 %8775, %v5624_v1  }
 0xa5f   :  { %6266 = vperm.xlu1 %8769, %v5625_v47  }
 0xa63   :  { %8770 = vset.pattern.permute.xlu1 %v17049_v42  ;;  %v14528_v42 = vrot.slane %v14500_v2, %v17036_v5 }
 0xa64   :  { %6501 = vperm.xlu1 %8770, %v5623_v61  }
 0xa68   :  { %6507 = vperm.xlu1 %8770, %v5625_v47  }
 0xa6c   :  { %6510 = vperm.xlu1 %8770, %v5626_v28  }
 0xa70   :  { %8773 = vset.pattern.permute.xlu1 %v17050_v48  ;;  %v14532_v48 = vrot.slane %v14503_v3, %v17036_v5 }
 0xa71   :  { %6443 = vperm.xlu1 %8773, %v5624_v1   ;;  %v14511_v1 = vrot.slane %v14500_v2, %v17037_v33 }
 0xa75   :  { %6446 = vperm.xlu1 %8773, %v5625_v47  }
 0xa79   :  { %8774 = vset.pattern.permute.xlu1 %v17051_v13  ;;  %v17065_v13 = vld [vmem:[#allocation69_spill] sm:$0xff] }
 0xa7a   :  { %6600 = vperm.xlu1 %8774, %v5623_v61   ;;  %v14536_v34 = vrot.slane %v14500_v2, %v17065_v13 }
 0xa7e   :  { %6606 = vperm.xlu1 %8774, %v5625_v47   ;;  %v14515_v47 = vrot.slane %v14503_v3, %v17037_v33 }
 0xa82   :  { %6609 = vperm.xlu1 %8774, %v5626_v28   ;;  %v5643_v28 = vld [vmem:[%s17062_s12] sm:$0xf] }
 0xaa1   :  { %v14448_v20 = vpop.permute.xlu1 %5960 }
 0xaa2   :  { %v5964_v9 = vpop.permute.xlu0 %5963  ;;  %v5972_v54 = vrot.slane %v14448_v20, 4 }
 0xaa4   :  { %v5984_v61 = vmul.f32 0.0, %v5972_v54 }
 0xaa5   :  { %v14451_v7 = vpop.permute.xlu1 %5966 }
 0xaa6   :  { %v15855_v10 = vrot.slane %v14451_v7, 4 }
 0xaa7   :  { %v6061_v59 = vpop.permute.xlu0 %6060 }
 0xaa8   :  { %v6071_v14 = vrot.slane %v6061_v59, 3 }
 0xaa9   :  { %v5970_v8 = vpop.permute.xlu1 %5969 }
 0xaaa   :  { %v14454_v12 = vrot.slane %v5970_v8, 4  ;;  %v6083_v6 = vmul.f32 0.0, %v6071_v14  ;;  %v5809_v8 = vrot.slane %v5643_v28, %v17037_v33 }
 0xaab   :  { %v6070_v45 = vpop.permute.xlu0 %6069 }
 0xaac   :  { %17057 = vst [vmem:[#allocation106_spill] sm:$0xff] %v14454_v12  ;;  %v14460_v57 = vsel %vm5971_vm6, %v15855_v10, %v14454_v12  ;;  %v5813_v10 = vrot.slane %v5643_v28, %v17065_v13 }
 0xaad   :  { %17058 = vst [vmem:[#allocation75_spill] sm:$0xff] %v14460_v57 }
 0xaae   :  { %v14462_v53 = vpop.permute.xlu1 %6063 }
 0xaaf   :  { %v6072_v59 = vrot.slane %v14462_v53, 3 }
 0xab0   :  { %v14486_v32 = vpop.permute.xlu0 %5899 }
 0xab1   :  { %v14603_v53 = vsel %vm261_vm0, %v6071_v14, %v6072_v59 }
 0xab2   :  { %v14464_v43 = vpop.permute.xlu1 %6066 }
 0xab5   :  { %v14488_v56 = vpop.permute.xlu0 %6159 }
 0xab7   :  { %v14466_v31 = vpop.permute.xlu1 %5895 }
 0xab8   :  { %v5910_v20 = vrot.slane %v14466_v31, 5 }
 0xab9   :  { %v14492_v26 = vpop.permute.xlu0 %6168 }
 0xabe   :  { %v14496_v19 = vpop.permute.xlu0 %6343 }
 0xac3   :  { %v14507_v11 = vpop.permute.xlu0 %6258 }
 0xac4   :  { %17063 = vst [vmem:[#allocation117_spill] sm:$0xff] %v14507_v11 }
 0xaf9   :  { %v8497_v24 = vpop.f32.mrb[40].mxu0 }
 0xafa   :  { %v5592_v29 = vpop.f32.mrb[41].mxu0  ;;  %v5613_v40 = vmul.f32 %v8497_v24, %v5610_v58  ;;  %v14540_v24 = vrot.slane %v14503_v3, %v17065_v13 }
 0xafb   :  { %v5611_v38 = vmul.f32 %v5610_v58, %v5592_v29  ;;  %v8498_v41 = vpop.f32.mrb[42].mxu0  ;;  %v17066_v29 = vld [vmem:[#allocation70_spill] sm:$0xff] }
 0xafc   :  { %v5595_v21 = vpop.f32.mrb[43].mxu0  ;;  %v5614_v30 = vmul.f32 %v8498_v41, %v5610_v58  ;;  %v14444_v37 = vadd.f32 %v5618_v35, %v5613_v40  ;;  %v14561_v40 = vmul.f32 %v14520_v25, %v6083_v6 }
 0xafd   :  { %v5612_v49 = vmul.f32 %v5610_v58, %v5595_v21  ;;  %v14435_v22 = vadd.f32 %v5618_v35, %v5611_v38  ;;  %v5973_v58 = vrot.slane %v5964_v9, 4  ;;  %v5783_v38 = vrot.slane %v5643_v28, %v17036_v5  ;;  %v14568_v9 = vpop.permute.xlu0 %6270 }
 0xafe   :  { %v14442_v16 = vadd.f32 %v5618_v35, %v5614_v30  ;;  %17056 = vst [vmem:[#allocation47_spill] sm:$0xff] %v14444_v37  ;;  %v14550_v21 = vmul.f32 %v14511_v1, %v5984_v61  ;;  %v14557_v30 = vrot.slane %v14503_v3, %v17066_v29  ;;  %17068 = vst [vmem:[#allocation125_spill] sm:$0xff] %v14561_v40 }
 0xaff   :  { %17053 = vst [vmem:[#allocation81_spill] sm:$0xff] %v14435_v22  ;;  %v14437_v17 = vadd.f32 %v5618_v35, %v5612_v49  ;;  %v14544_v35 = vrot.slane %v14500_v2, %v17066_v29  ;;  %v14553_v49 = vmul.f32 %v14515_v47, %v5984_v61  ;;  %17070 = vst [vmem:[#allocation73_spill] sm:$0xff] %v14568_v9  ;;  %v6074_v61 = vrot.slane %v14464_v43, 3 }
 0xb00   :  { %17055 = vst [vmem:[#allocation107_spill] sm:$0xff] %v14442_v16  ;;  %v5645_v0 = vpack.c.bf16 %v14442_v16, %v14444_v37  ;;  %17067 = vst [vmem:[#allocation92_spill] sm:$0xff] %v14557_v30  ;;  %v6170_v29 = vrot.slane %v14488_v56, 1  ;;  %v14575_v16 = vsel %vm5971_vm6, %v5972_v54, %v5973_v58  ;;  %v14577_v37 = vrot.slane %v6070_v45, 3 }
 0xb01   :  { %17054 = vst [vmem:[#allocation43_spill] sm:$0xff] %v14437_v17  ;;  %v5644_v55 = vpack.c.bf16 %v14437_v17, %v14435_v22  ;;  %v14581_v31 = vrot.slane %v5783_v38, %v17036_v5  ;;  %v17072_v56 = vrot.slane %v14451_v7, 4  ;;  %v14600_v17 = vsel %vm261_vm0, %v6072_v59, %v6074_v61  ;;  %v14618_v14 = vpop.permute.xlu0 %6504 }
 0xb02   :  { %17071 = vst [vmem:[#allocation27_spill] sm:$0xff] %v14577_v37  ;;  %v6182_v22 = vmul.f32 0.0, %v6170_v29 }
 0xb03   :  { %5759 = vmatmul.mubr.bf16.vlgmr.msra.gmra.mrb[28].mxu1 %v5644_v55  ;;  %v5787_v55 = vrot.slane %v5643_v28, %v17064_v60  ;;  %v14591_v54 = vsel %vm5971_vm6, %v5973_v58, %v17072_v56  ;;  %v5922_v28 = vmul.f32 0.0, %v5910_v20  ;;  %v14607_v58 = vrot.slane %v5813_v10, %v17037_v33 }
 0xb04   :  { %5768 = vmatprep.mubr.bf16.mxu1 %v17041_v62  ;;  %v14611_v56 = vsel %vm261_vm0, %v6074_v61, %v14577_v37  ;;  %v14621_v59 = vmul.f32 %v14536_v34, %v6182_v22  ;;  %v14624_v10 = vmul.f32 %v14540_v24, %v6182_v22 }
 0xb05   :  { %v14586_v43 = vrot.slane %v5787_v55, %v17036_v5  ;;  %17073 = vst [vmem:[#allocation60_spill] sm:$0xff] %v14611_v56  ;;  %v14627_v55 = vrot.slane %v14492_v26, 1  ;;  %v14647_v57 = vmul.f32 %v14532_v48, %v5922_v28 }
 0xb06   :  { %17074 = vst [vmem:[#allocation45_spill] sm:$0xff] %v14624_v10 }
 0xb07   :  { %17075 = vst [vmem:[#allocation84_spill] sm:$0xff] %v14627_v55 }
 0xb0b   :  { %5769 = vmatmul.mubr.bf16.gmra.mrb[32].mxu1 %v5645_v0  ;;  %v14564_v0 = vmul.f32 %v14524_v52, %v6083_v6  ;;  %v5911_v6 = vrot.slane %v14486_v32, 5  ;;  %v14595_v32 = vrot.slane %v5809_v8, %v17037_v33 }
 0xb0c   :  { %7220 = vmatprep.mubr.bf16.mxu1 %v17041_v62  ;;  %v14468_v62 = vpop.permute.xlu1 %5903 }
 0xb0d   :  { %17069 = vst [vmem:[#allocation53_spill] sm:$0xff] %v14564_v0  ;;  %v14614_v8 = vsel %vm5909_vm7, %v5910_v20, %v5911_v6  ;;  %v6441_v0 = vpop.permute.xlu0 %6440 }
 0xb10   :  { %v14470_v63 = vpop.permute.xlu1 %5907 }
 0xb11   :  { %v14639_v22 = vrot.slane %v14470_v63, 5 }
 0xb13   :  { %17076 = vst [vmem:[#allocation50_spill] sm:$0xff] %v14639_v22 }
 0xb14   :  { %v14472_v4 = vpop.permute.xlu1 %6162 }
 0xb15   :  { %v6171_v26 = vrot.slane %v14472_v4, 1 }
 0xb18   :  { %v14474_v15 = vpop.permute.xlu1 %6165 }
 0xb19   :  { %v6173_v63 = vrot.slane %v14474_v15, 1  ;;  %v14671_v15 = vsel %vm600_vm4, %v6170_v29, %v6171_v26 }
 0xb1b   :  { %v14680_v10 = vsel %vm600_vm4, %v6171_v26, %v6173_v63 }
 0xb1c   :  { %v14476_v23 = vpop.permute.xlu1 %6340 }
 0xb20   :  { %v14478_v36 = vpop.permute.xlu1 %6346 }
 0xb24   :  { %v14480_v27 = vpop.permute.xlu1 %6349 }
 0xb25   :  { %v6356_v45 = vrot.slane %v14480_v27, 7  ;;  %v5913_v27 = vrot.slane %v14468_v62, 5 }
 0xb27   :  { %v6371_v62 = vmul.f32 0.0, %v6356_v45  ;;  %v14668_v40 = vsel %vm5909_vm7, %v5913_v27, %v14639_v22 }
 0xb28   :  { %v14482_v18 = vpop.permute.xlu1 %6262  ;;  %17078 = vst [vmem:[#allocation41_spill] sm:$0xff] %v14668_v40 }
 0xb29   :  { %17060 = vst [vmem:[#allocation37_spill] sm:$0xff] %v14482_v18 }
 0xb2c   :  { %v14484_v51 = vpop.permute.xlu1 %6266 }
 0xb2d   :  { %17061 = vst [vmem:[#allocation71_spill] sm:$0xff] %v14484_v51  ;;  %v14631_v51 = vmul.f32 %v14528_v42, %v5922_v28  ;;  %v14662_v28 = vsel %vm5909_vm7, %v5911_v6, %v5913_v27  ;;  %v6354_v6 = vrot.slane %v14478_v36, 7  ;;  %v14683_v27 = vmul.f32 %v14557_v30, %v6371_v62 }
 0xb2e   :  { %17077 = vst [vmem:[#allocation85_spill] sm:$0xff] %v14662_v28  ;;  %v14676_v28 = vmul.f32 %v14544_v35, %v6371_v62  ;;  %v14688_v36 = vsel %vm600_vm4, %v6173_v63, %v14627_v55  ;;  %v14698_v62 = vrot.slane %v14476_v23, 7  ;;  %v6450_v55 = vpop.permute.xlu0 %6449 }
 0xb2f   :  { %17080 = vst [vmem:[#allocation94_spill] sm:$0xff] %v14683_v27  ;;  %17081 = vst [vmem:[#allocation83_spill] sm:$0xff] %v14688_v36  ;;  %v17084_v36 = vld [vmem:[#allocation51_spill] sm:$0xff] }
 0xb30   :  { %v14490_v46 = vpop.permute.xlu1 %6501  ;;  %17079 = vst [vmem:[#allocation36_spill] sm:$0xff] %v14676_v28  ;;  %17082 = vst [vmem:[#allocation88_spill] sm:$0xff] %v14698_v62 }
 0xb34   :  { %v14494_v50 = vpop.permute.xlu1 %6507 }
 0xb35   :  { %v6515_v27 = vrot.slane %v14494_v50, 4  ;;  %v14756_v50 = vrot.slane %v6441_v0, 5 }
 0xb38   :  { %v14505_v39 = vpop.permute.xlu1 %6510 }
 0xb39   :  { %v6517_v26 = vrot.slane %v14505_v39, 4 }
 0xb3c   :  { %v14547_v41 = vpop.permute.xlu1 %6443 }
 0xb40   :  { %v14597_v38 = vpop.permute.xlu1 %6446 }
 0xbd6   :  { %v5760_v7 = vpop.f32.mrb[28].mxu1 }
 0xbd7   :  { %v5798_v44 = vmul.f32 %v14581_v31, %v5760_v7  ;;  %v5762_v9 = vpop.f32.mrb[29].mxu1 }
 0xbd8   :  { %v5799_v61 = vmul.f32 %v14586_v43, %v5762_v9  ;;  %v5764_v20 = vpop.f32.mrb[30].mxu1 }
 0xbd9   :  { %v14635_v7 = vadd.f32 %v14595_v32, %v5798_v44  ;;  %v5800_v37 = vmul.f32 %v14581_v31, %v5764_v20  ;;  %v5766_v56 = vpop.f32.mrb[31].mxu1  ;;  %v14653_v20 = vpop.permute.xlu1 %6600 }
 0xbda   :  { %v14643_v12 = vadd.f32 %v14607_v58, %v5799_v61  ;;  %v5801_v9 = vmul.f32 %v14586_v43, %v5766_v56  ;;  %v14765_v0 = vrot.slane %v14653_v20, 3  ;;  %v17094_v20 = vld [vmem:[#allocation112_spill] sm:$0xff] }
 0xbdb   :  { %v8007_v44 = vmul.f32 -1.442695, %v14635_v7  ;;  %v14651_v18 = vadd.f32 %v14595_v32, %v5800_v37 }
 0xbdc   :  { %v8008_v61 = vmul.f32 -1.442695, %v14643_v12  ;;  %v14659_v11 = vadd.f32 %v14607_v58, %v5801_v9  ;;  %17092 = vst [vmem:[#allocation33_spill] sm:$0xff] %v14765_v0 }
 0xbdd   :  { %9166 = vpow2.f32 %v8007_v44  ;;  %v8009_v37 = vmul.f32 -1.442695, %v14651_v18  ;;  %v14695_v40 = vpop.permute.xlu1 %6606 }
 0xbde   :  { %9168 = vpow2.f32 %v8008_v61  ;;  %v8010_v9 = vmul.f32 -1.442695, %v14659_v11  ;;  %v5770_v4 = vpop.f32.mrb[32].mxu1 }
 0xbdf   :  { %9170 = vpow2.f32 %v8009_v37  ;;  %v5802_v44 = vmul.f32 %v14581_v31, %v5770_v4  ;;  %v5772_v56 = vpop.f32.mrb[33].mxu1 }
 0xbe0   :  { %9172 = vpow2.f32 %v8010_v9  ;;  %v5803_v29 = vmul.f32 %v14586_v43, %v5772_v56  ;;  %v5774_v61 = vpop.f32.mrb[34].mxu1  ;;  %v6352_v56 = vrot.slane %v14496_v19, 7 }
 0xbe1   :  { %v14691_v22 = vadd.f32 %v14595_v32, %v5802_v44  ;;  %v5804_v4 = vmul.f32 %v14581_v31, %v5774_v61  ;;  %v5776_v37 = vpop.f32.mrb[35].mxu1  ;;  %v14706_v44 = vsel %vm933_vm3, %v6354_v6, %v6356_v45  ;;  %v14724_v45 = vrot.slane %v14503_v3, %v17084_v36  ;;  %v14743_v28 = vpop.permute.xlu1 %6609 }
 0xbe2   :  { %v14702_v9 = vadd.f32 %v14607_v58, %v5803_v29  ;;  %v5805_v63 = vmul.f32 %v14586_v43, %v5776_v37  ;;  %17083 = vst [vmem:[#allocation58_spill] sm:$0xff] %v14706_v44  ;;  %v14717_v29 = vrot.slane %v14500_v2, %v17084_v36  ;;  %v14729_v37 = vsel %vm933_vm3, %v14698_v62, %v6352_v56  ;;  %v17087_v36 = vld [vmem:[#allocation74_spill] sm:$0xff] }
 0xbe3   :  { %v8011_v61 = vmul.f32 -1.442695, %v14691_v22  ;;  %v14711_v39 = vadd.f32 %v14595_v32, %v5804_v4  ;;  %v6532_v4 = vmul.f32 0.0, %v6517_v26  ;;  %v14732_v23 = vsel %vm933_vm3, %v6352_v56, %v6354_v6 }
 0xbe4   :  { %v8012_v19 = vmul.f32 -1.442695, %v14702_v9  ;;  %v14720_v43 = vadd.f32 %v14607_v58, %v5805_v63  ;;  %17086 = vst [vmem:[#allocation103_spill] sm:$0xff] %v14732_v23  ;;  %v14736_v63 = vrot.slane %v14490_v46, 4  ;;  %v14747_v6 = vrot.slane %v14503_v3, %v17087_v36 }
 0xbe5   :  { %9174 = vpow2.f32 %v8011_v61  ;;  %v8013_v32 = vmul.f32 -1.442695, %v14711_v39  ;;  %v14740_v61 = vrot.slane %v14500_v2, %v17087_v36  ;;  %v6513_v56 = vrot.slane %v14618_v14, 4 }
 0xbe6   :  { %17085 = vst [vmem:[#allocation108_spill] sm:$0xff] %v14720_v43  ;;  %9176 = vpow2.f32 %v8012_v19  ;;  %v8014_v31 = vmul.f32 -1.442695, %v14720_v43  ;;  %17089 = vst [vmem:[#allocation56_spill] sm:$0xff] %v14747_v6  ;;  %v14754_v23 = vmul.f32 %v14724_v45, %v6532_v4  ;;  %v6604_v43 = vpop.permute.xlu0 %6603  ;;  %v6452_v36 = vrot.slane %v14547_v41, 5 }
 0xbe7   :  { %v9167_v58 = vpop.eup %9166  ;;  %9178 = vpow2.f32 %v8013_v32  ;;  %17088 = vst [vmem:[#allocation129_spill] sm:$0xff] %v14740_v61  ;;  %v14751_v32 = vmul.f32 %v14717_v29, %v6532_v4  ;;  %v6456_v6 = vrot.slane %v6450_v55, 5  ;;  %v14762_v4 = vsel %vm5971_vm6, %v6515_v27, %v6517_v26 }
 0xbe8   :  { %v9169_v44 = vpop.eup %9168  ;;  %v5856_v30 = vadd.f32 1.0, %v9167_v58  ;;  %9180 = vpow2.f32 %v8014_v31  ;;  %17090 = vst [vmem:[#allocation82_spill] sm:$0xff] %v14754_v23  ;;  %v6616_v31 = vrot.slane %v14743_v28, 3  ;;  %v6612_v61 = vrot.slane %v6604_v43, 3 }
 0xbe9   :  { %v9171_v46 = vpop.eup %9170  ;;  %v5857_v19 = vadd.f32 1.0, %v9169_v44  ;;  %v6454_v44 = vrot.slane %v14597_v38, 5  ;;  %v14770_v41 = vsel %vm5971_vm6, %v14736_v63, %v6513_v56  ;;  %v14773_v28 = vsel %vm5971_vm6, %v6513_v56, %v6515_v27  ;;  %v5892_v38 = vld [vmem:[%s17091_s27] sm:$0xf] }
 0xbea   :  { %v9173_v62 = vpop.eup %9172  ;;  %9182 = vrcp.f32 %v5856_v30  ;;  %v5858_v58 = vadd.f32 1.0, %v9171_v46  ;;  %v14779_v26 = vsel %vm5909_vm7, %v14756_v50, %v6452_v36  ;;  %v6631_v43 = vmul.f32 0.0, %v6616_v31 }
 0xbeb   :  { %9184 = vrcp.f32 %v5857_v19  ;;  %v5859_v14 = vadd.f32 1.0, %v9173_v62  ;;  %17093 = vst [vmem:[#allocation135_spill] sm:$0xff] %v14779_v26  ;;  %v14783_v62 = vrot.slane %v14500_v2, %v17094_v20  ;;  %v14787_v19 = vrot.slane %v14503_v3, %v17094_v20  ;;  %v14802_v20 = vld [vmem:[%s17059_s30 + $0x10] ss:$0 sm:$0xff] }
 0xbec   :  { %9186 = vrcp.f32 %v5858_v58  ;;  %v14790_v27 = vsel %vm5909_vm7, %v6452_v36, %v6454_v44  ;;  %v14793_v56 = vsel %vm5909_vm7, %v6454_v44, %v6456_v6  ;;  %v6471_v58 = vmul.f32 0.0, %v6456_v6  ;;  %17098 = vst [vmem:[#allocation137_spill] sm:$0xff] %v14802_v20  ;;  %v14805_v36 = vld [vmem:[%s17059_s30 + $0x18] ss:$0 sm:$0xff] }
 0xbed   :  { %9188 = vrcp.f32 %v5859_v14  ;;  %17095 = vst [vmem:[#allocation136_spill] sm:$0xff] %v14790_v27  ;;  %17096 = vst [vmem:[#allocation105_spill] sm:$0xff] %v14793_v56  ;;  %v14797_v30 = vsel %vm261_vm0, %v14765_v0, %v6612_v61  ;;  %v6702_v2 = vrot.slane %v5892_v38, %v17036_v5  ;;  %v6614_v26 = vrot.slane %v14695_v40, 3 }
 0xbee   :  { %17097 = vst [vmem:[#allocation76_spill] sm:$0xff] %v14797_v30  ;;  %17099 = vst [vmem:[#allocation146_spill] sm:$0xff] %v14805_v36  ;;  %v6706_v44 = vrot.slane %v5892_v38, %v17064_v60  ;;  %v6730_v6 = vrot.slane %v5892_v38, %v17037_v33  ;;  %v14811_v40 = vmul.f32 %v14802_v20, %v6631_v43 }
 0xbef   :  { %v9175_v46 = vpop.eup %9174  ;;  %v14817_v60 = vmul.f32 %v14783_v62, %v6471_v58  ;;  %v14820_v27 = vmul.f32 %v14787_v19, %v6471_v58 }
 0xbf0   :  { %v9177_v14 = vpop.eup %9176  ;;  %v5860_v55 = vadd.f32 1.0, %v9175_v46  ;;  %v6734_v46 = vrot.slane %v5892_v38, %v17065_v13  ;;  %17101 = vst [vmem:[#allocation131_spill] sm:$0xff] %v14811_v40  ;;  %v14823_v38 = vrot.slane %v6702_v2, %v17036_v5  ;;  %v14838_v58 = vrot.slane %v6706_v44, %v17036_v5 }
 0xbf1   :  { %v9179_v23 = vpop.eup %9178  ;;  %v5861_v3 = vadd.f32 1.0, %v9177_v14  ;;  %v14814_v14 = vmul.f32 %v14805_v36, %v6631_v43  ;;  %17103 = vst [vmem:[#allocation151_spill] sm:$0xff] %v14817_v60  ;;  %17104 = vst [vmem:[#allocation61_spill] sm:$0xff] %v14820_v27  ;;  %v8866_v43 = vld [vmem:[%s17100_s22 + $0x40] sm:$0xff]   ;;  %v8881_v27 = vld [vmem:[%s17100_s22 + $0x38] sm:$0xff]  }
 0xbf2   :  { %v9181_v0 = vpop.eup %9180  ;;  %9190 = vrcp.f32 %v5860_v55  ;;  %v5862_v30 = vadd.f32 1.0, %v9179_v23  ;;  %17105 = vst [vmem:[#allocation134_spill] sm:$0xff] %v14823_v38  ;;  %v14826_v23 = vsel %vm261_vm0, %v6612_v61, %v6614_v26  ;;  %v14829_v55 = vsel %vm261_vm0, %v6614_v26, %v6616_v31  ;;  %17108 = vst [vmem:[#allocation101_spill] sm:$0xff] %v14838_v58  ;;  %8208 = vmatprep.subr.bf16.mxu0 %v8866_v43 }
 0xbf3   :  { %17102 = vst [vmem:[#allocation79_spill] sm:$0xff] %v14814_v14  ;;  %9192 = vrcp.f32 %v5861_v3  ;;  %v5863_v56 = vadd.f32 1.0, %v9181_v0  ;;  %17106 = vst [vmem:[#allocation142_spill] sm:$0xff] %v14826_v23  ;;  %v8867_v3 = vld [vmem:[%s17100_s22] sm:$0xff]   ;;  %v8868_v0 = vld [vmem:[%s17100_s22 + $0x48] sm:$0xff]   ;;  %v14844_v61 = vrot.slane %v6734_v46, %v17037_v33  ;;  %v17121_v23 = vrot.slane %v14621_v59, 4 }
 0xbf4   :  { %v9183_v13 = vpop.eup %9182  ;;  %9194 = vrcp.f32 %v5862_v30  ;;  %17107 = vst [vmem:[#allocation57_spill] sm:$0xff] %v14829_v55  ;;  %v14841_v30 = vrot.slane %v6730_v6, %v17037_v33  ;;  %8209 = vmatpush3.bf16.msra.mxu0 %v8867_v3 }
 0xbf5   :  { %v9185_v36 = vpop.eup %9184  ;;  %v14835_v20 = vmul.f32 %v9183_v13, %v14635_v7  ;;  %17110 = vst [vmem:[#allocation138_spill] sm:$0xff] %v14844_v61  ;;  %9196 = vrcp.f32 %v5863_v56  ;;  %v8869_v56 = vld [vmem:[%s17100_s22 + $0x8] sm:$0xff]   ;;  %8210 = vmatprep.subr.bf16.mxu0 %v8868_v0  ;;  %v8870_v7 = vld [vmem:[%s17100_s22 + $0x50] sm:$0xff]  }
 0xbf6   :  { %17109 = vst [vmem:[#allocation28_spill] sm:$0xff] %v14841_v30  ;;  %v9187_v2 = vpop.eup %9186  ;;  %v14847_v31 = vmul.f32 %v9185_v36, %v14643_v12 }
 0xbf7   :  { %v9189_v13 = vpop.eup %9188  ;;  %v14852_v44 = vmul.f32 %v9187_v2, %v14651_v18  ;;  %v6524_v6 = vmul.f32 %v14736_v63, %v14835_v20  ;;  %v5923_v46 = vmul.f32 %v14614_v8, %v14835_v20  ;;  %v5985_v12 = vmul.f32 %v14575_v16, %v14835_v20 }
 0xbf8   :  { %v14862_v36 = vmul.f32 %v9189_v13, %v14659_v11  ;;  %v6525_v43 = vmul.f32 %v14736_v63, %v14847_v31  ;;  %v5924_v18 = vmul.f32 %v14614_v8, %v14847_v31  ;;  %v5986_v2 = vmul.f32 %v14575_v16, %v14847_v31  ;;  %8211 = vmatpush3.bf16.msra.mxu0 %v8869_v56 }
 0xbf9   :  { %v6365_v26 = vmul.f32 %v14729_v37, %v14852_v44  ;;  %v14874_v3 = vmul.f32 %v14717_v29, %v6524_v6  ;;  %v5941_v11 = vmul.f32 %v14528_v42, %v5923_v46  ;;  %v5987_v63 = vmul.f32 %v14591_v54, %v14852_v44  ;;  %8212 = vmatprep.subr.bf16.mxu0 %v8870_v7 }
 0xbfa   :  { %v14880_v13 = vmul.f32 %v14724_v45, %v6525_v43  ;;  %v5942_v16 = vmul.f32 %v14532_v48, %v5924_v18  ;;  %v5988_v8 = vmul.f32 %v14591_v54, %v14862_v36  ;;  %v6003_v0 = vmul.f32 %v14511_v1, %v5985_v12  ;;  %v8871_v43 = vld [vmem:[%s17100_s22 + $0x10] sm:$0xff]   ;;  %v8872_v12 = vld [vmem:[%s17100_s22 + $0x58] sm:$0xff]  }
 0xbfb   :  { %v14887_v33 = vmul.f32 %v14544_v35, %v6365_v26  ;;  %v6004_v46 = vmul.f32 %v14515_v47, %v5986_v2  ;;  %v14892_v5 = vmul.f32 %v14511_v1, %v5987_v63  ;;  %v6084_v26 = vmul.f32 %v14603_v53, %v14835_v20 }
 0xbfc   :  { %v9191_v61 = vpop.eup %9190  ;;  %v14897_v30 = vmul.f32 %v14515_v47, %v5988_v8  ;;  %v6022_v54 = vrot.slane %v6003_v0, 1  ;;  %v17112_v0 = vrot.slane %v14550_v21, 1  ;;  %v6085_v2 = vmul.f32 %v14603_v53, %v14847_v31  ;;  %8213 = vmatpush3.bf16.msra.mxu0 %v8871_v43 }
 0xbfd   :  { %17111 = vst [vmem:[#allocation144_spill] sm:$0xff] %v14887_v33  ;;  %v9193_v6 = vpop.eup %9192  ;;  %v14904_v63 = vmul.f32 %v9191_v61, %v14691_v22  ;;  %v6025_v56 = vrot.slane %v6004_v46, 1  ;;  %v15913_v14 = vrot.slane %v14892_v5, 1  ;;  %v17113_v61 = vrot.slane %v14553_v49, 1  ;;  %8214 = vmatprep.subr.bf16.mxu0 %v8872_v12 }
 0xbfe   :  { %v9195_v18 = vpop.eup %9194  ;;  %v14908_v8 = vmul.f32 %v9193_v6, %v14702_v9  ;;  %v6023_v7 = vsel %vm600_vm4, %v17112_v0, %v6022_v54  ;;  %v15912_v40 = vrot.slane %v14897_v30, 1  ;;  %v8873_v6 = vld [vmem:[%s17100_s22 + $0x18] sm:$0xff]   ;;  %v6086_v49 = vmul.f32 %v14600_v17, %v14852_v44 }
 0xbff   :  { %v14917_v22 = vmul.f32 %v9195_v18, %v14711_v39  ;;  %v6026_v46 = vsel %vm600_vm4, %v17113_v61, %v6025_v56  ;;  %v6028_v9 = vsel %vm600_vm4, %v6022_v54, %v15913_v14  ;;  %v6049_v21 = vadd.f32 %v6023_v7, %v14631_v51  ;;  %v14927_v0 = vpop.eup %9196  ;;  %v8874_v61 = vld [vmem:[%s17100_s22 + $0x60] sm:$0xff]   ;;  %v17117_v14 = vld [vmem:[#allocation53_spill] sm:$0xff] }
 0xc00   :  { %v6030_v53 = vsel %vm600_vm4, %v6025_v56, %v15912_v40  ;;  %v6050_v39 = vadd.f32 %v6026_v46, %v14647_v57  ;;  %v6051_v18 = vadd.f32 %v6028_v9, %v5941_v11  ;;  %v6087_v51 = vmul.f32 %v14600_v17, %v14862_v36  ;;  %8215 = vmatpush3.bf16.msra.mxu0 %v8873_v6  ;;  %v8875_v46 = vld [vmem:[%s17100_s22 + $0x20] sm:$0xff]   ;;  %v17115_v40 = vld [vmem:[#allocation125_spill] sm:$0xff] }
 0xc01   :  { %v6052_v54 = vadd.f32 %v6030_v53, %v5942_v16  ;;  %v6102_v43 = vmul.f32 %v14520_v25, %v6084_v26  ;;  %v6103_v7 = vmul.f32 %v14524_v52, %v6085_v2  ;;  %v14941_v56 = vmul.f32 %v14520_v25, %v6086_v49  ;;  %8216 = vmatprep.subr.bf16.mxu0 %v8874_v61 }
 0xc02   :  { %v6183_v57 = vmul.f32 %v14671_v15, %v14835_v20  ;;  %v6184_v11 = vmul.f32 %v14671_v15, %v14847_v31  ;;  %v6185_v16 = vmul.f32 %v14680_v10, %v14852_v44  ;;  %v14950_v12 = vmul.f32 %v14524_v52, %v6087_v51  ;;  %v8876_v51 = vld [vmem:[%s17100_s22 + $0x68] sm:$0xff]  }
 0xc03   :  { %v6121_v17 = vrot.slane %v6102_v43, 2  ;;  %v6124_v26 = vrot.slane %v6103_v7, 2  ;;  %v6186_v2 = vmul.f32 %v14680_v10, %v14862_v36  ;;  %v17116_v43 = vrot.slane %v17115_v40, 2 }
 0xc04   :  { %v6201_v53 = vmul.f32 %v14536_v34, %v6183_v57  ;;  %v6202_v49 = vmul.f32 %v14540_v24, %v6184_v11  ;;  %v14959_v15 = vmul.f32 %v14536_v34, %v6185_v16  ;;  %v17118_v10 = vrot.slane %v17117_v14, 2  ;;  %8217 = vmatpush3.bf16.msra.mxu0 %v8875_v46 }
 0xc05   :  { %v6122_v7 = vsel %vm262_vm1, %v17116_v43, %v6121_v17  ;;  %v15920_v9 = vrot.slane %v14950_v12, 2  ;;  %v14970_v57 = vmul.f32 %v14540_v24, %v6186_v2  ;;  %v17120_v11 = vrot.slane %v14941_v56, 2  ;;  %v8877_v2 = vld [vmem:[%s17100_s22 + $0x28] sm:$0xff]   ;;  %8218 = vmatprep.subr.bf16.mxu0 %v8876_v51 }
 0xc06   :  { %17114 = vst [vmem:[#allocation145_spill] sm:$0xff] %v14959_v15  ;;  %v6125_v6 = vsel %vm262_vm1, %v17118_v10, %v6124_v26  ;;  %v6148_v61 = vadd.f32 %v6122_v7, %v6049_v21  ;;  %v6220_v38 = vrot.slane %v6201_v53, 4  ;;  %v6223_v43 = vrot.slane %v6202_v49, 4  ;;  %v8878_v7 = vld [vmem:[%s17100_s22 + $0x70] sm:$0xff]  }
 0xc07   :  { %17119 = vst [vmem:[#allocation110_spill] sm:$0xff] %v14970_v57  ;;  %v6127_v16 = vsel %vm262_vm1, %v6121_v17, %v17120_v11  ;;  %v6149_v58 = vadd.f32 %v6125_v6, %v6050_v39  ;;  %v6129_v40 = vsel %vm262_vm1, %v6124_v26, %v15920_v9  ;;  %v15918_v10 = vrot.slane %v14959_v15, 4  ;;  %v17122_v39 = vld [vmem:[#allocation117_spill] sm:$0xff] }
 0xc08   :  { %v6150_v14 = vadd.f32 %v6127_v16, %v6051_v18  ;;  %v6151_v55 = vadd.f32 %v6129_v40, %v6052_v54  ;;  %v6221_v17 = vsel %vm5971_vm6, %v17121_v23, %v6220_v38  ;;  %v15919_v21 = vrot.slane %v14970_v57, 4  ;;  %v17123_v26 = vld [vmem:[#allocation45_spill] sm:$0xff]  ;;  %8219 = vmatpush3.bf16.msra.mxu0 %v8877_v2 }
 0xc09   :  { %v6273_v53 = vmul.f32 %v17122_v39, %v14835_v20  ;;  %v17124_v18 = vrot.slane %v17123_v26, 4  ;;  %v6226_v54 = vsel %vm5971_vm6, %v6220_v38, %v15918_v10  ;;  %v6247_v46 = vadd.f32 %v6221_v17, %v6148_v61  ;;  %v17125_v11 = vld [vmem:[#allocation37_spill] sm:$0xff]  ;;  %v17127_v61 = vld [vmem:[#allocation56_spill] sm:$0xff]  ;;  %8220 = vmatprep.subr.bf16.mxu0 %v8878_v7 }
 0xc0a   :  { %v6274_v59 = vmul.f32 %v17122_v39, %v14847_v31  ;;  %v6228_v23 = vsel %vm5971_vm6, %v6223_v43, %v15919_v21  ;;  %v6249_v51 = vadd.f32 %v6226_v54, %v6150_v14  ;;  %v6275_v16 = vmul.f32 %v17125_v11, %v14852_v44  ;;  %v8879_v39 = vld [vmem:[%s17100_s22 + $0x30] sm:$0xff]  }
 0xc0b   :  { %v6224_v49 = vsel %vm5971_vm6, %v17124_v18, %v6223_v43  ;;  %v6250_v40 = vadd.f32 %v6228_v23, %v6151_v55  ;;  %v6276_v26 = vmul.f32 %v17125_v11, %v14862_v36  ;;  %v17126_v18 = vld [vmem:[#allocation129_spill] sm:$0xff]  ;;  %v17129_v43 = vld [vmem:[#allocation88_spill] sm:$0xff]  ;;  %v6366_v55 = vmul.f32 %v14729_v37, %v14862_v36 }
 0xc0c   :  { %v6248_v6 = vadd.f32 %v6224_v49, %v6149_v58  ;;  %v6289_v38 = vmul.f32 %v17126_v18, %v6273_v53  ;;  %v6290_v17 = vmul.f32 %v17127_v61, %v6274_v59  ;;  %v15006_v10 = vmul.f32 %v17126_v18, %v6275_v16  ;;  %v8880_v49 = vld [vmem:[%s17100_s22 + $0x78] sm:$0xff]   ;;  %v17131_v59 = vld [vmem:[#allocation108_spill] sm:$0xff]  ;;  %8221 = vmatpush3.bf16.msra.mxu0 %v8879_v39 }
 0xc0d   :  { %v6363_v58 = vmul.f32 %v17129_v43, %v14835_v20  ;;  %v6364_v14 = vmul.f32 %v17129_v43, %v14847_v31  ;;  %v15016_v53 = vmul.f32 %v17127_v61, %v6276_v26  ;;  %v15020_v23 = vmul.f32 %v14927_v0, %v17131_v59  ;;  %v17132_v43 = vld [vmem:[#allocation92_spill] sm:$0xff]  ;;  %8222 = vmatprep.subr.bf16.mxu0 %v8880_v49  ;;  %v17135_v39 = vld [vmem:[#allocation50_spill] sm:$0xff] }
 0xc0e   :  { %17128 = vst [vmem:[#allocation100_spill] sm:$0xff] %v15006_v10  ;;  %v6305_v2 = vrot.slane %v6289_v38, 5  ;;  %v6306_v54 = vrot.slane %v6290_v17, 5  ;;  %v15925_v11 = vrot.slane %v15006_v10, 5  ;;  %v15026_v37 = vmul.f32 %v17132_v43, %v6366_v55  ;;  %v17134_v38 = vld [vmem:[#allocation41_spill] sm:$0xff] }
 0xc0f   :  { %17130 = vst [vmem:[#allocation147_spill] sm:$0xff] %v15016_v53  ;;  %v6380_v16 = vmul.f32 %v14544_v35, %v6363_v58  ;;  %v6381_v21 = vmul.f32 %v17132_v43, %v6364_v14  ;;  %v15924_v7 = vrot.slane %v15016_v53, 5  ;;  %v5927_v17 = vmul.f32 %v17134_v38, %v14904_v63  ;;  %v17142_v53 = vld [vmem:[#allocation84_spill] sm:$0xff] }
 0xc10   :  { %17133 = vst [vmem:[#allocation39_spill] sm:$0xff] %v15026_v37  ;;  %v6329_v9 = vadd.f32 %v6305_v2, %v6247_v46  ;;  %v6330_v26 = vadd.f32 %v6306_v54, %v6248_v6  ;;  %v6308_v0 = vsel %vm5909_vm7, %v6305_v2, %v15925_v11  ;;  %v15923_v14 = vrot.slane %v15026_v37, 6  ;;  %8223 = vmatpush3.bf16.msra.mxu0 %v8881_v27 }
 0xc11   :  { %v6401_v59 = vrot.slane %v6380_v16, 6  ;;  %v6402_v58 = vrot.slane %v6381_v21, 6  ;;  %v6310_v55 = vsel %vm5909_vm7, %v6306_v54, %v15924_v7  ;;  %v6331_v46 = vadd.f32 %v6308_v0, %v6249_v51 }
 0xc12   :  { %v5928_v6 = vmul.f32 %v17134_v38, %v14908_v8  ;;  %v5929_v60 = vmul.f32 %v17135_v39, %v14917_v22  ;;  %v6332_v57 = vadd.f32 %v6310_v55, %v6250_v40  ;;  %v17136_v10 = vrot.slane %v14887_v33, 6  ;;  %v17137_v55 = vld [vmem:[#allocation75_spill] sm:$0xff] }
 0xc13   :  { %v6406_v21 = vsel %vm6400_vm8, %v6402_v58, %v15923_v14  ;;  %v15049_v49 = vadd.f32 %v6401_v59, %v6329_v9  ;;  %v15051_v16 = vadd.f32 %v6402_v58, %v6330_v26  ;;  %v5930_v54 = vmul.f32 %v17135_v39, %v15020_v23  ;;  %v17138_v58 = vld [vmem:[#allocation106_spill] sm:$0xff]  ;;  %v17140_v39 = vld [vmem:[#allocation27_spill] sm:$0xff] }
 0xc14   :  { %v6404_v2 = vsel %vm6400_vm8, %v6401_v59, %v17136_v10  ;;  %v5945_v38 = vmul.f32 %v14528_v42, %v5927_v17  ;;  %v15058_v40 = vadd.f32 %v6406_v21, %v6332_v57  ;;  %v5946_v10 = vmul.f32 %v14532_v48, %v5928_v6  ;;  %v17139_v17 = vld [vmem:[#allocation60_spill] sm:$0xff] }
 0xc15   :  { %v15053_v51 = vadd.f32 %v6404_v2, %v6331_v46  ;;  %v5947_v0 = vmul.f32 %v14528_v42, %v5929_v60  ;;  %v5989_v9 = vmul.f32 %v17137_v55, %v14904_v63  ;;  %v5948_v26 = vmul.f32 %v14532_v48, %v5930_v54 }
 0xc16   :  { %v5990_v59 = vmul.f32 %v17137_v55, %v14908_v8  ;;  %v5991_v46 = vmul.f32 %v17138_v58, %v14917_v22  ;;  %v5992_v27 = vmul.f32 %v17138_v58, %v15020_v23  ;;  %v6088_v60 = vmul.f32 %v17139_v17, %v14904_v63 }
 0xc17   :  { %v15072_v57 = vmul.f32 %v14511_v1, %v5989_v9  ;;  %v6089_v6 = vmul.f32 %v17139_v17, %v14908_v8  ;;  %v6090_v2 = vmul.f32 %v17140_v39, %v14917_v22  ;;  %v6091_v9 = vmul.f32 %v17140_v39, %v15020_v23  ;;  %v17141_v39 = vld [vmem:[#allocation83_spill] sm:$0xff] }
 0xc18   :  { %v15081_v21 = vmul.f32 %v14515_v47, %v5990_v59  ;;  %v6009_v54 = vmul.f32 %v14511_v1, %v5991_v46  ;;  %v6010_v55 = vmul.f32 %v14515_v47, %v5992_v27  ;;  %v15089_v14 = vmul.f32 %v14520_v25, %v6088_v60 }
 0xc19   :  { %v15929_v58 = vrot.slane %v15072_v57, 1  ;;  %v15092_v17 = vmul.f32 %v14524_v52, %v6089_v6  ;;  %v6108_v7 = vmul.f32 %v14520_v25, %v6090_v2  ;;  %v6109_v1 = vmul.f32 %v14524_v52, %v6091_v9 }
 0xc1a   :  { %v15933_v59 = vrot.slane %v15081_v21, 1  ;;  %v6035_v11 = vrot.slane %v6009_v54, 1  ;;  %v6037_v37 = vrot.slane %v6010_v55, 1  ;;  %v15931_v47 = vrot.slane %v15089_v14, 2 }
 0xc1b   :  { %v6134_v27 = vrot.slane %v6108_v7, 2  ;;  %v6187_v60 = vmul.f32 %v17141_v39, %v14904_v63  ;;  %v6136_v7 = vrot.slane %v6109_v1, 2  ;;  %v6188_v33 = vmul.f32 %v17141_v39, %v14908_v8 }
 0xc1c   :  { %v6036_v6 = vsel %vm600_vm4, %v15929_v58, %v6035_v11  ;;  %v6038_v25 = vsel %vm600_vm4, %v15933_v59, %v6037_v37  ;;  %v6057_v2 = vadd.f32 %v6035_v11, %v5947_v0  ;;  %v6058_v54 = vadd.f32 %v6037_v37, %v5948_v26 }
 0xc1d   :  { %v6055_v55 = vadd.f32 %v6036_v6, %v5945_v38  ;;  %v6056_v52 = vadd.f32 %v6038_v25, %v5946_v10  ;;  %v6135_v9 = vsel %vm262_vm1, %v15931_v47, %v6134_v27  ;;  %v6189_v58 = vmul.f32 %v17142_v53, %v14917_v22 }
 0xc1e   :  { %v6156_v46 = vadd.f32 %v6134_v27, %v6057_v2  ;;  %v6190_v15 = vmul.f32 %v17142_v53, %v15020_v23  ;;  %v17143_v11 = vrot.slane %v15092_v17, 2  ;;  %v6157_v10 = vadd.f32 %v6136_v7, %v6058_v54  ;;  %v17145_v53 = vld [vmem:[#allocation71_spill] sm:$0xff]  ;;  %v17146_v54 = vld [vmem:[#allocation73_spill] sm:$0xff] }
 0xc1f   :  { %v6154_v38 = vadd.f32 %v6135_v9, %v6055_v55  ;;  %v15120_v0 = vmul.f32 %v14536_v34, %v6187_v60  ;;  %v15123_v1 = vmul.f32 %v14540_v24, %v6188_v33  ;;  %v6207_v27 = vmul.f32 %v14536_v34, %v6189_v58  ;;  %v17147_v9 = vld [vmem:[#allocation103_spill] sm:$0xff] }
 0xc20   :  { %v6137_v37 = vsel %vm262_vm1, %v17143_v11, %v6136_v7  ;;  %v6208_v39 = vmul.f32 %v14540_v24, %v6190_v15  ;;  %v6277_v25 = vmul.f32 %v17145_v53, %v14904_v63  ;;  %v6278_v2 = vmul.f32 %v17145_v53, %v14908_v8 }
 0xc21   :  { %v6155_v26 = vadd.f32 %v6137_v37, %v6056_v52  ;;  %17144 = vst [vmem:[#allocation46_spill] sm:$0xff] %v15123_v1  ;;  %v15932_v6 = vrot.slane %v15120_v0, 4  ;;  %v6279_v60 = vmul.f32 %v17146_v54, %v14917_v22  ;;  %v6231_v55 = vrot.slane %v15123_v1, 4 }
 0xc22   :  { %v6233_v52 = vrot.slane %v6207_v27, 4  ;;  %v6235_v33 = vrot.slane %v6208_v39, 4  ;;  %v6280_v34 = vmul.f32 %v17146_v54, %v15020_v23  ;;  %v15138_v24 = vmul.f32 %v17126_v18, %v6277_v25 }
 0xc23   :  { %v15141_v15 = vmul.f32 %v17127_v61, %v6278_v2  ;;  %v6295_v58 = vmul.f32 %v17126_v18, %v6279_v60  ;;  %v6367_v7 = vmul.f32 %v17147_v9, %v14904_v63  ;;  %v6368_v47 = vmul.f32 %v17147_v9, %v14908_v8 }
 0xc24   :  { %v6234_v11 = vsel %vm5971_vm6, %v15932_v6, %v6233_v52  ;;  %v6236_v37 = vsel %vm5971_vm6, %v6231_v55, %v6235_v33  ;;  %v6255_v27 = vadd.f32 %v6233_v52, %v6156_v46  ;;  %v6256_v39 = vadd.f32 %v6235_v33, %v6157_v10  ;;  %v17148_v6 = vld [vmem:[#allocation58_spill] sm:$0xff] }
 0xc25   :  { %v6253_v53 = vadd.f32 %v6234_v11, %v6154_v38  ;;  %v6254_v25 = vadd.f32 %v6236_v37, %v6155_v26  ;;  %v6296_v2 = vmul.f32 %v17127_v61, %v6280_v34  ;;  %v6311_v54 = vrot.slane %v15138_v24, 5 }
 0xc26   :  { %v6313_v18 = vrot.slane %v15141_v15, 5  ;;  %v6315_v60 = vrot.slane %v6295_v58, 5  ;;  %v6369_v59 = vmul.f32 %v17148_v6, %v14917_v22  ;;  %v6370_v46 = vmul.f32 %v17148_v6, %v15020_v23  ;;  %v17183_v15 = vld [vmem:[#allocation136_spill] sm:$0xff] }
 0xc27   :  { %v6317_v1 = vrot.slane %v6296_v2, 5  ;;  %v15162_v38 = vmul.f32 %v14544_v35, %v6367_v7  ;;  %v6530_v61 = vmul.f32 %v14762_v4, %v14917_v22  ;;  %v15170_v52 = vmul.f32 %v17132_v43, %v6368_v47 }
 0xc28   :  { %v6316_v10 = vsel %vm5909_vm7, %v6311_v54, %v6315_v60  ;;  %v6337_v26 = vadd.f32 %v6315_v60, %v6255_v27  ;;  %v6386_v33 = vmul.f32 %v14544_v35, %v6369_v59  ;;  %v6387_v9 = vmul.f32 %v17132_v43, %v6370_v46  ;;  %v17151_v46 = vld [vmem:[#allocation94_spill] sm:$0xff] }
 0xc29   :  { %v6318_v6 = vsel %vm5909_vm7, %v6313_v18, %v6317_v1  ;;  %v6335_v34 = vadd.f32 %v6316_v10, %v6253_v53  ;;  %v6338_v58 = vadd.f32 %v6317_v1, %v6256_v39  ;;  %v6407_v11 = vrot.slane %v15162_v38, 6  ;;  %v17149_v1 = vld [vmem:[#allocation36_spill] sm:$0xff] }
 0xc2a   :  { %v6336_v7 = vadd.f32 %v6318_v6, %v6254_v25  ;;  %v15935_v37 = vrot.slane %v15170_v52, 6  ;;  %v6411_v2 = vrot.slane %v6386_v33, 6  ;;  %v6413_v27 = vrot.slane %v6387_v9, 6 }
 0xc2b   :  { %v6531_v47 = vmul.f32 %v14762_v4, %v15020_v23  ;;  %v15182_v35 = vmul.f32 %v14717_v29, %v6530_v61  ;;  %v6526_v59 = vmul.f32 %v14770_v41, %v14852_v44  ;;  %v17150_v39 = vrot.slane %v17149_v1, 6 }
 0xc2c   :  { %v6412_v43 = vsel %vm6400_vm8, %v6407_v11, %v6411_v2  ;;  %v6527_v25 = vmul.f32 %v14770_v41, %v14862_v36  ;;  %v6528_v4 = vmul.f32 %v14773_v28, %v14904_v63  ;;  %v6414_v60 = vsel %vm6400_vm8, %v15935_v37, %v6413_v27 }
 0xc2d   :  { %v6416_v53 = vsel %vm6400_vm8, %v6411_v2, %v17150_v39  ;;  %v17152_v61 = vrot.slane %v17151_v46, 6  ;;  %v15202_v33 = vadd.f32 %v6412_v43, %v6335_v34  ;;  %v15206_v9 = vadd.f32 %v6414_v60, %v6336_v7 }
 0xc2e   :  { %v15204_v6 = vadd.f32 %v6416_v53, %v6337_v26  ;;  %v6548_v41 = vmul.f32 %v14724_v45, %v6531_v47  ;;  %v6571_v1 = vrot.slane %v15182_v35, 1  ;;  %v6529_v39 = vmul.f32 %v14773_v28, %v14908_v8  ;;  %v17154_v53 = vld [vmem:[#allocation82_spill] sm:$0xff] }
 0xc2f   :  { %v6418_v10 = vsel %vm6400_vm8, %v6413_v27, %v17152_v61  ;;  %v6543_v37 = vmul.f32 %v14717_v29, %v6526_v59  ;;  %v6544_v46 = vmul.f32 %v14724_v45, %v6527_v25  ;;  %v6545_v34 = vmul.f32 %v14717_v29, %v6528_v4  ;;  %v17156_v4 = vld [vmem:[#allocation135_spill] sm:$0xff] }
 0xc30   :  { %v15208_v2 = vadd.f32 %v6418_v10, %v6338_v58  ;;  %v6573_v27 = vrot.slane %v6548_v41, 1  ;;  %v17153_v26 = vrot.slane %v14751_v32, 1  ;;  %v6463_v58 = vmul.f32 %v14756_v50, %v14835_v20 }
 0xc31   :  { %v6464_v47 = vmul.f32 %v14756_v50, %v14847_v31  ;;  %v6546_v28 = vmul.f32 %v14724_v45, %v6529_v39  ;;  %v6562_v35 = vrot.slane %v6543_v37, 1  ;;  %v6565_v59 = vrot.slane %v6544_v46, 1 }
 0xc32   :  { %v15220_v7 = vsel %vm600_vm4, %v6571_v1, %v17153_v26  ;;  %v6567_v43 = vrot.slane %v6545_v34, 1  ;;  %v17155_v25 = vrot.slane %v17154_v53, 1  ;;  %v6465_v60 = vmul.f32 %v17156_v4, %v14852_v44 }
 0xc33   :  { %v6466_v61 = vmul.f32 %v17156_v4, %v14862_v36  ;;  %v6480_v10 = vmul.f32 %v14783_v62, %v6463_v58  ;;  %v6569_v41 = vrot.slane %v6546_v28, 1  ;;  %v6481_v50 = vmul.f32 %v14787_v19, %v6464_v47 }
 0xc34   :  { %v15230_v29 = vsel %vm600_vm4, %v6573_v27, %v17155_v25  ;;  %v17157_v45 = vrot.slane %v14874_v3, 1  ;;  %v17158_v39 = vrot.slane %v14880_v13, 1  ;;  %v6482_v34 = vmul.f32 %v14783_v62, %v6465_v60  ;;  %v17159_v3 = vld [vmem:[#allocation85_spill] sm:$0xff] }
 0xc35   :  { %v6483_v26 = vmul.f32 %v14787_v19, %v6466_v61  ;;  %v6490_v25 = vadd.f32 %v6480_v10, %v15049_v49  ;;  %v6568_v4 = vsel %vm600_vm4, %v6562_v35, %v6567_v43  ;;  %v6491_v58 = vadd.f32 %v6481_v50, %v15051_v16 }
 0xc36   :  { %v6563_v37 = vsel %vm600_vm4, %v17157_v45, %v6562_v35  ;;  %v6566_v46 = vsel %vm600_vm4, %v17158_v39, %v6565_v59  ;;  %v6570_v47 = vsel %vm600_vm4, %v6565_v59, %v6569_v41  ;;  %v5925_v28 = vmul.f32 %v17159_v3, %v14852_v44 }
 0xc37   :  { %v5926_v13 = vmul.f32 %v17159_v3, %v14862_v36  ;;  %v6492_v45 = vadd.f32 %v6482_v34, %v15053_v51  ;;  %v6493_v60 = vadd.f32 %v6483_v26, %v15058_v40  ;;  %v15256_v39 = vadd.f32 %v6563_v37, %v6490_v25 }
 0xc38   :  { %v17160_v49 = vrot.slane %v15072_v57, 1  ;;  %v17161_v35 = vrot.slane %v14892_v5, 1  ;;  %v15263_v61 = vadd.f32 %v6566_v46, %v6491_v58  ;;  %v5943_v59 = vmul.f32 %v14528_v42, %v5925_v28 }
 0xc39   :  { %v5944_v10 = vmul.f32 %v14532_v48, %v5926_v13  ;;  %v17162_v50 = vrot.slane %v15081_v21, 1  ;;  %v17163_v51 = vrot.slane %v14897_v30, 1  ;;  %v15272_v37 = vadd.f32 %v6568_v4, %v6492_v45  ;;  %v17169_v4 = vld [vmem:[#allocation145_spill] sm:$0xff]  ;;  %v17176_v45 = vld [vmem:[#allocation147_spill] sm:$0xff] }
 0xc3a   :  { %v6032_v16 = vsel %vm600_vm4, %v17161_v35, %v17160_v49  ;;  %v15274_v34 = vadd.f32 %v6570_v47, %v6493_v60  ;;  %v17164_v5 = vrot.slane %v15089_v14, 2  ;;  %v17165_v57 = vrot.slane %v14941_v56, 2  ;;  %v17172_v14 = vld [vmem:[#allocation110_spill] sm:$0xff]  ;;  %v17178_v49 = vld [vmem:[#allocation144_spill] sm:$0xff] }
 0xc3b   :  { %v6034_v40 = vsel %vm600_vm4, %v17163_v51, %v17162_v50  ;;  %v17166_v42 = vrot.slane %v15092_v17, 2  ;;  %v17167_v48 = vrot.slane %v14950_v12, 2  ;;  %v6053_v26 = vadd.f32 %v6032_v16, %v5943_v59  ;;  %v17174_v17 = vld [vmem:[#allocation100_spill] sm:$0xff]  ;;  %v17181_v59 = vld [vmem:[#allocation39_spill] sm:$0xff] }
 0xc3c   :  { %v6131_v46 = vsel %vm262_vm1, %v17165_v57, %v17164_v5  ;;  %v6054_v30 = vadd.f32 %v6034_v40, %v5944_v10  ;;  %v17168_v25 = vrot.slane %v15120_v0, 4  ;;  %v17170_v58 = vrot.slane %v17169_v4, 4  ;;  %v17187_v4 = vld [vmem:[#allocation33_spill] sm:$0xff] }
 0xc3d   :  { %v6133_v21 = vsel %vm262_vm1, %v17167_v48, %v17166_v42  ;;  %v17173_v56 = vrot.slane %v17172_v14, 4  ;;  %v17175_v12 = vrot.slane %v17174_v17, 5  ;;  %v17177_v0 = vrot.slane %v17176_v45, 5 }
 0xc3e   :  { %v6230_v47 = vsel %vm5971_vm6, %v17170_v58, %v17168_v25  ;;  %v17179_v35 = vrot.slane %v17178_v49, 6  ;;  %v17182_v24 = vrot.slane %v17181_v59, 6  ;;  %v6152_v50 = vadd.f32 %v6131_v46, %v6053_v26 }
 0xc3f   :  { %v6232_v28 = vsel %vm5971_vm6, %v17173_v56, %v6231_v55  ;;  %v6312_v13 = vsel %vm5909_vm7, %v17175_v12, %v6311_v54  ;;  %v6314_v60 = vsel %vm5909_vm7, %v17177_v0, %v6313_v18  ;;  %v17180_v55 = vrot.slane %v15170_v52, 6  ;;  %v17190_v12 = vld [vmem:[#allocation146_spill] sm:$0xff] }
 0xc40   :  { %v6408_v16 = vsel %vm6400_vm8, %v17179_v35, %v6407_v11  ;;  %v6153_v54 = vadd.f32 %v6133_v21, %v6054_v30  ;;  %v6467_v51 = vmul.f32 %v17183_v15, %v14904_v63  ;;  %v6468_v18 = vmul.f32 %v17183_v15, %v14908_v8  ;;  %v17184_v11 = vld [vmem:[#allocation105_spill] sm:$0xff] }
 0xc41   :  { %v6410_v10 = vsel %vm6400_vm8, %v17182_v24, %v17180_v55  ;;  %v6572_v38 = vsel %vm600_vm4, %v6567_v43, %v6571_v1  ;;  %v6574_v40 = vsel %vm600_vm4, %v6569_v41, %v6573_v27  ;;  %v6469_v5 = vmul.f32 %v17184_v11, %v14917_v22  ;;  %v17185_v1 = vld [vmem:[#allocation151_spill] sm:$0xff]  ;;  %v17186_v27 = vld [vmem:[#allocation61_spill] sm:$0xff] }
 0xc42   :  { %v6470_v52 = vmul.f32 %v17184_v11, %v15020_v23  ;;  %v6251_v57 = vadd.f32 %v6230_v47, %v6152_v50  ;;  %v6252_v42 = vadd.f32 %v6232_v28, %v6153_v54  ;;  %v6484_v46 = vmul.f32 %v14783_v62, %v6467_v51  ;;  %v17189_v28 = vld [vmem:[#allocation137_spill] sm:$0xff] }
 0xc43   :  { %v6485_v48 = vmul.f32 %v14787_v19, %v6468_v18  ;;  %v6486_v21 = vmul.f32 %v14783_v62, %v6469_v5  ;;  %v6498_v43 = vadd.f32 %v17185_v1, %v15204_v6  ;;  %v6499_v41 = vadd.f32 %v17186_v27, %v15208_v2  ;;  %v17197_v1 = vld [vmem:[#allocation131_spill] sm:$0xff] }
 0xc44   :  { %v6487_v26 = vmul.f32 %v14787_v19, %v6470_v52  ;;  %v6333_v30 = vadd.f32 %v6312_v13, %v6251_v57  ;;  %v6334_v25 = vadd.f32 %v6314_v60, %v6252_v42  ;;  %v6623_v58 = vmul.f32 %v17187_v4, %v14835_v20  ;;  %v17188_v19 = vld [vmem:[#allocation76_spill] sm:$0xff]  ;;  %v17194_v52 = vld [vmem:[#allocation57_spill] sm:$0xff] }
 0xc45   :  { %v6624_v47 = vmul.f32 %v17187_v4, %v14847_v31  ;;  %v6496_v3 = vadd.f32 %v6486_v21, %v15202_v33  ;;  %v6625_v14 = vmul.f32 %v17188_v19, %v14852_v44  ;;  %v6626_v6 = vmul.f32 %v17188_v19, %v14862_v36  ;;  %v17191_v33 = vld [vmem:[#allocation142_spill] sm:$0xff] }
 0xc46   :  { %v6497_v62 = vadd.f32 %v6487_v26, %v15206_v9  ;;  %v6433_v56 = vadd.f32 %v6408_v16, %v6333_v30  ;;  %v6434_v2 = vadd.f32 %v6410_v10, %v6334_v25  ;;  %v6640_v17 = vmul.f32 %v17189_v28, %v6623_v58  ;;  %v17201_v25 = vld [vmem:[#allocation28_spill] sm:$0xff]  ;;  %v17202_v4 = vld [vmem:[#allocation138_spill] sm:$0xff] }
 0xc47   :  { %v6641_v13 = vmul.f32 %v17190_v12, %v6624_v47  ;;  %v6642_v20 = vmul.f32 %v17189_v28, %v6625_v14  ;;  %v6643_v31 = vmul.f32 %v17190_v12, %v6626_v6  ;;  %v6627_v45 = vmul.f32 %v17191_v33, %v14904_v63 }
 0xc48   :  { %v6628_v9 = vmul.f32 %v17191_v33, %v14908_v8  ;;  %v6494_v44 = vadd.f32 %v6484_v46, %v6433_v56  ;;  %v6495_v0 = vadd.f32 %v6485_v48, %v6434_v2  ;;  %v6660_v60 = vrot.slane %v6640_v17, 2  ;;  %v17195_v46 = vld [vmem:[#allocation134_spill] sm:$0xff]  ;;  %v17196_v48 = vld [vmem:[#allocation101_spill] sm:$0xff] }
 0xc49   :  { %v6663_v36 = vrot.slane %v6641_v13, 2  ;;  %v6661_v49 = vrot.slane %v6642_v20, 2  ;;  %v6664_v35 = vrot.slane %v6643_v31, 2  ;;  %v6644_v16 = vmul.f32 %v17189_v28, %v6627_v45 }
 0xc4a   :  { %v6645_v55 = vmul.f32 %v17190_v12, %v6628_v9  ;;  %v6593_v59 = vadd.f32 %v6572_v38, %v6494_v44  ;;  %v6594_v24 = vadd.f32 %v6574_v40, %v6495_v0  ;;  %v6595_v10 = vadd.f32 %v15220_v7, %v6496_v3 }
 0xc4b   :  { %v6596_v50 = vadd.f32 %v15230_v29, %v6497_v62  ;;  %v6662_v63 = vsel %vm262_vm1, %v6660_v60, %v6661_v49  ;;  %v6665_v8 = vsel %vm262_vm1, %v6663_v36, %v6664_v35  ;;  %v6666_v54 = vrot.slane %v6644_v16, 2 }
 0xc4c   :  { %v6668_v15 = vrot.slane %v6645_v55, 2  ;;  %v6688_v51 = vadd.f32 %v6662_v63, %v15256_v39  ;;  %v6689_v18 = vadd.f32 %v6665_v8, %v15263_v61  ;;  %v17192_v11 = vrot.slane %v14751_v32, 1 }
 0xc4d   :  { %v17193_v38 = vrot.slane %v17154_v53, 1  ;;  %v6667_v7 = vsel %vm262_vm1, %v6661_v49, %v6666_v54  ;;  %v6629_v57 = vmul.f32 %v17194_v52, %v14917_v22  ;;  %v6630_v42 = vmul.f32 %v17194_v52, %v15020_v23 }
 0xc4e   :  { %v6597_v5 = vadd.f32 %v17192_v11, %v6498_v43  ;;  %v6669_v29 = vsel %vm262_vm1, %v6664_v35, %v6668_v15  ;;  %v6717_v39 = vmul.f32 %v17195_v46, %v6688_v51  ;;  %v6718_v61 = vmul.f32 %v17196_v48, %v6689_v18 }
 0xc4f   :  { %v6598_v40 = vadd.f32 %v17193_v38, %v6499_v41  ;;  %v6690_v32 = vadd.f32 %v6667_v7, %v15272_v37  ;;  %v6691_v21 = vadd.f32 %v6669_v29, %v15274_v34  ;;  %v6646_v53 = vmul.f32 %v17189_v28, %v6629_v57  ;;  %v17199_v41 = vld [vmem:[#allocation79_spill] sm:$0xff] }
 0xc50   :  { %v6647_v26 = vmul.f32 %v17190_v12, %v6630_v42  ;;  %v17198_v43 = vrot.slane %v17197_v1, 2  ;;  %v17200_v22 = vrot.slane %v17199_v41, 2  ;;  %v15381_v23 = vadd.f32 %v17201_v25, %v6717_v39 }
 0xc51   :  { %v15384_v58 = vadd.f32 %v17202_v4, %v6718_v61  ;;  %v6719_v37 = vmul.f32 %v17195_v46, %v6690_v32  ;;  %v6720_v34 = vmul.f32 %v17196_v48, %v6691_v21  ;;  %v6670_v47 = vrot.slane %v6646_v53, 2 }
 0xc52   :  { %v6696_v27 = vadd.f32 %v17198_v43, %v6597_v5  ;;  %v6697_v30 = vadd.f32 %v17200_v22, %v6598_v40  ;;  %v6672_v3 = vrot.slane %v6647_v26, 2  ;;  %v8017_v14 = vmul.f32 -1.442695, %v15381_v23 }
 0xc53   :  { %v8018_v6 = vmul.f32 -1.442695, %v15384_v58  ;;  %v15393_v56 = vadd.f32 %v17201_v25, %v6719_v37  ;;  %v15396_v2 = vadd.f32 %v17202_v4, %v6720_v34  ;;  %v6671_v28 = vsel %vm262_vm1, %v6666_v54, %v6670_v47 }
 0xc54   :  { %v6725_v62 = vmul.f32 %v17195_v46, %v6696_v27  ;;  %v6726_v19 = vmul.f32 %v17196_v48, %v6697_v30  ;;  %v6673_v17 = vsel %vm262_vm1, %v6668_v15, %v6672_v3  ;;  %v17203_v12 = vmov %v17198_v43 }
 0xc55   :  { %v6675_v13 = vsel %vm262_vm1, %v6670_v47, %v17203_v12  ;;  %v17204_v20 = vmov %v17200_v22  ;;  %9198 = vpow2.f32 %v8017_v14  ;;  %v8019_v33 = vmul.f32 -1.442695, %v15393_v56 }
 0xc56   :  { %v6677_v31 = vsel %vm262_vm1, %v6672_v3, %v17204_v20  ;;  %v8020_v45 = vmul.f32 -1.442695, %v15396_v2  ;;  %v6692_v9 = vadd.f32 %v6671_v28, %v6593_v59  ;;  %9200 = vpow2.f32 %v8018_v6 }
 0xc57   :  { %v6693_v44 = vadd.f32 %v6673_v17, %v6594_v24  ;;  %v6694_v0 = vadd.f32 %v6675_v13, %v6595_v10  ;;  %v6695_v60 = vadd.f32 %v6677_v31, %v6596_v50  ;;  %9202 = vpow2.f32 %v8019_v33 }
 0xc58   :  { %v6721_v36 = vmul.f32 %v17195_v46, %v6692_v9  ;;  %v6753_v49 = vadd.f32 %v17201_v25, %v6725_v62  ;;  %v15411_v35 = vadd.f32 %v17202_v4, %v6726_v19  ;;  %9204 = vpow2.f32 %v8020_v45 }
 0xc59   :  { %v6722_v16 = vmul.f32 %v17196_v48, %v6693_v44  ;;  %v6723_v55 = vmul.f32 %v17195_v46, %v6694_v0  ;;  %v6724_v63 = vmul.f32 %v17196_v48, %v6695_v60 }
 0xc5a   :  { %v6749_v59 = vadd.f32 %v17201_v25, %v6721_v36  ;;  %v8025_v24 = vmul.f32 -1.442695, %v6753_v49  ;;  %v8026_v10 = vmul.f32 -1.442695, %v15411_v35 }
 0xc5b   :  { %v6750_v50 = vadd.f32 %v17202_v4, %v6722_v16  ;;  %v15420_v8 = vadd.f32 %v17201_v25, %v6723_v55  ;;  %v15423_v54 = vadd.f32 %v17202_v4, %v6724_v63 }
 0xc5c   :  { %v8021_v15 = vmul.f32 -1.442695, %v6749_v59  ;;  %9206 = vpow2.f32 %v8025_v24 }
 0xc5d   :  { %v8022_v51 = vmul.f32 -1.442695, %v6750_v50  ;;  %v8023_v18 = vmul.f32 -1.442695, %v15420_v8  ;;  %v8024_v11 = vmul.f32 -1.442695, %v15423_v54  ;;  %9208 = vpow2.f32 %v8026_v10 }
 0xc5e   :  { %9210 = vpow2.f32 %v8021_v15 }
 0xc5f   :  { %9212 = vpow2.f32 %v8022_v51  ;;  %v9199_v5 = vpop.eup %9198 }
 0xc60   :  { %9214 = vpow2.f32 %v8023_v18  ;;  %v9201_v38 = vpop.eup %9200  ;;  %v6785_v29 = vadd.f32 1.0, %v9199_v5 }
 0xc61   :  { %9216 = vpow2.f32 %v8024_v11  ;;  %v9203_v40 = vpop.eup %9202  ;;  %v6786_v57 = vadd.f32 1.0, %v9201_v38 }
 0xc62   :  { %v9205_v7 = vpop.eup %9204  ;;  %v6787_v52 = vadd.f32 1.0, %v9203_v40 }
 0xc63   :  { %v6788_v42 = vadd.f32 1.0, %v9205_v7 }
 0xc64   :  { %9218 = vrcp.f32 %v6787_v52 }
 0xc65   :  { %9220 = vrcp.f32 %v6788_v42 }
 0xc66   :  { %v9207_v46 = vpop.eup %9206  ;;  %9222 = vrcp.f32 %v6785_v29 }
 0xc67   :  { %v9209_v39 = vpop.eup %9208  ;;  %v6793_v48 = vadd.f32 1.0, %v9207_v46  ;;  %9224 = vrcp.f32 %v6786_v57 }
 0xc68   :  { %v9211_v61 = vpop.eup %9210  ;;  %v6794_v32 = vadd.f32 1.0, %v9209_v39 }
 0xc69   :  { %v9213_v21 = vpop.eup %9212  ;;  %v6789_v53 = vadd.f32 1.0, %v9211_v61  ;;  %9226 = vrcp.f32 %v6793_v48 }
 0xc6a   :  { %v9215_v26 = vpop.eup %9214  ;;  %v6790_v1 = vadd.f32 1.0, %v9213_v21  ;;  %9228 = vrcp.f32 %v6794_v32 }
 0xc6b   :  { %v9217_v43 = vpop.eup %9216  ;;  %v6791_v27 = vadd.f32 1.0, %v9215_v26  ;;  %9230 = vrcp.f32 %v6789_v53 }
 0xc6c   :  { %v6792_v41 = vadd.f32 1.0, %v9217_v43  ;;  %9232 = vrcp.f32 %v6790_v1 }
 0xc6d   :  { %9234 = vrcp.f32 %v6791_v27 }
 0xc6e   :  { %9236 = vrcp.f32 %v6792_v41  ;;  %v9219_v22 = vpop.eup %9218 }
 0xc6f   :  { %v9221_v30 = vpop.eup %9220  ;;  %v15428_v37 = vmul.f32 %v9219_v22, %v15393_v56 }
 0xc70   :  { %v9223_v25 = vpop.eup %9222  ;;  %v15431_v47 = vmul.f32 %v9221_v30, %v15396_v2 }
 0xc71   :  { %v9225_v4 = vpop.eup %9224  ;;  %v15434_v62 = vmul.f32 %v9223_v25, %v15381_v23  ;;  %v6882_v56 = vrot.slane %v15428_v37, 3 }
 0xc72   :  { %v15439_v6 = vmul.f32 %v9225_v4, %v15384_v58  ;;  %v6885_v23 = vrot.slane %v15431_v47, 3 }
 0xc73   :  { %v9227_v34 = vpop.eup %9226  ;;  %v6881_v31 = vrot.slane %v15434_v62, 3 }
 0xc74   :  { %v9229_v3 = vpop.eup %9228  ;;  %v15436_v19 = vmul.f32 %v9227_v34, %v6753_v49  ;;  %v6884_v0 = vrot.slane %v15439_v6, 3 }
 0xc75   :  { %v9231_v14 = vpop.eup %9230  ;;  %v15442_v28 = vmul.f32 %v9229_v3, %v15411_v35  ;;  %v6883_v49 = vsel %vm261_vm0, %v6881_v31, %v6882_v56  ;;  %v8887_v31 = vld [vmem:[%s17205_s23 + $0x14] ss:$8 sps:$4 sm:$0xff]  }
 0xc76   :  { %v9233_v17 = vpop.eup %9232  ;;  %v15445_v12 = vmul.f32 %v9231_v14, %v6749_v59  ;;  %v6919_v45 = vrot.slane %v15436_v19, 3  ;;  %v6886_v55 = vsel %vm261_vm0, %v6884_v0, %v6885_v23  ;;  %v8893_v0 = vld [vmem:[%s17205_s23 + $0x34] ss:$8 sps:$4 sm:$0xff]  }
 0xc77   :  { %v9235_v2 = vpop.eup %9234  ;;  %v15447_v13 = vmul.f32 %v9233_v17, %v6750_v50  ;;  %v6921_v44 = vrot.slane %v15442_v28, 3 }
 0xc78   :  { %v9237_v20 = vpop.eup %9236  ;;  %v15452_v33 = vmul.f32 %v9235_v2, %v15420_v8  ;;  %v6887_v58 = vrot.slane %v15445_v12, 3 }
 0xc79   :  { %v15457_v9 = vmul.f32 %v9237_v20, %v15423_v54  ;;  %v6889_v60 = vrot.slane %v15447_v13, 3  ;;  %v8882_v20 = vld [vmem:[%s17205_s23] ss:$8 sps:$4 sm:$0xff]  }
 0xc7a   :  { %v6915_v36 = vrot.slane %v15452_v33, 3  ;;  %v6888_v35 = vsel %vm261_vm0, %v6882_v56, %v6887_v58 }
 0xc7b   :  { %v6917_v16 = vrot.slane %v15457_v9, 3  ;;  %v6890_v63 = vsel %vm261_vm0, %v6885_v23, %v6889_v60  ;;  %v6895_v59 = vadd.f32 %v6888_v35, %v6883_v49  ;;  %v8884_v23 = vld [vmem:[%s17205_s23 + $0x4] ss:$8 sps:$4 sm:$0xff]   ;;  %v8894_v49 = vld [vmem:[%s17205_s23 + $0x40] ss:$8 sps:$4 sm:$0xff]  }
 0xc7c   :  { %v6920_v24 = vsel %vm261_vm0, %v6915_v36, %v6919_v45  ;;  %v6902_v10 = vadd.f32 %v6890_v63, %v6886_v55  ;;  %v6916_v50 = vsel %vm261_vm0, %v6887_v58, %v6915_v36  ;;  %7188 = vmatprep.subr.bf16.mxu1 %v8884_v23  ;;  %v8885_v58 = vld [vmem:[%s17205_s23 + $0x10] ss:$8 sps:$4 sm:$0xff]   ;;  %v8890_v45 = vld [vmem:[%s17205_s23 + $0x24] ss:$8 sps:$4 sm:$0xff]   ;;  %v8900_v63 = vld [vmem:[%s17205_s23 + $0x60] ss:$8 sps:$4 sm:$0xff]  }
 0xc7d   :  { %v6918_v8 = vsel %vm261_vm0, %v6889_v60, %v6917_v16  ;;  %v6922_v54 = vsel %vm261_vm0, %v6917_v16, %v6921_v44  ;;  %v6896_v15 = vrot.slane %v6895_v59, 4  ;;  %v6927_v51 = vadd.f32 %v6920_v24, %v6916_v50  ;;  %7189 = vmatpush1.bf16.msra.mxu1 %v8882_v20  ;;  %v8888_v44 = vld [vmem:[%s17205_s23 + $0x20] ss:$8 sps:$4 sm:$0xff]   ;;  %v8891_v60 = vld [vmem:[%s17205_s23 + $0x30] ss:$8 sps:$4 sm:$0xff]  }
 0xc7e   :  { %v6903_v18 = vrot.slane %v6902_v10, 4  ;;  %v6934_v11 = vadd.f32 %v6922_v54, %v6918_v8  ;;  %7190 = vmatprep.subr.bf16.mxu1 %v8887_v31  ;;  %v8896_v36 = vld [vmem:[%s17205_s23 + $0x44] ss:$8 sps:$4 sm:$0xff]   ;;  %v8897_v35 = vld [vmem:[%s17205_s23 + $0x50] ss:$8 sps:$4 sm:$0xff]  }
 0xc7f   :  { %v6897_v5 = vadd.f32 %v6896_v15, %v6895_v59  ;;  %v6928_v38 = vrot.slane %v6927_v51, 4  ;;  %v8899_v16 = vld [vmem:[%s17205_s23 + $0x54] ss:$8 sps:$4 sm:$0xff]   ;;  %v8902_v55 = vld [vmem:[%s17205_s23 + $0x64] ss:$8 sps:$4 sm:$0xff]  }
 0xc80   :  { %v6904_v40 = vadd.f32 %v6903_v18, %v6902_v10  ;;  %v6935_v7 = vrot.slane %v6934_v11, 4  ;;  %v8905_v59 = vld [vmem:[%s17205_s23 + $0x74] ss:$8 sps:$4 sm:$0xff]   ;;  %v8903_v24 = vld [vmem:[%s17205_s23 + $0x70] ss:$8 sps:$4 sm:$0xff]  }
 0xc81   :  { %v6898_v29 = vrot.slane %v6897_v5, 2  ;;  %v6929_v52 = vadd.f32 %v6928_v38, %v6927_v51  ;;  %7191 = vmatpush1.bf16.msra.mxu1 %v8885_v58  ;;  %v8027_v50 = vld [vmem:[%s17206_s26] ss:$0 sm:$0xff] }
 0xc82   :  { %v6905_v57 = vrot.slane %v6904_v40, 2  ;;  %v6936_v42 = vadd.f32 %v6935_v7, %v6934_v11  ;;  %7192 = vmatprep.subr.bf16.mxu1 %v8890_v45 }
 0xc83   :  { %v6899_v46 = vadd.f32 %v6898_v29, %v6897_v5  ;;  %v6930_v39 = vrot.slane %v6929_v52, 2 }
 0xc84   :  { %v6906_v48 = vadd.f32 %v6905_v57, %v6904_v40  ;;  %v6937_v61 = vrot.slane %v6936_v42, 2  ;;  %v8907_v57 = vld [vmem:[%s17207_s28] sm:$0xff]  }
 0xc85   :  { %v6900_v32 = vrot.slane %v6899_v46, 1  ;;  %v6931_v21 = vadd.f32 %v6930_v39, %v6929_v52  ;;  %7193 = vmatpush1.bf16.msra.mxu1 %v8888_v44  ;;  %v8906_v52 = vld [vmem:[%s17207_s28 + $0x40] sm:$0xff]   ;;  %v8910_v39 = vld [vmem:[%s17207_s28 + $0x50] sm:$0xff]  }
 0xc86   :  { %v6907_v53 = vrot.slane %v6906_v48, 1  ;;  %v6938_v26 = vadd.f32 %v6937_v61, %v6936_v42  ;;  %7194 = vmatprep.subr.bf16.mxu1 %v8893_v0  ;;  %8230 = vmatprep.subr.bf16.mxu0 %v8906_v52  ;;  %v8908_v42 = vld [vmem:[%s17207_s28 + $0x48] sm:$0xff]   ;;  %v8912_v61 = vld [vmem:[%s17207_s28 + $0x58] sm:$0xff]  }
 0xc87   :  { %v6901_v1 = vadd.f32 %v6900_v32, %v6899_v46  ;;  %v6932_v43 = vrot.slane %v6931_v21, 1  ;;  %v8909_v46 = vld [vmem:[%s17207_s28 + $0x8] sm:$0xff]   ;;  %v8913_v32 = vld [vmem:[%s17207_s28 + $0x18] sm:$0xff]  }
 0xc88   :  { %v6908_v27 = vadd.f32 %v6907_v53, %v6906_v48  ;;  %v6939_v41 = vrot.slane %v6938_v26, 1  ;;  %v8911_v48 = vld [vmem:[%s17207_s28 + $0x10] sm:$0xff]   ;;  %v8915_v53 = vld [vmem:[%s17207_s28 + $0x20] sm:$0xff]  }
 0xc89   :  { %v6933_v22 = vadd.f32 %v6932_v43, %v6931_v21  ;;  %v6909_v25 = vmul.f32 0.0625, %v6901_v1  ;;  %7195 = vmatpush1.bf16.msra.mxu1 %v8891_v60  ;;  %v8914_v21 = vld [vmem:[%s17207_s28 + $0x60] sm:$0xff]   ;;  %v8917_v1 = vld [vmem:[%s17207_s28 + $0x28] sm:$0xff]   ;;  %v8918_v43 = vld [vmem:[%s17207_s28 + $0x70] sm:$0xff]  }
 0xc8a   :  { %v6940_v30 = vadd.f32 %v6939_v41, %v6938_v26  ;;  %v6910_v34 = vmul.f32 0.0625, %v6908_v27  ;;  %7196 = vmatprep.subr.bf16.mxu1 %v8896_v36  ;;  %v8916_v26 = vld [vmem:[%s17207_s28 + $0x68] sm:$0xff]   ;;  %v8919_v27 = vld [vmem:[%s17207_s28 + $0x30] sm:$0xff]   ;;  %v8920_v41 = vld [vmem:[%s17207_s28 + $0x78] sm:$0xff]  }
 0xc8b   :  { %v6941_v4 = vmul.f32 0.0625, %v6933_v22  ;;  %v8921_v22 = vld [vmem:[%s17207_s28 + $0x38] sm:$0xff]  }
 0xc8c   :  { %v6942_v3 = vmul.f32 0.0625, %v6940_v30  ;;  %v8922_v30 = vld [vmem:[%s17208_s1] sm:$0xff]  }
 0xc8d   :  { %v6943_v14 = vsel %vm933_vm3, %v6909_v25, %v6941_v4  ;;  %7197 = vmatpush1.bf16.msra.mxu1 %v8894_v49  ;;  %v8923_v25 = vld [vmem:[%s17208_s1 + $0x8] sm:$0xff]   ;;  %v17210_v4 = vmov 0.0  }
 0xc8e   :  { %v6944_v17 = vsel %vm933_vm3, %v6910_v34, %v6942_v3  ;;  %v6945_v2 = vpack.c.bf16 %v6943_v14, %v6943_v14  ;;  %7198 = vmatprep.subr.bf16.mxu1 %v8899_v16  ;;  %v8924_v34 = vld [vmem:[%s17208_s1 + $0x10] sm:$0xff]   ;;  %v6874_v3 = vld [vmem:[%s17209_s2] sm:$0x3] }
 0xc8f   :  { %v6946_v56 = vpack.c.bf16 %v6944_v17, %v6944_v17  ;;  %v17211_v14 = vld [vmem:[#allocation62_spill] sm:$0xff] }
 0xc90   :  { %v7101_v17 = vrot.slane %v6874_v3, %v17211_v14 }
 0xc91   :  { %7081 = vmatprep.mubr.bf16.mxu0 %v6946_v56  ;;  %7199 = vmatpush1.bf16.msra.mxu1 %v8897_v35  ;;  %v17212_v56 = vld [vmem:[#allocation64_spill] sm:$0xff] }
 0xc92   :  { %7082 = vmatmul.mubr.bf16.vlgmr.msra.gmra.mrb[44].mxu0 %v6945_v2  ;;  %7200 = vmatprep.subr.bf16.mxu1 %v8902_v55  ;;  %v7105_v2 = vrot.slane %v6874_v3, %v17212_v56  ;;  %v8929_v3 = vld [vmem:[%s17208_s1 + $0x38] sm:$0xff]  }
 0xc93   :  { %8231 = vmatpush3.bf16.msra.mxu0 %v8907_v57 }
 0xc94   :  { %8232 = vmatprep.subr.bf16.mxu0 %v8908_v42 }
 0xc95   :  { %7201 = vmatpush1.bf16.msra.mxu1 %v8900_v63 }
 0xc96   :  { %7202 = vmatprep.subr.bf16.mxu1 %v8905_v59 }
 0xc97   :  { %8233 = vmatpush3.bf16.msra.mxu0 %v8909_v46 }
 0xc98   :  { %8234 = vmatprep.subr.bf16.mxu0 %v8910_v39 }
 0xc99   :  { %7203 = vmatpush1.bf16.msra.mxu1 %v8903_v24 }
 0xc9a   :  { %8499 = vmatprep.subr.bf16.mxu1 %v8922_v30 }
 0xc9b   :  { %8235 = vmatpush3.bf16.msra.mxu0 %v8911_v48 }
 0xc9c   :  { %8236 = vmatprep.subr.bf16.mxu0 %v8912_v61 }
 0xc9f   :  { %8237 = vmatpush3.bf16.msra.mxu0 %v8913_v32 }
 0xca0   :  { %8238 = vmatprep.subr.bf16.mxu0 %v8914_v21 }
 0xca3   :  { %8239 = vmatpush3.bf16.msra.mxu0 %v8915_v53 }
 0xca4   :  { %8240 = vmatprep.subr.bf16.mxu0 %v8916_v26 }
 0xca7   :  { %8241 = vmatpush3.bf16.msra.mxu0 %v8917_v1 }
 0xca8   :  { %8242 = vmatprep.subr.bf16.mxu0 %v8918_v43 }
 0xcab   :  { %8243 = vmatpush3.bf16.msra.mxu0 %v8919_v27 }
 0xcac   :  { %8244 = vmatprep.subr.bf16.mxu0 %v8920_v41 }
 0xcaf   :  { %8245 = vmatpush3.bf16.msra.mxu0 %v8921_v22 }
 0xcb0   :  { %8519 = vmatprep.subr.bf16.mxu0 %v17210_v4 }
 0xd65   :  { %v8224_v10 = vpop.f32.mrb[44].mxu0 }
 0xd66   :  { %v8225_v8 = vpop.f32.mrb[45].mxu0 }
 0xd67   :  { %v8226_v54 = vadd.f32 %v8225_v8, %v8224_v10  ;;  %v8227_v15 = vpop.f32.mrb[46].mxu0 }
 0xd68   :  { %v8228_v51 = vpop.f32.mrb[47].mxu0 }
 0xd69   :  { %v7084_v18 = vadd.f32 %v8226_v54, %v8027_v50 }
 0xd6b   :  { %v8044_v11 = vmul.f32 -1.442695, %v7084_v18 }
 0xd6d   :  { %9238 = vpow2.f32 %v8044_v11 }
 0xd77   :  { %v9239_v5 = vpop.eup %9238 }
 0xd78   :  { %v7092_v38 = vadd.f32 1.0, %v9239_v5 }
 0xd7a   :  { %9240 = vrcp.f32 %v7092_v38 }
 0xd84   :  { %v9241_v40 = vpop.eup %9240 }
 0xd85   :  { %v7095_v7 = vmul.f32 %v9241_v40, %v7084_v18 }
 0xd87   :  { %v7096_v29 = vpack.c.bf16 %v7095_v7, %v7095_v7 }
 0xd89   :  { %7221 = vmatmul.mubr.bf16.vlgmr.msra.gmra.mrb[36].mxu1 %v7096_v29 }
 0xd8a   :  { %8500 = vmatpush3.bf16.msra.mxu1 %v8922_v30  ;;  %v8926_v30 = vld [vmem:[%s17208_s1 + $0x20] sm:$0xff]  }
 0xd8b   :  { %8501 = vmatprep.subr.bf16.mxu1 %v8923_v25 }
 0xd8e   :  { %8502 = vmatpush3.bf16.msra.mxu1 %v8923_v25  ;;  %v8927_v25 = vld [vmem:[%s17208_s1 + $0x28] sm:$0xff]  }
 0xd8f   :  { %8503 = vmatprep.subr.bf16.mxu1 %v8924_v34 }
 0xd92   :  { %8504 = vmatpush3.bf16.msra.mxu1 %v8924_v34  ;;  %v8928_v34 = vld [vmem:[%s17208_s1 + $0x30] sm:$0xff]  }
 0xe5c   :  { %v7222_v23 = vpop.f32.mrb[36].mxu1 }
 0xe5d   :  { %v7223_v20 = vadd.f32 %v7222_v23, %v7101_v17  ;;  %v7224_v31 = vpop.f32.mrb[37].mxu1  ;;  %v7341_v17 = vld [vmem:[%s17213_s7] sm:$0x3] }
 0xe5e   :  { %v7225_v58 = vadd.f32 %v7224_v31, %v7105_v2  ;;  %v7226_v45 = vpop.f32.mrb[38].mxu1  ;;  %v7494_v23 = vrot.slane %v7341_v17, %v17211_v14 }
 0xe5f   :  { %v8061_v44 = vmul.f32 -1.442695, %v7223_v20  ;;  %v7227_v0 = vpop.f32.mrb[39].mxu1 }
 0xe60   :  { %v8062_v60 = vmul.f32 -1.442695, %v7225_v58  ;;  %v7502_v58 = vrot.slane %v7341_v17, %v17212_v56 }
 0xe61   :  { %9242 = vpow2.f32 %v8061_v44 }
 0xe62   :  { %9244 = vpow2.f32 %v8062_v60 }
 0xe6b   :  { %v9243_v36 = vpop.eup %9242 }
 0xe6c   :  { %v9245_v49 = vpop.eup %9244  ;;  %v7235_v35 = vadd.f32 1.0, %v9243_v36 }
 0xe6d   :  { %v7236_v16 = vadd.f32 1.0, %v9245_v49 }
 0xe6e   :  { %9246 = vrcp.f32 %v7235_v35 }
 0xe6f   :  { %9248 = vrcp.f32 %v7236_v16 }
 0xe78   :  { %v9247_v55 = vpop.eup %9246 }
 0xe79   :  { %v9249_v63 = vpop.eup %9248  ;;  %v7244_v59 = vrot.slane %v9247_v55, %v17211_v14  ;;  %v7258_v24 = vrot.slane %v9247_v55, %v17212_v56 }
 0xe7a   :  { %v7248_v10 = vrot.slane %v9249_v63, %v17211_v14  ;;  %v7262_v50 = vrot.slane %v9249_v63, %v17212_v56 }
 0xe7b   :  { %v7249_v8 = vmul.f32 %v7244_v59, %v15434_v62  ;;  %v7251_v54 = vmul.f32 %v7244_v59, %v15428_v37  ;;  %v7253_v15 = vmul.f32 %v7244_v59, %v15445_v12  ;;  %v7263_v51 = vmul.f32 %v7258_v24, %v15445_v12 }
 0xe7c   :  { %v7250_v18 = vmul.f32 %v7248_v10, %v15439_v6  ;;  %v7252_v11 = vmul.f32 %v7248_v10, %v15431_v47  ;;  %v7254_v5 = vmul.f32 %v7248_v10, %v15447_v13  ;;  %v7264_v38 = vmul.f32 %v7262_v50, %v15447_v13 }
 0xe7d   :  { %v7275_v40 = vrot.slane %v7249_v8, 3  ;;  %v7276_v7 = vrot.slane %v7251_v54, 3  ;;  %v7281_v29 = vrot.slane %v7253_v15, 3  ;;  %v7266_v52 = vmul.f32 %v7262_v50, %v15457_v9 }
 0xe7e   :  { %v7278_v62 = vrot.slane %v7250_v18, 3  ;;  %v7279_v57 = vrot.slane %v7252_v11, 3  ;;  %v7283_v37 = vrot.slane %v7254_v5, 3  ;;  %v7268_v42 = vmul.f32 %v7262_v50, %v15442_v28  ;;  %v17215_v50 = vld [vmem:[#allocation43_spill] sm:$0xff] }
 0xe7f   :  { %v7277_v12 = vsel %vm261_vm0, %v7275_v40, %v7276_v7  ;;  %v7282_v6 = vsel %vm261_vm0, %v7276_v7, %v7281_v29  ;;  %v7298_v46 = vrot.slane %v7264_v38, 3  ;;  %v7299_v47 = vrot.slane %v7266_v52, 3  ;;  %v17216_v40 = vld [vmem:[#allocation47_spill] sm:$0xff] }
 0xe80   :  { %v7280_v39 = vsel %vm261_vm0, %v7278_v62, %v7279_v57  ;;  %v7284_v13 = vsel %vm261_vm0, %v7279_v57, %v7283_v37  ;;  %v7303_v48 = vrot.slane %v7268_v42, 3  ;;  %v7265_v9 = vmul.f32 %v7258_v24, %v15452_v33  ;;  %v17217_v29 = vld [vmem:[#allocation107_spill] sm:$0xff]  ;;  %v8932_v42 = vld [vmem:[%s9551_s4 + $0x10] sm:$0xff]  }
 0xe81   :  { %v7343_v61 = vpack.c.bf16 %v7284_v13, %v7280_v39  ;;  %v7300_v32 = vsel %vm261_vm0, %v7298_v46, %v7299_v47  ;;  %v7267_v21 = vmul.f32 %v7258_v24, %v15436_v19  ;;  %v7342_v28 = vpack.c.bf16 %v7282_v6, %v7277_v12  ;;  %v8925_v19 = vld [vmem:[%s17208_s1 + $0x18] sm:$0xff]   ;;  %v8930_v57 = vld [vmem:[%s9551_s4] sm:$0xff]   ;;  %v8931_v37 = vld [vmem:[%s9551_s4 + $0x8] sm:$0xff]  }
 0xe82   :  { %v7304_v53 = vsel %vm261_vm0, %v7299_v47, %v7303_v48  ;;  %v7295_v1 = vrot.slane %v7263_v51, 3  ;;  %v7296_v43 = vrot.slane %v7265_v9, 3  ;;  %8505 = vmatprep.subr.bf16.mxu1 %v8925_v19  ;;  %v17214_v24 = vld [vmem:[#allocation81_spill] sm:$0xff]  ;;  %v8934_v6 = vld [vmem:[%s9551_s4 + $0x20] sm:$0xff]   ;;  %v8935_v46 = vld [vmem:[%s9551_s4 + $0x28] sm:$0xff]  }
 0xe83   :  { %7474 = vmatprep.mubr.bf16.mxu0 %v7343_v61  ;;  %v7345_v26 = vpack.c.bf16 %v7304_v53, %v7300_v32  ;;  %v7301_v27 = vrot.slane %v7267_v21, 3  ;;  %8506 = vmatpush3.bf16.msra.mxu1 %v8925_v19  ;;  %v8933_v12 = vld [vmem:[%s9551_s4 + $0x18] sm:$0xff]   ;;  %v8936_v47 = vld [vmem:[%s9551_s4 + $0x30] sm:$0xff]   ;;  %v7527_v13 = vld [vmem:[%s9546_s24] sm:$0x3]  ;;  %s9357_s24 = smov [#allocation2]  }
 0xe84   :  { %7475 = vmatmul.mubr.bf16.vlgmr.msra.gmra.mrb[48].mxu0 %v7342_v28  ;;  %v7297_v41 = vsel %vm261_vm0, %v7295_v1, %v7296_v43  ;;  %8507 = vmatprep.subr.bf16.mxu1 %v8926_v30  ;;  %v8937_v39 = vld [vmem:[%s9551_s4 + $0x38] sm:$0xff]   ;;  %v7647_v48 = vrot.slane %v7527_v13, %v17211_v14  ;;  %v7655_v61 = vrot.slane %v7527_v13, %v17212_v56  ;;  %s7807_s4 = sshll.u32 %s9357_s24, 4  ;;  %s7808_s4 = int_to_ptr.vmem [resolvable:$true] %s7807_s4 }
 0xe85   :  { %7482 = vmatprep.mubr.bf16.mxu0 %v7345_v26  ;;  %v7302_v33 = vsel %vm261_vm0, %v7296_v43, %v7301_v27  ;;  %8520 = vmatpush3.bf16.msra.mxu0 %v8930_v57  ;;  %s9282_s10 = scalar_lea.vmem %s7808_s4, 32  ;;  %p9287_p1 = scmp.lt.s32.totalorder %s7808_s4, %s7808_s4 }
 0xe86   :  { %v7344_v22 = vpack.c.bf16 %v7302_v33, %v7297_v41  ;;  %8521 = vmatprep.subr.bf16.mxu0 %v17210_v4  ;;  %p9283_p0 = scmp.ne.s32.totalorder %s7808_s4, %s9282_s10  ;;  %p9288_p2 = scmp.lt.s32.totalorder %s9282_s10, %s9282_s10 }
 0xe87   :  { %8508 = vmatpush3.bf16.msra.mxu1 %v8926_v30 }
 0xe88   :  { %8509 = vmatprep.subr.bf16.mxu1 %v8927_v25  ;;  %p9289_p3 = por %p9288_p2, %p9287_p1 }
 0xe89   :  { %8522 = vmatpush3.bf16.msra.mxu0 %v8931_v37 }
 0xe8a   :  { %8523 = vmatprep.subr.bf16.mxu0 %v17210_v4  ;;  %p9290_p4 = pnand %p9289_p3, %p9283_p0 }
 0xe8b   :  { %8510 = vmatpush3.bf16.msra.mxu1 %v8927_v25 }
 0xe8c   :  { %7483 = vmatmul.mubr.bf16.gmra.mrb[52].mxu0 %v7344_v22  ;;  %8511 = vmatprep.subr.bf16.mxu1 %v8928_v34 }
 0xe8d   :  { %8535 = vmatprep.mubr.msk.bf16.mxu0 %vm9356_vm5, %v17210_v4  ;;  %8524 = vmatpush3.bf16.msra.mxu0 %v8932_v42 }
 0xe8e   :  { %8525 = vmatprep.subr.bf16.mxu0 %v17210_v4 }
 0xe8f   :  { %8512 = vmatpush3.bf16.msra.mxu1 %v8928_v34 }
 0xe90   :  { %8513 = vmatprep.subr.bf16.mxu1 %v8929_v3 }
 0xe91   :  { %8526 = vmatpush3.bf16.msra.mxu0 %v8933_v12 }
 0xe92   :  { %8527 = vmatprep.subr.bf16.mxu0 %v17210_v4 }
 0xe93   :  { %8514 = vmatpush3.bf16.msra.mxu1 %v8929_v3 }
 0xe95   :  { %8528 = vmatpush3.bf16.msra.mxu0 %v8934_v6 }
 0xe96   :  { %8529 = vmatprep.subr.bf16.mxu0 %v17210_v4 }
 0xe99   :  { %8530 = vmatpush3.bf16.msra.mxu0 %v8935_v46 }
 0xe9a   :  { %8531 = vmatprep.subr.bf16.mxu0 %v17210_v4 }
 0xe9d   :  { %8532 = vmatpush3.bf16.msra.mxu0 %v8936_v47 }
 0xe9e   :  { %8533 = vmatprep.subr.bf16.mxu0 %v17210_v4 }
 0xea1   :  { %8534 = vmatpush3.bf16.msra.mxu0 %v8937_v39 }
 0xf57   :  { %v8246_v2 = vpop.f32.mrb[48].mxu0 }
 0xf58   :  { %v8247_v20 = vpop.f32.mrb[49].mxu0 }
 0xf59   :  { %v8248_v31 = vadd.f32 %v8247_v20, %v8246_v2  ;;  %v8249_v45 = vpop.f32.mrb[50].mxu0 }
 0xf5a   :  { %v8250_v44 = vpop.f32.mrb[51].mxu0 }
 0xf5b   :  { %v7495_v0 = vmul.f32 %v8248_v31, %v7494_v23  ;;  %v8251_v60 = vadd.f32 %v8250_v44, %v8249_v45 }
 0xf5d   :  { %v7503_v36 = vadd.f32 %v7502_v58, %v7495_v0  ;;  %v7496_v49 = vmul.f32 %v8251_v60, %v7494_v23 }
 0xf5f   :  { %v7504_v35 = vadd.f32 %v7502_v58, %v7496_v49  ;;  %v8252_v16 = vpop.f32.mrb[52].mxu0  ;;  %v7507_v10 = vadd.f32 %v7503_v36, %v17214_v24 }
 0xf60   :  { %v8253_v55 = vpop.f32.mrb[53].mxu0 }
 0xf61   :  { %v8254_v63 = vadd.f32 %v8253_v55, %v8252_v16  ;;  %v8255_v59 = vpop.f32.mrb[54].mxu0  ;;  %v7508_v8 = vadd.f32 %v7504_v35, %v17215_v50 }
 0xf62   :  { %v8256_v54 = vpop.f32.mrb[55].mxu0 }
 0xf63   :  { %v7497_v15 = vmul.f32 %v8254_v63, %v7494_v23  ;;  %v8257_v51 = vadd.f32 %v8256_v54, %v8255_v59  ;;  %v7545_v18 = vpack.c.bf16 %v7508_v8, %v7507_v10 }
 0xf65   :  { %v7505_v11 = vadd.f32 %v7502_v58, %v7497_v15  ;;  %v7498_v5 = vmul.f32 %v8257_v51, %v7494_v23  ;;  %8515 = vmatprep.mubr.bf16.mxu1 %v7545_v18 }
 0xf67   :  { %v7506_v38 = vadd.f32 %v7502_v58, %v7498_v5  ;;  %v7509_v7 = vadd.f32 %v7505_v11, %v17216_v40 }
 0xf69   :  { %v7510_v52 = vadd.f32 %v7506_v38, %v17217_v29  ;;  %v8091_v29 = vld [vmem:[%s9556_s6] ss:$0 sm:$0xff] }
 0xf6b   :  { %v7546_v62 = vpack.c.bf16 %v7510_v52, %v7509_v7 }
 0xf6d   :  { %8516 = vmatmul.mubr.bf16.vlgmr.msra.gmra.mrb[40].mxu1 %v7546_v62 }
0x1040   :  { %v8517_v32 = vpop.f32.mrb[40].mxu1 }
0x1041   :  { %v7650_v9 = vmul.f32 %v8517_v32, %v7647_v48  ;;  %v7629_v21 = vpop.f32.mrb[41].mxu1 }
0x1042   :  { %v7648_v28 = vmul.f32 %v7647_v48, %v7629_v21  ;;  %v8518_v53 = vpop.f32.mrb[42].mxu1 }
0x1043   :  { %v7658_v26 = vadd.f32 %v7655_v61, %v7650_v9  ;;  %v7651_v1 = vmul.f32 %v8518_v53, %v7647_v48  ;;  %v7632_v43 = vpop.f32.mrb[43].mxu1 }
0x1044   :  { %v7656_v27 = vadd.f32 %v7655_v61, %v7648_v28  ;;  %v7649_v41 = vmul.f32 %v7647_v48, %v7632_v43 }
0x1045   :  { %v8089_v33 = vmul.f32 -1.442695, %v7658_v26  ;;  %v7659_v22 = vadd.f32 %v7655_v61, %v7651_v1 }
0x1046   :  { %v8087_v19 = vmul.f32 -1.442695, %v7656_v27  ;;  %v7657_v4 = vadd.f32 %v7655_v61, %v7649_v41 }
0x1047   :  { %9250 = vpow2.f32 %v8089_v33  ;;  %v8090_v30 = vmul.f32 -1.442695, %v7659_v22 }
0x1048   :  { %9252 = vpow2.f32 %v8087_v19  ;;  %v8088_v14 = vmul.f32 -1.442695, %v7657_v4 }
0x1049   :  { %9254 = vpow2.f32 %v8090_v30 }
0x104a   :  { %9256 = vpow2.f32 %v8088_v14 }
0x1051   :  { %v9251_v56 = vpop.eup %9250 }
0x1052   :  { %v9253_v25 = vpop.eup %9252  ;;  %v7674_v34 = vadd.f32 1.0, %v9251_v56 }
0x1053   :  { %v9255_v3 = vpop.eup %9254  ;;  %v7672_v17 = vadd.f32 1.0, %v9253_v25 }
0x1054   :  { %v9257_v2 = vpop.eup %9256  ;;  %9258 = vrcp.f32 %v7674_v34  ;;  %v7675_v23 = vadd.f32 1.0, %v9255_v3 }
0x1055   :  { %9260 = vrcp.f32 %v7672_v17  ;;  %v7673_v20 = vadd.f32 1.0, %v9257_v2 }
0x1056   :  { %9262 = vrcp.f32 %v7675_v23 }
0x1057   :  { %9264 = vrcp.f32 %v7673_v20 }
0x105e   :  { %v9259_v31 = vpop.eup %9258 }
0x105f   :  { %v9261_v58 = vpop.eup %9260  ;;  %v7686_v0 = vmul.f32 %v9259_v31, %v7658_v26 }
0x1060   :  { %v9263_v45 = vpop.eup %9262  ;;  %v7684_v36 = vmul.f32 %v9261_v58, %v7656_v27 }
0x1061   :  { %v9265_v44 = vpop.eup %9264  ;;  %v7687_v60 = vmul.f32 %v9263_v45, %v7659_v22 }
0x1062   :  { %v7685_v49 = vmul.f32 %v9265_v44, %v7657_v4 }
0x1063   :  { %v7696_v35 = vadd.f32 %v7687_v60, %v7686_v0 }
0x1064   :  { %v7688_v16 = vadd.f32 %v7685_v49, %v7684_v36 }
0x1065   :  { %v7697_v55 = vrot.slane %v7696_v35, 4 }
0x1066   :  { %v7689_v63 = vrot.slane %v7688_v16, 4 }
0x1067   :  { %v7698_v59 = vadd.f32 %v7697_v55, %v7696_v35 }
0x1068   :  { %v7690_v24 = vadd.f32 %v7689_v63, %v7688_v16 }
0x1069   :  { %v7699_v10 = vrot.slane %v7698_v59, 2 }
0x106a   :  { %v7691_v50 = vrot.slane %v7690_v24, 2 }
0x106b   :  { %v7700_v8 = vadd.f32 %v7699_v10, %v7698_v59 }
0x106c   :  { %v7692_v54 = vadd.f32 %v7691_v50, %v7690_v24 }
0x106d   :  { %v7701_v15 = vrot.slane %v7700_v8, 1 }
0x106e   :  { %v7693_v51 = vrot.slane %v7692_v54, 1 }
0x106f   :  { %v7702_v18 = vadd.f32 %v7701_v15, %v7700_v8 }
0x1070   :  { %v7694_v11 = vadd.f32 %v7693_v51, %v7692_v54 }
0x1071   :  { %v7703_v5 = vmul.f32 0.0625, %v7702_v18 }
0x1072   :  { %v7695_v38 = vmul.f32 0.0625, %v7694_v11 }
0x1074   :  { %v7704_v40 = vsel %vm933_vm3, %v7695_v38, %v7703_v5 }
0x1075   :  { %v7705_v7 = vpack.c.bf16 %v7704_v40, %v7704_v40 }
0x1077   :  { %8536 = vmatmul.mubr.bf16.vlgmr.msra.gmra.mrb[56].mxu0 %v7705_v7 }
0x114a   :  { %v7794_v52 = vpop.f32.mrb[56].mxu0 }
0x114b   :  { %v7795_v62 = vadd.f32 %v8091_v29, %v7794_v52  ;;  %v8537_v57 = vpop.f32.mrb[57].mxu0 }
0x114c   :  { %v7797_v37 = vpop.f32.mrb[58].mxu0 }
0x114d   :  { %7800 = vst [vmem:[#allocation2] sm:$0x3] %v7795_v62  ;;  %v8538_v42 = vpop.f32.mrb[59].mxu0 }
0x114e   :  { %9293 = shalt.err (!%p9290_p4)
}
0x114f   :  { %s9294_s6 = scalar_lea.hbm %s9561_s20, 32 }
0x1150   :  { %p9295_p5 = scmp.ne.s32.totalorder %s9561_s20, %s9294_s6  ;;  %p9298_p6 = scmp.lt.u32.totalorder %s9294_s6, %s9561_s20 }
0x1152   :  { %p9300_p7 = pnand %p9298_p6, %p9295_p5 }
0x1154   :  { %9303 = shalt.err (!%p9300_p7)
}
0x1155   :  { %7810 = dma.vmem_to_hbm [thread:$0]  %s7808_s4, 32, %s9561_s20, [#allocation3]  }
0x1156   :  { %9304 = dma.done.wait [#allocation3], 32  }
0x1157   :  { %9305 = vsyncadd [#allocation3], 4294967264 }
0x1158   :  { %7814 = vsyncpa [#allocation3], 1 }

</bundles_post_ra>
